<compile_context>
chip_gen: v6e
topology: v6e:2x2x1
jax: 0.10.0
libtpu: 0.0.40
codegen_flags: <defaults>
</compile_context>

<pallas_src>
import functools

import jax
import jax.numpy as jnp
from jax.experimental import pallas as pl
from jax.experimental.pallas import tpu as pltpu


# --------------------------------------------------------------------------
# Kernels
# --------------------------------------------------------------------------

def _deconv_fused_kernel(x_ref, wt_ref, b_ref, o_ref):
    """Matmul + in-VMEM (kH,kW) pixel-shuffle; writes the final NCHW tile.

    x_ref:  (Cin, R*W)      input pixels of R image rows, channels major
    wt_ref: (Cout*4, Cin)   rows ordered (co, ki, kj)
    b_ref:  (Cout*4, 1)
    o_ref:  (Cout, 2R, 2W)  final NCHW output tile (interleave fused here)
    """
    cout, r2, w2 = o_ref.shape
    r, w = r2 // 2, w2 // 2
    acc = jnp.dot(wt_ref[...], x_ref[...], preferred_element_type=jnp.float32)
    acc = acc + b_ref[...]
    y = acc.reshape(cout, 2, 2, r, w)          # (co, ki, kj, i, j)
    z = jnp.transpose(y, (0, 3, 1, 4, 2))      # (co, i, ki, j, kj)  -- XLU shuffles
    o_ref[...] = z.reshape(cout, r2, w2).astype(o_ref.dtype)


def _deconv_matmul_kernel(x_ref, wt_ref, b_ref, o_ref):
    """Fallback: matmul only; depth-to-space left to XLA (one extra HBM pass)."""
    acc = jnp.dot(wt_ref[...], x_ref[0], preferred_element_type=jnp.float32)
    o_ref[0] = (acc + b_ref[...]).astype(o_ref.dtype)


# --------------------------------------------------------------------------
# Tiling / VMEM budgeting
# --------------------------------------------------------------------------

def _vmem_budget_bytes():
    """Generation-aware VMEM working budget (leave headroom for compiler scratch)."""
    cap = None
    try:
        cap = getattr(pltpu.get_tpu_info(), "vmem_capacity_bytes", None)
    except Exception:
        cap = None
    if not cap:
        cap = 64 * (2 ** 20)            # unknown -> assume smallest (v7x-class)
    if cap <= 64 * (2 ** 20):
        return 40 * (2 ** 20)           # v7x: 64 MiB/TC, keep >=24 MiB headroom
    return 96 * (2 ** 20)               # v5e / v6e: 128 MiB physical


def _pick_rows(H, W, Cin, Cout, N, budget_bytes, kk=4):
    """Rows of the input image per grid step.

    Constraints:
      * R divides H (no partial tiles),
      * (8,128)-legal blocks: R == H, or (R*W) % 128 == 0 and (2R) % 8 == 0,
      * double-buffered in+out tiles fit the VMEM budget,
      * enough grid steps to keep both v7x TensorCores busy when N is small.
    """
    ck = Cout * kk
    per_row = 4 * 2 * (Cin + ck) * W                 # f32, double-buffered in+out
    resident = 4 * 2 * ck * (Cin + 1)                # w^T + bias (2-deep buffers)
    max_rows = max(1, (budget_bytes - resident) // per_row)
    min_tiles = 1 if N >= 4 else (2 if N >= 2 else 4)

    def legal(r):
        if H % r:
            return False
        return r == H or ((r * W) % 128 == 0 and (2 * r) % 8 == 0)

    cands = [r for r in range(H, 0, -1) if legal(r)]
    for r in cands:                                   # biggest tile, >= min_tiles steps
        if r <= max_rows and H // r >= min_tiles:
            return r
    for r in cands:                                   # relax the step-count preference
        if r <= max_rows:
            return r
    # Nothing fits the budget (huge image with awkward H).
    # TODO(synk): masked partial last tile instead of an over-budget full tile.
    return cands[-1]


# --------------------------------------------------------------------------
# Forward
# --------------------------------------------------------------------------

def _forward(x, w, b, *, rows, fuse, vmem_limit):
    N, Cin, H, W = x.shape
    _, Cout, kH, kW = w.shape
    CK = Cout * kH * kW
    HW = H * W
    t = rows * W

    # Glue (free / tiny): NO transpose or pad of the activations.
    x_flat = x.reshape(N, Cin, HW)                     # free reshape of NCHW
    wt = jnp.transpose(w.reshape(Cin, CK))             # (CK, Cin); rows = (co, ki, kj)
    bias_col = jnp.repeat(b, kH * kW).reshape(CK, 1)   # co-major, matches wt rows

    params = pltpu.CompilerParams(
        dimension_semantics=("parallel", "parallel"),  # megacore over (N, row-blocks)
        vmem_limit_bytes=vmem_limit,
    )
    w_spec = pl.BlockSpec((CK, Cin), lambda n, r: (0, 0))
    b_spec = pl.BlockSpec((CK, 1), lambda n, r: (0, 0))
    grid = (N, H // rows)

    if fuse:
        # Output written directly in NCHW: the (kH,kW) interleave happens in
        # VMEM, saving a full HBM round trip over the largest tensor.
        return pl.pallas_call(
            _deconv_fused_kernel,
            out_shape=jax.ShapeDtypeStruct((N, Cout, H * kH, W * kW), jnp.float32),
            grid_spec=pltpu.PrefetchScalarGridSpec(
                num_scalar_prefetch=0,
                grid=grid,
                in_specs=[
                    pl.BlockSpec((None, Cin, t), lambda n, r: (n, 0, r)),
                    w_spec,
                    b_spec,
                ],
                out_specs=pl.BlockSpec((None, Cout, kH * rows, kW * W),
                                       lambda n, r: (n, 0, r, 0)),
            ),
            compiler_params=params,
        )(x_flat, wt, bias_col)

    # Fallback: lane-dense (CK, t) slab; XLA does the depth-to-space afterwards.
    out_flat = pl.pallas_call(
        _deconv_matmul_kernel,
        out_shape=jax.ShapeDtypeStruct((N, CK, HW), jnp.float32),
        grid_spec=pltpu.PrefetchScalarGridSpec(
            num_scalar_prefetch=0,
            grid=grid,
            in_specs=[
                pl.BlockSpec((1, Cin, t), lambda n, r: (n, 0, r)),
                w_spec,
                b_spec,
            ],
            out_specs=pl.BlockSpec((1, CK, t), lambda n, r: (n, 0, r)),
        ),
        compiler_params=params,
    )(x_flat, wt, bias_col)
    out = out_flat.reshape(N, Cout, kH, kW, H, W)
    out = jnp.transpose(out, (0, 1, 4, 2, 5, 3))       # (N, Cout, H, kH, W, kW)
    return out.reshape(N, Cout, H * kH, W * kW)


def _reference(x, w, b):
    N, Cin, H, W = x.shape
    _, Cout, kH, kW = w.shape
    r = jnp.einsum("ncij,cokl->noikjl", x, w, precision=jax.lax.Precision.HIGHEST)
    r = r.reshape(N, Cout, H * kH, W * kW)
    return r + b[None, :, None, None]


_impl_cache = {}


def _select_impl(x, w, b):
    N, Cin, H, W = x.shape
    Cin_w, Cout, kH, kW = w.shape
    assert Cin == Cin_w and (kH, kW) == (2, 2)
    budget = _vmem_budget_bytes()
    rows = _pick_rows(H, W, Cin, Cout, N, budget, kk=kH * kW)
    t = rows * W
    CK = Cout * kH * kW
    # Exact scoped-VMEM need: double-buffered x & out tiles + 2-deep wt/bias.
    need = 4 * (2 * Cin * t + 2 * CK * t + 2 * CK * (Cin + 1))
    vmem_limit = int(max(need + (4 << 20), 16 << 20))

    fused = jax.jit(functools.partial(
        _forward, rows=rows, fuse=True, vmem_limit=vmem_limit))
    fallback = jax.jit(functools.partial(
        _forward, rows=rows, fuse=False, vmem_limit=vmem_limit))

    # One-time (per shape) guard: the fused kernel leans on Mosaic lowering an
    # in-kernel reshape+transpose relayout.  If this jax/libtpu can't lower it
    # (or gets it wrong), drop to the proven matmul + XLA depth-to-space path.
    try:
        got = jax.block_until_ready(fused(x, w, b))
        ref = _reference(x, w, b)
        if got.shape == ref.shape and bool(
                jnp.allclose(got, ref, atol=1e-3, rtol=1e-3)):
            return fused
    except Exception:
        pass
    return fallback


def conv_transpose2d(x, w, b):
    """ConvTranspose2d forward (kernel_size=2, stride=2, padding=0, bias=True).

    x: (N, Cin, H, W) f32 NCHW;  w: (Cin, Cout, 2, 2);  b: (Cout,)
    returns (N, Cout, 2H, 2W) f32 NCHW.
    """
    key = (x.shape, str(x.dtype), w.shape, b.shape)
    impl = _impl_cache.get(key)
    if impl is None:
        impl = _select_impl(x, w, b)
        _impl_cache[key] = impl
    return impl(x, w, b)


if __name__ == "__main__":
    key = jax.random.PRNGKey(0)
    k_x, k_w, k_b = jax.random.split(key, 3)

    N, Cin, H, W = 2, 4, 16, 16
    Cout, kH, kW = 8, 2, 2

    x = jax.random.normal(k_x, (N, Cin, H, W), dtype=jnp.float32)
    # module init: weight ~ Normal(0, 0.02), bias = 0
    w = 0.02 * jax.random.normal(k_w, (Cin, Cout, kH, kW), dtype=jnp.float32)
    b = jnp.zeros((Cout,), dtype=jnp.float32)

    out = jax.block_until_ready(conv_transpose2d(x, w, b))
    assert out.shape == (N, Cout, H * kH, W * kW)
    assert jnp.allclose(out, _reference(x, w, b), atol=1e-3, rtol=1e-3)

    # exercise a non-zero bias with the same shapes (reuses the cached impl)
    b2 = jax.random.normal(k_b, (Cout,), dtype=jnp.float32)
    out2 = jax.block_until_ready(conv_transpose2d(x, w, b2))
    assert jnp.allclose(out2, _reference(x, w, b2), atol=1e-3, rtol=1e-3)

    print("KERNEL_OK")
</pallas_src>

<mosaic_0001>
module attributes {stable_mosaic.version = 11 : i64} {
  func.func @_deconv_fused_kernel(%arg0: i32, %arg1: i32, %arg2: memref<1x4x128xf32, #tpu.memory_space<vmem>>, %arg3: memref<32x4xf32, #tpu.memory_space<vmem>>, %arg4: memref<32x1xf32, #tpu.memory_space<vmem>>, %arg5: memref<1x8x16x32xf32, #tpu.memory_space<vmem>>) attributes {dimension_semantics = [#tpu.dimension_semantics<parallel>, #tpu.dimension_semantics<parallel>], iteration_bounds = array<i64: 2, 2>, scalar_prefetch = 0 : i64, scratch_operands = 0 : i64, tpu.core_type = #tpu.core_type<tc>, window_params = [{transform_indices = @transform_0, window_bounds = array<i64: 1, 4, 128>}, {pipeline_mode = #tpu.pipeline_mode<synchronous>, transform_indices = @transform_1, window_bounds = array<i64: 32, 4>}, {pipeline_mode = #tpu.pipeline_mode<synchronous>, transform_indices = @transform_2, window_bounds = array<i64: 32, 1>}, {transform_indices = @transform_3, window_bounds = array<i64: 1, 8, 16, 32>}]} {
    %c0 = arith.constant 0 : index
    %c0_0 = arith.constant 0 : index
    %0 = vector.load %arg3[%c0, %c0_0] : memref<32x4xf32, #tpu.memory_space<vmem>>, vector<32x4xf32>
    %c0_1 = arith.constant 0 : index
    %c0_2 = arith.constant 0 : index
    %c0_3 = arith.constant 0 : index
    %1 = vector.load %arg2[%c0_1, %c0_2, %c0_3] : memref<1x4x128xf32, #tpu.memory_space<vmem>>, vector<1x4x128xf32>
    %2 = vector.shape_cast %1 : vector<1x4x128xf32> to vector<4x128xf32>
    %cst = arith.constant dense<0.000000e+00> : vector<32x128xf32>
    %3 = tpu.matmul %0, %2, %cst {dimension_numbers = #tpu.dot_dimension_numbers<[1], [0], [0], [1], [0, 0, 1, 1], [], []>} : vector<32x4xf32>, vector<4x128xf32>, vector<32x128xf32> -> vector<32x128xf32>
    %c0_4 = arith.constant 0 : index
    %c0_5 = arith.constant 0 : index
    %4 = vector.load %arg4[%c0_4, %c0_5] : memref<32x1xf32, #tpu.memory_space<vmem>>, vector<32x1xf32>
    %5 = vector.broadcast %4 : vector<32x1xf32> to vector<32x128xf32>
    %6 = arith.addf %3, %5 : vector<32x128xf32>
    %7 = vector.shape_cast %6 : vector<32x128xf32> to vector<8x2x2x8x16xf32>
    %8 = tpu.transpose %7, [0, 3, 1, 4, 2] : vector<8x2x2x8x16xf32> -> vector<8x8x2x16x2xf32>
    %9 = vector.shape_cast %8 : vector<8x8x2x16x2xf32> to vector<8x16x32xf32>
    %c0_6 = arith.constant 0 : index
    %c0_7 = arith.constant 0 : index
    %c0_8 = arith.constant 0 : index
    %c0_9 = arith.constant 0 : index
    %10 = vector.load %arg5[%c0_6, %c0_7, %c0_8, %c0_9] : memref<1x8x16x32xf32, #tpu.memory_space<vmem>>, vector<1x8x16x32xf32>
    %11 = vector.shape_cast %10 : vector<1x8x16x32xf32> to vector<8x16x32xf32>
    %12 = vector.shape_cast %9 : vector<8x16x32xf32> to vector<1x8x16x32xf32>
    tpu.vector_store %arg5[%c0_6, %c0_7, %c0_8, %c0_9], %12 {strides = array<i32>} : memref<1x8x16x32xf32, #tpu.memory_space<vmem>>, vector<1x8x16x32xf32>,
    return
  }
  func.func @transform_0(%arg0: i32, %arg1: i32) -> (i32, i32, i32) {
    %c0_i32 = arith.constant 0 : i32
    %c0_i32_0 = arith.constant 0 : i32
    return %arg0, %c0_i32, %arg1 : i32, i32, i32
  }
  func.func @transform_1(%arg0: i32, %arg1: i32) -> (i32, i32) {
    %c0_i32 = arith.constant 0 : i32
    %c0_i32_0 = arith.constant 0 : i32
    %c0_i32_1 = arith.constant 0 : i32
    return %c0_i32, %c0_i32_0 : i32, i32
  }
  func.func @transform_2(%arg0: i32, %arg1: i32) -> (i32, i32) {
    %c0_i32 = arith.constant 0 : i32
    %c0_i32_0 = arith.constant 0 : i32
    %c0_i32_1 = arith.constant 0 : i32
    return %c0_i32, %c0_i32_0 : i32, i32
  }
  func.func @transform_3(%arg0: i32, %arg1: i32) -> (i32, i32, i32, i32) {
    %c0_i32 = arith.constant 0 : i32
    %c0_i32_0 = arith.constant 0 : i32
    %c0_i32_1 = arith.constant 0 : i32
    return %arg0, %c0_i32, %arg1, %c0_i32_0 : i32, i32, i32, i32
  }
}

module attributes {stable_mosaic.version = 11 : i64} {
  func.func @_deconv_matmul_kernel(%arg0: i32, %arg1: i32, %arg2: memref<1x4x128xf32, #tpu.memory_space<vmem>>, %arg3: memref<32x4xf32, #tpu.memory_space<vmem>>, %arg4: memref<32x1xf32, #tpu.memory_space<vmem>>, %arg5: memref<1x32x128xf32, #tpu.memory_space<vmem>>) attributes {dimension_semantics = [#tpu.dimension_semantics<parallel>, #tpu.dimension_semantics<parallel>], iteration_bounds = array<i64: 2, 2>, scalar_prefetch = 0 : i64, scratch_operands = 0 : i64, tpu.core_type = #tpu.core_type<tc>, window_params = [{transform_indices = @transform_0, window_bounds = array<i64: 1, 4, 128>}, {pipeline_mode = #tpu.pipeline_mode<synchronous>, transform_indices = @transform_1, window_bounds = array<i64: 32, 4>}, {pipeline_mode = #tpu.pipeline_mode<synchronous>, transform_indices = @transform_2, window_bounds = array<i64: 32, 1>}, {transform_indices = @transform_3, window_bounds = array<i64: 1, 32, 128>}]} {
    %c0 = arith.constant 0 : index
    %c0_0 = arith.constant 0 : index
    %0 = vector.load %arg3[%c0, %c0_0] : memref<32x4xf32, #tpu.memory_space<vmem>>, vector<32x4xf32>
    %c0_1 = arith.constant 0 : index
    %c0_2 = arith.constant 0 : index
    %c0_3 = arith.constant 0 : index
    %1 = vector.load %arg2[%c0_1, %c0_2, %c0_3] : memref<1x4x128xf32, #tpu.memory_space<vmem>>, vector<1x4x128xf32>
    %2 = vector.shape_cast %1 : vector<1x4x128xf32> to vector<4x128xf32>
    %cst = arith.constant dense<0.000000e+00> : vector<32x128xf32>
    %3 = tpu.matmul %0, %2, %cst {dimension_numbers = #tpu.dot_dimension_numbers<[1], [0], [0], [1], [0, 0, 1, 1], [], []>} : vector<32x4xf32>, vector<4x128xf32>, vector<32x128xf32> -> vector<32x128xf32>
    %c0_4 = arith.constant 0 : index
    %c0_5 = arith.constant 0 : index
    %4 = vector.load %arg4[%c0_4, %c0_5] : memref<32x1xf32, #tpu.memory_space<vmem>>, vector<32x1xf32>
    %5 = vector.broadcast %4 : vector<32x1xf32> to vector<32x128xf32>
    %6 = arith.addf %3, %5 : vector<32x128xf32>
    %c0_6 = arith.constant 0 : index
    %c0_7 = arith.constant 0 : index
    %c0_8 = arith.constant 0 : index
    %7 = vector.load %arg5[%c0_6, %c0_7, %c0_8] : memref<1x32x128xf32, #tpu.memory_space<vmem>>, vector<1x32x128xf32>
    %8 = vector.shape_cast %7 : vector<1x32x128xf32> to vector<32x128xf32>
    %9 = vector.shape_cast %6 : vector<32x128xf32> to vector<1x32x128xf32>
    tpu.vector_store %arg5[%c0_6, %c0_7, %c0_8], %9 {strides = array<i32>} : memref<1x32x128xf32, #tpu.memory_space<vmem>>, vector<1x32x128xf32>,
    return
  }
  func.func @transform_0(%arg0: i32, %arg1: i32) -> (i32, i32, i32) {
    %c0_i32 = arith.constant 0 : i32
    %c0_i32_0 = arith.constant 0 : i32
    return %arg0, %c0_i32, %arg1 : i32, i32, i32
  }
  func.func @transform_1(%arg0: i32, %arg1: i32) -> (i32, i32) {
    %c0_i32 = arith.constant 0 : i32
    %c0_i32_0 = arith.constant 0 : i32
    %c0_i32_1 = arith.constant 0 : i32
    return %c0_i32, %c0_i32_0 : i32, i32
  }
  func.func @transform_2(%arg0: i32, %arg1: i32) -> (i32, i32) {
    %c0_i32 = arith.constant 0 : i32
    %c0_i32_0 = arith.constant 0 : i32
    %c0_i32_1 = arith.constant 0 : i32
    return %c0_i32, %c0_i32_0 : i32, i32
  }
  func.func @transform_3(%arg0: i32, %arg1: i32) -> (i32, i32, i32) {
    %c0_i32 = arith.constant 0 : i32
    %c0_i32_0 = arith.constant 0 : i32
    return %arg0, %c0_i32, %arg1 : i32, i32, i32
  }
}

</mosaic_0001>

<bundles_post_ra>
// kernel: _forward.1
= control target key start
LH: loop header
LB: loop body
LE: loop exit
PB: predicated region body
PF: predicated region fallthrough
CT: control target
= control target key end

     0   :  { %8 = vsyncpa [#allocation3], 0  ;;  %s29649_s0 = inlined_call_operand.vmem [shape: f32[2,4,256], index: 0, kind: input, shape index: {}]   ;;  %s29650_s1 = inlined_call_operand.vmem [shape: f32[32,4], index: 1, kind: input, shape index: {}]   ;;  %s29651_s2 = inlined_call_operand.vmem [shape: f32[32,1], index: 2, kind: input, shape index: {}]   ;;  %s29652_s3 = inlined_call_operand.hbm [shape: f32[2,8,32,32], index: 3, kind: output, shape index: {}]  }
   0x1   :  { %10 = vsyncpa [#allocation3 + $0x1], 0  ;;  %s22607_s12 = smov 0   ;;  %s22609_s13 = smov 0  }
   0x2   :  { %s22611_s14 = smov 0   ;;  %s22613_s15 = smov 0  }
   0x3   :  { %s22615_s16 = smov 0   ;;  %s22617_s17 = smov 0  }
   0x4   :  { %s22619_s18 = smov 0   ;;  %s22621_s19 = smov 0  }
   0x5 LB: > { %s22342_s20 = sadd.s32 4294967295, %s22553_s19   ;;  %s22343_s21 = sadd.s32 4294967294, %s22553_s19   ;;  %s22553_s19 = sphi %s22621_s19, %s16_s19   ;;  %s22549_s18 = sphi %s22619_s18, %s31635_s18   ;;  %s22545_s17 = sphi %s22617_s17, %s31634_s17   ;;  %s22541_s16 = sphi %s22615_s16, %s31633_s16   ;;  %s22537_s15 = sphi %s22613_s15, %s31632_s15   ;;  %s22533_s14 = sphi %s22611_s14, %s31631_s14   ;;  %s22529_s13 = sphi %s22609_s13, %s31630_s13   ;;  %s22525_s12 = sphi %s22607_s12, %s31629_s12  }
   0x6   : > { %s25_s22 = sadd.s32 1, %s22545_s17  ;;  %s28_s23 = sadd.s32 1, %s22549_s18 }
   0x7   : > { %p26_p0 = scmp.ge.s32.totalorder %s25_s22, 2  ;;  %p117_p1 = scmp.ne.s32.totalorder %s22533_s14, %s22529_s13 }
   0x8   : > { %p118_p2 = scmp.eq.s32.totalorder %s22342_s20, 3  ;;  %p123_p5 = scmp.ne.s32.totalorder %s22529_s13, %s22525_s12 }
   0x9   : > { %s31637_s22 = smov (%p26_p0, %s25_s22), 0  ;;  %s31639_s23 = smov (!%p26_p0, %s28_s23), %s22549_s18 }
   0xa   : > { %s103_s24 = ssub.s32 %s22545_s17, %s31637_s22  ;;  %p22658_p3 = por %p118_p2, %p117_p1 }
   0xb   : > { %p30_p4 = scmp.ge.s32.totalorder %s31639_s23, 2  ;;  %p124_p6 = scmp.eq.s32.totalorder %s22343_s21, 3 }
   0xc   : > { %p22346_p7 = scmp.ge.s32.totalorder %s22553_s19, 1  ;;  %p159_p9 = scmp.lt.s32.totalorder %s22553_s19, 5 }
   0xd   : > { %s31641_s23 = smov (%p30_p4, %s31639_s23), 0  ;;  %p22667_p8 = por %p124_p6, %p123_p5 }
   0xe   : > { %s102_s27 = ssub.s32 %s22549_s18, %s31641_s23  ;;  %s107_s28 = sadd.s32 1, %s22533_s14 }
   0xf   : > { %s104_s29 = sor.u32 %s103_s24, %s102_s27  ;;  %p160_p10 = pnand %p22346_p7, %p159_p9 }
  0x10   : > { %p105_p11 = scmp.eq.s32.totalorder %s104_s29, 0 }
  0x11   : > { %163 = sbr.rel (%p160_p10) target bundleno = 1807 (0x70f), region = 32 }
  0x12   : > { %s22676_s30 = scalar_select %p105_p11, %s22533_s14, %s107_s28  }
  0x16   : > { %p186_p12 = scmp.lt.s32.totalorder %s22541_s16, 1  ;;  %p188_p13 = scmp.lt.s32.totalorder %s22537_s15, 1  ;;  %v195_v0 = vld [vmem:[%s29650_s1] sm:$0xff]  ;;  %vm224_vm0 = vcmask 31744   ;;  %v197_v1 = vld [vmem:[%s29650_s1 + $0x10] sm:$0xff]  ;;  %v22555_v3 = vmov 0   ;;  %v419_v40 = vlaneseq }
  0x17   : > { %22368 = vmatprep.mubr.msk.f32.mxu0 %vm224_vm0, %v195_v0  ;;  %22371 = vmatprep.mubr.msk.f32.mxu1 %vm224_vm0, %v197_v1  ;;  %v200_v2 = vld [vmem:[%s29651_s2] sm:$0xff]  ;;  %v202_v4 = vld [vmem:[%s29651_s2 + $0x10] sm:$0xff]  ;;  %v201_v5 = vld [vmem:[%s29651_s2 + $0x8] sm:$0xff]  ;;  %vm237_vm1 = vcmask 1043456   ;;  %s22558_s28 = smov 80   ;;  %s22559_s29 = smov 64  }
  0x18   : > { %s187_s10 = scalar_select %p186_p12, %s22541_s16, 1  ;;  %22485 = vset.pattern.permute.xlu0 %v22555_v3  ;;  %22486 = vset.pattern.permute.xlu1 %v22555_v3  ;;  %v203_v6 = vld [vmem:[%s29651_s2 + $0x18] sm:$0xff]  ;;  %v196_v8 = vld [vmem:[%s29650_s1 + $0x8] sm:$0xff]  ;;  %v22563_v38 = vmov 1983009808   ;;  %v420_v43 = vshrl.u32 %v419_v40, 7 }
  0x19   : > { %s189_s21 = scalar_select %p188_p13, %s22537_s15, 1  ;;  %206 = vperm.xlu0 %22485, %v200_v2   ;;  %216 = vperm.xlu1 %22486, %v202_v4   ;;  %v198_v9 = vld [vmem:[%s29650_s1 + $0x18] sm:$0xff]  ;;  %v417_v39 = vunpack.c.l.s4 %v22563_v38  ;;  %v22564_v47 = vmov 1934713408   ;;  %vm21950_vm2 = vcmask 15360   ;;  %vm21983_vm3 = vcmask 48128  }
  0x1a   : > { %s22348_s24 = sshll.u32 %s187_s10, 1  ;;  %s22560_s4 = smov 48   ;;  %v481_v48 = vunpack.c.l.s4 %v22564_v47  ;;  %vm22000_vm4 = vcmask 64512   ;;  %vm22017_vm5 = vcmask 80896   ;;  %vm22034_vm6 = vcmask 97280  }
  0x1b   : > { %s191_s5 = sadd.s32 %s22348_s24, %s189_s21  ;;  %s22556_s21 = smov 112   ;;  %v418_v42 = vunpack.c.0.s8 %v417_v39  ;;  %vm22051_vm7 = vcmask 113664   ;;  %vm22068_vm8 = vcmask 130048   ;;  %vm22085_vm9 = vcmask 146432  }
  0x1c   : > { %s22349_s6 = sshll.u32 %s191_s5, 2  ;;  %s22557_s24 = smov 96   ;;  %v482_v54 = vunpack.c.0.s8 %v481_v48  ;;  %vm22102_vm10 = vcmask 162816   ;;  %vm22119_vm11 = vcmask 179200   ;;  %vm22136_vm12 = vcmask 195584  }
  0x1d   : > { %s193_s9 = scalar_lea.vmem %s29649_s0, %s22349_s6  ;;  %211 = vperm.xlu0 %22485, %v201_v5   ;;  %221 = vperm.xlu1 %22486, %v203_v6   ;;  %s22561_s5 = smov 32   ;;  %v22779_v49 = vsub.s32 %v418_v42, %v420_v43  ;;  %vm22153_vm13 = vcmask 211968   ;;  %vm22170_vm14 = vcmask 228352   ;;  %vm22187_vm15 = vcmask 244736  }
  0x1e   : > { %v199_v7 = vld [vmem:[%s193_s9] sm:$0xf]  ;;  %s22562_s6 = smov 16   ;;  %v22788_v62 = vsub.s32 %v482_v54, %v420_v43  ;;  %s22566_s7 = smov 2  }
  0x1f   : > { %22366 = vmatprep.subr.msk.mxu0 %vm237_vm1, %v199_v7  ;;  %22374 = vmatprep.subr.msk.mxu1 %vm237_vm1, %v199_v7  ;;  %s22567_s8 = smov 4   ;;  %s22568_s9 = smov 6  }
  0x20   : > { %22367 = vmatpush3.msk.msra.mxu0 %vm237_vm1, %v199_v7  ;;  %22375 = vmatpush3.msk.msra.mxu1 %vm237_vm1, %v199_v7  ;;  %s22569_s11 = smov 8   ;;  %s22570_s10 = smov 10  }
  0x21   : > { %22369 = vmatmul.mubr.msk.f32.vlgmr.msra.gmra.mxu0 %vm224_vm0, %v196_v8  ;;  %22372 = vmatmul.mubr.msk.f32.vlgmr.msra.gmra.mxu1 %vm224_vm0, %v198_v9  ;;  %s22571_s20 = smov 12   ;;  %s22572_s27 = smov 14  }
  0x94   : > { %v207_v10 = vpop.permute.xlu0 %206  ;;  %v217_v11 = vpop.permute.xlu1 %216 }
  0x98   : > { %v212_v12 = vpop.permute.xlu0 %211  ;;  %v222_v16 = vpop.permute.xlu1 %221 }
  0xe1   : > { %v22370_v13 = vpop.f32.mrf.mxu0  ;;  %v22373_v14 = vpop.f32.mrf.mxu1 }
  0xe2   : > { %v22713_v15 = vadd.f32 %v22370_v13, %v212_v12  ;;  %v22718_v20 = vadd.f32 %v22373_v14, %v222_v16 }
  0xe3   : > { %v307_v17 = vpop.f32.mrf.mxu0  ;;  %v317_v19 = vpop.f32.mrf.mxu1 }
  0xe4   : > { %v22715_v18 = vadd.f32 %v307_v17, %v207_v10  ;;  %332 = vrot.lane.b32.xlu1 %v22713_v15, %s22556_s21  ;;  %v22721_v21 = vadd.f32 %v317_v19, %v217_v11 }
  0xe6   : > { %330 = vrot.lane.b32.xlu0 %v22715_v18, %s22556_s21 }
  0xe8   : > { %336 = vrot.lane.b32.xlu1 %v22718_v20, %s22556_s21 }
  0xea   : > { %334 = vrot.lane.b32.xlu0 %v22721_v21, %s22556_s21  ;;  %s22573_s21 = smov 18  }
  0xec   : > { %344 = vrot.lane.b32.xlu1 %v22713_v15, %s22557_s24 }
  0xee   : > { %342 = vrot.lane.b32.xlu0 %v22715_v18, %s22557_s24 }
  0xf0   : > { %348 = vrot.lane.b32.xlu1 %v22718_v20, %s22557_s24 }
  0xf2   : > { %346 = vrot.lane.b32.xlu0 %v22721_v21, %s22557_s24  ;;  %s22574_s24 = smov 20  }
  0xf4   : > { %356 = vrot.lane.b32.xlu1 %v22713_v15, %s22558_s28 }
  0xf6   : > { %354 = vrot.lane.b32.xlu0 %v22715_v18, %s22558_s28 }
  0xf8   : > { %360 = vrot.lane.b32.xlu1 %v22718_v20, %s22558_s28 }
  0xfa   : > { %358 = vrot.lane.b32.xlu0 %v22721_v21, %s22558_s28  ;;  %s22575_s28 = smov 22  }
  0xfc   : > { %368 = vrot.lane.b32.xlu1 %v22713_v15, %s22559_s29 }
  0xfe   : > { %366 = vrot.lane.b32.xlu0 %v22715_v18, %s22559_s29 }
 0x100   : > { %372 = vrot.lane.b32.xlu1 %v22718_v20, %s22559_s29 }
 0x102   : > { %370 = vrot.lane.b32.xlu0 %v22721_v21, %s22559_s29  ;;  %s22576_s29 = smov 24  }
 0x104   : > { %380 = vrot.lane.b32.xlu1 %v22713_v15, %s22560_s4 }
 0x106   : > { %378 = vrot.lane.b32.xlu0 %v22715_v18, %s22560_s4 }
 0x108   : > { %384 = vrot.lane.b32.xlu1 %v22718_v20, %s22560_s4 }
 0x10a   : > { %382 = vrot.lane.b32.xlu0 %v22721_v21, %s22560_s4  ;;  %s22577_s4 = smov 26  }
 0x10c   : > { %392 = vrot.lane.b32.xlu1 %v22713_v15, %s22561_s5 }
 0x10e   : > { %390 = vrot.lane.b32.xlu0 %v22715_v18, %s22561_s5 }
 0x110   : > { %396 = vrot.lane.b32.xlu1 %v22718_v20, %s22561_s5 }
 0x112   : > { %394 = vrot.lane.b32.xlu0 %v22721_v21, %s22561_s5  ;;  %s22578_s5 = smov 28  }
 0x114   : > { %404 = vrot.lane.b32.xlu1 %v22713_v15, %s22562_s6 }
 0x116   : > { %402 = vrot.lane.b32.xlu0 %v22715_v18, %s22562_s6 }
 0x118   : > { %408 = vrot.lane.b32.xlu1 %v22718_v20, %s22562_s6 }
 0x11a   : > { %406 = vrot.lane.b32.xlu0 %v22721_v21, %s22562_s6 }
 0x156   : > { %v333_v22 = vpop.permute.xlu1 %332 }
 0x158   : > { %v22755_v24 = vpop.permute.xlu0 %330 }
 0x15a   : > { %v22753_v23 = vpop.permute.xlu1 %336 }
 0x15c   : > { %v22759_v27 = vpop.permute.xlu0 %334 }
 0x15e   : > { %v345_v25 = vpop.permute.xlu1 %344 }
 0x15f   : > { %v550_v50 = vcombine.low %v22713_v15, %v345_v25  ;;  %v551_v5 = vcombine.high %v22713_v15, %v345_v25 }
 0x160   : > { %v22761_v29 = vpop.permute.xlu0 %342 }
 0x161   : > { %v558_v57 = vrot.slane %v550_v50, %v22779_v49  ;;  %v565_v16 = vrot.slane %v551_v5, %v22779_v49 }
 0x162   : > { %v22757_v26 = vpop.permute.xlu1 %348 }
 0x163   : > { %v823_v5 = vcombine.high %v22718_v20, %v22757_v26 }
 0x164   : > { %v22765_v32 = vpop.permute.xlu0 %346 }
 0x166   : > { %v357_v28 = vpop.permute.xlu1 %356 }
 0x167   : > { %v566_v45 = vcombine.low %v333_v22, %v357_v28  ;;  %v567_v0 = vcombine.high %v333_v22, %v357_v28 }
 0x168   : > { %v22769_v34 = vpop.permute.xlu0 %354 }
 0x169   : > { %v574_v52 = vrot.slane %v566_v45, %v22779_v49  ;;  %v581_v9 = vrot.slane %v567_v0, %v22779_v49 }
 0x16a   : > { %v22763_v30 = vpop.permute.xlu1 %360 }
 0x16b   : > { %v614_v60 = vcombine.low %v558_v57, %v574_v52  ;;  %v615_v8 = vcombine.high %v558_v57, %v574_v52  ;;  %v630_v22 = vcombine.low %v565_v16, %v581_v9  ;;  %v631_v45 = vcombine.high %v565_v16, %v581_v9 }
 0x16c   : > { %v22773_v37 = vpop.permute.xlu0 %358 }
 0x16d   : > { %v622_v7 = vrot.slane %v614_v60, %v22788_v62  ;;  %v629_v15 = vrot.slane %v615_v8, %v22788_v62  ;;  %v638_v43 = vrot.slane %v630_v22, %v22788_v62  ;;  %v645_v57 = vrot.slane %v631_v45, %v22788_v62 }
 0x16e   : > { %v369_v31 = vpop.permute.xlu1 %368 }
 0x170   : > { %v22775_v44 = vpop.permute.xlu0 %366 }
 0x172   : > { %v22767_v33 = vpop.permute.xlu1 %372 }
 0x174   : > { %v22783_v55 = vpop.permute.xlu0 %370 }
 0x176   : > { %v381_v35 = vpop.permute.xlu1 %380 }
 0x178   : > { %v22790_v2 = vpop.permute.xlu0 %378 }
 0x17a   : > { %v22771_v36 = vpop.permute.xlu1 %384 }
 0x17c   : > { %v22800_v19 = vpop.permute.xlu0 %382 }
 0x17e   : > { %v393_v41 = vpop.permute.xlu1 %392 }
 0x17f   : > { %v582_v51 = vcombine.low %v369_v31, %v393_v41  ;;  %v583_v1 = vcombine.high %v369_v31, %v393_v41  ;;  %v838_v31 = vcombine.low %v22753_v23, %v22763_v30  ;;  %v822_v41 = vcombine.low %v22718_v20, %v22757_v26 }
 0x180   : > { %v22813_v47 = vpop.permute.xlu0 %390 }
 0x181   : > { %v590_v58 = vrot.slane %v582_v51, %v22779_v49  ;;  %v597_v10 = vrot.slane %v583_v1, %v22779_v49  ;;  %v846_v48 = vrot.slane %v838_v31, %v22779_v49  ;;  %v830_v54 = vrot.slane %v822_v41, %v22779_v49 }
 0x182   : > { %v22777_v46 = vpop.permute.xlu1 %396  ;;  %v446_v16 = vcombine.low %v22775_v44, %v22813_v47 }
 0x183   : > { %v855_v0 = vcombine.high %v22767_v33, %v22777_v46 }
 0x184   : > { %v22821_v60 = vpop.permute.xlu0 %394 }
 0x186   : > { %v405_v53 = vpop.permute.xlu1 %404 }
 0x187   : > { %v598_v56 = vcombine.low %v381_v35, %v405_v53  ;;  %v599_v61 = vcombine.high %v381_v35, %v405_v53  ;;  %v854_v35 = vcombine.low %v22767_v33, %v22777_v46 }
 0x188   : > { %v403_v33 = vpop.permute.xlu0 %402 }
 0x189   : > { %v606_v59 = vrot.slane %v598_v56, %v22779_v49  ;;  %v613_v6 = vrot.slane %v599_v61, %v22779_v49  ;;  %v862_v50 = vrot.slane %v854_v35, %v22779_v49 }
 0x18a   : > { %v409_v13 = vpop.permute.xlu1 %408 }
 0x18b   : > { %v646_v63 = vcombine.low %v590_v58, %v606_v59  ;;  %v647_v3 = vcombine.high %v590_v58, %v606_v59  ;;  %v662_v17 = vcombine.low %v597_v10, %v613_v6  ;;  %v870_v25 = vcombine.low %v22771_v36, %v409_v13 }
 0x18c   : > { %v663_v40 = vcombine.high %v597_v10, %v613_v6  ;;  %v886_v58 = vcombine.low %v830_v54, %v846_v48  ;;  %v871_v59 = vcombine.high %v22771_v36, %v409_v13  ;;  %v837_v10 = vrot.slane %v823_v5, %v22779_v49 }
 0x18d   : > { %v654_v4 = vrot.slane %v646_v63, %v22788_v62  ;;  %v661_v14 = vrot.slane %v647_v3, %v22788_v62  ;;  %v670_v39 = vrot.slane %v662_v17, %v22788_v62  ;;  %v878_v42 = vrot.slane %v870_v25, %v22779_v49 }
 0x18e   : > { %v677_v53 = vrot.slane %v663_v40, %v22788_v62  ;;  %v839_v63 = vcombine.high %v22753_v23, %v22763_v30  ;;  %v885_v6 = vrot.slane %v871_v59, %v22779_v49  ;;  %v894_v36 = vrot.slane %v886_v58, %v22788_v62 }
 0x18f   : > { %v679_v11 = vcombine.high %v622_v7, %v654_v4  ;;  %v678_v12 = vcombine.low %v622_v7, %v654_v4  ;;  %v681_v28 = vcombine.high %v629_v15, %v661_v14  ;;  %v680_v38 = vcombine.low %v629_v15, %v661_v14 }
 0x190   : > { %v683_v51 = vcombine.high %v638_v43, %v670_v39  ;;  %v682_v52 = vcombine.low %v638_v43, %v670_v39  ;;  %v918_v56 = vcombine.low %v862_v50, %v878_v42  ;;  %v685_v61 = vcombine.high %v645_v57, %v677_v53 }
 0x191   : > { %1246 = vxpose.xlu1.b32.start.end [1/1] (short) (narrow) %v679_v11, 16  ;;  %1214 = vxpose.xlu0.b32.start.end [1/1] (short) (narrow) %v678_v12, 16  ;;  %v684_v1 = vcombine.low %v645_v57, %v677_v53  ;;  %v919_v4 = vcombine.high %v862_v50, %v878_v42  ;;  %v887_v7 = vcombine.high %v830_v54, %v846_v48 }
 0x192   : > { %v926_v3 = vrot.slane %v918_v56, %v22788_v62  ;;  %v853_v8 = vrot.slane %v839_v63, %v22779_v49  ;;  %v869_v23 = vrot.slane %v855_v0, %v22779_v49  ;;  %v462_v12 = vcombine.low %v22790_v2, %v403_v33 }
 0x193   : > { %v933_v9 = vrot.slane %v919_v4, %v22788_v62  ;;  %v901_v20 = vrot.slane %v887_v7, %v22788_v62  ;;  %v430_v14 = vcombine.low %v22755_v24, %v22769_v34  ;;  %v414_v25 = vcombine.low %v22715_v18, %v22761_v29 }
 0x194   : > { %v951_v30 = vcombine.high %v894_v36, %v926_v3  ;;  %v950_v46 = vcombine.low %v894_v36, %v926_v3  ;;  %v934_v11 = vcombine.low %v869_v23, %v885_v6  ;;  %v902_v26 = vcombine.low %v837_v10, %v853_v8 }
 0x195   : > { %v953_v13 = vcombine.high %v901_v20, %v933_v9  ;;  %v952_v17 = vcombine.low %v901_v20, %v933_v9  ;;  %v935_v22 = vcombine.high %v869_v23, %v885_v6  ;;  %v903_v35 = vcombine.high %v837_v10, %v853_v8 }
 0x196   : > { %1310 = vxpose.xlu1.b32.start.end [1/1] (short) (narrow) %v681_v28, 16  ;;  %1278 = vxpose.xlu0.b32.start.end [1/1] (short) (narrow) %v680_v38, 16  ;;  %v942_v15 = vrot.slane %v934_v11, %v22788_v62  ;;  %v470_v28 = vrot.slane %v462_v12, %v22779_v49  ;;  %v910_v31 = vrot.slane %v902_v26, %v22788_v62 }
 0x197   : > { %v463_v38 = vcombine.high %v22790_v2, %v403_v33  ;;  %v438_v39 = vrot.slane %v430_v14, %v22779_v49  ;;  %v454_v40 = vrot.slane %v446_v16, %v22779_v49  ;;  %v431_v42 = vcombine.high %v22755_v24, %v22769_v34 }
 0x198   : > { %v955_v41 = vcombine.high %v910_v31, %v942_v15  ;;  %v447_v43 = vcombine.high %v22775_v44, %v22813_v47  ;;  %v954_v45 = vcombine.low %v910_v31, %v942_v15  ;;  %v949_v48 = vrot.slane %v935_v22, %v22788_v62  ;;  %v407_v47 = vpop.permute.xlu0 %406 }
 0x199   : > { %v422_v50 = vrot.slane %v414_v25, %v22779_v49  ;;  %v415_v2 = vcombine.high %v22715_v18, %v22761_v29  ;;  %v917_v53 = vrot.slane %v903_v35, %v22788_v62  ;;  %v445_v24 = vrot.slane %v431_v42, %v22779_v49 }
 0x19a   : > { %v461_v34 = vrot.slane %v447_v43, %v22779_v49  ;;  %v511_v18 = vcombine.high %v454_v40, %v470_v28  ;;  %v734_v63 = vcombine.low %v22800_v19, %v407_v47  ;;  %v702_v3 = vcombine.low %v22759_v27, %v22773_v37 }
 0x19b   : > { %1374 = vxpose.xlu1.b32.start.end [1/1] (short) (narrow) %v683_v51, 16  ;;  %1342 = vxpose.xlu0.b32.start.end [1/1] (short) (narrow) %v682_v52, 16  ;;  %v510_v51 = vcombine.low %v454_v40, %v470_v28  ;;  %v477_v52 = vrot.slane %v463_v38, %v22779_v49  ;;  %v478_v54 = vcombine.low %v422_v50, %v438_v39 }
 0x19c   : > { %v957_v44 = vcombine.high %v917_v53, %v949_v48  ;;  %v956_v56 = vcombine.low %v917_v53, %v949_v48  ;;  %v429_v58 = vrot.slane %v415_v2, %v22779_v49  ;;  %v479_v0 = vcombine.high %v422_v50, %v438_v39 }
 0x19d   : > { %v518_v57 = vrot.slane %v510_v51, %v22788_v62  ;;  %v526_v59 = vcombine.low %v461_v34, %v477_v52  ;;  %v486_v29 = vrot.slane %v478_v54, %v22788_v62  ;;  %v718_v4 = vcombine.low %v22783_v55, %v22821_v60 }
 0x19e   : > { %v527_v36 = vcombine.high %v461_v34, %v477_v52  ;;  %v525_v7 = vrot.slane %v511_v18, %v22788_v62  ;;  %v686_v8 = vcombine.low %v22721_v21, %v22765_v32  ;;  %v742_v23 = vrot.slane %v734_v63, %v22779_v49 }
 0x19f   : > { %v542_v5 = vcombine.low %v486_v29, %v518_v57  ;;  %v534_v6 = vrot.slane %v526_v59, %v22788_v62  ;;  %v495_v33 = vcombine.high %v429_v58, %v445_v24  ;;  %v710_v9 = vrot.slane %v702_v3, %v22779_v49 }
 0x1a0   : > { %1438 = vxpose.xlu1.b32.start.end [1/1] (short) (narrow) %v685_v61, 16  ;;  %1406 = vxpose.xlu0.b32.start.end [1/1] (short) (narrow) %v684_v1, 16  ;;  %v494_v61 = vcombine.low %v429_v58, %v445_v24  ;;  %v543_v1 = vcombine.high %v486_v29, %v518_v57  ;;  %v726_v10 = vrot.slane %v718_v4, %v22779_v49 }
 0x1a1   : > { %v541_v26 = vrot.slane %v527_v36, %v22788_v62  ;;  %v694_v12 = vrot.slane %v686_v8, %v22779_v49  ;;  %v509_v14 = vrot.slane %v495_v33, %v22788_v62  ;;  %v703_v22 = vcombine.high %v22759_v27, %v22773_v37 }
 0x1a2   : > { %v719_v25 = vcombine.high %v22783_v55, %v22821_v60  ;;  %v783_v35 = vcombine.high %v726_v10, %v742_v23  ;;  %v687_v38 = vcombine.high %v22721_v21, %v22765_v32  ;;  %v29674_v36 = vmov 0.0  }
 0x1a3   : > { %v750_v16 = vcombine.low %v694_v12, %v710_v9  ;;  %v549_v15 = vcombine.high %v509_v14, %v541_v26  ;;  %v751_v40 = vcombine.high %v694_v12, %v710_v9  ;;  %v548_v48 = vcombine.low %v509_v14, %v541_v26 }
 0x1a4   : > { %v733_v27 = vrot.slane %v719_v25, %v22779_v49  ;;  %v797_v60 = vrot.slane %v783_v35, %v22788_v62  ;;  %v701_v42 = vrot.slane %v687_v38, %v22779_v49 }
 0x1a5   : > { %1758 = vxpose.xlu1.b32.start.end [1/1] (short) (narrow) %v951_v30, 16  ;;  %1726 = vxpose.xlu0.b32.start.end [1/1] (short) (narrow) %v950_v46, 16  ;;  %v502_v30 = vrot.slane %v494_v61, %v22788_v62  ;;  %v493_v46 = vrot.slane %v479_v0, %v22788_v62  ;;  %v765_v21 = vrot.slane %v751_v40, %v22788_v62 }
 0x1a7   : > { %v547_v11 = vcombine.high %v502_v30, %v534_v6  ;;  %v544_v20 = vcombine.low %v493_v46, %v525_v7  ;;  %v545_v28 = vcombine.high %v493_v46, %v525_v7  ;;  %v546_v55 = vcombine.low %v502_v30, %v534_v6 }
 0x1aa   : > { %1822 = vxpose.xlu1.b32.start.end [1/1] (short) (narrow) %v953_v13, 16  ;;  %1790 = vxpose.xlu0.b32.start.end [1/1] (short) (narrow) %v952_v17, 16  ;;  %v782_v13 = vcombine.low %v726_v10, %v742_v23  ;;  %v735_v17 = vcombine.high %v22800_v19, %v407_v47  ;;  %v758_v19 = vrot.slane %v750_v16, %v22788_v62 }
 0x1ab   : > { %v816_v47 = vcombine.low %v765_v21, %v797_v60 }
 0x1ac   : > { %v790_v31 = vrot.slane %v782_v13, %v22788_v62  ;;  %v749_v39 = vrot.slane %v735_v17, %v22779_v49 }
 0x1ae   : > { %v815_v37 = vcombine.high %v758_v19, %v790_v31  ;;  %v798_v43 = vcombine.low %v733_v27, %v749_v39  ;;  %v799_v51 = vcombine.high %v733_v27, %v749_v39  ;;  %v814_v54 = vcombine.low %v758_v19, %v790_v31 }
 0x1af   : > { %1886 = vxpose.xlu1.b32.start.end [1/1] (short) (narrow) %v955_v41, 16  ;;  %1854 = vxpose.xlu0.b32.start.end [1/1] (short) (narrow) %v954_v45, 16  ;;  %v717_v41 = vrot.slane %v703_v22, %v22779_v49  ;;  %v817_v45 = vcombine.high %v765_v21, %v797_v60 }
 0x1b0   : > { %v806_v50 = vrot.slane %v798_v43, %v22788_v62  ;;  %v813_v24 = vrot.slane %v799_v51, %v22788_v62 }
 0x1b1   : > { %v766_v32 = vcombine.low %v701_v42, %v717_v41  ;;  %v767_v52 = vcombine.high %v701_v42, %v717_v41 }
 0x1b3   : > { %v774_v2 = vrot.slane %v766_v32, %v22788_v62  ;;  %v781_v34 = vrot.slane %v767_v52, %v22788_v62 }
 0x1b4   : > { %1950 = vxpose.xlu1.b32.start.end [1/1] (short) (narrow) %v957_v44, 16  ;;  %1918 = vxpose.xlu0.b32.start.end [1/1] (short) (narrow) %v956_v56, 16 }
 0x1b5   : > { %v819_v53 = vcombine.high %v774_v2, %v806_v50  ;;  %v821_v44 = vcombine.high %v781_v34, %v813_v24  ;;  %v818_v56 = vcombine.low %v774_v2, %v806_v50  ;;  %v820_v57 = vcombine.low %v781_v34, %v813_v24 }
 0x1b9   : > { %990 = vxpose.xlu1.b32.start.end [1/1] (short) (narrow) %v543_v1, 16  ;;  %958 = vxpose.xlu0.b32.start.end [1/1] (short) (narrow) %v542_v5, 16 }
 0x1be   : > { %1118 = vxpose.xlu1.b32.start.end [1/1] (short) (narrow) %v547_v11, 16  ;;  %1022 = vxpose.xlu0.b32.start.end [1/1] (short) (narrow) %v544_v20, 16 }
 0x1c3   : > { %1182 = vxpose.xlu1.b32.start.end [1/1] (short) (narrow) %v549_v15, 16  ;;  %1054 = vxpose.xlu0.b32.start.end [1/1] (short) (narrow) %v545_v28, 16 }
 0x1c8   : > { %1502 = vxpose.xlu1.b32.start.end [1/1] (short) (narrow) %v815_v37, 16  ;;  %1086 = vxpose.xlu0.b32.start.end [1/1] (short) (narrow) %v546_v55, 16 }
 0x1cd   : > { %1566 = vxpose.xlu1.b32.start.end [1/1] (short) (narrow) %v817_v45, 16  ;;  %1150 = vxpose.xlu0.b32.start.end [1/1] (short) (narrow) %v548_v48, 16 }
 0x1d2   : > { %1630 = vxpose.xlu1.b32.start.end [1/1] (short) (narrow) %v819_v53, 16  ;;  %1470 = vxpose.xlu0.b32.start.end [1/1] (short) (narrow) %v814_v54, 16 }
 0x1d7   : > { %1694 = vxpose.xlu1.b32.start.end [1/1] (short) (narrow) %v821_v44, 16  ;;  %1534 = vxpose.xlu0.b32.start.end [1/1] (short) (narrow) %v816_v47, 16 }
 0x1dc   : > { %1598 = vxpose.xlu0.b32.start.end [1/1] (short) (narrow) %v818_v56, 16 }
 0x1e1   : > { %1662 = vxpose.xlu0.b32.start.end [1/1] (short) (narrow) %v820_v57, 16 }
 0x20d   : > { %v22901_v58 = vpop.trf.xlu1  ;;  %v22905_v18 = vpop.trf.xlu0 }
 0x20e   : > { %v2532_v59 = vrot.slane %v22901_v58, %v22779_v49  ;;  %v2517_v29 = vrot.slane %v22905_v18, %v22779_v49 }
 0x210   : > { %v2540_v61 = vcombine.low %v2517_v29, %v2532_v59  ;;  %v2541_v0 = vcombine.high %v2517_v29, %v2532_v59 }
 0x211   : > { %v22909_v63 = vpop.trf.xlu1  ;;  %v22911_v1 = vpop.trf.xlu0 }
 0x212   : > { %v2548_v3 = vrot.slane %v2540_v61, %v22788_v62  ;;  %v2555_v8 = vrot.slane %v2541_v0, %v22788_v62 }
 0x214   : > { %6142 = vxpose.xlu0.b32.start.end [1/1] (short) (narrow) %v2548_v3, 8  ;;  %v2572_v7 = vcombine.high %v2548_v3, %v29674_v36  ;;  %v2573_v10 = vcombine.high %v2555_v8, %v29674_v36 }
 0x215   : > { %v22914_v4 = vpop.trf.xlu1  ;;  %v22918_v6 = vpop.trf.xlu0 }
 0x216   : > { %v2664_v5 = vrot.slane %v22914_v4, %v22779_v49  ;;  %v2649_v23 = vrot.slane %v22918_v6, %v22779_v49  ;;  %6174 = vxpose.xlu1.b32.start.end [1/1] (short) (narrow) %v2572_v7, 8 }
 0x218   : > { %v2672_v30 = vcombine.low %v2649_v23, %v2664_v5  ;;  %v2673_v46 = vcombine.high %v2649_v23, %v2664_v5  ;;  %6206 = vxpose.xlu0.b32.start.end [1/1] (short) (narrow) %v2555_v8, 8 }
 0x219   : > { %v22924_v33 = vpop.trf.xlu1  ;;  %v22926_v9 = vpop.trf.xlu0 }
 0x21a   : > { %6238 = vxpose.xlu1.b32.start.end [1/1] (short) (narrow) %v2573_v10, 8  ;;  %v2680_v11 = vrot.slane %v2672_v30, %v22788_v62  ;;  %v2687_v14 = vrot.slane %v2673_v46, %v22788_v62 }
 0x21c   : > { %6654 = vxpose.xlu0.b32.start.end [1/1] (short) (narrow) %v2680_v11, 8  ;;  %v2704_v13 = vcombine.high %v2680_v11, %v29674_v36  ;;  %v2705_v28 = vcombine.high %v2687_v14, %v29674_v36 }
 0x21d   : > { %v22930_v20 = vpop.trf.xlu1  ;;  %v22934_v12 = vpop.trf.xlu0 }
 0x21e   : > { %v2796_v26 = vrot.slane %v22930_v20, %v22779_v49  ;;  %v2781_v16 = vrot.slane %v22934_v12, %v22779_v49  ;;  %6686 = vxpose.xlu1.b32.start.end [1/1] (short) (narrow) %v2704_v13, 8 }
 0x220   : > { %v2804_v17 = vcombine.low %v2781_v16, %v2796_v26  ;;  %v2805_v22 = vcombine.high %v2781_v16, %v2796_v26  ;;  %6718 = vxpose.xlu0.b32.start.end [1/1] (short) (narrow) %v2687_v14, 8 }
 0x221   : > { %v22940_v15 = vpop.trf.xlu1  ;;  %v22942_v25 = vpop.trf.xlu0 }
 0x222   : > { %6750 = vxpose.xlu1.b32.start.end [1/1] (short) (narrow) %v2705_v28, 8  ;;  %v2812_v31 = vrot.slane %v2804_v17, %v22788_v62  ;;  %v2819_v41 = vrot.slane %v2805_v22, %v22788_v62 }
 0x224   : > { %7166 = vxpose.xlu0.b32.start.end [1/1] (short) (narrow) %v2812_v31, 8  ;;  %v2836_v40 = vcombine.high %v2812_v31, %v29674_v36  ;;  %v2837_v45 = vcombine.high %v2819_v41, %v29674_v36 }
 0x225   : > { %v1454_v35 = vpop.trf.xlu1  ;;  %v1422_v19 = vpop.trf.xlu0 }
 0x226   : > { %v2921_v38 = vcombine.high %v1454_v35, %v29674_v36  ;;  %v2928_v39 = vrot.slane %v1454_v35, %v22779_v49  ;;  %v2906_v27 = vcombine.high %v1422_v19, %v29674_v36  ;;  %v2913_v37 = vrot.slane %v1422_v19, %v22779_v49  ;;  %7198 = vxpose.xlu1.b32.start.end [1/1] (short) (narrow) %v2836_v40, 8 }
 0x228   : > { %v22953_v55 = vrot.slane %v2921_v38, %v22779_v49  ;;  %v22956_v60 = vrot.slane %v2906_v27, %v22779_v49  ;;  %v2936_v42 = vcombine.low %v2913_v37, %v2928_v39  ;;  %v2937_v21 = vcombine.high %v2913_v37, %v2928_v39  ;;  %7230 = vxpose.xlu0.b32.start.end [1/1] (short) (narrow) %v2819_v41, 8 }
 0x229   : > { %v22958_v43 = vpop.trf.xlu1  ;;  %v22960_v32 = vpop.trf.xlu0 }
 0x22a   : > { %7262 = vxpose.xlu1.b32.start.end [1/1] (short) (narrow) %v2837_v45, 8  ;;  %v2944_v50 = vrot.slane %v2936_v42, %v22788_v62  ;;  %v2951_v53 = vrot.slane %v2937_v21, %v22788_v62 }
 0x22c   : > { %7678 = vxpose.xlu0.b32.start.end [1/1] (short) (narrow) %v2944_v50, 8  ;;  %v2968_v52 = vcombine.high %v2944_v50, %v29674_v36  ;;  %v2969_v34 = vcombine.high %v2951_v53, %v29674_v36 }
 0x22d   : > { %v22966_v51 = vpop.trf.xlu1  ;;  %v22968_v2 = vpop.trf.xlu0 }
 0x22e   : > { %30260 = vst [vmem:[#allocation7_spill] sm:$0xff] %v22966_v51  ;;  %30261 = vst [vmem:[#allocation8_spill] sm:$0xff] %v22968_v2  ;;  %7710 = vxpose.xlu1.b32.start.end [1/1] (short) (narrow) %v2968_v52, 8 }
 0x230   : > { %7742 = vxpose.xlu0.b32.start.end [1/1] (short) (narrow) %v2951_v53, 8 }
 0x231   : > { %v22972_v54 = vpop.trf.xlu1  ;;  %v22974_v24 = vpop.trf.xlu0 }
 0x232   : > { %30262 = vst [vmem:[#allocation9_spill] sm:$0xff] %v22972_v54  ;;  %30263 = vst [vmem:[#allocation10_spill] sm:$0xff] %v22974_v24  ;;  %7774 = vxpose.xlu1.b32.start.end [1/1] (short) (narrow) %v2969_v34, 8 }
 0x235   : > { %v22977_v44 = vpop.trf.xlu1  ;;  %v22979_v47 = vpop.trf.xlu0 }
 0x236   : > { %30264 = vst [vmem:[#allocation11_spill] sm:$0xff] %v22977_v44  ;;  %30265 = vst [vmem:[#allocation12_spill] sm:$0xff] %v22979_v47 }
 0x239   : > { %v22981_v56 = vpop.trf.xlu1  ;;  %v22983_v57 = vpop.trf.xlu0 }
 0x23a   : > { %30266 = vst [vmem:[#allocation13_spill] sm:$0xff] %v22981_v56  ;;  %30267 = vst [vmem:[#allocation14_spill] sm:$0xff] %v22983_v57 }
 0x23d   : > { %v22985_v59 = vpop.trf.xlu1  ;;  %v22987_v29 = vpop.trf.xlu0 }
 0x23e   : > { %30268 = vst [vmem:[#allocation15_spill] sm:$0xff] %v22985_v59  ;;  %30269 = vst [vmem:[#allocation16_spill] sm:$0xff] %v22987_v29 }
 0x241   : > { %v22989_v61 = vpop.trf.xlu1  ;;  %v22991_v0 = vpop.trf.xlu0 }
 0x242   : > { %30270 = vst [vmem:[#allocation17_spill] sm:$0xff] %v22989_v61  ;;  %30271 = vst [vmem:[#allocation18_spill] sm:$0xff] %v22991_v0 }
 0x245   : > { %v22993_v3 = vpop.trf.xlu1  ;;  %v22995_v5 = vpop.trf.xlu0 }
 0x246   : > { %30272 = vst [vmem:[#allocation19_spill] sm:$0xff] %v22993_v3  ;;  %30273 = vst [vmem:[#allocation20_spill] sm:$0xff] %v22995_v5 }
 0x249   : > { %v22997_v7 = vpop.trf.xlu1  ;;  %v22999_v8 = vpop.trf.xlu0 }
 0x24a   : > { %30274 = vst [vmem:[#allocation21_spill] sm:$0xff] %v22997_v7  ;;  %30275 = vst [vmem:[#allocation22_spill] sm:$0xff] %v22999_v8 }
 0x24d   : > { %v23001_v23 = vpop.trf.xlu1  ;;  %v23005_v46 = vpop.trf.xlu0 }
 0x24e   : > { %v2004_v30 = vrot.slane %v23001_v23, %v22779_v49  ;;  %v1989_v10 = vrot.slane %v23005_v46, %v22779_v49 }
 0x250   : > { %v2012_v11 = vcombine.low %v1989_v10, %v2004_v30  ;;  %v2013_v13 = vcombine.high %v1989_v10, %v2004_v30 }
 0x251   : > { %v23009_v26 = vpop.trf.xlu1  ;;  %v23011_v14 = vpop.trf.xlu0 }
 0x252   : > { %v2020_v16 = vrot.slane %v2012_v11, %v22788_v62  ;;  %v2027_v31 = vrot.slane %v2013_v13, %v22788_v62 }
 0x254   : > { %4094 = vxpose.xlu0.b32.start.end [1/1] (short) (narrow) %v2020_v16, 8  ;;  %v2044_v28 = vcombine.high %v2020_v16, %v29674_v36  ;;  %v2045_v39 = vcombine.high %v2027_v31, %v29674_v36 }
 0x255   : > { %v23014_v17 = vpop.trf.xlu1  ;;  %v23016_v22 = vpop.trf.xlu0 }
 0x256   : > { %4126 = vxpose.xlu1.b32.start.end [1/1] (short) (narrow) %v2044_v28, 8  ;;  %v2121_v41 = vrot.slane %v23016_v22, %v22779_v49  ;;  %v2268_v52 = vrot.slane %v23014_v17, %v22779_v49 }
 0x258   : > { %4158 = vxpose.xlu0.b32.start.end [1/1] (short) (narrow) %v2027_v31, 8 }
 0x259   : > { %v23020_v35 = vpop.trf.xlu1  ;;  %v23022_v38 = vpop.trf.xlu0 }
 0x25a   : > { %4190 = vxpose.xlu1.b32.start.end [1/1] (short) (narrow) %v2045_v39, 8 }
 0x25d   : > { %v23025_v19 = vpop.trf.xlu1  ;;  %v23027_v40 = vpop.trf.xlu0 }
 0x25e   : > { %v2136_v27 = vrot.slane %v23027_v40, %v22779_v49 }
 0x260   : > { %v2144_v37 = vcombine.low %v2121_v41, %v2136_v27  ;;  %v2145_v21 = vcombine.high %v2121_v41, %v2136_v27  ;;  %v2400_v27 = vrot.slane %v23025_v19, %v22779_v49 }
 0x261   : > { %v23033_v42 = vpop.trf.xlu1  ;;  %v23035_v45 = vpop.trf.xlu0 }
 0x262   : > { %v2152_v50 = vrot.slane %v2144_v37, %v22788_v62  ;;  %v2159_v10 = vrot.slane %v2145_v21, %v22788_v62  ;;  %v2525_v37 = vcombine.high %v22901_v58, %v29674_v36  ;;  %v2510_v21 = vcombine.high %v22905_v18, %v29674_v36 }
 0x264   : > { %4606 = vxpose.xlu0.b32.start.end [1/1] (short) (narrow) %v2152_v50, 8  ;;  %v2176_v30 = vcombine.high %v2152_v50, %v29674_v36  ;;  %v2177_v31 = vcombine.high %v2159_v10, %v29674_v36  ;;  %v2524_v58 = vrot.slane %v2510_v21, %v22779_v49 }
 0x265   : > { %v23040_v53 = vpop.trf.xlu1  ;;  %v23042_v34 = vpop.trf.xlu0 }
 0x266   : > { %v2253_v11 = vrot.slane %v23042_v34, %v22779_v49  ;;  %4638 = vxpose.xlu1.b32.start.end [1/1] (short) (narrow) %v2176_v30, 8 }
 0x268   : > { %v2276_v13 = vcombine.low %v2253_v11, %v2268_v52  ;;  %v2277_v16 = vcombine.high %v2253_v11, %v2268_v52  ;;  %4670 = vxpose.xlu0.b32.start.end [1/1] (short) (narrow) %v2159_v10, 8 }
 0x269   : > { %v23048_v28 = vpop.trf.xlu0  ;;  %v23051_v39 = vpop.trf.xlu1 }
 0x26a   : > { %4702 = vxpose.xlu1.b32.start.end [1/1] (short) (narrow) %v2177_v31, 8  ;;  %v2284_v41 = vrot.slane %v2276_v13, %v22788_v62  ;;  %v2291_v30 = vrot.slane %v2277_v16, %v22788_v62  ;;  %v2539_v31 = vrot.slane %v2525_v37, %v22779_v49  ;;  %v2642_v37 = vcombine.high %v22918_v6, %v29674_v36 }
 0x26c   : > { %5118 = vxpose.xlu0.b32.start.end [1/1] (short) (narrow) %v2284_v41, 8  ;;  %v2308_v52 = vcombine.high %v2284_v41, %v29674_v36  ;;  %v2309_v18 = vcombine.high %v2291_v30, %v29674_v36  ;;  %v2556_v7 = vcombine.low %v2524_v58, %v2539_v31 }
 0x26d   : > { %v23060_v50 = vpop.trf.xlu0  ;;  %v23066_v11 = vpop.trf.xlu1 }
 0x26e   : > { %v2385_v10 = vrot.slane %v23060_v50, %v22779_v49  ;;  %5150 = vxpose.xlu1.b32.start.end [1/1] (short) (narrow) %v2308_v52, 8  ;;  %v2657_v52 = vcombine.high %v22914_v4, %v29674_v36  ;;  %v2564_v4 = vrot.slane %v2556_v7, %v22788_v62 }
 0x270   : > { %v2408_v13 = vcombine.low %v2385_v10, %v2400_v27  ;;  %v2409_v48 = vcombine.high %v2385_v10, %v2400_v27  ;;  %5182 = vxpose.xlu0.b32.start.end [1/1] (short) (narrow) %v2291_v30, 8  ;;  %v2557_v10 = vcombine.high %v2524_v58, %v2539_v31  ;;  %v2774_v31 = vcombine.high %v22934_v12, %v29674_v36 }
 0x271   : > { %v23071_v8 = vpop.trf.xlu0  ;;  %v23082_v30 = vpop.trf.xlu1 }
 0x272   : > { %v2416_v41 = vrot.slane %v2408_v13, %v22788_v62  ;;  %5214 = vxpose.xlu1.b32.start.end [1/1] (short) (narrow) %v2309_v18, 8  ;;  %v2423_v27 = vrot.slane %v2409_v48, %v22788_v62  ;;  %30276 = vst [vmem:[#allocation23_spill] sm:$0xff] %v23082_v30  ;;  %v2671_v13 = vrot.slane %v2657_v52, %v22779_v49 }
 0x273   : > { %v2656_v18 = vrot.slane %v2642_v37, %v22779_v49  ;;  %v2789_v48 = vcombine.high %v22930_v20, %v29674_v36 }
 0x274   : > { %v2440_v16 = vcombine.high %v2416_v41, %v29674_v36  ;;  %5630 = vxpose.xlu0.b32.start.end [1/1] (short) (narrow) %v2416_v41, 8  ;;  %v2441_v5 = vcombine.high %v2423_v27, %v29674_v36  ;;  %v2574_v41 = vcombine.high %v2564_v4, %v29674_v36 }
 0x275   : > { %v23080_v21 = vpop.trf.xlu0  ;;  %v23090_v6 = vpop.trf.xlu1  ;;  %v2688_v58 = vcombine.low %v2656_v18, %v2671_v13  ;;  %v2803_v7 = vrot.slane %v2789_v48, %v22779_v49  ;;  %v2689_v37 = vcombine.high %v2656_v18, %v2671_v13 }
 0x276   : > { %5662 = vxpose.xlu1.b32.start.end [1/1] (short) (narrow) %v2440_v16, 8  ;;  %30277 = vst [vmem:[#allocation24_spill] sm:$0xff] %v23090_v6  ;;  %v2571_v16 = vrot.slane %v2557_v10, %v22788_v62 }
 0x278   : > { %5694 = vxpose.xlu0.b32.start.end [1/1] (short) (narrow) %v2423_v27, 8  ;;  %v2575_v20 = vcombine.high %v2571_v16, %v29674_v36  ;;  %v2696_v27 = vrot.slane %v2688_v58, %v22788_v62  ;;  %v1997_v58 = vcombine.high %v23001_v23, %v29674_v36 }
 0x279   : > { %v23088_v3 = vpop.trf.xlu0  ;;  %v23106_v0 = vpop.trf.xlu1 }
 0x27a   : > { %5726 = vxpose.xlu1.b32.start.end [1/1] (short) (narrow) %v2441_v5, 8  ;;  %v2788_v5 = vrot.slane %v2774_v31, %v22779_v49  ;;  %30280 = vst [vmem:[#allocation27_spill] sm:$0xff] %v23106_v0  ;;  %v2706_v10 = vcombine.high %v2696_v27, %v29674_v36 }
 0x27c   : > { %6270 = vxpose.xlu0.b32.start.end [1/1] (short) (narrow) %v2564_v4, 8  ;;  %v2820_v4 = vcombine.low %v2788_v5, %v2803_v7  ;;  %v2821_v31 = vcombine.high %v2788_v5, %v2803_v7 }
 0x27d   : > { %v23098_v52 = vpop.trf.xlu0  ;;  %v23112_v13 = vpop.trf.xlu1 }
 0x27e   : > { %30278 = vst [vmem:[#allocation25_spill] sm:$0xff] %v23098_v52  ;;  %6302 = vxpose.xlu1.b32.start.end [1/1] (short) (narrow) %v2574_v41, 8  ;;  %v2703_v41 = vrot.slane %v2689_v37, %v22788_v62  ;;  %30282 = vst [vmem:[#allocation29_spill] sm:$0xff] %v23112_v13  ;;  %v2828_v18 = vrot.slane %v2820_v4, %v22788_v62  ;;  %v2011_v4 = vrot.slane %v1997_v58, %v22779_v49 }
 0x27f   : > { %v2835_v23 = vrot.slane %v2821_v31, %v22788_v62  ;;  %v2598_v31 = vrot.slane %v22909_v63, %v22779_v49 }
 0x280   : > { %6334 = vxpose.xlu0.b32.start.end [1/1] (short) (narrow) %v2571_v16, 8  ;;  %v1982_v16 = vcombine.high %v23005_v46, %v29674_v36  ;;  %v2838_v37 = vcombine.high %v2828_v18, %v29674_v36 }
 0x281   : > { %v23104_v12 = vpop.trf.xlu0  ;;  %v23130_v46 = vpop.trf.xlu1  ;;  %v2839_v61 = vcombine.high %v2835_v23, %v29674_v36 }
 0x282   : > { %30279 = vst [vmem:[#allocation26_spill] sm:$0xff] %v23104_v12  ;;  %6366 = vxpose.xlu1.b32.start.end [1/1] (short) (narrow) %v2575_v20, 8  ;;  %v2707_v20 = vcombine.high %v2703_v41, %v29674_v36  ;;  %v1996_v7 = vrot.slane %v1982_v16, %v22779_v49  ;;  %30285 = vst [vmem:[#allocation32_spill] sm:$0xff] %v23130_v46  ;;  %v2583_v16 = vrot.slane %v22911_v1, %v22779_v49 }
 0x284   : > { %6782 = vxpose.xlu0.b32.start.end [1/1] (short) (narrow) %v2696_v27, 8  ;;  %v2029_v46 = vcombine.high %v1996_v7, %v2011_v4  ;;  %v2606_v56 = vcombine.low %v2583_v16, %v2598_v31  ;;  %v2607_v54 = vcombine.high %v2583_v16, %v2598_v31 }
 0x285   : > { %v23110_v48 = vpop.trf.xlu0 }
 0x286   : > { %30281 = vst [vmem:[#allocation28_spill] sm:$0xff] %v23110_v48  ;;  %6814 = vxpose.xlu1.b32.start.end [1/1] (short) (narrow) %v2706_v10, 8  ;;  %v2952_v10 = vcombine.low %v22956_v60, %v22953_v55 }
 0x288   : > { %6846 = vxpose.xlu0.b32.start.end [1/1] (short) (narrow) %v2703_v41, 8  ;;  %v2129_v41 = vcombine.high %v23027_v40, %v29674_v36  ;;  %v2960_v29 = vrot.slane %v2952_v10, %v22788_v62  ;;  %v2246_v10 = vcombine.high %v23042_v34, %v29674_v36  ;;  %v2393_v34 = vcombine.high %v23025_v19, %v29674_v36 }
 0x289   : > { %v23120_v27 = vpop.trf.xlu0 }
 0x28a   : > { %30283 = vst [vmem:[#allocation30_spill] sm:$0xff] %v23120_v27  ;;  %6878 = vxpose.xlu1.b32.start.end [1/1] (short) (narrow) %v2707_v20, 8  ;;  %v2028_v20 = vcombine.low %v1996_v7, %v2011_v4  ;;  %v2143_v40 = vrot.slane %v2129_v41, %v22779_v49  ;;  %v2260_v7 = vrot.slane %v2246_v10, %v22779_v49 }
 0x28c   : > { %7294 = vxpose.xlu0.b32.start.end [1/1] (short) (narrow) %v2828_v18, 8  ;;  %v2114_v18 = vcombine.high %v23016_v22, %v29674_v36  ;;  %v2970_v22 = vcombine.high %v2960_v29, %v29674_v36 }
 0x28d   : > { %v23128_v5 = vpop.trf.xlu0 }
 0x28e   : > { %30284 = vst [vmem:[#allocation31_spill] sm:$0xff] %v23128_v5  ;;  %7326 = vxpose.xlu1.b32.start.end [1/1] (short) (narrow) %v2838_v37, 8  ;;  %v2128_v57 = vrot.slane %v2114_v18, %v22779_v49 }
 0x290   : > { %7358 = vxpose.xlu0.b32.start.end [1/1] (short) (narrow) %v2835_v23, 8  ;;  %v2261_v23 = vcombine.high %v23014_v17, %v29674_v36  ;;  %v2160_v47 = vcombine.low %v2128_v57, %v2143_v40 }
 0x291   : > { %v23136_v58 = vpop.trf.xlu0 }
 0x292   : > { %30286 = vst [vmem:[#allocation33_spill] sm:$0xff] %v23136_v58  ;;  %7390 = vxpose.xlu1.b32.start.end [1/1] (short) (narrow) %v2839_v61, 8  ;;  %v6190_v37 = vpop.trf.xlu1  ;;  %v2036_v58 = vrot.slane %v2028_v20, %v22788_v62  ;;  %v23153_v41 = vrot.slane %v2261_v23, %v22779_v49  ;;  %v2043_v20 = vrot.slane %v2029_v46, %v22788_v62 }
 0x293   : > { %v2168_v19 = vrot.slane %v2160_v47, %v22788_v62  ;;  %v23176_v47 = vrot.slane %v22924_v33, %v22779_v49 }
 0x294   : > { %7806 = vxpose.xlu0.b32.start.end [1/1] (short) (narrow) %v2960_v29, 8  ;;  %v2046_v29 = vcombine.high %v2036_v58, %v29674_v36 }
 0x295   : > { %v6158_v59 = vpop.trf.xlu0 }
 0x296   : > { %7838 = vxpose.xlu1.b32.start.end [1/1] (short) (narrow) %v2970_v22, 8  ;;  %v6254_v61 = vpop.trf.xlu1  ;;  %v2378_v22 = vcombine.high %v23060_v50, %v29674_v36  ;;  %v2292_v50 = vcombine.low %v2260_v7, %v23153_v41 }
 0x297   : > { %v13390_v17 = vcombine.low %v6190_v37, %v6254_v61  ;;  %v13391_v4 = vcombine.high %v6190_v37, %v6254_v61  ;;  %v2161_v37 = vcombine.high %v2128_v57, %v2143_v40  ;;  %v23164_v61 = vrot.slane %v2606_v56, %v22788_v62 }
 0x298   : > { %4222 = vxpose.xlu0.b32.start.end [1/1] (short) (narrow) %v2036_v58, 8  ;;  %v2407_v57 = vrot.slane %v2393_v34, %v22779_v49  ;;  %v2392_v16 = vrot.slane %v2378_v22, %v22779_v49  ;;  %v23187_v34 = vrot.slane %v2607_v54, %v22788_v62  ;;  %v2293_v22 = vcombine.high %v2260_v7, %v23153_v41 }
 0x299   : > { %v6222_v18 = vpop.trf.xlu0  ;;  %v13398_v44 = vrot.slane %v13390_v17, %v22779_v49  ;;  %v13405_v58 = vrot.slane %v13391_v4, %v22779_v49  ;;  %v23180_v17 = vrot.slane %v22926_v9, %v22779_v49  ;;  %v23184_v4 = vcombine.high %v23164_v61, %v29674_v36 }
 0x29a   : > { %v13374_v23 = vcombine.low %v6158_v59, %v6222_v18  ;;  %v13375_v24 = vcombine.high %v6158_v59, %v6222_v18  ;;  %4254 = vxpose.xlu1.b32.start.end [1/1] (short) (narrow) %v2046_v29, 8  ;;  %v6702_v10 = vpop.trf.xlu1  ;;  %v2047_v59 = vcombine.high %v2043_v20, %v29674_v36  ;;  %v2178_v29 = vcombine.high %v2168_v19, %v29674_v36 }
 0x29b   : > { %v2424_v5 = vcombine.low %v2392_v16, %v2407_v57  ;;  %v2425_v13 = vcombine.high %v2392_v16, %v2407_v57 }
 0x29c   : > { %v13382_v46 = vrot.slane %v13374_v23, %v22779_v49  ;;  %v13389_v2 = vrot.slane %v13375_v24, %v22779_v49  ;;  %4286 = vxpose.xlu0.b32.start.end [1/1] (short) (narrow) %v2043_v20, 8  ;;  %v2300_v23 = vrot.slane %v2292_v50, %v22788_v62 }
 0x29d   : > { %v6670_v31 = vpop.trf.xlu0 }
 0x29e   : > { %v13438_v56 = vcombine.low %v13382_v46, %v13398_v44  ;;  %v13439_v40 = vcombine.high %v13382_v46, %v13398_v44  ;;  %4318 = vxpose.xlu1.b32.start.end [1/1] (short) (narrow) %v2047_v59, 8  ;;  %v6766_v24 = vpop.trf.xlu1  ;;  %v2175_v44 = vrot.slane %v2161_v37, %v22788_v62  ;;  %v13454_v20 = vcombine.low %v13389_v2, %v13405_v58 }
 0x29f   : > { %v13455_v18 = vcombine.high %v13389_v2, %v13405_v58  ;;  %v13662_v46 = vcombine.low %v6702_v10, %v6766_v24  ;;  %v13663_v59 = vcombine.high %v6702_v10, %v6766_v24 }
 0x2a0   : > { %4734 = vxpose.xlu0.b32.start.end [1/1] (short) (narrow) %v2168_v19, 8  ;;  %v13446_v27 = vrot.slane %v13438_v56, %v22788_v62  ;;  %v13453_v54 = vrot.slane %v13439_v40, %v22788_v62  ;;  %v30287_v19 = vmov 0.0   ;;  %v13462_v50 = vrot.slane %v13454_v20, %v22788_v62 }
 0x2a1   : > { %v6734_v51 = vpop.trf.xlu0  ;;  %v13670_v36 = vrot.slane %v13662_v46, %v22779_v49  ;;  %v13677_v37 = vrot.slane %v13663_v59, %v22779_v49  ;;  %v2179_v10 = vcombine.high %v2175_v44, %v30287_v19  ;;  %v13469_v57 = vrot.slane %v13455_v18, %v22788_v62 }
 0x2a2   : > { %4766 = vxpose.xlu1.b32.start.end [1/1] (short) (narrow) %v2178_v29, 8  ;;  %v13646_v2 = vcombine.low %v6670_v31, %v6734_v51  ;;  %v13647_v58 = vcombine.high %v6670_v31, %v6734_v51  ;;  %v7214_v41 = vpop.trf.xlu1  ;;  %v2310_v16 = vcombine.high %v2300_v23, %v30287_v19  ;;  %v2307_v56 = vrot.slane %v2293_v22, %v22788_v62 }
 0x2a3   : > { %v2432_v31 = vrot.slane %v2424_v5, %v22788_v62  ;;  %v23208_v29 = vrot.slane %v13446_v27, %v22779_v49  ;;  %v23211_v46 = vrot.slane %v13453_v54, %v22779_v49  ;;  %v23214_v20 = vrot.slane %v2425_v13, %v22788_v62 }
 0x2a4   : > { %4798 = vxpose.xlu0.b32.start.end [1/1] (short) (narrow) %v2175_v44, 8  ;;  %v13654_v40 = vrot.slane %v13646_v2, %v22779_v49  ;;  %v13661_v24 = vrot.slane %v13647_v58, %v22779_v49  ;;  %v23217_v58 = vrot.slane %v13462_v50, %v22779_v49  ;;  %v23220_v5 = vrot.slane %v13469_v57, %v22779_v49 }
 0x2a5   : > { %v7182_v51 = vpop.trf.xlu0  ;;  %v2442_v48 = vcombine.high %v2432_v31, %v30287_v19 }
 0x2a6   : > { %4830 = vxpose.xlu1.b32.start.end [1/1] (short) (narrow) %v2179_v10, 8  ;;  %v13710_v44 = vcombine.low %v13654_v40, %v13670_v36  ;;  %v13711_v18 = vcombine.high %v13654_v40, %v13670_v36  ;;  %v13726_v22 = vcombine.low %v13661_v24, %v13677_v37  ;;  %v13727_v59 = vcombine.high %v13661_v24, %v13677_v37  ;;  %v7278_v2 = vpop.trf.xlu1 }
 0x2a7   : > { %v13934_v27 = vcombine.low %v7214_v41, %v7278_v2  ;;  %v13935_v7 = vcombine.high %v7214_v41, %v7278_v2 }
 0x2a8   : > { %5246 = vxpose.xlu0.b32.start.end [1/1] (short) (narrow) %v2300_v23, 8  ;;  %v13718_v54 = vrot.slane %v13710_v44, %v22788_v62  ;;  %v13725_v13 = vrot.slane %v13711_v18, %v22788_v62  ;;  %v13734_v10 = vrot.slane %v13726_v22, %v22788_v62  ;;  %v13741_v36 = vrot.slane %v13727_v59, %v22788_v62 }
 0x2a9   : > { %v7246_v40 = vpop.trf.xlu0  ;;  %v13942_v37 = vrot.slane %v13934_v27, %v22779_v49  ;;  %v13949_v50 = vrot.slane %v13935_v7, %v22779_v49  ;;  %v2311_v59 = vcombine.high %v2307_v56, %v30287_v19 }
 0x2aa   : > { %v13918_v24 = vcombine.low %v7182_v51, %v7246_v40  ;;  %v13919_v0 = vcombine.high %v7182_v51, %v7246_v40  ;;  %5278 = vxpose.xlu1.b32.start.end [1/1] (short) (narrow) %v2310_v16, 8  ;;  %v17750_v57 = vrot.slane %v13718_v54, %v22779_v49  ;;  %v17782_v23 = vrot.slane %v13725_v13, %v22779_v49  ;;  %v7726_v18 = vpop.trf.xlu1 }
 0x2ab   : > { %v17886_v41 = vrot.slane %v13734_v10, %v22779_v49  ;;  %v17918_v44 = vrot.slane %v13741_v36, %v22779_v49 }
 0x2ac   : > { %v13926_v2 = vrot.slane %v13918_v24, %v22779_v49  ;;  %v13933_v7 = vrot.slane %v13919_v0, %v22779_v49  ;;  %5310 = vxpose.xlu0.b32.start.end [1/1] (short) (narrow) %v2307_v56, 8  ;;  %v17790_v51 = vcombine.low %v23208_v29, %v17750_v57  ;;  %v17822_v27 = vcombine.low %v23211_v46, %v17782_v23 }
 0x2ad   : > { %v7694_v16 = vpop.trf.xlu0  ;;  %v17926_v54 = vcombine.low %v23217_v58, %v17886_v41  ;;  %v17958_v13 = vcombine.low %v23220_v5, %v17918_v44  ;;  %v2443_v0 = vcombine.high %v23214_v20, %v30287_v19 }
 0x2ae   : > { %v13982_v10 = vcombine.low %v13926_v2, %v13942_v37  ;;  %v13983_v36 = vcombine.high %v13926_v2, %v13942_v37  ;;  %v13998_v40 = vcombine.low %v13933_v7, %v13949_v50  ;;  %v13999_v22 = vcombine.high %v13933_v7, %v13949_v50  ;;  %5342 = vxpose.xlu1.b32.start.end [1/1] (short) (narrow) %v2311_v59, 8  ;;  %v7790_v56 = vpop.trf.xlu1 }
 0x2af   : > { %v23245_v24 = vrot.slane %v17790_v51, %v22788_v62  ;;  %v23248_v6 = vrot.slane %v17822_v27, %v22788_v62  ;;  %v14206_v59 = vcombine.low %v7726_v18, %v7790_v56  ;;  %v14207_v2 = vcombine.high %v7726_v18, %v7790_v56 }
 0x2b0   : > { %v13990_v12 = vrot.slane %v13982_v10, %v22788_v62  ;;  %v13997_v30 = vrot.slane %v13983_v36, %v22788_v62  ;;  %v14006_v37 = vrot.slane %v13998_v40, %v22788_v62  ;;  %v14013_v50 = vrot.slane %v13999_v22, %v22788_v62  ;;  %5758 = vxpose.xlu0.b32.start.end [1/1] (short) (narrow) %v2432_v31, 8 }
 0x2b1   : > { %30288 = vst [vmem:[#allocation34_spill] sm:$0xff] %v23245_v24  ;;  %30289 = vst [vmem:[#allocation35_spill] sm:$0xff] %v23248_v6  ;;  %v7758_v7 = vpop.trf.xlu0  ;;  %v23255_v52 = vrot.slane %v17926_v54, %v22788_v62  ;;  %v23258_v51 = vrot.slane %v17958_v13, %v22788_v62  ;;  %v14214_v31 = vrot.slane %v14206_v59, %v22779_v49  ;;  %v30440_v24 = vld [vmem:[#allocation32_spill] sm:$0xff] }
 0x2b2   : > { %v23261_v27 = vrot.slane %v13990_v12, %v22779_v49  ;;  %v23264_v10 = vrot.slane %v13997_v30, %v22779_v49  ;;  %v18414_v36 = vrot.slane %v14006_v37, %v22779_v49  ;;  %v18446_v22 = vrot.slane %v14013_v50, %v22779_v49  ;;  %5790 = vxpose.xlu1.b32.start.end [1/1] (short) (narrow) %v2442_v48, 8 }
 0x2b3   : > { %30290 = vst [vmem:[#allocation36_spill] sm:$0xff] %v23255_v52  ;;  %30291 = vst [vmem:[#allocation37_spill] sm:$0xff] %v23258_v51  ;;  %v14221_v18 = vrot.slane %v14207_v2, %v22779_v49  ;;  %v14190_v54 = vcombine.low %v7694_v16, %v7758_v7  ;;  %v14191_v40 = vcombine.high %v7694_v16, %v7758_v7 }
 0x2b4   : > { %v17927_v13 = vcombine.high %v23217_v58, %v17886_v41  ;;  %v17959_v56 = vcombine.high %v23220_v5, %v17918_v44  ;;  %v17791_v12 = vcombine.high %v23208_v29, %v17750_v57  ;;  %v17823_v30 = vcombine.high %v23211_v46, %v17782_v23  ;;  %5822 = vxpose.xlu0.b32.start.end [1/1] (short) (narrow) %v23214_v20, 8 }
 0x2b5   : > { %v14198_v37 = vrot.slane %v14190_v54, %v22779_v49  ;;  %v14205_v48 = vrot.slane %v14191_v40, %v22779_v49  ;;  %v2639_v40 = vcombine.high %v23187_v34, %v30287_v19 }
 0x2b6   : > { %v23282_v58 = vrot.slane %v17927_v13, %v22788_v62  ;;  %v23285_v5 = vrot.slane %v17959_v56, %v22788_v62  ;;  %v23288_v29 = vrot.slane %v17791_v12, %v22788_v62  ;;  %v23291_v46 = vrot.slane %v17823_v30, %v22788_v62  ;;  %5854 = vxpose.xlu1.b32.start.end [1/1] (short) (narrow) %v2443_v0, 8 }
 0x2b7   : > { %v14254_v20 = vcombine.low %v14198_v37, %v14214_v31  ;;  %v14255_v57 = vcombine.high %v14198_v37, %v14214_v31  ;;  %v14270_v23 = vcombine.low %v14205_v48, %v14221_v18  ;;  %v14271_v41 = vcombine.high %v14205_v48, %v14221_v18 }
 0x2b8   : > { %30292 = vst [vmem:[#allocation38_spill] sm:$0xff] %v23282_v58  ;;  %30293 = vst [vmem:[#allocation39_spill] sm:$0xff] %v23285_v5  ;;  %6398 = vxpose.xlu0.b32.start.end [1/1] (short) (narrow) %v23164_v61, 8  ;;  %v2862_v30 = vrot.slane %v22940_v15, %v22779_v49  ;;  %v2847_v37 = vrot.slane %v22942_v25, %v22779_v49  ;;  %v30296_v48 = vcombine.low %v23180_v17, %v23176_v47 }
 0x2b9   : > { %30294 = vst [vmem:[#allocation40_spill] sm:$0xff] %v23288_v29  ;;  %30295 = vst [vmem:[#allocation41_spill] sm:$0xff] %v23291_v46  ;;  %v14262_v0 = vrot.slane %v14254_v20, %v22788_v62  ;;  %v14269_v31 = vrot.slane %v14255_v57, %v22788_v62  ;;  %v14278_v18 = vrot.slane %v14270_v23, %v22788_v62 }
 0x2ba   : > { %v14285_v54 = vrot.slane %v14271_v41, %v22788_v62  ;;  %6430 = vxpose.xlu1.b32.start.end [1/1] (short) (narrow) %v23184_v4, 8  ;;  %v2746_v20 = vrot.slane %v30296_v48, %v22788_v62  ;;  %v30297_v4 = vcombine.high %v23180_v17, %v23176_v47 }
 0x2bb   : > { %v18294_v13 = vrot.slane %v14262_v0, %v22779_v49  ;;  %v18326_v56 = vrot.slane %v14269_v31, %v22779_v49  ;;  %v18430_v12 = vrot.slane %v14278_v18, %v22779_v49 }
 0x2bc   : > { %v18462_v61 = vrot.slane %v14285_v54, %v22779_v49  ;;  %v2753_v57 = vrot.slane %v30297_v4, %v22788_v62  ;;  %6462 = vxpose.xlu0.b32.start.end [1/1] (short) (narrow) %v23187_v34, 8 }
 0x2bd   : > { %v18334_v23 = vcombine.low %v23261_v27, %v18294_v13  ;;  %v18366_v41 = vcombine.low %v23264_v10, %v18326_v56  ;;  %v18470_v0 = vcombine.low %v18414_v36, %v18430_v12  ;;  %v18471_v18 = vcombine.high %v18414_v36, %v18430_v12 }
 0x2be   : > { %v18502_v31 = vcombine.low %v18446_v22, %v18462_v61  ;;  %v18503_v54 = vcombine.high %v18446_v22, %v18462_v61  ;;  %v18335_v16 = vcombine.high %v23261_v27, %v18294_v13  ;;  %v18367_v50 = vcombine.high %v23264_v10, %v18326_v56  ;;  %6494 = vxpose.xlu1.b32.start.end [1/1] (short) (narrow) %v2639_v40, 8 }
 0x2bf   : > { %v23331_v48 = vrot.slane %v18334_v23, %v22788_v62  ;;  %v23334_v47 = vrot.slane %v18366_v41, %v22788_v62  ;;  %v23337_v17 = vrot.slane %v18470_v0, %v22788_v62  ;;  %v23343_v36 = vrot.slane %v18471_v18, %v22788_v62 }
 0x2c0   : > { %v23340_v34 = vrot.slane %v18502_v31, %v22788_v62  ;;  %v23346_v27 = vrot.slane %v18503_v54, %v22788_v62  ;;  %v23349_v10 = vrot.slane %v18335_v16, %v22788_v62  ;;  %v23352_v22 = vrot.slane %v18367_v50, %v22788_v62  ;;  %6910 = vxpose.xlu0.b32.start.end [1/1] (short) (narrow) %v2746_v20, 8 }
 0x2c1   : > { %30298 = vst [vmem:[#allocation42_spill] sm:$0xff] %v23331_v48  ;;  %30299 = vst [vmem:[#allocation43_spill] sm:$0xff] %v23334_v47  ;;  %v2870_v40 = vcombine.low %v2847_v37, %v2862_v30  ;;  %v2770_v13 = vcombine.high %v2746_v20, %v30287_v19  ;;  %v2771_v20 = vcombine.high %v2753_v57, %v30287_v19 }
 0x2c2   : > { %30300 = vst [vmem:[#allocation44_spill] sm:$0xff] %v23337_v17  ;;  %30301 = vst [vmem:[#allocation45_spill] sm:$0xff] %v23340_v34  ;;  %v2871_v23 = vcombine.high %v2847_v37, %v2862_v30  ;;  %v2070_v41 = vrot.slane %v23009_v26, %v22779_v49  ;;  %v2055_v0 = vrot.slane %v23011_v14, %v22779_v49 }
 0x2c3   : > { %30302 = vst [vmem:[#allocation46_spill] sm:$0xff] %v23343_v36  ;;  %30303 = vst [vmem:[#allocation47_spill] sm:$0xff] %v23346_v27  ;;  %6942 = vxpose.xlu1.b32.start.end [1/1] (short) (narrow) %v2770_v13, 8  ;;  %v2878_v31 = vrot.slane %v2870_v40, %v22788_v62  ;;  %v2202_v30 = vrot.slane %v23035_v45, %v22779_v49  ;;  %v23544_v17 = vcombine.high %v23020_v35, %v30287_v19 }
 0x2c4   : > { %30304 = vst [vmem:[#allocation48_spill] sm:$0xff] %v23349_v10  ;;  %30305 = vst [vmem:[#allocation49_spill] sm:$0xff] %v23352_v22  ;;  %6974 = vxpose.xlu0.b32.start.end [1/1] (short) (narrow) %v2753_v57, 8  ;;  %v2078_v18 = vcombine.low %v2055_v0, %v2070_v41  ;;  %v2885_v12 = vrot.slane %v2871_v23, %v22788_v62  ;;  %v2079_v13 = vcombine.high %v2055_v0, %v2070_v41 }
 0x2c5   : > { %v2902_v54 = vcombine.high %v2878_v31, %v30287_v19  ;;  %v2187_v57 = vrot.slane %v23022_v38, %v22779_v49  ;;  %v2591_v41 = vcombine.high %v22909_v63, %v30287_v19  ;;  %v2576_v0 = vcombine.high %v22911_v1, %v30287_v19 }
 0x2c6   : > { %v2903_v37 = vcombine.high %v2885_v12, %v30287_v19  ;;  %v2086_v56 = vrot.slane %v2078_v18, %v22788_v62  ;;  %v2093_v23 = vrot.slane %v2079_v13, %v22788_v62  ;;  %v2723_v1 = vcombine.high %v22924_v33, %v30287_v19 }
 0x2c7   : > { %7006 = vxpose.xlu1.b32.start.end [1/1] (short) (narrow) %v2771_v20, 8  ;;  %v2210_v40 = vcombine.low %v2187_v57, %v2202_v30  ;;  %v2605_v63 = vrot.slane %v2591_v41, %v22779_v49  ;;  %v2590_v4 = vrot.slane %v2576_v0, %v22779_v49 }
 0x2c8   : > { %7422 = vxpose.xlu0.b32.start.end [1/1] (short) (narrow) %v2878_v31, 8  ;;  %v2110_v20 = vcombine.high %v2086_v56, %v30287_v19  ;;  %v2737_v50 = vrot.slane %v2723_v1, %v22779_v49  ;;  %v2451_v1 = vrot.slane %v23071_v8, %v22779_v49 }
 0x2c9   : > { %v2218_v13 = vrot.slane %v2210_v40, %v22788_v62  ;;  %v2622_v0 = vcombine.low %v2590_v4, %v2605_v63  ;;  %v2623_v2 = vcombine.high %v2590_v4, %v2605_v63 }
 0x2cb   : > { %7454 = vxpose.xlu1.b32.start.end [1/1] (short) (narrow) %v2902_v54, 8  ;;  %v2334_v54 = vrot.slane %v23020_v35, %v22779_v49  ;;  %v2242_v41 = vcombine.high %v2218_v13, %v30287_v19 }
 0x2cc   : > { %7486 = vxpose.xlu0.b32.start.end [1/1] (short) (narrow) %v2885_v12, 8  ;;  %v2211_v12 = vcombine.high %v2187_v57, %v2202_v30  ;;  %v2708_v30 = vcombine.high %v22926_v9, %v30287_v19  ;;  %v2855_v57 = vcombine.high %v22940_v15, %v30287_v19 }
 0x2ce   : > { %v2722_v33 = vrot.slane %v2708_v30, %v22779_v49  ;;  %v2869_v15 = vrot.slane %v2855_v57, %v22779_v49  ;;  %v23418_v57 = vrot.slane %v2622_v0, %v22788_v62 }
 0x2cf   : > { %7518 = vxpose.xlu1.b32.start.end [1/1] (short) (narrow) %v2903_v37, 8  ;;  %v2319_v37 = vrot.slane %v23048_v28, %v22779_v49 }
 0x2d0   : > { %4350 = vxpose.xlu0.b32.start.end [1/1] (short) (narrow) %v2086_v56, 8  ;;  %v4110_v18 = vpop.trf.xlu0  ;;  %v2111_v56 = vcombine.high %v2093_v23, %v30287_v19  ;;  %v2754_v63 = vcombine.low %v2722_v33, %v2737_v50  ;;  %v2755_v61 = vcombine.high %v2722_v33, %v2737_v50 }
 0x2d1   : > { %v2342_v40 = vcombine.low %v2319_v37, %v2334_v54 }
 0x2d2   : > { %v4142_v31 = vpop.trf.xlu1 }
 0x2d3   : > { %4382 = vxpose.xlu1.b32.start.end [1/1] (short) (narrow) %v2110_v20, 8  ;;  %v2840_v20 = vcombine.high %v22942_v25, %v30287_v19  ;;  %v2343_v25 = vcombine.high %v2319_v37, %v2334_v54  ;;  %v2350_v4 = vrot.slane %v2342_v40, %v22788_v62  ;;  %v30306_v54 = vcombine.high %v22956_v60, %v22953_v55 }
 0x2d4   : > { %4414 = vxpose.xlu0.b32.start.end [1/1] (short) (narrow) %v2093_v23, 8  ;;  %v2225_v23 = vrot.slane %v2211_v12, %v22788_v62  ;;  %v4174_v9 = vpop.trf.xlu0  ;;  %v23411_v12 = vrot.slane %v23033_v42, %v22779_v49 }
 0x2d5   : > { %v12286_v30 = vcombine.low %v4110_v18, %v4174_v9  ;;  %v23424_v37 = vrot.slane %v30306_v54, %v22788_v62  ;;  %v2357_v44 = vrot.slane %v2343_v25, %v22788_v62  ;;  %v2374_v60 = vcombine.high %v2350_v4, %v30287_v19 }
 0x2d6   : > { %v4206_v7 = vpop.trf.xlu1  ;;  %v2474_v40 = vcombine.low %v2451_v1, %v23411_v12 }
 0x2d7   : > { %4446 = vxpose.xlu1.b32.start.end [1/1] (short) (narrow) %v2111_v56, 8  ;;  %v2854_v56 = vrot.slane %v2840_v20, %v22779_v49  ;;  %v12302_v16 = vcombine.low %v4142_v31, %v4206_v7  ;;  %v12303_v20 = vcombine.high %v4142_v31, %v4206_v7  ;;  %v12294_v22 = vrot.slane %v12286_v30, %v22779_v49 }
 0x2d8   : > { %4862 = vxpose.xlu0.b32.start.end [1/1] (short) (narrow) %v2218_v13, 8  ;;  %v2243_v13 = vcombine.high %v2225_v23, %v30287_v19  ;;  %v23436_v50 = vcombine.high %v23424_v37, %v30287_v19  ;;  %v23440_v31 = vcombine.high %v23418_v57, %v30287_v19  ;;  %v2482_v54 = vrot.slane %v2474_v40, %v22788_v62 }
 0x2d9   : > { %v2886_v59 = vcombine.low %v2854_v56, %v2869_v15  ;;  %v12310_v0 = vrot.slane %v12302_v16, %v22779_v49  ;;  %v2887_v7 = vcombine.high %v2854_v56, %v2869_v15  ;;  %v2063_v16 = vcombine.high %v23009_v26, %v30287_v19 }
 0x2da   : > { %v12317_v33 = vrot.slane %v12303_v20, %v22779_v49  ;;  %v2375_v56 = vcombine.high %v2357_v44, %v30287_v19 }
 0x2db   : > { %4894 = vxpose.xlu1.b32.start.end [1/1] (short) (narrow) %v2242_v41, 8  ;;  %v12287_v41 = vcombine.high %v4110_v18, %v4174_v9  ;;  %v2048_v18 = vcombine.high %v23011_v14, %v30287_v19  ;;  %v23460_v26 = vrot.slane %v2886_v59, %v22788_v62  ;;  %v2475_v14 = vcombine.high %v2451_v1, %v23411_v12 }
 0x2dc   : > { %4926 = vxpose.xlu0.b32.start.end [1/1] (short) (narrow) %v2225_v23, 8  ;;  %v23428_v23 = vrot.slane %v2623_v2, %v22788_v62  ;;  %v23443_v2 = vrot.slane %v2754_v63, %v22788_v62  ;;  %v12350_v30 = vcombine.low %v12294_v22, %v12310_v0  ;;  %v23472_v59 = vrot.slane %v2063_v16, %v22779_v49 }
 0x2dd   : > { %v12301_v9 = vrot.slane %v12287_v41, %v22779_v49  ;;  %v23475_v12 = vrot.slane %v2048_v18, %v22779_v49 }
 0x2de   : > { %v23454_v25 = vcombine.high %v23428_v23, %v30287_v19  ;;  %v12358_v16 = vrot.slane %v12350_v30, %v22788_v62 }
 0x2df   : > { %4958 = vxpose.xlu1.b32.start.end [1/1] (short) (narrow) %v2243_v13, 8  ;;  %v23457_v13 = vrot.slane %v2755_v61, %v22788_v62  ;;  %v23469_v61 = vrot.slane %v2887_v7, %v22788_v62  ;;  %v23483_v7 = vcombine.high %v23460_v26, %v30287_v19  ;;  %v2094_v27 = vcombine.low %v23475_v12, %v23472_v59 }
 0x2e0   : > { %5374 = vxpose.xlu0.b32.start.end [1/1] (short) (narrow) %v2350_v4, 8  ;;  %v4622_v55 = vpop.trf.xlu0  ;;  %v12351_v4 = vcombine.high %v12294_v22, %v12310_v0  ;;  %v12366_v22 = vcombine.low %v12301_v9, %v12317_v33 }
 0x2e2   : > { %v4654_v15 = vpop.trf.xlu1  ;;  %v12374_v30 = vrot.slane %v12366_v22, %v22788_v62 }
 0x2e3   : > { %5406 = vxpose.xlu1.b32.start.end [1/1] (short) (narrow) %v2374_v60, 8  ;;  %v23466_v60 = vcombine.high %v23443_v2, %v30287_v19 }
 0x2e4   : > { %5438 = vxpose.xlu0.b32.start.end [1/1] (short) (narrow) %v2357_v44, 8  ;;  %v4686_v63 = vpop.trf.xlu0  ;;  %v12367_v44 = vcombine.high %v12301_v9, %v12317_v33  ;;  %v2506_v33 = vcombine.high %v2482_v54, %v30287_v19  ;;  %v2489_v9 = vrot.slane %v2475_v14, %v22788_v62  ;;  %v23499_v14 = vcombine.high %v23469_v61, %v30287_v19 }
 0x2e5   : > { %v12558_v20 = vcombine.low %v4622_v55, %v4686_v63  ;;  %v12559_v41 = vcombine.high %v4622_v55, %v4686_v63  ;;  %v23479_v55 = vcombine.high %v23457_v13, %v30287_v19  ;;  %v12365_v63 = vrot.slane %v12351_v4, %v22788_v62 }
 0x2e6   : > { %v4718_v1 = vpop.trf.xlu1  ;;  %v12381_v4 = vrot.slane %v12367_v44, %v22788_v62 }
 0x2e7   : > { %5470 = vxpose.xlu1.b32.start.end [1/1] (short) (narrow) %v2375_v56, 8  ;;  %v12574_v40 = vcombine.low %v4654_v15, %v4718_v1  ;;  %v12575_v0 = vcombine.high %v4654_v15, %v4718_v1  ;;  %v12566_v15 = vrot.slane %v12558_v20, %v22779_v49  ;;  %v12573_v56 = vrot.slane %v12559_v41, %v22779_v49 }
 0x2e8   : > { %5886 = vxpose.xlu0.b32.start.end [1/1] (short) (narrow) %v2482_v54, 8  ;;  %v5134_v18 = vpop.trf.xlu0  ;;  %v23507_v22 = vrot.slane %v12365_v63, %v22779_v49 }
 0x2e9   : > { %v12582_v1 = vrot.slane %v12574_v40, %v22779_v49  ;;  %v12589_v10 = vrot.slane %v12575_v0, %v22779_v49  ;;  %v23504_v0 = vrot.slane %v12358_v16, %v22779_v49  ;;  %v16814_v16 = vrot.slane %v12381_v4, %v22779_v49 }
 0x2ea   : > { %v5166_v36 = vpop.trf.xlu1 }
 0x2eb   : > { %5918 = vxpose.xlu1.b32.start.end [1/1] (short) (narrow) %v2506_v33, 8  ;;  %v12622_v54 = vcombine.low %v12566_v15, %v12582_v1  ;;  %v12623_v20 = vcombine.high %v12566_v15, %v12582_v1  ;;  %v12638_v41 = vcombine.low %v12573_v56, %v12589_v10  ;;  %v12639_v46 = vcombine.high %v12573_v56, %v12589_v10 }
 0x2ec   : > { %5950 = vxpose.xlu0.b32.start.end [1/1] (short) (narrow) %v2489_v9, 8  ;;  %v5198_v44 = vpop.trf.xlu0  ;;  %v2507_v33 = vcombine.high %v2489_v9, %v30287_v19  ;;  %v16782_v56 = vrot.slane %v12374_v30, %v22779_v49 }
 0x2ed   : > { %v12630_v29 = vrot.slane %v12622_v54, %v22788_v62  ;;  %v12637_v5 = vrot.slane %v12623_v20, %v22788_v62  ;;  %v12646_v15 = vrot.slane %v12638_v41, %v22788_v62  ;;  %v12653_v10 = vrot.slane %v12639_v46, %v22788_v62 }
 0x2ee   : > { %v12830_v1 = vcombine.low %v5134_v18, %v5198_v44  ;;  %v12831_v40 = vcombine.high %v5134_v18, %v5198_v44  ;;  %v5230_v63 = vpop.trf.xlu1 }
 0x2ef   : > { %5982 = vxpose.xlu1.b32.start.end [1/1] (short) (narrow) %v2507_v33, 8  ;;  %v23517_v58 = vrot.slane %v12630_v29, %v22779_v49  ;;  %v23520_v9 = vrot.slane %v12637_v5, %v22779_v49  ;;  %v16798_v54 = vrot.slane %v12646_v15, %v22779_v49  ;;  %v16830_v20 = vrot.slane %v12653_v10, %v22779_v49 }
 0x2f0   : > { %v12838_v46 = vrot.slane %v12830_v1, %v22779_v49  ;;  %v12845_v30 = vrot.slane %v12831_v40, %v22779_v49  ;;  %v12846_v41 = vcombine.low %v5166_v36, %v5230_v63  ;;  %v12847_v4 = vcombine.high %v5166_v36, %v5230_v63  ;;  %6526 = vxpose.xlu0.b32.start.end [1/1] (short) (narrow) %v23418_v57, 8  ;;  %v5646_v18 = vpop.trf.xlu0 }
 0x2f1   : > { %v16838_v44 = vcombine.low %v16782_v56, %v16798_v54  ;;  %v16870_v33 = vcombine.low %v16814_v16, %v16830_v20  ;;  %v16702_v29 = vcombine.low %v23504_v0, %v23517_v58  ;;  %v16734_v5 = vcombine.low %v23507_v22, %v23520_v9 }
 0x2f2   : > { %v12854_v15 = vrot.slane %v12846_v41, %v22779_v49  ;;  %v12861_v10 = vrot.slane %v12847_v4, %v22779_v49  ;;  %v5678_v1 = vpop.trf.xlu1  ;;  %v16839_v40 = vcombine.high %v16782_v56, %v16798_v54  ;;  %v16871_v36 = vcombine.high %v16814_v16, %v16830_v20 }
 0x2f3   : > { %7902 = vxpose.xlu1.b32.start.end [1/1] (short) (narrow) %v23436_v50, 8  ;;  %v23536_v57 = vcombine.high %v23022_v38, %v30287_v19  ;;  %v23540_v63 = vcombine.high %v23035_v45, %v30287_v19  ;;  %v23547_v41 = vrot.slane %v2094_v27, %v22788_v62  ;;  %v23551_v20 = vrot.slane %v16838_v44, %v22788_v62 }
 0x2f4   : > { %v12894_v4 = vcombine.low %v12838_v46, %v12854_v15  ;;  %v12895_v34 = vcombine.high %v12838_v46, %v12854_v15  ;;  %v12910_v50 = vcombine.low %v12845_v30, %v12861_v10  ;;  %v12911_v56 = vcombine.high %v12845_v30, %v12861_v10  ;;  %6590 = vxpose.xlu0.b32.start.end [1/1] (short) (narrow) %v23428_v23, 8  ;;  %v5710_v16 = vpop.trf.xlu0 }
 0x2f5   : > { %v13102_v38 = vcombine.low %v5646_v18, %v5710_v16  ;;  %v13103_v54 = vcombine.high %v5646_v18, %v5710_v16  ;;  %30307 = vst [vmem:[#allocation50_spill] sm:$0xff] %v23551_v20  ;;  %v23554_v45 = vrot.slane %v16870_v33, %v22788_v62  ;;  %v23560_v46 = vrot.slane %v16702_v29, %v22788_v62 }
 0x2f6   : > { %v12902_v35 = vrot.slane %v12894_v4, %v22788_v62  ;;  %v12909_v27 = vrot.slane %v12895_v34, %v22788_v62  ;;  %v5742_v48 = vpop.trf.xlu1  ;;  %v23563_v23 = vrot.slane %v16734_v5, %v22788_v62  ;;  %v12918_v30 = vrot.slane %v12910_v50, %v22788_v62 }
 0x2f7   : > { %30308 = vst [vmem:[#allocation51_spill] sm:$0xff] %v23554_v45  ;;  %6558 = vxpose.xlu1.b32.start.end [1/1] (short) (narrow) %v23440_v31, 8  ;;  %30309 = vst [vmem:[#allocation52_spill] sm:$0xff] %v23560_v46  ;;  %v12925_v18 = vrot.slane %v12911_v56, %v22788_v62  ;;  %v13118_v44 = vcombine.low %v5678_v1, %v5742_v48  ;;  %v13119_v33 = vcombine.high %v5678_v1, %v5742_v48 }
 0x2f8   : > { %30310 = vst [vmem:[#allocation53_spill] sm:$0xff] %v23563_v23  ;;  %v23568_v15 = vrot.slane %v12902_v35, %v22779_v49  ;;  %v23571_v34 = vrot.slane %v12909_v27, %v22779_v49  ;;  %v13110_v31 = vrot.slane %v13102_v38, %v22779_v49  ;;  %v13117_v29 = vrot.slane %v13103_v54, %v22779_v49  ;;  %v23576_v5 = vpop.trf.xlu0 }
 0x2f9   : > { %7038 = vxpose.xlu0.b32.start.end [1/1] (short) (narrow) %v23443_v2, 8  ;;  %v13126_v10 = vrot.slane %v13118_v44, %v22779_v49  ;;  %v13133_v4 = vrot.slane %v13119_v33, %v22779_v49  ;;  %v23581_v48 = vrot.slane %v16839_v40, %v22788_v62  ;;  %v23584_v1 = vrot.slane %v16871_v36, %v22788_v62 }
 0x2fa   : > { %v23586_v50 = vpop.trf.xlu1  ;;  %v16703_v56 = vcombine.high %v23504_v0, %v23517_v58  ;;  %v16735_v2 = vcombine.high %v23507_v22, %v23520_v9 }
 0x2fb   : > { %30311 = vst [vmem:[#allocation54_spill] sm:$0xff] %v23581_v48  ;;  %30312 = vst [vmem:[#allocation55_spill] sm:$0xff] %v23584_v1  ;;  %6622 = vxpose.xlu1.b32.start.end [1/1] (short) (narrow) %v23454_v25, 8  ;;  %v13166_v38 = vcombine.low %v13110_v31, %v13126_v10  ;;  %v13167_v54 = vcombine.high %v13110_v31, %v13126_v10  ;;  %v13182_v36 = vcombine.low %v13117_v29, %v13133_v4 }
 0x2fc   : > { %v13183_v35 = vcombine.high %v13117_v29, %v13133_v4  ;;  %v6350_v27 = vpop.trf.xlu0  ;;  %v23601_v58 = vrot.slane %v16703_v56, %v22788_v62  ;;  %v23604_v0 = vrot.slane %v16735_v2, %v22788_v62  ;;  %v17326_v31 = vrot.slane %v12918_v30, %v22779_v49 }
 0x2fd   : > { %7102 = vxpose.xlu0.b32.start.end [1/1] (short) (narrow) %v23457_v13, 8  ;;  %v13174_v9 = vrot.slane %v13166_v38, %v22788_v62  ;;  %v13181_v44 = vrot.slane %v13167_v54, %v22788_v62  ;;  %v13190_v33 = vrot.slane %v13182_v36, %v22788_v62  ;;  %v13407_v29 = vcombine.high %v23576_v5, %v6350_v27 }
 0x2fe   : > { %30313 = vst [vmem:[#allocation56_spill] sm:$0xff] %v23601_v58  ;;  %30314 = vst [vmem:[#allocation57_spill] sm:$0xff] %v23604_v0  ;;  %v13197_v13 = vrot.slane %v13183_v35, %v22788_v62  ;;  %v6382_v10 = vpop.trf.xlu1  ;;  %v23629_v36 = vrot.slane %v23540_v63, %v22779_v49  ;;  %v17358_v35 = vrot.slane %v12925_v18, %v22779_v49 }
 0x2ff   : > { %7070 = vxpose.xlu1.b32.start.end [1/1] (short) (narrow) %v23466_v60, 8  ;;  %v23620_v2 = vrot.slane %v13174_v9, %v22779_v49  ;;  %v23623_v38 = vrot.slane %v13181_v44, %v22779_v49  ;;  %v17342_v54 = vrot.slane %v13190_v33, %v22779_v49  ;;  %v2312_v60 = vcombine.high %v23048_v28, %v30287_v19 }
 0x300   : > { %v17374_v30 = vrot.slane %v13197_v13, %v22779_v49  ;;  %v13423_v40 = vcombine.high %v23586_v50, %v6382_v10  ;;  %v6798_v9 = vpop.trf.xlu0  ;;  %v13421_v44 = vrot.slane %v13407_v29, %v22779_v49  ;;  %v13406_v29 = vcombine.low %v23576_v5, %v6350_v27 }
 0x301   : > { %7550 = vxpose.xlu0.b32.start.end [1/1] (short) (narrow) %v23460_v26, 8  ;;  %v17246_v33 = vcombine.low %v23568_v15, %v23620_v2  ;;  %v17278_v13 = vcombine.low %v23571_v34, %v23623_v38  ;;  %v17382_v63 = vcombine.low %v17326_v31, %v17342_v54  ;;  %v17383_v18 = vcombine.high %v17326_v31, %v17342_v54 }
 0x302   : > { %v13437_v16 = vrot.slane %v13423_v40, %v22779_v49  ;;  %v6830_v56 = vpop.trf.xlu1  ;;  %v17414_v28 = vcombine.low %v17358_v35, %v17374_v30  ;;  %v17415_v22 = vcombine.high %v17358_v35, %v17374_v30  ;;  %v23645_v26 = vrot.slane %v23536_v57, %v22779_v49 }
 0x303   : > { %7134 = vxpose.xlu1.b32.start.end [1/1] (short) (narrow) %v23479_v55, 8  ;;  %v13422_v4 = vcombine.low %v23586_v50, %v6382_v10  ;;  %v30315_v25 = vcombine.high %v23475_v12, %v23472_v59  ;;  %v23657_v55 = vrot.slane %v23544_v17, %v22779_v49  ;;  %v2112_v5 = vcombine.high %v23547_v41, %v30287_v19 }
 0x304   : > { %v13486_v40 = vcombine.low %v13421_v44, %v13437_v16  ;;  %v13487_v31 = vcombine.high %v13421_v44, %v13437_v16  ;;  %v6862_v57 = vpop.trf.xlu0  ;;  %v2226_v50 = vcombine.low %v23645_v26, %v23629_v36  ;;  %v23665_v27 = vrot.slane %v2312_v60, %v22779_v49 }
 0x305   : > { %v23653_v0 = vrot.slane %v30315_v25, %v22788_v62  ;;  %7614 = vxpose.xlu0.b32.start.end [1/1] (short) (narrow) %v23469_v61, 8  ;;  %v13678_v59 = vcombine.low %v6798_v9, %v6862_v57  ;;  %v13679_v12 = vcombine.high %v6798_v9, %v6862_v57  ;;  %v23669_v17 = vrot.slane %v17246_v33, %v22788_v62 }
 0x306   : > { %v6894_v25 = vpop.trf.xlu1  ;;  %v23672_v61 = vrot.slane %v17278_v13, %v22788_v62  ;;  %v23675_v16 = vrot.slane %v17382_v63, %v22788_v62  ;;  %v23678_v10 = vrot.slane %v17414_v28, %v22788_v62  ;;  %v13414_v54 = vrot.slane %v13406_v29, %v22779_v49 }
 0x307   : > { %7582 = vxpose.xlu1.b32.start.end [1/1] (short) (narrow) %v23483_v7, 8  ;;  %30316 = vst [vmem:[#allocation58_spill] sm:$0xff] %v23669_v17  ;;  %v13430_v30 = vrot.slane %v13422_v4, %v22779_v49  ;;  %v13694_v60 = vcombine.low %v6830_v56, %v6894_v25  ;;  %v13695_v35 = vcombine.high %v6830_v56, %v6894_v25 }
 0x308   : > { %30317 = vst [vmem:[#allocation59_spill] sm:$0xff] %v23672_v61  ;;  %30318 = vst [vmem:[#allocation60_spill] sm:$0xff] %v23675_v16  ;;  %v13494_v7 = vrot.slane %v13486_v40, %v22788_v62  ;;  %v13501_v9 = vrot.slane %v13487_v31, %v22788_v62  ;;  %v13686_v44 = vrot.slane %v13678_v59, %v22779_v49  ;;  %v23687_v13 = vpop.trf.xlu0 }
 0x309   : > { %30319 = vst [vmem:[#allocation61_spill] sm:$0xff] %v23678_v10  ;;  %v13693_v33 = vrot.slane %v13679_v12, %v22779_v49  ;;  %4478 = vxpose.xlu0.b32.start.end [1/1] (short) (narrow) %v23547_v41, 8  ;;  %v13702_v63 = vrot.slane %v13694_v60, %v22779_v49  ;;  %v13709_v28 = vrot.slane %v13695_v35, %v22779_v49 }
 0x30a   : > { %v23692_v4 = vrot.slane %v17383_v18, %v22788_v62  ;;  %v23695_v56 = vrot.slane %v17415_v22, %v22788_v62  ;;  %v23697_v29 = vpop.trf.xlu1  ;;  %v17247_v40 = vcombine.high %v23568_v15, %v23620_v2  ;;  %v17279_v41 = vcombine.high %v23571_v34, %v23623_v38 }
 0x30b   : > { %7646 = vxpose.xlu1.b32.start.end [1/1] (short) (narrow) %v23499_v14, 8  ;;  %v13742_v57 = vcombine.low %v13686_v44, %v13702_v63  ;;  %v13743_v59 = vcombine.high %v13686_v44, %v13702_v63  ;;  %v13758_v22 = vcombine.low %v13693_v33, %v13709_v28  ;;  %v13759_v12 = vcombine.high %v13693_v33, %v13709_v28 }
 0x30c   : > { %30320 = vst [vmem:[#allocation62_spill] sm:$0xff] %v23692_v4  ;;  %30321 = vst [vmem:[#allocation63_spill] sm:$0xff] %v23695_v56  ;;  %v23709_v25 = vpop.trf.xlu0  ;;  %v23714_v15 = vrot.slane %v17247_v40, %v22788_v62  ;;  %v23717_v34 = vrot.slane %v17279_v41, %v22788_v62  ;;  %v13470_v38 = vcombine.low %v13414_v54, %v13430_v30 }
 0x30d   : > { %4542 = vxpose.xlu0.b32.start.end [1/1] (short) (narrow) %v23653_v0, 8  ;;  %v13471_v60 = vcombine.high %v13414_v54, %v13430_v30  ;;  %v13766_v35 = vrot.slane %v13758_v22, %v22788_v62  ;;  %v13773_v44 = vrot.slane %v13759_v12, %v22788_v62  ;;  %v2227_v33 = vcombine.high %v23645_v26, %v23629_v36 }
 0x30e   : > { %30322 = vst [vmem:[#allocation64_spill] sm:$0xff] %v23714_v15  ;;  %30323 = vst [vmem:[#allocation65_spill] sm:$0xff] %v23717_v34  ;;  %v23725_v63 = vpop.trf.xlu1  ;;  %v2234_v28 = vrot.slane %v2226_v50, %v22788_v62  ;;  %v13750_v54 = vrot.slane %v13742_v57, %v22788_v62  ;;  %v13757_v30 = vrot.slane %v13743_v59, %v22788_v62 }
 0x30f   : > { %4510 = vxpose.xlu1.b32.start.end [1/1] (short) (narrow) %v2112_v5, 8  ;;  %v23735_v22 = vrot.slane %v13766_v35, %v22779_v49  ;;  %v23738_v36 = vrot.slane %v13773_v44, %v22779_v49  ;;  %v23741_v26 = vrot.slane %v13494_v7, %v22779_v49  ;;  %v23744_v5 = vrot.slane %v13501_v9, %v22779_v49 }
 0x310   : > { %v23746_v50 = vpop.trf.xlu0  ;;  %v2113_v57 = vcombine.high %v23653_v0, %v30287_v19  ;;  %v2358_v59 = vcombine.low %v23665_v27, %v23657_v55  ;;  %v2459_v12 = vcombine.high %v23033_v42, %v30287_v19  ;;  %v13478_v35 = vrot.slane %v13470_v38, %v22788_v62 }
 0x311   : > { %30324 = vst [vmem:[#allocation66_spill] sm:$0xff] %v23735_v22  ;;  %30325 = vst [vmem:[#allocation67_spill] sm:$0xff] %v23738_v36  ;;  %4990 = vxpose.xlu0.b32.start.end [1/1] (short) (narrow) %v2234_v28, 8  ;;  %v13485_v7 = vrot.slane %v13471_v60, %v22788_v62  ;;  %v2444_v9 = vcombine.high %v23071_v8, %v30287_v19  ;;  %v2241_v18 = vrot.slane %v2227_v33, %v22788_v62 }
 0x312   : > { %30326 = vst [vmem:[#allocation68_spill] sm:$0xff] %v23741_v26  ;;  %30327 = vst [vmem:[#allocation69_spill] sm:$0xff] %v23744_v5  ;;  %v23758_v44 = vpop.trf.xlu1  ;;  %v17943_v0 = vcombine.high %v23741_v26, %v23735_v22  ;;  %v17975_v31 = vcombine.high %v23744_v5, %v23738_v36  ;;  %v23766_v42 = vrot.slane %v13750_v54, %v22779_v49 }
 0x313   : > { %4574 = vxpose.xlu1.b32.start.end [1/1] (short) (narrow) %v2113_v57, 8  ;;  %v23769_v38 = vrot.slane %v13757_v30, %v22779_v49  ;;  %v2244_v8 = vcombine.high %v2234_v28, %v30287_v19  ;;  %v23775_v57 = vrot.slane %v13478_v35, %v22779_v49  ;;  %v23778_v33 = vrot.slane %v13485_v7, %v22779_v49 }
 0x314   : > { %30328 = vst [vmem:[#allocation70_spill] sm:$0xff] %v23766_v42  ;;  %v23771_v60 = vpop.trf.xlu0  ;;  %v2359_v41 = vcombine.high %v23665_v27, %v23657_v55  ;;  %v2473_v54 = vrot.slane %v2459_v12, %v22779_v49  ;;  %v2458_v2 = vrot.slane %v2444_v9, %v22779_v49  ;;  %v2366_v40 = vrot.slane %v2358_v59, %v22788_v62 }
 0x315   : > { %30329 = vst [vmem:[#allocation71_spill] sm:$0xff] %v23769_v38  ;;  %5054 = vxpose.xlu0.b32.start.end [1/1] (short) (narrow) %v2241_v18, 8  ;;  %30330 = vst [vmem:[#allocation72_spill] sm:$0xff] %v23775_v57  ;;  %v23788_v28 = vrot.slane %v17943_v0, %v22788_v62  ;;  %v23791_v35 = vrot.slane %v17975_v31, %v22788_v62  ;;  %v17807_v7 = vcombine.high %v23775_v57, %v23766_v42 }
 0x316   : > { %30331 = vst [vmem:[#allocation73_spill] sm:$0xff] %v23778_v33  ;;  %v23784_v30 = vpop.trf.xlu1  ;;  %v17839_v55 = vcombine.high %v23778_v33, %v23769_v38  ;;  %v2245_v12 = vcombine.high %v2241_v18, %v30287_v19  ;;  %v2994_v59 = vrot.slane %v22958_v43, %v22779_v49  ;;  %v2979_v9 = vrot.slane %v22960_v32, %v22779_v49 }
 0x317   : > { %5022 = vxpose.xlu1.b32.start.end [1/1] (short) (narrow) %v2244_v8, 8  ;;  %30332 = vst [vmem:[#allocation74_spill] sm:$0xff] %v23788_v28  ;;  %30333 = vst [vmem:[#allocation75_spill] sm:$0xff] %v23791_v35  ;;  %v23807_v0 = vrot.slane %v17807_v7, %v22788_v62  ;;  %v2490_v8 = vcombine.low %v2458_v2, %v2473_v54  ;;  %v2373_v33 = vrot.slane %v2359_v41, %v22788_v62 }
 0x318   : > { %v23797_v27 = vpop.trf.xlu0  ;;  %v23811_v38 = vrot.slane %v17839_v55, %v22788_v62  ;;  %v2987_v57 = vcombine.high %v22958_v43, %v30287_v19  ;;  %v2972_v31 = vcombine.high %v22960_v32, %v30287_v19  ;;  %v2376_v42 = vcombine.high %v2366_v40, %v30287_v19 }
 0x319   : > { %5502 = vxpose.xlu0.b32.start.end [1/1] (short) (narrow) %v2366_v40, 8  ;;  %30334 = vst [vmem:[#allocation76_spill] sm:$0xff] %v23807_v0  ;;  %v3002_v55 = vcombine.low %v2979_v9, %v2994_v59  ;;  %v3003_v5 = vcombine.high %v2979_v9, %v2994_v59  ;;  %v2491_v36 = vcombine.high %v2458_v2, %v2473_v54 }
 0x31a   : > { %v4334_v14 = vpop.trf.xlu1  ;;  %30335 = vst [vmem:[#allocation77_spill] sm:$0xff] %v23811_v38  ;;  %v2498_v43 = vrot.slane %v2490_v8, %v22788_v62  ;;  %v3001_v35 = vrot.slane %v2987_v57, %v22779_v49  ;;  %v2986_v32 = vrot.slane %v2972_v31, %v22779_v49  ;;  %v2377_v40 = vcombine.high %v2373_v33, %v30287_v19 }
 0x31b   : > { %5086 = vxpose.xlu1.b32.start.end [1/1] (short) (narrow) %v2245_v12, 8  ;;  %v3010_v12 = vrot.slane %v3002_v55, %v22788_v62  ;;  %v12334_v26 = vcombine.low %v23784_v30, %v4334_v14  ;;  %v2505_v2 = vrot.slane %v2491_v36, %v22788_v62  ;;  %v12335_v57 = vcombine.high %v23784_v30, %v4334_v14 }
 0x31c   : > { %v4750_v7 = vpop.trf.xlu0  ;;  %v3018_v54 = vcombine.low %v2986_v32, %v3001_v35  ;;  %v2508_v9 = vcombine.high %v2498_v43, %v30287_v19  ;;  %v12319_v36 = vcombine.high %v23771_v60, %v23797_v27 }
 0x31d   : > { %5566 = vxpose.xlu0.b32.start.end [1/1] (short) (narrow) %v2373_v33, 8  ;;  %v12318_v33 = vcombine.low %v23771_v60, %v23797_v27  ;;  %v12342_v14 = vrot.slane %v12334_v26, %v22779_v49  ;;  %v3038_v26 = vcombine.high %v23080_v21, %v30287_v19 }
 0x31e   : > { %v4782_v18 = vpop.trf.xlu1  ;;  %v23855_v27 = vrot.slane %v3018_v54, %v22788_v62 }
 0x31f   : > { %5534 = vxpose.xlu1.b32.start.end [1/1] (short) (narrow) %v2376_v42, 8  ;;  %v23832_v42 = vrot.slane %v3003_v5, %v22788_v62  ;;  %v3034_v5 = vcombine.high %v3010_v12, %v30287_v19 }
 0x320   : > { %v4814_v28 = vpop.trf.xlu0 }
 0x321   : > { %6014 = vxpose.xlu0.b32.start.end [1/1] (short) (narrow) %v2498_v43, 8  ;;  %v12591_v59 = vcombine.high %v4750_v7, %v4814_v28  ;;  %v12590_v31 = vcombine.low %v4750_v7, %v4814_v28  ;;  %v3035_v28 = vcombine.high %v23832_v42, %v30287_v19  ;;  %v12326_v7 = vrot.slane %v12318_v33, %v22779_v49 }
 0x322   : > { %v4846_v41 = vpop.trf.xlu1 }
 0x323   : > { %5598 = vxpose.xlu1.b32.start.end [1/1] (short) (narrow) %v2377_v40, 8  ;;  %v12606_v8 = vcombine.low %v4782_v18, %v4846_v41  ;;  %v12607_v55 = vcombine.high %v4782_v18, %v4846_v41  ;;  %v3019_v40 = vcombine.high %v2986_v32, %v3001_v35  ;;  %v3053_v35 = vcombine.high %v23040_v53, %v30287_v19 }
 0x324   : > { %v23838_v38 = vpop.trf.xlu0  ;;  %v12349_v18 = vrot.slane %v12335_v57, %v22779_v49  ;;  %v12605_v60 = vrot.slane %v12591_v59, %v22779_v49  ;;  %v12598_v41 = vrot.slane %v12590_v31, %v22779_v49  ;;  %v12333_v57 = vrot.slane %v12319_v36, %v22779_v49 }
 0x325   : > { %6078 = vxpose.xlu0.b32.start.end [1/1] (short) (narrow) %v2505_v2, 8  ;;  %v12614_v30 = vrot.slane %v12606_v8, %v22779_v49  ;;  %v12621_v43 = vrot.slane %v12607_v55, %v22779_v49  ;;  %v23867_v54 = vrot.slane %v3019_v40, %v22788_v62  ;;  %v12382_v55 = vcombine.low %v12326_v7, %v12342_v14 }
 0x326   : > { %v23846_v0 = vpop.trf.xlu1  ;;  %v12383_v22 = vcombine.high %v12326_v7, %v12342_v14  ;;  %v12398_v31 = vcombine.low %v12333_v57, %v12349_v18  ;;  %v12399_v56 = vcombine.high %v12333_v57, %v12349_v18  ;;  %v23875_v36 = vrot.slane %v23040_v53, %v22779_v49 }
 0x327   : > { %6046 = vxpose.xlu1.b32.start.end [1/1] (short) (narrow) %v2508_v9, 8  ;;  %v2509_v9 = vcombine.high %v2505_v2, %v30287_v19  ;;  %v12670_v8 = vcombine.low %v12605_v60, %v12621_v43  ;;  %v12671_v59 = vcombine.high %v12605_v60, %v12621_v43  ;;  %v12654_v34 = vcombine.low %v12598_v41, %v12614_v30 }
 0x328   : > { %v23862_v32 = vpop.trf.xlu0  ;;  %v12655_v15 = vcombine.high %v12598_v41, %v12614_v30  ;;  %v3036_v2 = vcombine.high %v23855_v27, %v30287_v19  ;;  %v23878_v40 = vrot.slane %v3053_v35, %v22779_v49  ;;  %v23882_v14 = vrot.slane %v23080_v21, %v22779_v49 }
 0x329   : > { %7870 = vxpose.xlu0.b32.start.end [1/1] (short) (narrow) %v23424_v37, 8  ;;  %v3119_v37 = vcombine.high %v23051_v39, %v30287_v19  ;;  %v23885_v30 = vrot.slane %v3038_v26, %v22779_v49  ;;  %v23889_v18 = vrot.slane %v23051_v39, %v22779_v49  ;;  %v12678_v60 = vrot.slane %v12670_v8, %v22788_v62 }
 0x32a   : > { %v5358_v33 = vpop.trf.xlu1  ;;  %v12685_v53 = vrot.slane %v12671_v59, %v22788_v62  ;;  %v23895_v35 = vcombine.high %v23867_v54, %v30287_v19  ;;  %v12390_v21 = vrot.slane %v12382_v55, %v22788_v62  ;;  %v12397_v7 = vrot.slane %v12383_v22, %v22788_v62 }
 0x32b   : > { %6110 = vxpose.xlu1.b32.start.end [1/1] (short) (narrow) %v2509_v9, 8  ;;  %v12662_v26 = vrot.slane %v12654_v34, %v22788_v62  ;;  %v23902_v39 = vrot.slane %v3119_v37, %v22779_v49  ;;  %v23906_v9 = vcombine.high %v23066_v11, %v30287_v19  ;;  %v12406_v57 = vrot.slane %v12398_v31, %v22788_v62 }
 0x32c   : > { %v5774_v43 = vpop.trf.xlu0  ;;  %v12413_v8 = vrot.slane %v12399_v56, %v22788_v62  ;;  %v3068_v22 = vcombine.low %v23882_v14, %v23875_v36  ;;  %v3069_v34 = vcombine.high %v23882_v14, %v23875_v36  ;;  %v23920_v55 = vrot.slane %v12678_v60, %v22779_v49 }
 0x32d   : > { %7934 = vxpose.xlu0.b32.start.end [1/1] (short) (narrow) %v3010_v12, 8  ;;  %v12669_v12 = vrot.slane %v12655_v15, %v22788_v62  ;;  %v23923_v56 = vrot.slane %v12685_v53, %v22779_v49  ;;  %v12878_v37 = vcombine.low %v23846_v0, %v5358_v33  ;;  %v12879_v31 = vcombine.high %v23846_v0, %v5358_v33 }
 0x32e   : > { %v5806_v41 = vpop.trf.xlu1  ;;  %30336 = vst [vmem:[#allocation78_spill] sm:$0xff] %v23920_v55  ;;  %v23928_v36 = vrot.slane %v12390_v21, %v22779_v49  ;;  %v23931_v14 = vrot.slane %v12397_v7, %v22779_v49  ;;  %v23934_v15 = vrot.slane %v12662_v26, %v22779_v49  ;;  %v23940_v53 = vrot.slane %v12406_v57, %v22779_v49 }
 0x32f   : > { %7966 = vxpose.xlu1.b32.start.end [1/1] (short) (narrow) %v3034_v5, 8  ;;  %v3104_v5 = vcombine.high %v23088_v3, %v30287_v19  ;;  %30337 = vst [vmem:[#allocation79_spill] sm:$0xff] %v23923_v56  ;;  %v23943_v4 = vrot.slane %v12413_v8, %v22779_v49  ;;  %v12862_v0 = vcombine.low %v23838_v38, %v23862_v32 }
 0x330   : > { %v5838_v59 = vpop.trf.xlu0  ;;  %30338 = vst [vmem:[#allocation80_spill] sm:$0xff] %v23928_v36  ;;  %30339 = vst [vmem:[#allocation81_spill] sm:$0xff] %v23931_v14  ;;  %v12863_v21 = vcombine.high %v23838_v38, %v23862_v32  ;;  %v12893_v57 = vrot.slane %v12879_v31, %v22779_v49  ;;  %v16855_v8 = vcombine.high %v23940_v53, %v23920_v55 }
 0x331   : > { %7998 = vxpose.xlu0.b32.start.end [1/1] (short) (narrow) %v23832_v42, 8  ;;  %30340 = vst [vmem:[#allocation82_spill] sm:$0xff] %v23934_v15  ;;  %v23937_v42 = vrot.slane %v12669_v12, %v22779_v49  ;;  %30342 = vst [vmem:[#allocation84_spill] sm:$0xff] %v23940_v53  ;;  %v13135_v33 = vcombine.high %v5774_v43, %v5838_v59  ;;  %v13134_v7 = vcombine.low %v5774_v43, %v5838_v59 }
 0x332   : > { %v5870_v60 = vpop.trf.xlu1  ;;  %30343 = vst [vmem:[#allocation85_spill] sm:$0xff] %v23943_v4  ;;  %v16887_v1 = vcombine.high %v23943_v4, %v23923_v56 }
 0x333   : > { %30341 = vst [vmem:[#allocation83_spill] sm:$0xff] %v23937_v42  ;;  %8030 = vxpose.xlu1.b32.start.end [1/1] (short) (narrow) %v3035_v28, 8  ;;  %v13150_v26 = vcombine.low %v5806_v41, %v5870_v60  ;;  %v13151_v58 = vcombine.high %v5806_v41, %v5870_v60  ;;  %v12886_v28 = vrot.slane %v12878_v37, %v22779_v49 }
 0x334   : > { %v23950_v12 = vpop.trf.xlu0  ;;  %v16751_v43 = vcombine.high %v23931_v14, %v23937_v42  ;;  %v12870_v41 = vrot.slane %v12862_v0, %v22779_v49  ;;  %v13149_v59 = vrot.slane %v13135_v33, %v22779_v49  ;;  %v23969_v37 = vrot.slane %v16855_v8, %v22788_v62 }
 0x335   : > { %8062 = vxpose.xlu0.b32.start.end [1/1] (short) (narrow) %v23855_v27, 8  ;;  %v13158_v48 = vrot.slane %v13150_v26, %v22779_v49  ;;  %v13165_v38 = vrot.slane %v13151_v58, %v22779_v49  ;;  %v16719_v27 = vcombine.high %v23928_v36, %v23934_v15  ;;  %v23972_v31 = vrot.slane %v16887_v1, %v22788_v62 }
 0x336   : > { %v23960_v32 = vpop.trf.xlu1  ;;  %30344 = vst [vmem:[#allocation86_spill] sm:$0xff] %v23969_v37  ;;  %v23976_v58 = vrot.slane %v23088_v3, %v22779_v49  ;;  %v13142_v60 = vrot.slane %v13134_v7, %v22779_v49  ;;  %v3076_v0 = vrot.slane %v3068_v22, %v22788_v62  ;;  %v23986_v33 = vrot.slane %v23066_v11, %v22779_v49 }
 0x337   : > { %8094 = vxpose.xlu1.b32.start.end [1/1] (short) (narrow) %v3036_v2, 8  ;;  %30345 = vst [vmem:[#allocation87_spill] sm:$0xff] %v23972_v31  ;;  %v12877_v2 = vrot.slane %v12863_v21, %v22779_v49  ;;  %v12926_v1 = vcombine.low %v12870_v41, %v12886_v28  ;;  %v13214_v8 = vcombine.low %v13149_v59, %v13165_v38 }
 0x338   : > { %v23981_v26 = vpop.trf.xlu0  ;;  %v13198_v21 = vcombine.low %v13142_v60, %v13158_v48  ;;  %v13215_v36 = vcombine.high %v13149_v59, %v13165_v38  ;;  %v23996_v22 = vrot.slane %v3104_v5, %v22779_v49  ;;  %v13199_v11 = vcombine.high %v13142_v60, %v13158_v48 }
 0x339   : > { %8126 = vxpose.xlu0.b32.start.end [1/1] (short) (narrow) %v23867_v54, 8  ;;  %v12942_v14 = vcombine.low %v12877_v2, %v12893_v57  ;;  %v12943_v42 = vcombine.high %v12877_v2, %v12893_v57  ;;  %v3085_v54 = vcombine.high %v23885_v30, %v23878_v40  ;;  %v3083_v15 = vrot.slane %v3069_v34, %v22788_v62 }
 0x33a   : > { %v23990_v7 = vpop.trf.xlu1  ;;  %v3134_v3 = vcombine.low %v23976_v58, %v23889_v18  ;;  %v12927_v4 = vcombine.high %v12870_v41, %v12886_v28  ;;  %v3100_v38 = vcombine.high %v3076_v0, %v30287_v19  ;;  %v24008_v5 = vrot.slane %v23906_v9, %v22779_v49 }
 0x33b   : > { %8158 = vxpose.xlu1.b32.start.end [1/1] (short) (narrow) %v23895_v35, 8  ;;  %v30346_v35 = vcombine.low %v23885_v30, %v23878_v40  ;;  %v12934_v48 = vrot.slane %v12926_v1, %v22788_v62  ;;  %v13222_v34 = vrot.slane %v13214_v8, %v22788_v62  ;;  %v12950_v41 = vrot.slane %v12942_v14, %v22788_v62 }
 0x33c   : > { %v6926_v57 = vpop.trf.xlu0  ;;  %v12957_v2 = vrot.slane %v12943_v42, %v22788_v62  ;;  %v13206_v60 = vrot.slane %v13198_v21, %v22788_v62  ;;  %v13229_v40 = vrot.slane %v13215_v36, %v22788_v62  ;;  %v13213_v1 = vrot.slane %v13199_v11, %v22788_v62 }
 0x33d   : > { %8190 = vxpose.xlu0.b32.start.end [1/1] (short) (narrow) %v3076_v0, 8  ;;  %v3092_v59 = vrot.slane %v30346_v35, %v22788_v62  ;;  %v3101_v8 = vcombine.high %v3083_v15, %v30287_v19  ;;  %v12941_v14 = vrot.slane %v12927_v4, %v22788_v62  ;;  %v3099_v36 = vrot.slane %v3085_v54, %v22788_v62 }
 0x33e   : > { %v24029_v35 = vrot.slane %v12934_v48, %v22779_v49  ;;  %v24032_v28 = vrot.slane %v13222_v34, %v22779_v49  ;;  %v24035_v11 = vrot.slane %v16719_v27, %v22788_v62  ;;  %v24038_v0 = vrot.slane %v16751_v43, %v22788_v62 }
 0x33f   : > { %v6958_v30 = vpop.trf.xlu1  ;;  %8222 = vxpose.xlu1.b32.start.end [1/1] (short) (narrow) %v3100_v38, 8  ;;  %v3102_v21 = vcombine.high %v3092_v59, %v30287_v19  ;;  %v3142_v38 = vrot.slane %v3134_v3, %v22788_v62  ;;  %v24041_v4 = vrot.slane %v12950_v41, %v22779_v49  ;;  %v24047_v3 = vrot.slane %v13206_v60, %v22779_v49 }
 0x340   : > { %v6990_v42 = vpop.trf.xlu0  ;;  %30347 = vst [vmem:[#allocation88_spill] sm:$0xff] %v24029_v35  ;;  %30348 = vst [vmem:[#allocation89_spill] sm:$0xff] %v24032_v28  ;;  %v24050_v54 = vrot.slane %v13229_v40, %v22779_v49  ;;  %v24053_v27 = vrot.slane %v13213_v1, %v22779_v49  ;;  %v13510_v43 = vcombine.low %v23950_v12, %v23981_v26 }
 0x341   : > { %8254 = vxpose.xlu0.b32.start.end [1/1] (short) (narrow) %v3083_v15, 8  ;;  %30349 = vst [vmem:[#allocation90_spill] sm:$0xff] %v24035_v11  ;;  %30350 = vst [vmem:[#allocation91_spill] sm:$0xff] %v24038_v0  ;;  %v24044_v15 = vrot.slane %v12957_v2, %v22779_v49  ;;  %v13526_v34 = vcombine.low %v23960_v32, %v23990_v7  ;;  %v13782_v41 = vcombine.low %v6926_v57, %v6990_v42 }
 0x342   : > { %30351 = vst [vmem:[#allocation92_spill] sm:$0xff] %v24041_v4  ;;  %30353 = vst [vmem:[#allocation94_spill] sm:$0xff] %v24047_v3  ;;  %v13527_v2 = vcombine.high %v23960_v32, %v23990_v7  ;;  %v13783_v60 = vcombine.high %v6926_v57, %v6990_v42  ;;  %v13511_v1 = vcombine.high %v23950_v12, %v23981_v26 }
 0x343   : > { %30352 = vst [vmem:[#allocation93_spill] sm:$0xff] %v24044_v15  ;;  %30354 = vst [vmem:[#allocation95_spill] sm:$0xff] %v24050_v54  ;;  %v7022_v48 = vpop.trf.xlu1  ;;  %8286 = vxpose.xlu1.b32.start.end [1/1] (short) (narrow) %v3101_v8, 8  ;;  %v24064_v8 = vrot.slane %v12941_v14, %v22779_v49  ;;  %v17399_v56 = vcombine.high %v24041_v4, %v24032_v28  ;;  %v13534_v12 = vrot.slane %v13526_v34, %v22779_v49 }
 0x344   : > { %30355 = vst [vmem:[#allocation96_spill] sm:$0xff] %v24053_v27  ;;  %v13798_v9 = vcombine.low %v6958_v30, %v7022_v48  ;;  %v13799_v31 = vcombine.high %v6958_v30, %v7022_v48  ;;  %v24061_v40 = vpop.trf.xlu0  ;;  %v17263_v30 = vcombine.high %v24029_v35, %v24047_v3  ;;  %v13790_v26 = vrot.slane %v13782_v41, %v22779_v49 }
 0x345   : > { %8318 = vxpose.xlu0.b32.start.end [1/1] (short) (narrow) %v3092_v59, 8  ;;  %30356 = vst [vmem:[#allocation97_spill] sm:$0xff] %v24064_v8  ;;  %v17431_v59 = vcombine.high %v24044_v15, %v24050_v54  ;;  %v17295_v14 = vcombine.high %v24064_v8, %v24053_v27  ;;  %v13541_v42 = vrot.slane %v13527_v2, %v22779_v49 }
 0x346   : > { %v13806_v32 = vrot.slane %v13798_v9, %v22779_v49  ;;  %v13813_v7 = vrot.slane %v13799_v31, %v22779_v49  ;;  %v13518_v31 = vrot.slane %v13510_v43, %v22779_v49  ;;  %v3103_v37 = vcombine.high %v3099_v36, %v30287_v19 }
 0x347   : > { %v24074_v57 = vpop.trf.xlu1  ;;  %8350 = vxpose.xlu1.b32.start.end [1/1] (short) (narrow) %v3102_v21, 8  ;;  %v13797_v21 = vrot.slane %v13783_v60, %v22779_v49  ;;  %v24093_v41 = vrot.slane %v17399_v56, %v22788_v62  ;;  %v24096_v8 = vrot.slane %v17431_v59, %v22788_v62  ;;  %v3151_v43 = vcombine.high %v23996_v22, %v23902_v39 }
 0x348   : > { %v24089_v48 = vpop.trf.xlu0  ;;  %v13846_v34 = vcombine.low %v13790_v26, %v13806_v32  ;;  %v13847_v35 = vcombine.high %v13790_v26, %v13806_v32  ;;  %v13525_v2 = vrot.slane %v13511_v1, %v22779_v49  ;;  %v13574_v32 = vcombine.low %v13518_v31, %v13534_v12 }
 0x349   : > { %8382 = vxpose.xlu0.b32.start.end [1/1] (short) (narrow) %v3099_v36, 8  ;;  %30357 = vst [vmem:[#allocation98_spill] sm:$0xff] %v24093_v41  ;;  %30358 = vst [vmem:[#allocation99_spill] sm:$0xff] %v24096_v8  ;;  %v13862_v9 = vcombine.low %v13797_v21, %v13813_v7  ;;  %v13863_v60 = vcombine.high %v13797_v21, %v13813_v7  ;;  %v30359_v36 = vld [vmem:[#allocation25_spill] sm:$0xff]  ;;  %v13575_v26 = vcombine.high %v13518_v31, %v13534_v12 }
 0x34a   : > { %v3170_v11 = vcombine.high %v30359_v36, %v30287_v19  ;;  %v30360_v56 = vcombine.high %v23976_v58, %v23889_v18  ;;  %v13590_v27 = vcombine.low %v13525_v2, %v13541_v42  ;;  %v13591_v3 = vcombine.high %v13525_v2, %v13541_v42 }
 0x34b   : > { %v24101_v0 = vpop.trf.xlu1  ;;  %8414 = vxpose.xlu1.b32.start.end [1/1] (short) (narrow) %v3103_v37, 8  ;;  %v3166_v1 = vcombine.high %v3142_v38, %v30287_v19  ;;  %v24113_v7 = vrot.slane %v17263_v30, %v22788_v62  ;;  %v13854_v37 = vrot.slane %v13846_v34, %v22788_v62  ;;  %v13861_v21 = vrot.slane %v13847_v35, %v22788_v62 }
 0x34c   : > { %v3149_v59 = vrot.slane %v30360_v56, %v22788_v62  ;;  %v24109_v15 = vpop.trf.xlu0  ;;  %v24120_v18 = vrot.slane %v17295_v14, %v22788_v62  ;;  %v24124_v58 = vrot.slane %v30359_v36, %v22779_v49  ;;  %v13870_v31 = vrot.slane %v13862_v9, %v22788_v62 }
 0x34d   : > { %8446 = vxpose.xlu0.b32.start.end [1/1] (short) (narrow) %v3142_v38, 8  ;;  %30361 = vst [vmem:[#allocation25_spill] sm:$0xff] %v24113_v7  ;;  %v13877_v38 = vrot.slane %v13863_v60, %v22788_v62  ;;  %v13582_v42 = vrot.slane %v13574_v32, %v22788_v62  ;;  %v13589_v34 = vrot.slane %v13575_v26, %v22788_v62  ;;  %v30364_v26 = vld [vmem:[#allocation23_spill] sm:$0xff] }
 0x34e   : > { %30362 = vst [vmem:[#allocation100_spill] sm:$0xff] %v24120_v18  ;;  %v3167_v14 = vcombine.high %v3149_v59, %v30287_v19  ;;  %v30363_v2 = vcombine.low %v23996_v22, %v23902_v39  ;;  %v13598_v9 = vrot.slane %v13590_v27, %v22788_v62  ;;  %v13605_v60 = vrot.slane %v13591_v3, %v22788_v62 }
 0x34f   : > { %v24128_v30 = vpop.trf.xlu1  ;;  %8478 = vxpose.xlu1.b32.start.end [1/1] (short) (narrow) %v3166_v1, 8  ;;  %v3251_v35 = vcombine.high %v30364_v26, %v30287_v19  ;;  %v24151_v39 = vrot.slane %v30364_v26, %v22779_v49  ;;  %v24154_v22 = vrot.slane %v13854_v37, %v22779_v49  ;;  %v24157_v3 = vrot.slane %v13861_v21, %v22779_v49  ;;  %v30369_v37 = vld [vmem:[#allocation26_spill] sm:$0xff] }
 0x350   : > { %v3158_v36 = vrot.slane %v30363_v2, %v22788_v62  ;;  %v24141_v56 = vpop.trf.xlu0  ;;  %v24160_v27 = vrot.slane %v3170_v11, %v22779_v49  ;;  %v24165_v2 = vrot.slane %v13870_v31, %v22779_v49  ;;  %v24168_v32 = vrot.slane %v13877_v38, %v22779_v49 }
 0x351   : > { %8510 = vxpose.xlu0.b32.start.end [1/1] (short) (narrow) %v3149_v59, 8  ;;  %30365 = vst [vmem:[#allocation23_spill] sm:$0xff] %v24154_v22  ;;  %30366 = vst [vmem:[#allocation101_spill] sm:$0xff] %v24157_v3  ;;  %v3200_v59 = vcombine.low %v24124_v58, %v23986_v33  ;;  %v3236_v1 = vcombine.high %v30369_v37, %v30287_v19  ;;  %v24175_v21 = vrot.slane %v13582_v42, %v22779_v49 }
 0x352   : > { %30367 = vst [vmem:[#allocation102_spill] sm:$0xff] %v24165_v2  ;;  %30368 = vst [vmem:[#allocation103_spill] sm:$0xff] %v24168_v32  ;;  %v24178_v11 = vrot.slane %v13589_v34, %v22779_v49  ;;  %v3165_v12 = vrot.slane %v3151_v43, %v22788_v62  ;;  %v24182_v31 = vrot.slane %v13598_v9, %v22779_v49 }
 0x353   : > { %v24170_v26 = vpop.trf.xlu1  ;;  %8542 = vxpose.xlu1.b32.start.end [1/1] (short) (narrow) %v3167_v14, 8  ;;  %30370 = vst [vmem:[#allocation26_spill] sm:$0xff] %v24175_v21  ;;  %v24185_v38 = vrot.slane %v13605_v60, %v22779_v49  ;;  %v3168_v7 = vcombine.high %v3158_v36, %v30287_v19  ;;  %v3201_v42 = vcombine.high %v24124_v58, %v23986_v33 }
 0x354   : > { %30371 = vst [vmem:[#allocation104_spill] sm:$0xff] %v24178_v11  ;;  %30372 = vst [vmem:[#allocation105_spill] sm:$0xff] %v24182_v31  ;;  %v12438_v14 = vcombine.low %v24128_v30, %v24170_v26  ;;  %v4878_v18 = vpop.trf.xlu0  ;;  %v24194_v34 = vrot.slane %v30369_v37, %v22779_v49  ;;  %v18063_v43 = vcombine.high %v24175_v21, %v24154_v22 }
 0x355   : > { %30373 = vst [vmem:[#allocation106_spill] sm:$0xff] %v24185_v38  ;;  %8574 = vxpose.xlu0.b32.start.end [1/1] (short) (narrow) %v3158_v36, 8  ;;  %v18095_v9 = vcombine.high %v24178_v11, %v24157_v3  ;;  %v12422_v60 = vcombine.low %v24109_v15, %v24141_v56  ;;  %v3208_v36 = vrot.slane %v3200_v59, %v22788_v62  ;;  %v30374_v11 = vld [vmem:[#allocation24_spill] sm:$0xff] }
 0x356   : > { %v18199_v33 = vcombine.high %v24182_v31, %v24165_v2  ;;  %v18231_v58 = vcombine.high %v24185_v38, %v24168_v32  ;;  %v3216_v37 = vcombine.low %v24160_v27, %v24008_v5  ;;  %v24210_v21 = vrot.slane %v3251_v35, %v22779_v49 }
 0x357   : > { %v4910_v8 = vpop.trf.xlu1  ;;  %8606 = vxpose.xlu1.b32.start.end [1/1] (short) (narrow) %v3168_v7, 8  ;;  %v24214_v3 = vcombine.high %v30374_v11, %v30287_v19  ;;  %v24218_v7 = vrot.slane %v30374_v11, %v22779_v49  ;;  %v3217_v59 = vcombine.high %v24160_v27, %v24008_v5  ;;  %v24223_v31 = vrot.slane %v3236_v1, %v22779_v49 }
 0x358   : > { %v12446_v38 = vrot.slane %v12438_v14, %v22779_v49  ;;  %v4942_v32 = vpop.trf.xlu0  ;;  %v3169_v35 = vcombine.high %v3165_v12, %v30287_v19  ;;  %v24230_v41 = vrot.slane %v18063_v43, %v22788_v62  ;;  %v24233_v11 = vrot.slane %v18095_v9, %v22788_v62 }
 0x359   : > { %8638 = vxpose.xlu0.b32.start.end [1/1] (short) (narrow) %v3165_v12, 8  ;;  %v12694_v22 = vcombine.low %v4878_v18, %v4942_v32  ;;  %v12430_v1 = vrot.slane %v12422_v60, %v22779_v49  ;;  %v3232_v14 = vcombine.high %v3208_v36, %v30287_v19  ;;  %v3215_v12 = vrot.slane %v3201_v42, %v22788_v62 }
 0x35a   : > { %30375 = vst [vmem:[#allocation24_spill] sm:$0xff] %v24230_v41  ;;  %30376 = vst [vmem:[#allocation107_spill] sm:$0xff] %v24233_v11  ;;  %v12439_v2 = vcombine.high %v24128_v30, %v24170_v26  ;;  %v12695_v54 = vcombine.high %v4878_v18, %v4942_v32  ;;  %v12423_v9 = vcombine.high %v24109_v15, %v24141_v56 }
 0x35b   : > { %v4974_v27 = vpop.trf.xlu1  ;;  %8670 = vxpose.xlu1.b32.start.end [1/1] (short) (narrow) %v3169_v35, 8  ;;  %v12486_v28 = vcombine.low %v12430_v1, %v12446_v38  ;;  %v12487_v53 = vcombine.high %v12430_v1, %v12446_v38  ;;  %v12702_v5 = vrot.slane %v12694_v22, %v22779_v49  ;;  %v24252_v18 = vrot.slane %v18199_v33, %v22788_v62 }
 0x35c   : > { %v12710_v43 = vcombine.low %v4910_v8, %v4974_v27  ;;  %v12711_v4 = vcombine.high %v4910_v8, %v4974_v27  ;;  %v24245_v60 = vpop.trf.xlu0  ;;  %v3233_v15 = vcombine.high %v3215_v12, %v30287_v19  ;;  %v3224_v56 = vrot.slane %v3216_v37, %v22788_v62 }
 0x35d   : > { %8702 = vxpose.xlu0.b32.start.end [1/1] (short) (narrow) %v3208_v36, 8  ;;  %30377 = vst [vmem:[#allocation108_spill] sm:$0xff] %v24252_v18  ;;  %v24257_v32 = vrot.slane %v18231_v58, %v22788_v62  ;;  %v12709_v26 = vrot.slane %v12695_v54, %v22779_v49  ;;  %v12494_v33 = vrot.slane %v12486_v28, %v22788_v62 }
 0x35e   : > { %v12718_v35 = vrot.slane %v12710_v43, %v22779_v49  ;;  %v12725_v42 = vrot.slane %v12711_v4, %v22779_v49  ;;  %v12453_v4 = vrot.slane %v12439_v2, %v22779_v49  ;;  %v12501_v1 = vrot.slane %v12487_v53, %v22788_v62 }
 0x35f   : > { %v5422_v8 = vpop.trf.xlu1  ;;  %8734 = vxpose.xlu1.b32.start.end [1/1] (short) (narrow) %v3232_v14, 8  ;;  %30378 = vst [vmem:[#allocation109_spill] sm:$0xff] %v24257_v32  ;;  %v12437_v14 = vrot.slane %v12423_v9, %v22779_v49  ;;  %v3231_v22 = vrot.slane %v3217_v59, %v22788_v62  ;;  %v3282_v59 = vcombine.low %v24223_v31, %v24210_v21 }
 0x360   : > { %v12758_v38 = vcombine.low %v12702_v5, %v12718_v35  ;;  %v12759_v36 = vcombine.high %v12702_v5, %v12718_v35  ;;  %v5454_v27 = vpop.trf.xlu0  ;;  %v12774_v43 = vcombine.low %v12709_v26, %v12725_v42  ;;  %v30379_v5 = vld [vmem:[#allocation28_spill] sm:$0xff]  ;;  %v12775_v53 = vcombine.high %v12709_v26, %v12725_v42 }
 0x361   : > { %8766 = vxpose.xlu0.b32.start.end [1/1] (short) (narrow) %v3215_v12, 8  ;;  %v24274_v28 = vrot.slane %v30379_v5, %v22779_v49  ;;  %v3234_v35 = vcombine.high %v3224_v56, %v30287_v19  ;;  %v12502_v30 = vcombine.low %v12437_v14, %v12453_v4  ;;  %v12503_v58 = vcombine.high %v12437_v14, %v12453_v4 }
 0x362   : > { %v12766_v2 = vrot.slane %v12758_v38, %v22788_v62  ;;  %v12773_v54 = vrot.slane %v12759_v36, %v22788_v62  ;;  %v24285_v36 = vrot.slane %v12494_v33, %v22779_v49  ;;  %v24288_v37 = vrot.slane %v12501_v1, %v22779_v49 }
 0x363   : > { %v5486_v12 = vpop.trf.xlu1  ;;  %8798 = vxpose.xlu1.b32.start.end [1/1] (short) (narrow) %v3233_v15, 8  ;;  %v12782_v14 = vrot.slane %v12774_v43, %v22788_v62  ;;  %v12789_v33 = vrot.slane %v12775_v53, %v22788_v62  ;;  %v12510_v53 = vrot.slane %v12502_v30, %v22788_v62  ;;  %v3235_v41 = vcombine.high %v3231_v22, %v30287_v19 }
 0x364   : > { %v24279_v9 = vrot.slane %v12766_v2, %v22779_v49  ;;  %v24282_v38 = vrot.slane %v12773_v54, %v22779_v49  ;;  %30382 = vst [vmem:[#allocation111_spill] sm:$0xff] %v24285_v36  ;;  %30383 = vst [vmem:[#allocation112_spill] sm:$0xff] %v24288_v37  ;;  %v12982_v42 = vcombine.low %v5422_v8, %v5486_v12  ;;  %v5902_v26 = vpop.trf.xlu0 }
 0x365   : > { %v12983_v15 = vcombine.high %v5422_v8, %v5486_v12  ;;  %8830 = vxpose.xlu0.b32.start.end [1/1] (short) (narrow) %v3224_v56, 8  ;;  %v12966_v2 = vcombine.low %v24245_v60, %v5454_v27  ;;  %v12967_v54 = vcombine.high %v24245_v60, %v5454_v27  ;;  %v24304_v12 = vcombine.high %v30379_v5, %v30287_v19 }
 0x366   : > { %30380 = vst [vmem:[#allocation28_spill] sm:$0xff] %v24279_v9  ;;  %30381 = vst [vmem:[#allocation110_spill] sm:$0xff] %v24282_v38  ;;  %v16975_v8 = vcombine.high %v24285_v36, %v24279_v9  ;;  %v17007_v56 = vcombine.high %v24288_v37, %v24282_v38  ;;  %v12990_v4 = vrot.slane %v12982_v42, %v22779_v49 }
 0x367   : > { %v5934_v1 = vpop.trf.xlu1  ;;  %8862 = vxpose.xlu1.b32.start.end [1/1] (short) (narrow) %v3234_v35, 8  ;;  %v30384_v60 = vcombine.low %v24194_v34, %v24151_v39  ;;  %v12517_v35 = vrot.slane %v12503_v58, %v22788_v62  ;;  %v24316_v11 = vrot.slane %v12983_v15, %v22779_v49  ;;  %v12974_v43 = vrot.slane %v12966_v2, %v22779_v49 }
 0x368   : > { %v5966_v5 = vpop.trf.xlu0  ;;  %v30385_v18 = vcombine.high %v24194_v34, %v24151_v39  ;;  %v24325_v30 = vrot.slane %v12782_v14, %v22779_v49  ;;  %v24328_v58 = vrot.slane %v12789_v33, %v22779_v49  ;;  %v24331_v15 = vrot.slane %v12967_v54, %v22779_v49 }
 0x369   : > { %v3274_v27 = vrot.slane %v30384_v60, %v22788_v62  ;;  %8894 = vxpose.xlu0.b32.start.end [1/1] (short) (narrow) %v3231_v22, 8  ;;  %v13238_v32 = vcombine.low %v5902_v26, %v5966_v5  ;;  %v13239_v42 = vcombine.high %v5902_v26, %v5966_v5  ;;  %v3290_v22 = vrot.slane %v3282_v59, %v22788_v62 }
 0x36a   : > { %v3281_v60 = vrot.slane %v30385_v18, %v22788_v62  ;;  %30386 = vst [vmem:[#allocation113_spill] sm:$0xff] %v24325_v30  ;;  %30387 = vst [vmem:[#allocation114_spill] sm:$0xff] %v24328_v58  ;;  %v13030_v2 = vcombine.low %v12974_v43, %v12990_v4  ;;  %v24336_v39 = vrot.slane %v12510_v53, %v22779_v49 }
 0x36b   : > { %v5998_v37 = vpop.trf.xlu1  ;;  %8926 = vxpose.xlu1.b32.start.end [1/1] (short) (narrow) %v3235_v41, 8  ;;  %v3298_v38 = vcombine.high %v3274_v27, %v30287_v19  ;;  %v24339_v34 = vrot.slane %v12517_v35, %v22779_v49  ;;  %v13031_v18 = vcombine.high %v12974_v43, %v12990_v4  ;;  %v13046_v14 = vcombine.low %v24331_v15, %v24316_v11 }
 0x36c   : > { %v13254_v26 = vcombine.low %v5934_v1, %v5998_v37  ;;  %v13255_v5 = vcombine.high %v5934_v1, %v5998_v37  ;;  %30388 = vst [vmem:[#allocation115_spill] sm:$0xff] %v24336_v39  ;;  %v24343_v33 = vpop.trf.xlu0  ;;  %v13246_v41 = vrot.slane %v13238_v32, %v22779_v49  ;;  %v13253_v59 = vrot.slane %v13239_v42, %v22779_v49 }
 0x36d   : > { %30389 = vst [vmem:[#allocation116_spill] sm:$0xff] %v24339_v34  ;;  %8958 = vxpose.xlu0.b32.start.end [1/1] (short) (narrow) %v3274_v27, 8  ;;  %30390 = vst [vmem:[#allocation117_spill] sm:$0xff] %v24343_v33  ;;  %v24352_v53 = vrot.slane %v16975_v8, %v22788_v62  ;;  %v24355_v4 = vrot.slane %v17007_v56, %v22788_v62  ;;  %v17111_v43 = vcombine.high %v24336_v39, %v24325_v30 }
 0x36e   : > { %v13262_v37 = vrot.slane %v13254_v26, %v22779_v49  ;;  %v13269_v54 = vrot.slane %v13255_v5, %v22779_v49  ;;  %v17143_v32 = vcombine.high %v24339_v34, %v24328_v58  ;;  %v13038_v27 = vrot.slane %v13030_v2, %v22788_v62 }
 0x36f   : > { %v24349_v1 = vpop.trf.xlu1  ;;  %8990 = vxpose.xlu1.b32.start.end [1/1] (short) (narrow) %v3298_v38, 8  ;;  %30391 = vst [vmem:[#allocation118_spill] sm:$0xff] %v24352_v53  ;;  %30392 = vst [vmem:[#allocation119_spill] sm:$0xff] %v24355_v4  ;;  %v13045_v5 = vrot.slane %v13031_v18, %v22788_v62  ;;  %v13054_v38 = vrot.slane %v13046_v14, %v22788_v62  ;;  %v3299_v56 = vcombine.high %v3281_v60, %v30287_v19 }
 0x370   : > { %v13302_v35 = vcombine.low %v13246_v41, %v13262_v37  ;;  %v13303_v42 = vcombine.high %v13246_v41, %v13262_v37  ;;  %v13318_v26 = vcombine.low %v13253_v59, %v13269_v54  ;;  %v24364_v8 = vpop.trf.xlu0  ;;  %v13319_v2 = vcombine.high %v13253_v59, %v13269_v54 }
 0x371   : > { %9022 = vxpose.xlu0.b32.start.end [1/1] (short) (narrow) %v3281_v60, 8  ;;  %30393 = vst [vmem:[#allocation120_spill] sm:$0xff] %v24364_v8  ;;  %v13047_v18 = vcombine.high %v24331_v15, %v24316_v11  ;;  %v3300_v14 = vcombine.high %v3290_v22, %v30287_v19  ;;  %v30395_v60 = vcombine.high %v24223_v31, %v24210_v21 }
 0x372   : > { %v13310_v9 = vrot.slane %v13302_v35, %v22788_v62  ;;  %v13317_v34 = vrot.slane %v13303_v42, %v22788_v62  ;;  %v13326_v41 = vrot.slane %v13318_v26, %v22788_v62  ;;  %v24382_v35 = vrot.slane %v17111_v43, %v22788_v62 }
 0x373   : > { %v24374_v37 = vpop.trf.xlu1  ;;  %9054 = vxpose.xlu1.b32.start.end [1/1] (short) (narrow) %v3299_v56, 8  ;;  %v3297_v36 = vrot.slane %v30395_v60, %v22788_v62  ;;  %v24385_v59 = vrot.slane %v13038_v27, %v22779_v49  ;;  %v24397_v42 = vrot.slane %v13045_v5, %v22779_v49  ;;  %v24400_v21 = vrot.slane %v13054_v38, %v22779_v49 }
 0x374   : > { %30394 = vst [vmem:[#allocation121_spill] sm:$0xff] %v24374_v37  ;;  %30396 = vst [vmem:[#allocation122_spill] sm:$0xff] %v24382_v35  ;;  %v24388_v54 = vrot.slane %v13310_v9, %v22779_v49  ;;  %v24391_v11 = vrot.slane %v13317_v34, %v22779_v49  ;;  %v24394_v15 = vrot.slane %v13326_v41, %v22779_v49 }
 0x375   : > { %30397 = vst [vmem:[#allocation123_spill] sm:$0xff] %v24385_v59  ;;  %30401 = vst [vmem:[#allocation127_spill] sm:$0xff] %v24397_v42  ;;  %9086 = vxpose.xlu0.b32.start.end [1/1] (short) (narrow) %v3290_v22, 8  ;;  %v24402_v31 = vpop.trf.xlu0  ;;  %v24405_v43 = vrot.slane %v17143_v32, %v22788_v62  ;;  %v13333_v34 = vrot.slane %v13319_v2, %v22788_v62  ;;  %v3331_v38 = vrot.slane %v24214_v3, %v22779_v49 }
 0x376   : > { %30398 = vst [vmem:[#allocation124_spill] sm:$0xff] %v24388_v54  ;;  %30399 = vst [vmem:[#allocation125_spill] sm:$0xff] %v24391_v11  ;;  %v17519_v5 = vcombine.high %v24385_v59, %v24388_v54  ;;  %v17551_v22 = vcombine.high %v24397_v42, %v24391_v11  ;;  %v17655_v32 = vcombine.high %v24400_v21, %v24394_v15 }
 0x377   : > { %30400 = vst [vmem:[#allocation126_spill] sm:$0xff] %v24394_v15  ;;  %30402 = vst [vmem:[#allocation128_spill] sm:$0xff] %v24400_v21  ;;  %v24410_v27 = vpop.trf.xlu1  ;;  %9118 = vxpose.xlu1.b32.start.end [1/1] (short) (narrow) %v3300_v14, 8  ;;  %v3316_v56 = vrot.slane %v24304_v12, %v22779_v49  ;;  %v3333_v2 = vcombine.high %v24274_v28, %v24218_v7  ;;  %v30406_v41 = vcombine.low %v24274_v28, %v24218_v7  ;;  %v30425_v15 = vld [vmem:[#allocation8_spill] sm:$0xff] }
 0x378   : > { %30403 = vst [vmem:[#allocation129_spill] sm:$0xff] %v24402_v31  ;;  %30404 = vst [vmem:[#allocation130_spill] sm:$0xff] %v24405_v43  ;;  %v13061_v60 = vrot.slane %v13047_v18, %v22788_v62  ;;  %v3301_v26 = vcombine.high %v3297_v36, %v30287_v19  ;;  %v24435_v3 = vrot.slane %v17519_v5, %v22788_v62 }
 0x379   : > { %30405 = vst [vmem:[#allocation131_spill] sm:$0xff] %v24410_v27  ;;  %v3340_v14 = vrot.slane %v30406_v41, %v22788_v62  ;;  %9150 = vxpose.xlu0.b32.start.end [1/1] (short) (narrow) %v3297_v36, 8  ;;  %v24431_v9 = vpop.trf.xlu0  ;;  %v24438_v12 = vrot.slane %v17551_v22, %v22788_v62  ;;  %v24441_v4 = vrot.slane %v13333_v34, %v22779_v49  ;;  %v30417_v22 = vld [vmem:[#allocation30_spill] sm:$0xff] }
 0x37a   : > { %30407 = vst [vmem:[#allocation132_spill] sm:$0xff] %v24431_v9  ;;  %30408 = vst [vmem:[#allocation133_spill] sm:$0xff] %v24435_v3  ;;  %v3348_v7 = vcombine.low %v3316_v56, %v3331_v38  ;;  %v24446_v28 = vrot.slane %v13061_v60, %v22779_v49  ;;  %v3347_v5 = vrot.slane %v3333_v2, %v22788_v62  ;;  %v30416_v2 = vld [vmem:[#allocation27_spill] sm:$0xff] }
 0x37b   : > { %30409 = vst [vmem:[#allocation134_spill] sm:$0xff] %v24438_v12  ;;  %30410 = vst [vmem:[#allocation135_spill] sm:$0xff] %v24441_v4  ;;  %v24443_v53 = vpop.trf.xlu1  ;;  %9182 = vxpose.xlu1.b32.start.end [1/1] (short) (narrow) %v3301_v26, 8  ;;  %v3364_v36 = vcombine.high %v3340_v14, %v30287_v19  ;;  %v24457_v34 = vrot.slane %v17655_v32, %v22788_v62  ;;  %v3349_v42 = vcombine.high %v3316_v56, %v3331_v38 }
 0x37c   : > { %30411 = vst [vmem:[#allocation136_spill] sm:$0xff] %v24443_v53  ;;  %30412 = vst [vmem:[#allocation137_spill] sm:$0xff] %v24446_v28  ;;  %v17687_v26 = vcombine.high %v24446_v28, %v24441_v4  ;;  %v3390_v11 = vrot.slane %v30416_v2, %v22779_v49  ;;  %v3375_v59 = vrot.slane %v30417_v22, %v22779_v49 }
 0x37d   : > { %9214 = vxpose.xlu0.b32.start.end [1/1] (short) (narrow) %v3340_v14, 8  ;;  %v24448_v18 = vpop.trf.xlu0  ;;  %30415 = vst [vmem:[#allocation140_spill] sm:$0xff] %v24457_v34  ;;  %v3365_v32 = vcombine.high %v3347_v5, %v30287_v19  ;;  %v3356_v54 = vrot.slane %v3348_v7, %v22788_v62  ;;  %v3383_v14 = vcombine.high %v30416_v2, %v30287_v19 }
 0x37e   : > { %30413 = vst [vmem:[#allocation138_spill] sm:$0xff] %v24448_v18  ;;  %v24474_v28 = vrot.slane %v17687_v26, %v22788_v62  ;;  %v3398_v12 = vcombine.low %v3375_v59, %v3390_v11 }
 0x37f   : > { %v24454_v41 = vpop.trf.xlu1  ;;  %9246 = vxpose.xlu1.b32.start.end [1/1] (short) (narrow) %v3364_v36, 8  ;;  %v3366_v26 = vcombine.high %v3356_v54, %v30287_v19  ;;  %v3397_v38 = vrot.slane %v3383_v14, %v22779_v49 }
 0x380   : > { %30414 = vst [vmem:[#allocation139_spill] sm:$0xff] %v24454_v41  ;;  %30419 = vst [vmem:[#allocation30_spill] sm:$0xff] %v24474_v28  ;;  %v3399_v28 = vcombine.high %v3375_v59, %v3390_v11  ;;  %v3406_v34 = vrot.slane %v3398_v12, %v22788_v62  ;;  %v30422_v59 = vld [vmem:[#allocation29_spill] sm:$0xff]  ;;  %v30423_v12 = vld [vmem:[#allocation31_spill] sm:$0xff] }
 0x381   : > { %9278 = vxpose.xlu0.b32.start.end [1/1] (short) (narrow) %v3347_v5, 8  ;;  %v24469_v36 = vpop.trf.xlu0  ;;  %v3368_v5 = vcombine.high %v30417_v22, %v30287_v19  ;;  %v3456_v11 = vrot.slane %v30422_v59, %v22779_v49  ;;  %v3441_v35 = vrot.slane %v30423_v12, %v22779_v49 }
 0x382   : > { %30418 = vst [vmem:[#allocation27_spill] sm:$0xff] %v24469_v36  ;;  %v3413_v14 = vrot.slane %v3399_v28, %v22788_v62 }
 0x383   : > { %v24476_v60 = vpop.trf.xlu1  ;;  %9310 = vxpose.xlu1.b32.start.end [1/1] (short) (narrow) %v3365_v32, 8  ;;  %v3363_v32 = vrot.slane %v3349_v42, %v22788_v62  ;;  %v3382_v56 = vrot.slane %v3368_v5, %v22779_v49  ;;  %v3464_v39 = vcombine.low %v3441_v35, %v3456_v11 }
 0x384   : > { %30420 = vst [vmem:[#allocation141_spill] sm:$0xff] %v24476_v60  ;;  %v3431_v4 = vcombine.high %v3413_v14, %v30287_v19 }
 0x385   : > { %9342 = vxpose.xlu0.b32.start.end [1/1] (short) (narrow) %v3356_v54, 8  ;;  %v24486_v7 = vpop.trf.xlu0  ;;  %v3367_v22 = vcombine.high %v3363_v32, %v30287_v19  ;;  %v3414_v54 = vcombine.low %v3382_v56, %v3397_v38 }
 0x387   : > { %v24490_v3 = vpop.trf.xlu1  ;;  %9374 = vxpose.xlu1.b32.start.end [1/1] (short) (narrow) %v3366_v26, 8  ;;  %v3430_v26 = vcombine.high %v3406_v34, %v30287_v19  ;;  %v3422_v21 = vrot.slane %v3414_v54, %v22788_v62  ;;  %v3449_v54 = vcombine.high %v30422_v59, %v30287_v19 }
 0x388   : > { %30421 = vst [vmem:[#allocation142_spill] sm:$0xff] %v24490_v3  ;;  %v30428_v3 = vld [vmem:[#allocation10_spill] sm:$0xff] }
 0x389   : > { %9406 = vxpose.xlu0.b32.start.end [1/1] (short) (narrow) %v3363_v32, 8  ;;  %v24494_v2 = vpop.trf.xlu0  ;;  %v3415_v32 = vcombine.high %v3382_v56, %v3397_v38  ;;  %v3566_v38 = vcombine.high %v30425_v15, %v30287_v19  ;;  %v24524_v56 = vrot.slane %v30425_v15, %v22779_v49  ;;  %v3432_v30 = vcombine.high %v3422_v21, %v30287_v19  ;;  %v30427_v15 = vld [vmem:[#allocation9_spill] sm:$0xff] }
 0x38a   : > { %v3647_v60 = vcombine.high %v30427_v15, %v30287_v19  ;;  %v24556_v36 = vrot.slane %v30428_v3, %v22779_v49  ;;  %v24563_v46 = vrot.slane %v3449_v54, %v22779_v49 }
 0x38b   : > { %v24498_v43 = vpop.trf.xlu1  ;;  %9438 = vxpose.xlu1.b32.start.end [1/1] (short) (narrow) %v3367_v22, 8  ;;  %v3429_v55 = vrot.slane %v3415_v32, %v22788_v62  ;;  %v24544_v59 = vrot.slane %v3566_v38, %v22779_v49  ;;  %v30430_v38 = vld [vmem:[#allocation12_spill] sm:$0xff] }
 0x38c   : > { %v3698_v10 = vcombine.high %v30430_v38, %v30287_v19  ;;  %v24573_v61 = vrot.slane %v3647_v60, %v22779_v49 }
 0x38d   : > { %9470 = vxpose.xlu0.b32.start.end [1/1] (short) (narrow) %v3406_v34, 8  ;;  %v24500_v42 = vpop.trf.xlu0  ;;  %v30424_v34 = vld [vmem:[#allocation7_spill] sm:$0xff] }
 0x38e   : > { %v3581_v28 = vcombine.high %v30424_v34, %v30287_v19 }
 0x38f   : > { %v24504_v5 = vpop.trf.xlu1  ;;  %9502 = vxpose.xlu1.b32.start.end [1/1] (short) (narrow) %v3430_v26, 8  ;;  %v24518_v26 = vrot.slane %v30424_v34, %v22779_v49 }
 0x390   : > { %v24541_v18 = vrot.slane %v3581_v28, %v22779_v49  ;;  %v30429_v28 = vld [vmem:[#allocation11_spill] sm:$0xff] }
 0x391   : > { %9534 = vxpose.xlu0.b32.start.end [1/1] (short) (narrow) %v3413_v14, 8  ;;  %v24510_v22 = vpop.trf.xlu0  ;;  %v3434_v14 = vcombine.high %v30423_v12, %v30287_v19  ;;  %v3596_v12 = vcombine.low %v24524_v56, %v24518_v26  ;;  %v3713_v16 = vcombine.high %v30429_v28, %v30287_v19  ;;  %v24580_v54 = vrot.slane %v30429_v28, %v22779_v49 }
 0x392   : > { %v3613_v28 = vcombine.high %v24544_v59, %v24541_v18 }
 0x393   : > { %v24526_v58 = vpop.trf.xlu1  ;;  %9566 = vxpose.xlu1.b32.start.end [1/1] (short) (narrow) %v3431_v4, 8  ;;  %v3632_v4 = vcombine.high %v30428_v3, %v30287_v19  ;;  %v24566_v23 = vrot.slane %v3434_v14, %v22779_v49  ;;  %v3472_v3 = vrot.slane %v3464_v39, %v22788_v62  ;;  %v30432_v39 = vld [vmem:[#allocation13_spill] sm:$0xff]  ;;  %v30433_v14 = vld [vmem:[#allocation14_spill] sm:$0xff]  ;;  %v24647_v6 = vrot.slane %v3596_v12, %v22788_v62 }
 0x394   : > { %v3779_v60 = vcombine.high %v30432_v39, %v30287_v19  ;;  %v24624_v51 = vrot.slane %v30432_v39, %v22779_v49 }
 0x395   : > { %9598 = vxpose.xlu0.b32.start.end [1/1] (short) (narrow) %v3422_v21, 8  ;;  %v24532_v34 = vpop.trf.xlu0  ;;  %v24550_v21 = vrot.slane %v30427_v15, %v22779_v49  ;;  %v3465_v15 = vcombine.high %v3441_v35, %v3456_v11  ;;  %v24576_v20 = vrot.slane %v3632_v4, %v22779_v49  ;;  %v24584_v35 = vrot.slane %v30430_v38, %v22779_v49  ;;  %v30439_v38 = vld [vmem:[#allocation15_spill] sm:$0xff] }
 0x396   : > { %30426 = vst [vmem:[#allocation29_spill] sm:$0xff] %v24532_v34  ;;  %v3597_v11 = vcombine.high %v24524_v56, %v24518_v26  ;;  %v3764_v4 = vcombine.high %v30433_v14, %v30287_v19  ;;  %v24601_v26 = vrot.slane %v3713_v16, %v22779_v49  ;;  %v24604_v56 = vrot.slane %v3698_v10, %v22779_v49 }
 0x397   : > { %v24552_v32 = vpop.trf.xlu1  ;;  %9630 = vxpose.xlu1.b32.start.end [1/1] (short) (narrow) %v3432_v30, 8  ;;  %v3433_v30 = vcombine.high %v3429_v55, %v30287_v19  ;;  %v3480_v52 = vcombine.low %v24566_v23, %v24563_v46  ;;  %v3845_v39 = vcombine.high %v30439_v38, %v30287_v19  ;;  %v24663_v12 = vrot.slane %v30439_v38, %v22779_v49 }
 0x398   : > { %v24634_v16 = vrot.slane %v3764_v4, %v22779_v49  ;;  %v30441_v4 = vld [vmem:[#allocation33_spill] sm:$0xff]  ;;  %v3515_v38 = vcombine.high %v30440_v24, %v30287_v19 }
 0x399   : > { %9662 = vxpose.xlu0.b32.start.end [1/1] (short) (narrow) %v3429_v55, 8  ;;  %v24568_v17 = vpop.trf.xlu0  ;;  %v3612_v55 = vcombine.low %v24544_v59, %v24541_v18  ;;  %v3496_v18 = vcombine.high %v3472_v3, %v30287_v19  ;;  %v3479_v59 = vrot.slane %v3465_v15, %v22788_v62  ;;  %v24631_v15 = vrot.slane %v30433_v14, %v22779_v49 }
 0x39a   : > { %30431 = vst [vmem:[#allocation31_spill] sm:$0xff] %v24568_v17  ;;  %30437 = vst [vmem:[#allocation10_spill] sm:$0xff] %v24634_v16  ;;  %v3481_v14 = vcombine.high %v24566_v23, %v24563_v46  ;;  %v24653_v34 = vrot.slane %v30441_v4, %v22779_v49  ;;  %v3488_v17 = vrot.slane %v3480_v52, %v22788_v62  ;;  %v30444_v46 = vld [vmem:[#allocation16_spill] sm:$0xff]  ;;  %v30451_v16 = vld [vmem:[#allocation18_spill] sm:$0xff] }
 0x39b   : > { %v24594_v45 = vpop.trf.xlu1  ;;  %9694 = vxpose.xlu1.b32.start.end [1/1] (short) (narrow) %v3433_v30, 8  ;;  %v3497_v47 = vcombine.high %v3479_v59, %v30287_v19  ;;  %30443 = vst [vmem:[#allocation13_spill] sm:$0xff] %v24663_v12  ;;  %v3830_v23 = vcombine.high %v30444_v46, %v30287_v19  ;;  %v24690_v52 = vcombine.high %v24647_v6, %v30287_v19 }
 0x39c   : > { %30434 = vst [vmem:[#allocation7_spill] sm:$0xff] %v24594_v45  ;;  %v24669_v45 = vrot.slane %v30444_v46, %v22779_v49  ;;  %v24684_v46 = vrot.slane %v3845_v39, %v22779_v49  ;;  %v3495_v53 = vrot.slane %v3481_v14, %v22788_v62  ;;  %v24706_v31 = vrot.slane %v3612_v55, %v22788_v62 }
 0x39d   : > { %9726 = vxpose.xlu0.b32.start.end [1/1] (short) (narrow) %v3472_v3, 8  ;;  %v24610_v30 = vpop.trf.xlu0  ;;  %v24627_v3 = vrot.slane %v3779_v60, %v22779_v49  ;;  %v24644_v60 = vrot.slane %v30440_v24, %v22779_v49  ;;  %v24700_v39 = vrot.slane %v3830_v23, %v22779_v49  ;;  %v24717_v23 = vrot.slane %v3613_v28, %v22788_v62 }
 0x39e   : > { %30435 = vst [vmem:[#allocation8_spill] sm:$0xff] %v24610_v30  ;;  %30445 = vst [vmem:[#allocation14_spill] sm:$0xff] %v24669_v45 }
 0x39f   : > { %30436 = vst [vmem:[#allocation9_spill] sm:$0xff] %v24627_v3  ;;  %v24636_v10 = vpop.trf.xlu1  ;;  %9758 = vxpose.xlu1.b32.start.end [1/1] (short) (narrow) %v3496_v18, 8  ;;  %30447 = vst [vmem:[#allocation32_spill] sm:$0xff] %v24684_v46  ;;  %v3531_v55 = vcombine.high %v24653_v34, %v24644_v60 }
 0x3a0   : > { %30438 = vst [vmem:[#allocation11_spill] sm:$0xff] %v24636_v10  ;;  %v24697_v10 = vrot.slane %v3597_v11, %v22788_v62  ;;  %30448 = vst [vmem:[#allocation33_spill] sm:$0xff] %v24700_v39 }
 0x3a1   : > { %9790 = vxpose.xlu0.b32.start.end [1/1] (short) (narrow) %v3479_v59, 8  ;;  %v24655_v18 = vpop.trf.xlu0  ;;  %v3530_v59 = vcombine.low %v24653_v34, %v24644_v60  ;;  %v30450_v34 = vld [vmem:[#allocation17_spill] sm:$0xff]  ;;  %v3545_v33 = vrot.slane %v3531_v55, %v22788_v62  ;;  %v24776_v55 = vrot.slane %v30451_v16, %v22779_v49 }
 0x3a2   : > { %30442 = vst [vmem:[#allocation12_spill] sm:$0xff] %v24655_v18  ;;  %v3500_v18 = vcombine.high %v30441_v4, %v30287_v19  ;;  %v3911_v60 = vcombine.high %v30450_v34, %v30287_v19  ;;  %v24738_v9 = vrot.slane %v30450_v34, %v22779_v49  ;;  %v24754_v34 = vcombine.high %v24706_v31, %v30287_v19 }
 0x3a3   : > { %v24679_v30 = vpop.trf.xlu1  ;;  %9822 = vxpose.xlu1.b32.start.end [1/1] (short) (narrow) %v3497_v47, 8  ;;  %v3498_v47 = vcombine.high %v3488_v17, %v30287_v19 }
 0x3a4   : > { %30446 = vst [vmem:[#allocation15_spill] sm:$0xff] %v24679_v30  ;;  %v3514_v4 = vrot.slane %v3500_v18, %v22779_v49  ;;  %v13967_v30 = vcombine.high %v23697_v29, %v23725_v63  ;;  %v3499_v18 = vcombine.high %v3495_v53, %v30287_v19 }
 0x3a5   : > { %9854 = vxpose.xlu0.b32.start.end [1/1] (short) (narrow) %v3488_v17, 8  ;;  %v7886_v24 = vpop.trf.xlu0  ;;  %v24711_v17 = vrot.slane %v3515_v38, %v22779_v49  ;;  %v14239_v38 = vcombine.high %v23758_v44, %v24349_v1 }
 0x3a6   : > { %v14223_v41 = vcombine.high %v23746_v50, %v7886_v24  ;;  %v14222_v11 = vcombine.low %v23746_v50, %v7886_v24  ;;  %v13966_v50 = vcombine.low %v23697_v29, %v23725_v63  ;;  %v14238_v24 = vcombine.low %v23758_v44, %v24349_v1 }
 0x3a7   : > { %v24714_v14 = vpop.trf.xlu1  ;;  %9886 = vxpose.xlu1.b32.start.end [1/1] (short) (narrow) %v3498_v47, 8  ;;  %v3538_v47 = vrot.slane %v3530_v59, %v22788_v62  ;;  %v13951_v29 = vcombine.high %v23687_v13, %v23709_v25  ;;  %v13950_v44 = vcombine.low %v23687_v13, %v23709_v25  ;;  %v24750_v59 = vcombine.high %v24697_v10, %v30287_v19 }
 0x3a8   : > { %30449 = vst [vmem:[#allocation16_spill] sm:$0xff] %v24714_v14  ;;  %v14237_v63 = vrot.slane %v14223_v41, %v22779_v49  ;;  %v14230_v1 = vrot.slane %v14222_v11, %v22779_v49  ;;  %v3546_v41 = vcombine.low %v3514_v4, %v24711_v17  ;;  %v13981_v13 = vrot.slane %v13967_v30, %v22779_v49 }
 0x3a9   : > { %9918 = vxpose.xlu0.b32.start.end [1/1] (short) (narrow) %v3495_v53, 8  ;;  %v24730_v28 = vpop.trf.xlu0  ;;  %v14253_v25 = vrot.slane %v14239_v38, %v22779_v49  ;;  %v13974_v11 = vrot.slane %v13966_v50, %v22779_v49  ;;  %v3562_v27 = vcombine.high %v3538_v47, %v30287_v19  ;;  %v13965_v8 = vrot.slane %v13951_v29, %v22779_v49 }
 0x3aa   : > { %v3547_v38 = vcombine.high %v3514_v4, %v24711_v17  ;;  %v13958_v50 = vrot.slane %v13950_v44, %v22779_v49  ;;  %v3563_v4 = vcombine.high %v3545_v33, %v30287_v19  ;;  %v3554_v17 = vrot.slane %v3546_v41, %v22788_v62 }
 0x3ab   : > { %v24746_v53 = vpop.trf.xlu1  ;;  %9950 = vxpose.xlu1.b32.start.end [1/1] (short) (narrow) %v3499_v18, 8  ;;  %v14246_v18 = vrot.slane %v14238_v24, %v22779_v49  ;;  %v14302_v12 = vcombine.low %v14237_v63, %v14253_v25  ;;  %v14303_v30 = vcombine.high %v14237_v63, %v14253_v25  ;;  %v14030_v14 = vcombine.low %v13965_v8, %v13981_v13 }
 0x3ac   : > { %v14031_v46 = vcombine.high %v13965_v8, %v13981_v13  ;;  %v14014_v29 = vcombine.low %v13958_v50, %v13974_v11  ;;  %v14015_v39 = vcombine.high %v13958_v50, %v13974_v11 }
 0x3ad   : > { %9982 = vxpose.xlu0.b32.start.end [1/1] (short) (narrow) %v3538_v47, 8  ;;  %v24763_v37 = vpop.trf.xlu0  ;;  %v14286_v45 = vcombine.low %v14230_v1, %v14246_v18  ;;  %v14287_v24 = vcombine.high %v14230_v1, %v14246_v18  ;;  %v3896_v47 = vcombine.high %v30451_v16, %v30287_v19  ;;  %v14310_v44 = vrot.slane %v14302_v12, %v22788_v62 }
 0x3ae   : > { %v14317_v1 = vrot.slane %v14303_v30, %v22788_v62  ;;  %v24789_v16 = vcombine.high %v24717_v23, %v30287_v19  ;;  %v14038_v11 = vrot.slane %v14030_v14, %v22788_v62  ;;  %v30455_v18 = vcombine.high %v24556_v36, %v24550_v21 }
 0x3af   : > { %v8046_v3 = vpop.trf.xlu1  ;;  %10014 = vxpose.xlu1.b32.start.end [1/1] (short) (narrow) %v3562_v27, 8  ;;  %v24783_v27 = vrot.slane %v3911_v60, %v22779_v49  ;;  %v14294_v8 = vrot.slane %v14286_v45, %v22788_v62  ;;  %v14301_v13 = vrot.slane %v14287_v24, %v22788_v62  ;;  %v30454_v60 = vcombine.low %v24556_v36, %v24550_v21 }
 0x3b0   : > { %v24803_v41 = vrot.slane %v3896_v47, %v22779_v49  ;;  %v14045_v45 = vrot.slane %v14031_v46, %v22788_v62  ;;  %v24811_v30 = vrot.slane %v30455_v18, %v22788_v62  ;;  %v14022_v50 = vrot.slane %v14014_v29, %v22788_v62 }
 0x3b1   : > { %10046 = vxpose.xlu0.b32.start.end [1/1] (short) (narrow) %v3545_v33, 8  ;;  %v24778_v63 = vpop.trf.xlu0  ;;  %v3561_v33 = vrot.slane %v3547_v38, %v22788_v62  ;;  %v24800_v12 = vrot.slane %v30454_v60, %v22788_v62  ;;  %v14029_v24 = vrot.slane %v14015_v39, %v22788_v62  ;;  %v3564_v14 = vcombine.high %v3554_v17, %v30287_v19 }
 0x3b2   : > { %30452 = vst [vmem:[#allocation17_spill] sm:$0xff] %v24778_v63  ;;  %v24826_v36 = vrot.slane %v14317_v1, %v22779_v49  ;;  %v14342_v21 = vcombine.low %v24746_v53, %v8046_v3  ;;  %v24830_v29 = vrot.slane %v14294_v8, %v22779_v49  ;;  %v24833_v39 = vrot.slane %v14301_v13, %v22779_v49 }
 0x3b3   : > { %v24793_v25 = vpop.trf.xlu1  ;;  %10078 = vxpose.xlu1.b32.start.end [1/1] (short) (narrow) %v3563_v4, 8  ;;  %v24823_v4 = vrot.slane %v14310_v44, %v22779_v49  ;;  %v14343_v60 = vcombine.high %v24746_v53, %v8046_v3  ;;  %v3565_v18 = vcombine.high %v3561_v33, %v30287_v19  ;;  %v24840_v44 = vrot.slane %v14038_v11, %v22779_v49 }
 0x3b4   : > { %30453 = vst [vmem:[#allocation18_spill] sm:$0xff] %v24793_v25  ;;  %30458 = vst [vmem:[#allocation145_spill] sm:$0xff] %v24826_v36  ;;  %v24843_v1 = vrot.slane %v14045_v45, %v22779_v49  ;;  %v14070_v8 = vcombine.low %v24074_v57, %v24101_v0  ;;  %v14326_v13 = vcombine.low %v24730_v28, %v24763_v37 }
 0x3b5   : > { %10110 = vxpose.xlu0.b32.start.end [1/1] (short) (narrow) %v3554_v17, 8  ;;  %v24817_v47 = vpop.trf.xlu0  ;;  %30457 = vst [vmem:[#allocation144_spill] sm:$0xff] %v24823_v4  ;;  %30459 = vst [vmem:[#allocation146_spill] sm:$0xff] %v24830_v29  ;;  %v24850_v46 = vrot.slane %v14022_v50, %v22779_v49  ;;  %v24853_v3 = vrot.slane %v14029_v24, %v22779_v49  ;;  %v14071_v53 = vcombine.high %v24074_v57, %v24101_v0 }
 0x3b6   : > { %30456 = vst [vmem:[#allocation143_spill] sm:$0xff] %v24817_v47  ;;  %30460 = vst [vmem:[#allocation147_spill] sm:$0xff] %v24833_v39  ;;  %v14327_v11 = vcombine.high %v24730_v28, %v24763_v37  ;;  %v14350_v38 = vrot.slane %v14342_v21, %v22779_v49  ;;  %v18487_v50 = vcombine.high %v24840_v44, %v24823_v4 }
 0x3b7   : > { %v24836_v17 = vpop.trf.xlu1  ;;  %10142 = vxpose.xlu1.b32.start.end [1/1] (short) (narrow) %v3564_v14, 8  ;;  %30462 = vst [vmem:[#allocation149_spill] sm:$0xff] %v24840_v44  ;;  %30463 = vst [vmem:[#allocation150_spill] sm:$0xff] %v24843_v1  ;;  %v14054_v14 = vcombine.low %v24061_v40, %v24089_v48  ;;  %v18519_v24 = vcombine.high %v24843_v1, %v24826_v36  ;;  %v14055_v0 = vcombine.high %v24061_v40, %v24089_v48  ;;  %v30468_v48 = vld [vmem:[#allocation19_spill] sm:$0xff] }
 0x3b8   : > { %30461 = vst [vmem:[#allocation148_spill] sm:$0xff] %v24836_v17  ;;  %30464 = vst [vmem:[#allocation151_spill] sm:$0xff] %v24850_v46  ;;  %v14357_v57 = vrot.slane %v14343_v60, %v22779_v49  ;;  %v18351_v28 = vcombine.high %v24850_v46, %v24830_v29  ;;  %v14078_v21 = vrot.slane %v14070_v8, %v22779_v49 }
 0x3b9   : > { %30465 = vst [vmem:[#allocation152_spill] sm:$0xff] %v24853_v3  ;;  %10174 = vxpose.xlu0.b32.start.end [1/1] (short) (narrow) %v3561_v33, 8  ;;  %v24859_v45 = vpop.trf.xlu0  ;;  %v18383_v33 = vcombine.high %v24853_v3, %v24833_v39  ;;  %v14334_v44 = vrot.slane %v14326_v13, %v22779_v49  ;;  %v24880_v1 = vrot.slane %v18487_v50, %v22788_v62 }
 0x3ba   : > { %v24883_v40 = vrot.slane %v18519_v24, %v22788_v62  ;;  %v3977_v60 = vcombine.high %v30468_v48, %v30287_v19  ;;  %v14341_v46 = vrot.slane %v14327_v11, %v22779_v49  ;;  %v30469_v8 = vcombine.low %v24576_v20, %v24573_v61 }
 0x3bb   : > { %v24871_v37 = vpop.trf.xlu1  ;;  %10206 = vxpose.xlu1.b32.start.end [1/1] (short) (narrow) %v3565_v18, 8  ;;  %30466 = vst [vmem:[#allocation153_spill] sm:$0xff] %v24880_v1  ;;  %v14085_v18 = vrot.slane %v14071_v53, %v22779_v49  ;;  %v14062_v50 = vrot.slane %v14054_v14, %v22779_v49  ;;  %v14390_v24 = vcombine.low %v14334_v44, %v14350_v38 }
 0x3bc   : > { %30467 = vst [vmem:[#allocation154_spill] sm:$0xff] %v24883_v40  ;;  %v24896_v13 = vrot.slane %v30469_v8, %v22788_v62  ;;  %v14391_v39 = vcombine.high %v14334_v44, %v14350_v38  ;;  %v24903_v53 = vrot.slane %v30468_v48, %v22779_v49  ;;  %v14406_v11 = vcombine.low %v14341_v46, %v14357_v57 }
 0x3bd   : > { %10238 = vxpose.xlu0.b32.start.end [1/1] (short) (narrow) %v24647_v6, 8  ;;  %v24890_v3 = vpop.trf.xlu0  ;;  %v14069_v6 = vrot.slane %v14055_v0, %v22779_v49  ;;  %v14407_v36 = vcombine.high %v14341_v46, %v14357_v57  ;;  %v14118_v8 = vcombine.low %v14062_v50, %v14078_v21  ;;  %v14119_v63 = vcombine.high %v14062_v50, %v14078_v21 }
 0x3be   : > { %v24911_v38 = vcombine.high %v24800_v12, %v30287_v19  ;;  %v24915_v44 = vcombine.high %v24811_v30, %v30287_v19  ;;  %v14398_v57 = vrot.slane %v14390_v24, %v22788_v62  ;;  %v14405_v21 = vrot.slane %v14391_v39, %v22788_v62 }
 0x3bf   : > { %v24906_v4 = vpop.trf.xlu1  ;;  %10270 = vxpose.xlu1.b32.start.end [1/1] (short) (narrow) %v24690_v52, 8  ;;  %v14134_v0 = vcombine.low %v14069_v6, %v14085_v18  ;;  %v14135_v48 = vcombine.high %v14069_v6, %v14085_v18  ;;  %v24923_v52 = vrot.slane %v18351_v28, %v22788_v62  ;;  %v24928_v50 = vrot.slane %v18383_v33, %v22788_v62 }
 0x3c0   : > { %v14414_v14 = vrot.slane %v14406_v11, %v22788_v62  ;;  %v14421_v28 = vrot.slane %v14407_v36, %v22788_v62  ;;  %v24942_v39 = vrot.slane %v3977_v60, %v22779_v49  ;;  %v14126_v24 = vrot.slane %v14118_v8, %v22788_v62 }
 0x3c1   : > { %10302 = vxpose.xlu0.b32.start.end [1/1] (short) (narrow) %v24697_v10, 8  ;;  %v24920_v46 = vpop.trf.xlu0  ;;  %30470 = vst [vmem:[#allocation19_spill] sm:$0xff] %v24923_v52  ;;  %30471 = vst [vmem:[#allocation155_spill] sm:$0xff] %v24928_v50  ;;  %v30472_v10 = vld [vmem:[#allocation20_spill] sm:$0xff]  ;;  %v14133_v29 = vrot.slane %v14119_v63, %v22788_v62  ;;  %v14142_v18 = vrot.slane %v14134_v0, %v22788_v62  ;;  %v14149_v11 = vrot.slane %v14135_v48, %v22788_v62  ;;  %v30486_v52 = vld [vmem:[#allocation22_spill] sm:$0xff] }
 0x3c2   : > { %v3962_v6 = vcombine.high %v30472_v10, %v30287_v19  ;;  %v24946_v33 = vrot.slane %v30472_v10, %v22779_v49  ;;  %v24960_v10 = vrot.slane %v14398_v57, %v22779_v49  ;;  %v24963_v8 = vrot.slane %v14405_v21, %v22779_v49 }
 0x3c3   : > { %v24938_v47 = vpop.trf.xlu1  ;;  %10334 = vxpose.xlu1.b32.start.end [1/1] (short) (narrow) %v24750_v59, 8  ;;  %v24967_v63 = vcombine.high %v24896_v13, %v30287_v19  ;;  %v24979_v60 = vrot.slane %v14414_v14, %v22779_v49  ;;  %v24982_v57 = vrot.slane %v14421_v28, %v22779_v49  ;;  %v30478_v59 = vcombine.low %v24584_v35, %v24580_v54 }
 0x3c4   : > { %30473 = vst [vmem:[#allocation20_spill] sm:$0xff] %v24960_v10  ;;  %30474 = vst [vmem:[#allocation156_spill] sm:$0xff] %v24963_v8  ;;  %v24976_v48 = vrot.slane %v3962_v6, %v22779_v49  ;;  %v24998_v6 = vrot.slane %v14126_v24, %v22779_v49  ;;  %v25001_v28 = vrot.slane %v14133_v29, %v22779_v49 }
 0x3c5   : > { %10366 = vxpose.xlu0.b32.start.end [1/1] (short) (narrow) %v24706_v31, 8  ;;  %v24953_v36 = vpop.trf.xlu0  ;;  %v30475_v31 = vcombine.high %v24576_v20, %v24573_v61  ;;  %30476 = vst [vmem:[#allocation157_spill] sm:$0xff] %v24979_v60  ;;  %30477 = vst [vmem:[#allocation158_spill] sm:$0xff] %v24982_v57  ;;  %v24991_v20 = vrot.slane %v30478_v59, %v22788_v62  ;;  %v25006_v50 = vrot.slane %v14142_v18, %v22779_v49 }
 0x3c6   : > { %30479 = vst [vmem:[#allocation159_spill] sm:$0xff] %v24998_v6  ;;  %30480 = vst [vmem:[#allocation160_spill] sm:$0xff] %v25001_v28  ;;  %v25009_v59 = vrot.slane %v14149_v11, %v22779_v49  ;;  %v30484_v24 = vcombine.high %v24584_v35, %v24580_v54  ;;  %v18607_v11 = vcombine.high %v24998_v6, %v24960_v10 }
 0x3c7   : > { %v24973_v0 = vrot.slane %v30475_v31, %v22788_v62  ;;  %v24984_v21 = vpop.trf.xlu1  ;;  %10398 = vxpose.xlu1.b32.start.end [1/1] (short) (narrow) %v24754_v34, 8  ;;  %v30481_v34 = vld [vmem:[#allocation21_spill] sm:$0xff]  ;;  %v4028_v40 = vcombine.high %v30486_v52, %v30287_v19  ;;  %v25036_v54 = vrot.slane %v30486_v52, %v22779_v49 }
 0x3c8   : > { %v4043_v31 = vcombine.high %v30481_v34, %v30287_v19  ;;  %30482 = vst [vmem:[#allocation21_spill] sm:$0xff] %v25006_v50  ;;  %30483 = vst [vmem:[#allocation161_spill] sm:$0xff] %v25009_v59  ;;  %v25018_v14 = vrot.slane %v30484_v24, %v22788_v62  ;;  %v25022_v29 = vrot.slane %v30481_v34, %v22779_v49 }
 0x3c9   : > { %10430 = vxpose.xlu0.b32.start.end [1/1] (short) (narrow) %v24717_v23, 8  ;;  %v25012_v61 = vpop.trf.xlu0  ;;  %v25026_v18 = vcombine.high %v24973_v0, %v30287_v19  ;;  %v18639_v23 = vcombine.high %v25001_v28, %v24963_v8  ;;  %30487 = vst [vmem:[#allocation22_spill] sm:$0xff] %v25036_v54  ;;  %v18743_v34 = vcombine.high %v25006_v50, %v24979_v60 }
 0x3ca   : > { %30485 = vst [vmem:[#allocation162_spill] sm:$0xff] %v25022_v29  ;;  %v18775_v24 = vcombine.high %v25009_v59, %v24982_v57  ;;  %v25049_v8 = vcombine.high %v24991_v20, %v30287_v19  ;;  %v25052_v52 = vrot.slane %v18607_v11, %v22788_v62  ;;  %v25060_v10 = vrot.slane %v4043_v31, %v22779_v49 }
 0x3cb   : > { %v25038_v35 = vpop.trf.xlu1  ;;  %10462 = vxpose.xlu1.b32.start.end [1/1] (short) (narrow) %v24789_v16, 8  ;;  %v25055_v6 = vrot.slane %v18639_v23, %v22788_v62  ;;  %v30491_v28 = vcombine.low %v24604_v56, %v24601_v26  ;;  %v30492_v11 = vcombine.high %v24604_v56, %v24601_v26  ;;  %v12470_v31 = vcombine.low %v24498_v43, %v24504_v5 }
 0x3cc   : > { %30488 = vst [vmem:[#allocation163_spill] sm:$0xff] %v25052_v52  ;;  %30490 = vst [vmem:[#allocation165_spill] sm:$0xff] %v25060_v10  ;;  %v25083_v16 = vcombine.high %v25018_v14, %v30287_v19  ;;  %v25088_v50 = vrot.slane %v4028_v40, %v22779_v49  ;;  %v30494_v60 = vcombine.low %v24631_v15, %v24624_v51 }
 0x3cd   : > { %30489 = vst [vmem:[#allocation164_spill] sm:$0xff] %v25055_v6  ;;  %10494 = vxpose.xlu0.b32.start.end [1/1] (short) (narrow) %v24800_v12, 8  ;;  %v25063_v59 = vpop.trf.xlu0  ;;  %v25069_v57 = vrot.slane %v30491_v28, %v22788_v62  ;;  %v25075_v23 = vrot.slane %v30492_v11, %v22788_v62  ;;  %v12742_v12 = vcombine.low %v24526_v58, %v24552_v32 }
 0x3ce   : > { %30493 = vst [vmem:[#allocation166_spill] sm:$0xff] %v25088_v50  ;;  %v25101_v1 = vrot.slane %v30494_v60, %v22788_v62  ;;  %v12454_v40 = vcombine.low %v24486_v7, %v24494_v2  ;;  %v12471_v28 = vcombine.high %v24498_v43, %v24504_v5  ;;  %v12726_v26 = vcombine.low %v24500_v42, %v24510_v22 }
 0x3cf   : > { %v25094_v11 = vpop.trf.xlu1  ;;  %10526 = vxpose.xlu1.b32.start.end [1/1] (short) (narrow) %v24911_v38, 8  ;;  %v12743_v56 = vcombine.high %v24526_v58, %v24552_v32  ;;  %v12455_v38 = vcombine.high %v24486_v7, %v24494_v2  ;;  %v25118_v60 = vcombine.high %v25069_v57, %v30287_v19  ;;  %v25122_v43 = vcombine.high %v25075_v23, %v30287_v19 }
 0x3d0   : > { %v25125_v5 = vrot.slane %v18743_v34, %v22788_v62  ;;  %v12478_v58 = vrot.slane %v12470_v31, %v22779_v49  ;;  %v12750_v32 = vrot.slane %v12742_v12, %v22779_v49  ;;  %v25130_v7 = vrot.slane %v18775_v24, %v22788_v62 }
 0x3d1   : > { %10558 = vxpose.xlu0.b32.start.end [1/1] (short) (narrow) %v24811_v30, 8  ;;  %v25114_v25 = vpop.trf.xlu0  ;;  %v12727_v34 = vcombine.high %v24500_v42, %v24510_v22  ;;  %v14478_v31 = vcombine.low %v24871_v37, %v24906_v4  ;;  %v12462_v24 = vrot.slane %v12454_v40, %v22779_v49  ;;  %v12485_v12 = vrot.slane %v12471_v28, %v22779_v49 }
 0x3d2   : > { %30495 = vst [vmem:[#allocation167_spill] sm:$0xff] %v25114_v25  ;;  %30496 = vst [vmem:[#allocation168_spill] sm:$0xff] %v25125_v5  ;;  %v12734_v2 = vrot.slane %v12726_v26, %v22779_v49  ;;  %v12757_v30 = vrot.slane %v12743_v56, %v22779_v49  ;;  %v14462_v25 = vcombine.low %v24859_v45, %v24890_v3 }
 0x3d3   : > { %30497 = vst [vmem:[#allocation169_spill] sm:$0xff] %v25130_v7  ;;  %v25142_v17 = vpop.trf.xlu1  ;;  %10590 = vxpose.xlu1.b32.start.end [1/1] (short) (narrow) %v24915_v44, 8  ;;  %v14479_v42 = vcombine.high %v24871_v37, %v24906_v4  ;;  %v12469_v26 = vrot.slane %v12455_v38, %v22779_v49  ;;  %v12518_v40 = vcombine.low %v12462_v24, %v12478_v58 }
 0x3d4   : > { %30498 = vst [vmem:[#allocation170_spill] sm:$0xff] %v25142_v17  ;;  %v12519_v56 = vcombine.high %v12462_v24, %v12478_v58  ;;  %v12790_v6 = vcombine.low %v12734_v2, %v12750_v32  ;;  %v12741_v52 = vrot.slane %v12727_v34, %v22779_v49  ;;  %v12791_v17 = vcombine.high %v12734_v2, %v12750_v32 }
 0x3d5   : > { %10622 = vxpose.xlu0.b32.start.end [1/1] (short) (narrow) %v24896_v13, 8  ;;  %v25154_v22 = vpop.trf.xlu0  ;;  %v14463_v4 = vcombine.high %v24859_v45, %v24890_v3  ;;  %v14486_v37 = vrot.slane %v14478_v31, %v22779_v49  ;;  %v12534_v44 = vcombine.low %v12469_v26, %v12485_v12  ;;  %v25170_v38 = vcombine.high %v25101_v1, %v30287_v19 }
 0x3d6   : > { %30499 = vst [vmem:[#allocation171_spill] sm:$0xff] %v25154_v22  ;;  %v12535_v22 = vcombine.high %v12469_v26, %v12485_v12  ;;  %v30501_v58 = vcombine.high %v24631_v15, %v24624_v51  ;;  %v12806_v2 = vcombine.low %v12741_v52, %v12757_v30  ;;  %v12807_v3 = vcombine.high %v12741_v52, %v12757_v30  ;;  %v30502_v26 = vld [vmem:[#allocation10_spill] sm:$0xff]  ;;  %v30503_v51 = vld [vmem:[#allocation9_spill] sm:$0xff] }
 0x3d7   : > { %v25165_v13 = vpop.trf.xlu1  ;;  %10654 = vxpose.xlu1.b32.start.end [1/1] (short) (narrow) %v24967_v63, 8  ;;  %v14470_v45 = vrot.slane %v14462_v25, %v22779_v49  ;;  %v14493_v34 = vrot.slane %v14479_v42, %v22779_v49  ;;  %v12526_v31 = vrot.slane %v12518_v40, %v22788_v62  ;;  %v12533_v24 = vrot.slane %v12519_v56, %v22788_v62 }
 0x3d8   : > { %30500 = vst [vmem:[#allocation172_spill] sm:$0xff] %v25165_v13  ;;  %v25176_v32 = vrot.slane %v30501_v58, %v22788_v62  ;;  %v12798_v12 = vrot.slane %v12790_v6, %v22788_v62  ;;  %v30504_v15 = vcombine.low %v30502_v26, %v30503_v51  ;;  %v12805_v52 = vrot.slane %v12791_v17, %v22788_v62 }
 0x3d9   : > { %10686 = vxpose.xlu0.b32.start.end [1/1] (short) (narrow) %v24973_v0, 8  ;;  %v8718_v63 = vpop.trf.xlu0  ;;  %v14477_v25 = vrot.slane %v14463_v4, %v22779_v49  ;;  %v14526_v30 = vcombine.low %v14470_v45, %v14486_v37  ;;  %v14527_v42 = vcombine.high %v14470_v45, %v14486_v37  ;;  %v12542_v40 = vrot.slane %v12534_v44, %v22788_v62 }
 0x3da   : > { %v25188_v58 = vrot.slane %v30504_v15, %v22788_v62  ;;  %v12549_v56 = vrot.slane %v12535_v22, %v22788_v62  ;;  %v25197_v6 = vcombine.high %v25176_v32, %v30287_v19  ;;  %v30505_v15 = vcombine.high %v30502_v26, %v30503_v51 }
 0x3db   : > { %v8750_v0 = vpop.trf.xlu1  ;;  %10718 = vxpose.xlu1.b32.start.end [1/1] (short) (narrow) %v25026_v18, 8  ;;  %v12814_v4 = vrot.slane %v12806_v2, %v22788_v62  ;;  %v12821_v37 = vrot.slane %v12807_v3, %v22788_v62  ;;  %v14542_v45 = vcombine.low %v14477_v25, %v14493_v34  ;;  %v14543_v18 = vcombine.high %v14477_v25, %v14493_v34 }
 0x3dc   : > { %v25203_v17 = vrot.slane %v30505_v15, %v22788_v62  ;;  %v25209_v22 = vrot.slane %v12526_v31, %v22779_v49  ;;  %v25212_v28 = vrot.slane %v12533_v24, %v22779_v49  ;;  %v25215_v26 = vrot.slane %v12798_v12, %v22779_v49 }
 0x3dd   : > { %10750 = vxpose.xlu0.b32.start.end [1/1] (short) (narrow) %v24991_v20, 8  ;;  %v8782_v44 = vpop.trf.xlu0  ;;  %v25218_v2 = vrot.slane %v12805_v52, %v22779_v49  ;;  %v14534_v3 = vrot.slane %v14526_v30, %v22788_v62  ;;  %v14541_v34 = vrot.slane %v14527_v42, %v22788_v62  ;;  %v25224_v31 = vrot.slane %v12542_v40, %v22779_v49 }
 0x3de   : > { %30506 = vst [vmem:[#allocation10_spill] sm:$0xff] %v25209_v22  ;;  %30507 = vst [vmem:[#allocation9_spill] sm:$0xff] %v25212_v28  ;;  %v14734_v7 = vcombine.low %v8718_v63, %v8782_v44  ;;  %v14735_v5 = vcombine.high %v8718_v63, %v8782_v44  ;;  %v25227_v24 = vrot.slane %v12549_v56, %v22779_v49 }
 0x3df   : > { %30508 = vst [vmem:[#allocation173_spill] sm:$0xff] %v25215_v26  ;;  %30509 = vst [vmem:[#allocation174_spill] sm:$0xff] %v25218_v2  ;;  %v8814_v20 = vpop.trf.xlu1  ;;  %10782 = vxpose.xlu1.b32.start.end [1/1] (short) (narrow) %v25049_v8, 8  ;;  %v25230_v12 = vrot.slane %v12814_v4, %v22779_v49  ;;  %v25233_v52 = vrot.slane %v12821_v37, %v22779_v49  ;;  %v14550_v25 = vrot.slane %v14542_v45, %v22788_v62 }
 0x3e0   : > { %30510 = vst [vmem:[#allocation175_spill] sm:$0xff] %v25224_v31  ;;  %30511 = vst [vmem:[#allocation176_spill] sm:$0xff] %v25227_v24  ;;  %v14750_v63 = vcombine.low %v8750_v0, %v8814_v20  ;;  %v14751_v51 = vcombine.high %v8750_v0, %v8814_v20  ;;  %v14557_v30 = vrot.slane %v14543_v18, %v22788_v62 }
 0x3e1   : > { %30512 = vst [vmem:[#allocation177_spill] sm:$0xff] %v25230_v12  ;;  %30513 = vst [vmem:[#allocation178_spill] sm:$0xff] %v25233_v52  ;;  %10814 = vxpose.xlu0.b32.start.end [1/1] (short) (narrow) %v25018_v14, 8  ;;  %v25238_v8 = vpop.trf.xlu0  ;;  %v14742_v42 = vrot.slane %v14734_v7, %v22779_v49  ;;  %v14749_v40 = vrot.slane %v14735_v5, %v22779_v49  ;;  %v25245_v15 = vrot.slane %v14534_v3, %v22779_v49 }
 0x3e2   : > { %v14758_v0 = vrot.slane %v14750_v63, %v22779_v49  ;;  %v14765_v56 = vrot.slane %v14751_v51, %v22779_v49  ;;  %v25248_v4 = vrot.slane %v14541_v34, %v22779_v49  ;;  %v16991_v14 = vcombine.high %v25209_v22, %v25215_v26 }
 0x3e3   : > { %v25250_v37 = vpop.trf.xlu1  ;;  %10846 = vxpose.xlu1.b32.start.end [1/1] (short) (narrow) %v25083_v16, 8  ;;  %v17023_v5 = vcombine.high %v25212_v28, %v25218_v2  ;;  %v18990_v63 = vrot.slane %v14557_v30, %v22779_v49  ;;  %v25319_v50 = vcombine.high %v25203_v17, %v30287_v19 }
 0x3e4   : > { %v14798_v7 = vcombine.low %v14742_v42, %v14758_v0  ;;  %v14799_v45 = vcombine.high %v14742_v42, %v14758_v0  ;;  %v14814_v18 = vcombine.low %v14749_v40, %v14765_v56  ;;  %v14815_v44 = vcombine.high %v14749_v40, %v14765_v56 }
 0x3e5   : > { %10878 = vxpose.xlu0.b32.start.end [1/1] (short) (narrow) %v25069_v57, 8  ;;  %v25258_v3 = vpop.trf.xlu0  ;;  %v25261_v34 = vrot.slane %v16991_v14, %v22788_v62  ;;  %v25264_v20 = vrot.slane %v17023_v5, %v22788_v62  ;;  %v18958_v0 = vrot.slane %v14550_v25, %v22779_v49  ;;  %v14511_v56 = vcombine.high %v24938_v47, %v24984_v21 }
 0x3e6   : > { %v14806_v51 = vrot.slane %v14798_v7, %v22788_v62  ;;  %v14813_v42 = vrot.slane %v14799_v45, %v22788_v62  ;;  %v14822_v57 = vrot.slane %v14814_v18, %v22788_v62  ;;  %v14829_v40 = vrot.slane %v14815_v44, %v22788_v62 }
 0x3e7   : > { %30514 = vst [vmem:[#allocation179_spill] sm:$0xff] %v25261_v34  ;;  %30515 = vst [vmem:[#allocation180_spill] sm:$0xff] %v25264_v20  ;;  %v14767_v14 = vcombine.high %v25238_v8, %v25258_v3  ;;  %v8942_v5 = vpop.trf.xlu1  ;;  %10910 = vxpose.xlu1.b32.start.end [1/1] (short) (narrow) %v25118_v60, 8  ;;  %v25297_v7 = vcombine.high %v25188_v58, %v30287_v19  ;;  %v14525_v13 = vrot.slane %v14511_v56, %v22779_v49 }
 0x3e8   : > { %v25283_v45 = vrot.slane %v14806_v51, %v22779_v49  ;;  %v25286_v18 = vrot.slane %v14813_v42, %v22779_v49  ;;  %v18974_v25 = vrot.slane %v14822_v57, %v22779_v49  ;;  %v19006_v44 = vrot.slane %v14829_v40, %v22779_v49  ;;  %v30516_v51 = vld [vmem:[#allocation14_spill] sm:$0xff]  ;;  %v30517_v42 = vld [vmem:[#allocation13_spill] sm:$0xff] }
 0x3e9   : > { %v14783_v16 = vcombine.high %v25250_v37, %v8942_v5  ;;  %10942 = vxpose.xlu0.b32.start.end [1/1] (short) (narrow) %v25075_v23, 8  ;;  %v25293_v60 = vpop.trf.xlu0  ;;  %v30518_v28 = vcombine.low %v30516_v51, %v30517_v42  ;;  %v14495_v57 = vcombine.high %v24920_v46, %v24953_v36  ;;  %v14781_v10 = vrot.slane %v14767_v14, %v22779_v49 }
 0x3ea   : > { %v18878_v30 = vcombine.low %v25245_v15, %v25283_v45  ;;  %v18910_v23 = vcombine.low %v25248_v4, %v25286_v18  ;;  %v19014_v40 = vcombine.low %v18958_v0, %v18974_v25  ;;  %v19046_v34 = vcombine.low %v18990_v63, %v19006_v44 }
 0x3eb   : > { %v25303_v2 = vrot.slane %v30518_v28, %v22788_v62  ;;  %v14797_v22 = vrot.slane %v14783_v16, %v22779_v49  ;;  %v25312_v26 = vpop.trf.xlu1  ;;  %10974 = vxpose.xlu1.b32.start.end [1/1] (short) (narrow) %v25122_v43, 8  ;;  %v19015_v20 = vcombine.high %v18958_v0, %v18974_v25  ;;  %v19047_v28 = vcombine.high %v18990_v63, %v19006_v44  ;;  %v30520_v63 = vld [vmem:[#allocation33_spill] sm:$0xff]  ;;  %v30521_v0 = vld [vmem:[#allocation32_spill] sm:$0xff] }
 0x3ec   : > { %v30519_v29 = vcombine.high %v30516_v51, %v30517_v42  ;;  %v14782_v54 = vcombine.low %v25250_v37, %v8942_v5  ;;  %v30522_v56 = vcombine.low %v30520_v63, %v30521_v0  ;;  %v30523_v25 = vcombine.high %v30520_v63, %v30521_v0 }
 0x3ed   : > { %11006 = vxpose.xlu0.b32.start.end [1/1] (short) (narrow) %v25101_v1, 8  ;;  %v25329_v43 = vpop.trf.xlu0  ;;  %v14509_v1 = vrot.slane %v14495_v57, %v22779_v49  ;;  %v14846_v5 = vcombine.low %v14781_v10, %v14797_v22  ;;  %v14847_v51 = vcombine.high %v14781_v10, %v14797_v22  ;;  %v25352_v42 = vcombine.high %v25303_v2, %v30287_v19 }
 0x3ee   : > { %v25325_v16 = vrot.slane %v30519_v29, %v22788_v62  ;;  %v25335_v14 = vrot.slane %v30522_v56, %v22788_v62  ;;  %v25341_v44 = vrot.slane %v30523_v25, %v22788_v62  ;;  %v30524_v29 = vcombine.low %v24776_v55, %v24738_v9 }
 0x3ef   : > { %v25354_v56 = vpop.trf.xlu1  ;;  %11038 = vxpose.xlu1.b32.start.end [1/1] (short) (narrow) %v25170_v38, 8  ;;  %v25358_v63 = vrot.slane %v18878_v30, %v22788_v62  ;;  %v25361_v0 = vrot.slane %v18910_v23, %v22788_v62  ;;  %v25364_v25 = vrot.slane %v19014_v40, %v22788_v62  ;;  %v25367_v57 = vrot.slane %v19046_v34, %v22788_v62 }
 0x3f0   : > { %v25347_v37 = vrot.slane %v30524_v29, %v22788_v62  ;;  %v14510_v10 = vcombine.low %v24938_v47, %v24984_v21  ;;  %v14574_v22 = vcombine.low %v14509_v1, %v14525_v13  ;;  %v14575_v29 = vcombine.high %v14509_v1, %v14525_v13 }
 0x3f1   : > { %30525 = vst [vmem:[#allocation14_spill] sm:$0xff] %v25358_v63  ;;  %30526 = vst [vmem:[#allocation13_spill] sm:$0xff] %v25361_v0  ;;  %v14766_v38 = vcombine.low %v25238_v8, %v25258_v3  ;;  %v14494_v30 = vcombine.low %v24920_v46, %v24953_v36  ;;  %v14790_v23 = vrot.slane %v14782_v54, %v22779_v49  ;;  %11070 = vxpose.xlu0.b32.start.end [1/1] (short) (narrow) %v25176_v32, 8  ;;  %v25377_v40 = vpop.trf.xlu0 }
 0x3f2   : > { %30527 = vst [vmem:[#allocation33_spill] sm:$0xff] %v25364_v25  ;;  %30528 = vst [vmem:[#allocation32_spill] sm:$0xff] %v25367_v57  ;;  %v25381_v34 = vcombine.high %v25325_v16, %v30287_v19  ;;  %v30530_v47 = vcombine.high %v24776_v55, %v24738_v9  ;;  %v14854_v13 = vrot.slane %v14846_v5, %v22788_v62  ;;  %v30568_v25 = vld [vmem:[#allocation12_spill] sm:$0xff] }
 0x3f3   : > { %30529 = vst [vmem:[#allocation181_spill] sm:$0xff] %v25377_v40  ;;  %v14861_v46 = vrot.slane %v14847_v51, %v22788_v62  ;;  %v25392_v36 = vrot.slane %v19015_v20, %v22788_v62  ;;  %v25395_v54 = vrot.slane %v19047_v28, %v22788_v62  ;;  %v25397_v32 = vpop.trf.xlu1  ;;  %11102 = vxpose.xlu1.b32.start.end [1/1] (short) (narrow) %v25197_v6, 8  ;;  %v30569_v57 = vld [vmem:[#allocation8_spill] sm:$0xff] }
 0x3f4   : > { %v25387_v21 = vrot.slane %v30530_v47, %v22788_v62  ;;  %30533 = vst [vmem:[#allocation184_spill] sm:$0xff] %v25397_v32  ;;  %v18879_v8 = vcombine.high %v25245_v15, %v25283_v45  ;;  %v18911_v9 = vcombine.high %v25248_v4, %v25286_v18  ;;  %v14518_v20 = vrot.slane %v14510_v10, %v22779_v49 }
 0x3f5   : > { %30531 = vst [vmem:[#allocation182_spill] sm:$0xff] %v25392_v36  ;;  %30532 = vst [vmem:[#allocation183_spill] sm:$0xff] %v25395_v54  ;;  %v14582_v28 = vrot.slane %v14574_v22, %v22788_v62  ;;  %v14589_v1 = vrot.slane %v14575_v29, %v22788_v62  ;;  %v14774_v6 = vrot.slane %v14766_v38, %v22779_v49  ;;  %11134 = vxpose.xlu0.b32.start.end [1/1] (short) (narrow) %v25188_v58, 8  ;;  %v25413_v15 = vpop.trf.xlu0  ;;  %v30549_v36 = vld [vmem:[#allocation117_spill] sm:$0xff] }
 0x3f6   : > { %30534 = vst [vmem:[#allocation185_spill] sm:$0xff] %v25413_v15  ;;  %v25418_v45 = vrot.slane %v18879_v8, %v22788_v62  ;;  %v25421_v18 = vrot.slane %v18911_v9, %v22788_v62  ;;  %v14502_v51 = vrot.slane %v14494_v30, %v22779_v49  ;;  %v14886_v58 = vcombine.low %v25312_v26, %v25354_v56  ;;  %v30550_v15 = vld [vmem:[#allocation131_spill] sm:$0xff] }
 0x3f7   : > { %v14830_v10 = vcombine.low %v14774_v6, %v14790_v23  ;;  %v14831_v22 = vcombine.high %v14774_v6, %v14790_v23  ;;  %v25429_v29 = vrot.slane %v14854_v13, %v22779_v49  ;;  %v25432_v38 = vrot.slane %v14861_v46, %v22779_v49  ;;  %v25434_v47 = vpop.trf.xlu1  ;;  %11166 = vxpose.xlu1.b32.start.end [1/1] (short) (narrow) %v25297_v7, 8 }
 0x3f8   : > { %30535 = vst [vmem:[#allocation186_spill] sm:$0xff] %v25418_v45  ;;  %30536 = vst [vmem:[#allocation187_spill] sm:$0xff] %v25421_v18  ;;  %v14614_v23 = vcombine.low %v25038_v35, %v25094_v11  ;;  %v14870_v13 = vcombine.low %v25293_v60, %v25329_v43  ;;  %v30540_v46 = vcombine.low %v24803_v41, %v24783_v27 }
 0x3f9   : > { %30537 = vst [vmem:[#allocation188_spill] sm:$0xff] %v25429_v29  ;;  %30538 = vst [vmem:[#allocation189_spill] sm:$0xff] %v25432_v38  ;;  %v30541_v7 = vcombine.high %v24803_v41, %v24783_v27  ;;  %v14558_v3 = vcombine.low %v14502_v51, %v14518_v20  ;;  %v14559_v55 = vcombine.high %v14502_v51, %v14518_v20  ;;  %11198 = vxpose.xlu0.b32.start.end [1/1] (short) (narrow) %v25203_v17, 8  ;;  %v25464_v8 = vpop.trf.xlu0 }
 0x3fa   : > { %30539 = vst [vmem:[#allocation190_spill] sm:$0xff] %v25434_v47  ;;  %v25449_v9 = vrot.slane %v30540_v46, %v22788_v62  ;;  %v25458_v30 = vrot.slane %v14582_v28, %v22779_v49  ;;  %v25461_v5 = vrot.slane %v14589_v1, %v22779_v49  ;;  %v14598_v46 = vcombine.low %v25012_v61, %v25063_v59 }
 0x3fb   : > { %v25455_v6 = vrot.slane %v30541_v7, %v22788_v62  ;;  %v14894_v4 = vrot.slane %v14886_v58, %v22779_v49  ;;  %v25471_v27 = vcombine.high %v25335_v14, %v30287_v19  ;;  %v25475_v41 = vcombine.high %v25341_v44, %v30287_v19  ;;  %v25479_v17 = vpop.trf.xlu1  ;;  %11230 = vxpose.xlu1.b32.start.end [1/1] (short) (narrow) %v25319_v50, 8 }
 0x3fc   : > { %30542 = vst [vmem:[#allocation191_spill] sm:$0xff] %v25458_v30  ;;  %30543 = vst [vmem:[#allocation192_spill] sm:$0xff] %v25461_v5  ;;  %v14838_v20 = vrot.slane %v14830_v10, %v22788_v62  ;;  %v14845_v28 = vrot.slane %v14831_v22, %v22788_v62  ;;  %v19031_v1 = vcombine.high %v25458_v30, %v25429_v29 }
 0x3fd   : > { %v19063_v51 = vcombine.high %v25461_v5, %v25432_v38  ;;  %v14622_v58 = vrot.slane %v14614_v23, %v22779_v49  ;;  %v14878_v7 = vrot.slane %v14870_v13, %v22779_v49  ;;  %v25490_v18 = vcombine.high %v25347_v37, %v30287_v19  ;;  %11262 = vxpose.xlu0.b32.start.end [1/1] (short) (narrow) %v25303_v2, 8  ;;  %v25499_v30 = vpop.trf.xlu0 }
 0x3fe   : > { %v25494_v10 = vcombine.high %v25387_v21, %v30287_v19  ;;  %v14566_v50 = vrot.slane %v14558_v3, %v22788_v62  ;;  %v14573_v22 = vrot.slane %v14559_v55, %v22788_v62  ;;  %v25503_v23 = vcombine.high %v25449_v9, %v30287_v19 }
 0x3ff   : > { %v25507_v13 = vcombine.high %v25455_v6, %v30287_v19  ;;  %v14606_v5 = vrot.slane %v14598_v46, %v22779_v49  ;;  %v14887_v38 = vcombine.high %v25312_v26, %v25354_v56  ;;  %v14934_v3 = vcombine.low %v14878_v7, %v14894_v4  ;;  %v25518_v45 = vpop.trf.xlu1  ;;  %11294 = vxpose.xlu1.b32.start.end [1/1] (short) (narrow) %v25352_v42, 8 }
 0x400   : > { %v14935_v29 = vcombine.high %v14878_v7, %v14894_v4  ;;  %v25513_v55 = vrot.slane %v14838_v20, %v22779_v49  ;;  %v25516_v2 = vrot.slane %v14845_v28, %v22779_v49  ;;  %v30546_v54 = vcombine.low %v24946_v33, %v24903_v53  ;;  %v30548_v7 = vld [vmem:[#allocation120_spill] sm:$0xff] }
 0x401   : > { %v30547_v26 = vcombine.high %v24946_v33, %v24903_v53  ;;  %v14615_v4 = vcombine.high %v25038_v35, %v25094_v11  ;;  %v14662_v20 = vcombine.low %v14606_v5, %v14622_v58  ;;  %v14663_v28 = vcombine.high %v14606_v5, %v14622_v58  ;;  %11326 = vxpose.xlu0.b32.start.end [1/1] (short) (narrow) %v25325_v16, 8  ;;  %v25548_v33 = vpop.trf.xlu0 }
 0x402   : > { %30544 = vst [vmem:[#allocation193_spill] sm:$0xff] %v25513_v55  ;;  %30545 = vst [vmem:[#allocation194_spill] sm:$0xff] %v25516_v2  ;;  %v25525_v46 = vrot.slane %v30546_v54, %v22788_v62  ;;  %v14871_v42 = vcombine.high %v25293_v60, %v25329_v43  ;;  %v13542_v40 = vcombine.low %v30549_v36, %v30548_v7  ;;  %v30551_v54 = vld [vmem:[#allocation121_spill] sm:$0xff] }
 0x403   : > { %v25531_v56 = vrot.slane %v30547_v26, %v22788_v62  ;;  %v13558_v32 = vcombine.low %v30551_v54, %v30550_v15  ;;  %v25542_v47 = vrot.slane %v14566_v50, %v22779_v49  ;;  %v25545_v53 = vrot.slane %v14573_v22, %v22779_v49  ;;  %v25555_v5 = vpop.trf.xlu1  ;;  %11358 = vxpose.xlu1.b32.start.end [1/1] (short) (narrow) %v25381_v34, 8 }
 0x404   : > { %v14599_v35 = vcombine.high %v25012_v61, %v25063_v59  ;;  %v14901_v11 = vrot.slane %v14887_v38, %v22779_v49  ;;  %v14942_v60 = vrot.slane %v14934_v3, %v22788_v62  ;;  %v14949_v43 = vrot.slane %v14935_v29, %v22788_v62 }
 0x405   : > { %30552 = vst [vmem:[#allocation120_spill] sm:$0xff] %v25542_v47  ;;  %30553 = vst [vmem:[#allocation117_spill] sm:$0xff] %v25545_v53  ;;  %v25559_v58 = vrot.slane %v19031_v1, %v22788_v62  ;;  %v25562_v16 = vrot.slane %v19063_v51, %v22788_v62  ;;  %v18895_v50 = vcombine.high %v25542_v47, %v25513_v55  ;;  %11390 = vxpose.xlu0.b32.start.end [1/1] (short) (narrow) %v25335_v14, 8  ;;  %v25573_v1 = vpop.trf.xlu0  ;;  %v30566_v47 = vld [vmem:[#allocation11_spill] sm:$0xff] }
 0x406   : > { %v18927_v61 = vcombine.high %v25545_v53, %v25516_v2  ;;  %v14629_v59 = vrot.slane %v14615_v4, %v22779_v49  ;;  %v14670_v29 = vrot.slane %v14662_v20, %v22788_v62  ;;  %v14677_v38 = vrot.slane %v14663_v28, %v22788_v62  ;;  %v30558_v4 = vld [vmem:[#allocation16_spill] sm:$0xff]  ;;  %v30559_v20 = vld [vmem:[#allocation15_spill] sm:$0xff] }
 0x407   : > { %30554 = vst [vmem:[#allocation131_spill] sm:$0xff] %v25559_v58  ;;  %30555 = vst [vmem:[#allocation195_spill] sm:$0xff] %v25562_v16  ;;  %v14885_v34 = vrot.slane %v14871_v42, %v22779_v49  ;;  %v25578_v22 = vrot.slane %v18895_v50, %v22788_v62  ;;  %v13286_v28 = vcombine.low %v30559_v20, %v30558_v4  ;;  %v25594_v50 = vpop.trf.xlu1  ;;  %11422 = vxpose.xlu1.b32.start.end [1/1] (short) (narrow) %v25471_v27, 8  ;;  %v30562_v16 = vld [vmem:[#allocation132_spill] sm:$0xff]  ;;  %v30567_v55 = vld [vmem:[#allocation7_spill] sm:$0xff] }
 0x408   : > { %v25581_v3 = vrot.slane %v18927_v61, %v22788_v62  ;;  %v14613_v42 = vrot.slane %v14599_v35, %v22779_v49  ;;  %v25589_v2 = vrot.slane %v14942_v60, %v22779_v49  ;;  %v25592_v51 = vrot.slane %v14949_v43, %v22779_v49  ;;  %v30563_v35 = vld [vmem:[#allocation129_spill] sm:$0xff] }
 0x409   : > { %30556 = vst [vmem:[#allocation196_spill] sm:$0xff] %v25578_v22  ;;  %v14950_v14 = vcombine.low %v14885_v34, %v14901_v11  ;;  %v14951_v53 = vcombine.high %v14885_v34, %v14901_v11  ;;  %v13814_v58 = vcombine.low %v30563_v35, %v30562_v16  ;;  %v30564_v11 = vld [vmem:[#allocation139_spill] sm:$0xff]  ;;  %v30565_v34 = vld [vmem:[#allocation136_spill] sm:$0xff]  ;;  %v13014_v43 = vcombine.low %v30567_v55, %v30566_v47  ;;  %v25616_v26 = vpop.trf.xlu0  ;;  %v30573_v16 = vld [vmem:[#allocation29_spill] sm:$0xff] }
 0x40a   : > { %30557 = vst [vmem:[#allocation197_spill] sm:$0xff] %v25581_v3  ;;  %30560 = vst [vmem:[#allocation16_spill] sm:$0xff] %v25589_v2  ;;  %v13830_v60 = vcombine.low %v30565_v34, %v30564_v11  ;;  %v13270_v63 = vcombine.low %v30569_v57, %v30568_v25  ;;  %v14678_v0 = vcombine.low %v14613_v42, %v14629_v59  ;;  %11454 = vxpose.xlu0.b32.start.end [1/1] (short) (narrow) %v25341_v44, 8  ;;  %v30572_v35 = vld [vmem:[#allocation31_spill] sm:$0xff] }
 0x40b   : > { %30561 = vst [vmem:[#allocation15_spill] sm:$0xff] %v25592_v51  ;;  %v14679_v27 = vcombine.high %v14613_v42, %v14629_v59  ;;  %v25610_v54 = vrot.slane %v14670_v29, %v22779_v49  ;;  %v25613_v61 = vrot.slane %v14677_v38, %v22779_v49  ;;  %v25619_v3 = vrot.slane %v13542_v40, %v22779_v49  ;;  %v25631_v42 = vpop.trf.xlu1 }
 0x40c   : > { %v25622_v22 = vrot.slane %v13558_v32, %v22779_v49  ;;  %v12998_v34 = vcombine.low %v30573_v16, %v30572_v35  ;;  %v25627_v59 = vrot.slane %v13286_v28, %v22779_v49  ;;  %v14958_v29 = vrot.slane %v14950_v14, %v22788_v62  ;;  %11486 = vxpose.xlu1.b32.start.end [1/1] (short) (narrow) %v25475_v41, 8 }
 0x40d   : > { %30570 = vst [vmem:[#allocation139_spill] sm:$0xff] %v25610_v54  ;;  %30571 = vst [vmem:[#allocation11_spill] sm:$0xff] %v25613_v61  ;;  %v14965_v38 = vrot.slane %v14951_v53, %v22788_v62  ;;  %v19151_v44 = vcombine.high %v25610_v54, %v25589_v2  ;;  %v19183_v40 = vcombine.high %v25613_v61, %v25592_v51 }
 0x40e   : > { %v25639_v32 = vrot.slane %v13814_v58, %v22779_v49  ;;  %v25642_v28 = vrot.slane %v13830_v60, %v22779_v49  ;;  %v25645_v14 = vrot.slane %v13014_v43, %v22779_v49  ;;  %v25648_v53 = vrot.slane %v13270_v63, %v22779_v49  ;;  %11518 = vxpose.xlu0.b32.start.end [1/1] (short) (narrow) %v25347_v37, 8  ;;  %v25657_v60 = vpop.trf.xlu0 }
 0x40f   : > { %v12999_v41 = vcombine.high %v30573_v16, %v30572_v35  ;;  %v13015_v54 = vcombine.high %v30567_v55, %v30566_v47  ;;  %v14686_v61 = vrot.slane %v14678_v0, %v22788_v62  ;;  %v14693_v58 = vrot.slane %v14679_v27, %v22788_v62  ;;  %v25672_v37 = vpop.trf.xlu1 }
 0x410   : > { %30574 = vst [vmem:[#allocation7_spill] sm:$0xff] %v25639_v32  ;;  %30575 = vst [vmem:[#allocation12_spill] sm:$0xff] %v25642_v28  ;;  %v13006_v43 = vrot.slane %v12998_v34, %v22779_v49  ;;  %v13271_v63 = vcombine.high %v30569_v57, %v30568_v25  ;;  %v13287_v51 = vcombine.high %v30559_v20, %v30558_v4  ;;  %11550 = vxpose.xlu1.b32.start.end [1/1] (short) (narrow) %v25490_v18, 8 }
 0x411   : > { %v13334_v16 = vcombine.low %v25648_v53, %v25627_v59  ;;  %v25667_v47 = vrot.slane %v14958_v29, %v22779_v49  ;;  %v25670_v0 = vrot.slane %v14965_v38, %v22779_v49  ;;  %v25677_v55 = vcombine.high %v25525_v46, %v30287_v19 }
 0x412   : > { %v30578_v25 = vcombine.low %v24976_v48, %v24942_v39  ;;  %v13606_v4 = vcombine.low %v25619_v3, %v25622_v22  ;;  %v13878_v20 = vcombine.low %v25639_v32, %v25642_v28  ;;  %v13062_v35 = vcombine.low %v13006_v43, %v25645_v14  ;;  %11582 = vxpose.xlu0.b32.start.end [1/1] (short) (narrow) %v25387_v21, 8 }
 0x413   : > { %30576 = vst [vmem:[#allocation8_spill] sm:$0xff] %v25667_v47  ;;  %30577 = vst [vmem:[#allocation31_spill] sm:$0xff] %v25670_v0  ;;  %v15022_v18 = vcombine.low %v25479_v17, %v25518_v45  ;;  %v13013_v34 = vrot.slane %v12999_v41, %v22779_v49  ;;  %v13029_v27 = vrot.slane %v13015_v54, %v22779_v49  ;;  %v25708_v54 = vpop.trf.xlu1 }
 0x414   : > { %v25683_v57 = vrot.slane %v30578_v25, %v22788_v62  ;;  %v25695_v29 = vrot.slane %v14686_v61, %v22779_v49  ;;  %v25698_v38 = vrot.slane %v14693_v58, %v22779_v49  ;;  %v25701_v25 = vpop.trf.xlu0  ;;  %v13285_v2 = vrot.slane %v13271_v63, %v22779_v49  ;;  %30582 = vst [vmem:[#allocation200_spill] sm:$0xff] %v25708_v54  ;;  %v30667_v54 = vld [vmem:[#allocation141_spill] sm:$0xff] }
 0x415   : > { %30581 = vst [vmem:[#allocation199_spill] sm:$0xff] %v25701_v25  ;;  %v13301_v32 = vrot.slane %v13287_v51, %v22779_v49  ;;  %v13342_v28 = vrot.slane %v13334_v16, %v22788_v62  ;;  %v15006_v41 = vcombine.low %v25464_v8, %v25499_v30  ;;  %11614 = vxpose.xlu1.b32.start.end [1/1] (short) (narrow) %v25494_v10, 8 }
 0x416   : > { %30579 = vst [vmem:[#allocation29_spill] sm:$0xff] %v25695_v29  ;;  %30580 = vst [vmem:[#allocation198_spill] sm:$0xff] %v25698_v38  ;;  %v25712_v61 = vrot.slane %v19151_v44, %v22788_v62  ;;  %v25715_v21 = vrot.slane %v19183_v40, %v22788_v62  ;;  %v19287_v58 = vcombine.high %v25695_v29, %v25667_v47  ;;  %11646 = vxpose.xlu0.b32.start.end [1/1] (short) (narrow) %v25449_v9, 8 }
 0x417   : > { %v19319_v51 = vcombine.high %v25698_v38, %v25670_v0  ;;  %v13063_v63 = vcombine.high %v13006_v43, %v25645_v14  ;;  %v13070_v16 = vrot.slane %v13062_v35, %v22788_v62  ;;  %v15023_v25 = vcombine.high %v25479_v17, %v25518_v45 }
 0x418   : > { %30583 = vst [vmem:[#allocation201_spill] sm:$0xff] %v25712_v61  ;;  %30584 = vst [vmem:[#allocation202_spill] sm:$0xff] %v25715_v21  ;;  %v15030_v10 = vrot.slane %v15022_v18, %v22779_v49  ;;  %v25727_v44 = vpop.trf.xlu0  ;;  %v25732_v29 = vrot.slane %v19287_v58, %v22788_v62  ;;  %v13078_v43 = vcombine.low %v13013_v34, %v13029_v27  ;;  %v25747_v58 = vpop.trf.xlu1 }
 0x419   : > { %30585 = vst [vmem:[#allocation203_spill] sm:$0xff] %v25727_v44  ;;  %v25735_v38 = vrot.slane %v19319_v51, %v22788_v62  ;;  %v13335_v45 = vcombine.high %v25648_v53, %v25627_v59  ;;  %v13350_v17 = vcombine.low %v13285_v2, %v13301_v32  ;;  %v25742_v9 = vrot.slane %v13342_v28, %v22779_v49 }
 0x41a   : > { %30586 = vst [vmem:[#allocation204_spill] sm:$0xff] %v25732_v29  ;;  %v15007_v35 = vcombine.high %v25464_v8, %v25499_v30  ;;  %v15014_v18 = vrot.slane %v15006_v41, %v22779_v49  ;;  %30589 = vst [vmem:[#allocation207_spill] sm:$0xff] %v25747_v58  ;;  %11678 = vxpose.xlu1.b32.start.end [1/1] (short) (narrow) %v25503_v23, 8  ;;  %v13614_v59 = vrot.slane %v13606_v4, %v22788_v62 }
 0x41b   : > { %30587 = vst [vmem:[#allocation205_spill] sm:$0xff] %v25735_v38  ;;  %30588 = vst [vmem:[#allocation206_spill] sm:$0xff] %v25742_v9  ;;  %v13886_v28 = vrot.slane %v13878_v20, %v22788_v62  ;;  %v13079_v53 = vcombine.high %v13013_v34, %v13029_v27  ;;  %v13351_v40 = vcombine.high %v13285_v2, %v13301_v32  ;;  %11710 = vxpose.xlu0.b32.start.end [1/1] (short) (narrow) %v25455_v6, 8 }
 0x41c   : > { %v25757_v8 = vrot.slane %v13070_v16, %v22779_v49  ;;  %v15037_v30 = vrot.slane %v15023_v25, %v22779_v49  ;;  %v15070_v41 = vcombine.low %v15014_v18, %v15030_v10  ;;  %v9742_v23 = vpop.trf.xlu0  ;;  %v4025_v51 = vcombine.high %v25531_v56, %v30287_v19  ;;  %v9774_v25 = vpop.trf.xlu1 }
 0x41d   : > { %v13077_v14 = vrot.slane %v13063_v63, %v22788_v62  ;;  %v13086_v4 = vrot.slane %v13078_v43, %v22788_v62  ;;  %v25767_v20 = vcombine.high %v25683_v57, %v30287_v19  ;;  %v30591_v2 = vcombine.high %v24976_v48, %v24942_v39 }
 0x41e   : > { %30590 = vst [vmem:[#allocation208_spill] sm:$0xff] %v25757_v8  ;;  %v13349_v6 = vrot.slane %v13335_v45, %v22788_v62  ;;  %v13358_v34 = vrot.slane %v13350_v17, %v22788_v62  ;;  %v15021_v27 = vrot.slane %v15007_v35, %v22779_v49  ;;  %11742 = vxpose.xlu1.b32.start.end [1/1] (short) (narrow) %v25507_v13, 8 }
 0x41f   : > { %v25773_v32 = vrot.slane %v30591_v2, %v22788_v62  ;;  %v17535_v63 = vcombine.high %v25757_v8, %v25742_v9  ;;  %v25782_v16 = vrot.slane %v13614_v59, %v22779_v49  ;;  %v25785_v43 = vrot.slane %v13886_v28, %v22779_v49  ;;  %11774 = vxpose.xlu0.b32.start.end [1/1] (short) (narrow) %v25525_v46, 8 }
 0x420   : > { %v13093_v39 = vrot.slane %v13079_v53, %v22788_v62  ;;  %v13365_v48 = vrot.slane %v13351_v40, %v22788_v62  ;;  %v15071_v45 = vcombine.high %v15014_v18, %v15030_v10  ;;  %v15078_v17 = vrot.slane %v15070_v41, %v22788_v62  ;;  %v9806_v13 = vpop.trf.xlu0  ;;  %v9838_v40 = vpop.trf.xlu1 }
 0x421   : > { %30592 = vst [vmem:[#allocation209_spill] sm:$0xff] %v25782_v16  ;;  %30593 = vst [vmem:[#allocation210_spill] sm:$0xff] %v25785_v43  ;;  %v15086_v35 = vcombine.low %v15021_v27, %v15037_v30  ;;  %v15087_v2 = vcombine.high %v15021_v27, %v15037_v30  ;;  %v25792_v8 = vrot.slane %v13077_v14, %v22779_v49 }
 0x422   : > { %v25795_v59 = vrot.slane %v13086_v4, %v22779_v49  ;;  %v15278_v28 = vcombine.low %v9742_v23, %v9806_v13  ;;  %v15279_v9 = vcombine.high %v9742_v23, %v9806_v13  ;;  %v25798_v53 = vrot.slane %v13349_v6, %v22779_v49  ;;  %11806 = vxpose.xlu1.b32.start.end [1/1] (short) (narrow) %v25677_v55, 8 }
 0x423   : > { %30594 = vst [vmem:[#allocation211_spill] sm:$0xff] %v25792_v8  ;;  %v25801_v10 = vrot.slane %v13358_v34, %v22779_v49  ;;  %v30598_v46 = vcombine.high %v25224_v31, %v25230_v12  ;;  %v30600_v18 = vcombine.high %v25227_v24, %v25233_v52  ;;  %v25817_v41 = vrot.slane %v13093_v39, %v22779_v49 }
 0x424   : > { %30595 = vst [vmem:[#allocation212_spill] sm:$0xff] %v25795_v59  ;;  %30596 = vst [vmem:[#allocation213_spill] sm:$0xff] %v25798_v53  ;;  %v25820_v23 = vrot.slane %v13365_v48, %v22779_v49  ;;  %v15294_v4 = vcombine.low %v9774_v25, %v9838_v40  ;;  %v15295_v55 = vcombine.high %v9774_v25, %v9838_v40  ;;  %11838 = vxpose.xlu0.b32.start.end [1/1] (short) (narrow) %v25531_v56, 8 }
 0x425   : > { %30597 = vst [vmem:[#allocation214_spill] sm:$0xff] %v25801_v10  ;;  %v25808_v14 = vrot.slane %v30598_v46, %v22788_v62  ;;  %v25814_v30 = vrot.slane %v30600_v18, %v22788_v62  ;;  %30602 = vst [vmem:[#allocation217_spill] sm:$0xff] %v25817_v41  ;;  %v15085_v6 = vrot.slane %v15071_v45, %v22788_v62  ;;  %v25829_v46 = vpop.trf.xlu0  ;;  %v25835_v45 = vpop.trf.xlu1 }
 0x426   : > { %30603 = vst [vmem:[#allocation218_spill] sm:$0xff] %v25820_v23  ;;  %v15094_v34 = vrot.slane %v15086_v35, %v22788_v62  ;;  %v15101_v27 = vrot.slane %v15087_v2, %v22788_v62  ;;  %v25826_v13 = vrot.slane %v15078_v17, %v22779_v49  ;;  %v15286_v39 = vrot.slane %v15278_v28, %v22779_v49 }
 0x427   : > { %30599 = vst [vmem:[#allocation215_spill] sm:$0xff] %v25808_v14  ;;  %30601 = vst [vmem:[#allocation216_spill] sm:$0xff] %v25814_v30  ;;  %v15293_v48 = vrot.slane %v15279_v9, %v22779_v49  ;;  %v15302_v18 = vrot.slane %v15294_v4, %v22779_v49  ;;  %v15309_v25 = vrot.slane %v15295_v55, %v22779_v49  ;;  %11870 = vxpose.xlu1.b32.start.end [1/1] (short) (narrow) %v4025_v51, 8  ;;  %v30636_v14 = vld [vmem:[#allocation42_spill] sm:$0xff] }
 0x428   : > { %v25840_v17 = vrot.slane %v17535_v63, %v22788_v62  ;;  %v17567_v56 = vcombine.high %v25792_v8, %v25798_v53  ;;  %v25847_v55 = vrot.slane %v15085_v6, %v22779_v49  ;;  %11902 = vxpose.xlu0.b32.start.end [1/1] (short) (narrow) %v25683_v57, 8  ;;  %v19502_v57 = vrot.slane %v15094_v34, %v22779_v49  ;;  %v30607_v53 = vld [vmem:[#allocation162_spill] sm:$0xff] }
 0x429   : > { %v15342_v9 = vcombine.low %v15286_v39, %v15302_v18  ;;  %v15343_v28 = vcombine.high %v15286_v39, %v15302_v18  ;;  %v15358_v40 = vcombine.low %v15293_v48, %v15309_v25  ;;  %v15359_v4 = vcombine.high %v15293_v48, %v15309_v25  ;;  %v25850_v51 = vpop.trf.xlu0  ;;  %v9966_v35 = vpop.trf.xlu1 }
 0x42a   : > { %30604 = vst [vmem:[#allocation219_spill] sm:$0xff] %v25840_v17  ;;  %v25853_v63 = vrot.slane %v17567_v56, %v22788_v62  ;;  %v15055_v25 = vcombine.high %v25555_v5, %v25594_v50  ;;  %v15311_v56 = vcombine.high %v25829_v46, %v25850_v51  ;;  %v19534_v2 = vrot.slane %v15101_v27, %v22779_v49 }
 0x42b   : > { %v15350_v39 = vrot.slane %v15342_v9, %v22788_v62  ;;  %v15357_v48 = vrot.slane %v15343_v28, %v22788_v62  ;;  %v15366_v6 = vrot.slane %v15358_v40, %v22788_v62  ;;  %v15373_v18 = vrot.slane %v15359_v4, %v22788_v62  ;;  %11934 = vxpose.xlu1.b32.start.end [1/1] (short) (narrow) %v25767_v20, 8 }
 0x42c   : > { %30605 = vst [vmem:[#allocation220_spill] sm:$0xff] %v25853_v63  ;;  %v15327_v8 = vcombine.high %v25835_v45, %v9966_v35  ;;  %11966 = vxpose.xlu0.b32.start.end [1/1] (short) (narrow) %v25773_v32, 8  ;;  %v4027_v9 = vcombine.high %v25773_v32, %v30287_v19  ;;  %v15325_v38 = vrot.slane %v15311_v56, %v22779_v49  ;;  %v30632_v63 = vld [vmem:[#allocation37_spill] sm:$0xff] }
 0x42d   : > { %v25872_v28 = vrot.slane %v15350_v39, %v22779_v49  ;;  %v25875_v40 = vrot.slane %v15357_v48, %v22779_v49  ;;  %v19518_v34 = vrot.slane %v15366_v6, %v22779_v49  ;;  %v19550_v4 = vrot.slane %v15373_v18, %v22779_v49  ;;  %v25882_v20 = vpop.trf.xlu0  ;;  %v30606_v39 = vld [vmem:[#allocation22_spill] sm:$0xff]  ;;  %v25897_v12 = vpop.trf.xlu1 }
 0x42e   : > { %v30608_v48 = vcombine.low %v30606_v39, %v30607_v53  ;;  %v15039_v6 = vcombine.high %v25548_v33, %v25573_v1  ;;  %v15341_v31 = vrot.slane %v15327_v8, %v22779_v49  ;;  %v15326_v29 = vcombine.low %v25835_v45, %v9966_v35 }
 0x42f   : > { %v19422_v27 = vcombine.low %v25826_v13, %v25872_v28  ;;  %v19454_v18 = vcombine.low %v25847_v55, %v25875_v40  ;;  %v19558_v52 = vcombine.low %v19502_v57, %v19518_v34  ;;  %11998 = vxpose.xlu1.b32.start.end [1/1] (short) (narrow) %v4027_v9, 8  ;;  %v19590_v32 = vcombine.low %v19534_v2, %v19550_v4  ;;  %v30610_v9 = vld [vmem:[#allocation166_spill] sm:$0xff] }
 0x430   : > { %v4066_v24 = vrot.slane %v30608_v48, %v22788_v62  ;;  %v19559_v21 = vcombine.high %v19502_v57, %v19518_v34  ;;  %v19591_v61 = vcombine.high %v19534_v2, %v19550_v4  ;;  %v15069_v48 = vrot.slane %v15055_v25, %v22779_v49  ;;  %v30611_v57 = vld [vmem:[#allocation165_spill] sm:$0xff] }
 0x431   : > { %v25902_v0 = vpop.trf.xlu0  ;;  %v30609_v8 = vcombine.high %v30606_v39, %v30607_v53  ;;  %v30612_v2 = vcombine.low %v30610_v9, %v30611_v57  ;;  %v15053_v25 = vrot.slane %v15039_v6, %v22779_v49  ;;  %v15390_v56 = vcombine.low %v15325_v38, %v15341_v31 }
 0x432   : > { %12030 = vxpose.xlu0.b32.start.end [1/1] (short) (narrow) %v4066_v24, 8  ;;  %v4090_v47 = vcombine.high %v4066_v24, %v30287_v19  ;;  %v15391_v4 = vcombine.high %v15325_v38, %v15341_v31  ;;  %v30613_v45 = vcombine.high %v30610_v9, %v30611_v57  ;;  %v25918_v24 = vpop.trf.xlu1  ;;  %v25921_v53 = vrot.slane %v19422_v27, %v22788_v62 }
 0x433   : > { %v4073_v17 = vrot.slane %v30609_v8, %v22788_v62  ;;  %v4082_v34 = vrot.slane %v30612_v2, %v22788_v62  ;;  %v25924_v39 = vrot.slane %v19454_v18, %v22788_v62  ;;  %v25927_v8 = vrot.slane %v19558_v52, %v22788_v62 }
 0x434   : > { %v4089_v35 = vrot.slane %v30613_v45, %v22788_v62  ;;  %12062 = vxpose.xlu1.b32.start.end [1/1] (short) (narrow) %v4090_v47, 8  ;;  %30614 = vst [vmem:[#allocation22_spill] sm:$0xff] %v25921_v53  ;;  %v25930_v6 = vrot.slane %v19590_v32, %v22788_v62  ;;  %v15054_v31 = vcombine.low %v25555_v5, %v25594_v50 }
 0x435   : > { %30615 = vst [vmem:[#allocation162_spill] sm:$0xff] %v25924_v39  ;;  %30616 = vst [vmem:[#allocation166_spill] sm:$0xff] %v25927_v8  ;;  %v15118_v38 = vcombine.low %v15053_v25, %v15069_v48  ;;  %v15119_v9 = vcombine.high %v15053_v25, %v15069_v48  ;;  %v15310_v47 = vcombine.low %v25829_v46, %v25850_v51  ;;  %v25939_v57 = vpop.trf.xlu0 }
 0x436   : > { %30617 = vst [vmem:[#allocation165_spill] sm:$0xff] %v25930_v6  ;;  %v15038_v27 = vcombine.low %v25548_v33, %v25573_v1  ;;  %v15334_v18 = vrot.slane %v15326_v29, %v22779_v49  ;;  %12094 = vxpose.xlu0.b32.start.end [1/1] (short) (narrow) %v4073_v17, 8  ;;  %30618 = vst [vmem:[#allocation221_spill] sm:$0xff] %v25939_v57  ;;  %v4091_v52 = vcombine.high %v4073_v17, %v30287_v19  ;;  %v25951_v33 = vpop.trf.xlu1 }
 0x437   : > { %v4092_v32 = vcombine.high %v4082_v34, %v30287_v19  ;;  %v15398_v2 = vrot.slane %v15390_v56, %v22788_v62  ;;  %v15405_v5 = vrot.slane %v15391_v4, %v22788_v62  ;;  %v25946_v50 = vrot.slane %v19559_v21, %v22788_v62  ;;  %30621 = vst [vmem:[#allocation224_spill] sm:$0xff] %v25951_v33 }
 0x438   : > { %v25949_v46 = vrot.slane %v19591_v61, %v22788_v62  ;;  %12126 = vxpose.xlu1.b32.start.end [1/1] (short) (narrow) %v4091_v52, 8  ;;  %v19423_v1 = vcombine.high %v25826_v13, %v25872_v28  ;;  %v19455_v29 = vcombine.high %v25847_v55, %v25875_v40  ;;  %v15062_v21 = vrot.slane %v15054_v31, %v22779_v49  ;;  %v30630_v52 = vld [vmem:[#allocation35_spill] sm:$0xff]  ;;  %v30631_v13 = vld [vmem:[#allocation34_spill] sm:$0xff] }
 0x439   : > { %30619 = vst [vmem:[#allocation222_spill] sm:$0xff] %v25946_v50  ;;  %v15126_v61 = vrot.slane %v15118_v38, %v22788_v62  ;;  %v15133_v48 = vrot.slane %v15119_v9, %v22788_v62  ;;  %v15318_v25 = vrot.slane %v15310_v47, %v22779_v49  ;;  %v25965_v56 = vpop.trf.xlu0  ;;  %v15046_v4 = vrot.slane %v15038_v27, %v22779_v49 }
 0x43a   : > { %30620 = vst [vmem:[#allocation223_spill] sm:$0xff] %v25949_v46  ;;  %12158 = vxpose.xlu0.b32.start.end [1/1] (short) (narrow) %v4082_v34, 8  ;;  %30622 = vst [vmem:[#allocation225_spill] sm:$0xff] %v25965_v56  ;;  %v25970_v55 = vrot.slane %v19423_v1, %v22788_v62  ;;  %v25973_v28 = vrot.slane %v19455_v29, %v22788_v62  ;;  %v15430_v34 = vcombine.low %v25897_v12, %v25918_v24  ;;  %v25986_v47 = vpop.trf.xlu1 }
 0x43b   : > { %v15374_v45 = vcombine.low %v15318_v25, %v15334_v18  ;;  %v15375_v31 = vcombine.high %v15318_v25, %v15334_v18  ;;  %v25981_v38 = vrot.slane %v15398_v2, %v22779_v49  ;;  %v25984_v9 = vrot.slane %v15405_v5, %v22779_v49  ;;  %30627 = vst [vmem:[#allocation230_spill] sm:$0xff] %v25986_v47 }
 0x43c   : > { %30623 = vst [vmem:[#allocation226_spill] sm:$0xff] %v25970_v55  ;;  %30624 = vst [vmem:[#allocation227_spill] sm:$0xff] %v25973_v28  ;;  %12190 = vxpose.xlu1.b32.start.end [1/1] (short) (narrow) %v4092_v32, 8  ;;  %v15158_v18 = vcombine.low %v25631_v42, %v25672_v37  ;;  %v15414_v1 = vcombine.low %v25882_v20, %v25902_v0  ;;  %v4093_v2 = vcombine.high %v4089_v35, %v30287_v19  ;;  %v30641_v55 = vld [vmem:[#allocation45_spill] sm:$0xff] }
 0x43d   : > { %30625 = vst [vmem:[#allocation228_spill] sm:$0xff] %v25981_v38  ;;  %30626 = vst [vmem:[#allocation229_spill] sm:$0xff] %v25984_v9  ;;  %v15102_v29 = vcombine.low %v15046_v4, %v15062_v21  ;;  %v15103_v5 = vcombine.high %v15046_v4, %v15062_v21  ;;  %v25998_v32 = vrot.slane %v15126_v61, %v22779_v49  ;;  %v26003_v51 = vpop.trf.xlu0 }
 0x43e   : > { %v26001_v25 = vrot.slane %v15133_v48, %v22779_v49  ;;  %12222 = vxpose.xlu0.b32.start.end [1/1] (short) (narrow) %v4089_v35, 8  ;;  %v15142_v17 = vcombine.low %v25616_v26, %v25657_v60  ;;  %v15438_v27 = vrot.slane %v15430_v34, %v22779_v49  ;;  %v15382_v40 = vrot.slane %v15374_v45, %v22788_v62  ;;  %v26010_v21 = vpop.trf.xlu1  ;;  %v30633_v45 = vld [vmem:[#allocation36_spill] sm:$0xff] }
 0x43f   : > { %30628 = vst [vmem:[#allocation231_spill] sm:$0xff] %v25998_v32  ;;  %v15389_v19 = vrot.slane %v15375_v31, %v22788_v62  ;;  %v19575_v61 = vcombine.high %v25998_v32, %v25981_v38  ;;  %v15166_v48 = vrot.slane %v15158_v18, %v22779_v49  ;;  %v15422_v4 = vrot.slane %v15414_v1, %v22779_v49  ;;  %v30635_v38 = vld [vmem:[#allocation43_spill] sm:$0xff] }
 0x440   : > { %30629 = vst [vmem:[#allocation232_spill] sm:$0xff] %v26001_v25  ;;  %12254 = vxpose.xlu1.b32.start.end [1/1] (short) (narrow) %v4093_v2, 8  ;;  %v19607_v35 = vcombine.high %v26001_v25, %v25984_v9  ;;  %v13543_v31 = vcombine.high %v30549_v36, %v30548_v7  ;;  %v30634_v2 = vld [vmem:[#allocation121_spill] sm:$0xff]  ;;  %v15110_v32 = vrot.slane %v15102_v29, %v22788_v62  ;;  %v30639_v29 = vld [vmem:[#allocation51_spill] sm:$0xff] }
 0x441   : > { %v13559_v30 = vcombine.high %v30634_v2, %v30550_v15  ;;  %v15117_v25 = vrot.slane %v15103_v5, %v22788_v62  ;;  %v26028_v9 = vpop.trf.xlu0  ;;  %v15150_v18 = vrot.slane %v15142_v17, %v22779_v49  ;;  %v15431_v1 = vcombine.high %v25897_v12, %v25918_v24  ;;  %v30640_v5 = vld [vmem:[#allocation50_spill] sm:$0xff]  ;;  %v30642_v17 = vld [vmem:[#allocation44_spill] sm:$0xff] }
 0x442   : > { %v15478_v34 = vcombine.low %v15422_v4, %v15438_v27  ;;  %v26036_v36 = vrot.slane %v15382_v40, %v22779_v49  ;;  %v26039_v15 = vrot.slane %v15389_v19, %v22779_v49  ;;  %v26041_v7 = vpop.trf.xlu1  ;;  %v15159_v12 = vcombine.high %v25631_v42, %v25672_v37 }
 0x443   : > { %v15206_v24 = vcombine.low %v15150_v18, %v15166_v48  ;;  %v15415_v28 = vcombine.high %v25882_v20, %v25902_v0  ;;  %v15479_v40 = vcombine.high %v15422_v4, %v15438_v27  ;;  %v13557_v50 = vrot.slane %v13543_v31, %v22779_v49 }
 0x444   : > { %30637 = vst [vmem:[#allocation121_spill] sm:$0xff] %v26036_v36  ;;  %30638 = vst [vmem:[#allocation233_spill] sm:$0xff] %v26039_v15  ;;  %v13573_v19 = vrot.slane %v13559_v30, %v22779_v49  ;;  %v26054_v33 = vrot.slane %v15110_v32, %v22779_v49  ;;  %v26057_v2 = vrot.slane %v15117_v25, %v22779_v49 }
 0x445   : > { %v26059_v47 = vpop.trf.xlu0  ;;  %v15143_v42 = vcombine.high %v25616_v26, %v25657_v60  ;;  %v15207_v37 = vcombine.high %v15150_v18, %v15166_v48  ;;  %v15445_v46 = vrot.slane %v15431_v1, %v22779_v49  ;;  %v15486_v0 = vrot.slane %v15478_v34, %v22788_v62 }
 0x446   : > { %30643 = vst [vmem:[#allocation234_spill] sm:$0xff] %v26054_v33  ;;  %30644 = vst [vmem:[#allocation235_spill] sm:$0xff] %v26057_v2  ;;  %v26065_v20 = vpop.trf.xlu1  ;;  %v26068_v30 = vrot.slane %v19575_v61, %v22788_v62  ;;  %v26071_v27 = vrot.slane %v19607_v35, %v22788_v62  ;;  %v19439_v32 = vcombine.high %v26054_v33, %v26036_v36 }
 0x447   : > { %v19471_v25 = vcombine.high %v26057_v2, %v26039_v15  ;;  %v15173_v26 = vrot.slane %v15159_v12, %v22779_v49  ;;  %v15214_v60 = vrot.slane %v15206_v24, %v22788_v62  ;;  %v15429_v48 = vrot.slane %v15415_v28, %v22779_v49  ;;  %v30654_v2 = vld [vmem:[#allocation52_spill] sm:$0xff] }
 0x448   : > { %30645 = vst [vmem:[#allocation236_spill] sm:$0xff] %v26068_v30  ;;  %30646 = vst [vmem:[#allocation237_spill] sm:$0xff] %v26071_v27  ;;  %v15493_v4 = vrot.slane %v15479_v40, %v22788_v62  ;;  %v26086_v35 = vrot.slane %v19439_v32, %v22788_v62  ;;  %v13607_v1 = vcombine.high %v25619_v3, %v25622_v22  ;;  %v30651_v3 = vld [vmem:[#allocation59_spill] sm:$0xff]  ;;  %v30662_v15 = vld [vmem:[#allocation60_spill] sm:$0xff] }
 0x449   : > { %v26081_v34 = vpop.trf.xlu0  ;;  %v26089_v31 = vrot.slane %v19471_v25, %v22788_v62  ;;  %v13622_v28 = vcombine.low %v13557_v50, %v13573_v19  ;;  %v15157_v12 = vrot.slane %v15143_v42, %v22779_v49  ;;  %v15221_v24 = vrot.slane %v15207_v37, %v22788_v62  ;;  %v30652_v42 = vld [vmem:[#allocation58_spill] sm:$0xff]  ;;  %v30653_v37 = vld [vmem:[#allocation53_spill] sm:$0xff] }
 0x44a   : > { %30647 = vst [vmem:[#allocation238_spill] sm:$0xff] %v26086_v35  ;;  %v15494_v40 = vcombine.low %v15429_v48, %v15445_v46  ;;  %v26098_v61 = vrot.slane %v15486_v0, %v22779_v49  ;;  %v26100_v32 = vpop.trf.xlu1  ;;  %v13623_v27 = vcombine.high %v13557_v50, %v13573_v19  ;;  %v26107_v22 = vrot.slane %v15493_v4, %v22779_v49  ;;  %v30655_v0 = vld [vmem:[#allocation136_spill] sm:$0xff]  ;;  %v30659_v4 = vld [vmem:[#allocation129_spill] sm:$0xff] }
 0x44b   : > { %30648 = vst [vmem:[#allocation239_spill] sm:$0xff] %v26089_v31  ;;  %v13831_v33 = vcombine.high %v30655_v0, %v30564_v11  ;;  %v15222_v36 = vcombine.low %v15157_v12, %v15173_v26  ;;  %v26116_v57 = vrot.slane %v15214_v60, %v22779_v49  ;;  %v15495_v25 = vcombine.high %v15429_v48, %v15445_v46  ;;  %v30658_v19 = vld [vmem:[#allocation132_spill] sm:$0xff]  ;;  %v30661_v31 = vld [vmem:[#allocation61_spill] sm:$0xff] }
 0x44c   : > { %30649 = vst [vmem:[#allocation240_spill] sm:$0xff] %v26098_v61  ;;  %30650 = vst [vmem:[#allocation241_spill] sm:$0xff] %v26107_v22  ;;  %v13621_v50 = vrot.slane %v13607_v1, %v22788_v62  ;;  %v13815_v18 = vcombine.high %v30659_v4, %v30658_v19  ;;  %v26124_v30 = vrot.slane %v15221_v24, %v22779_v49  ;;  %v30664_v1 = vld [vmem:[#allocation27_spill] sm:$0xff]  ;;  %v30665_v19 = vld [vmem:[#allocation138_spill] sm:$0xff] }
 0x44d   : > { %30656 = vst [vmem:[#allocation136_spill] sm:$0xff] %v26116_v57  ;;  %v26118_v56 = vpop.trf.xlu0  ;;  %v13630_v11 = vrot.slane %v13622_v28, %v22788_v62  ;;  %v15223_v0 = vcombine.high %v15157_v12, %v15173_v26  ;;  %v15502_v60 = vrot.slane %v15494_v40, %v22788_v62  ;;  %v19695_v46 = vcombine.high %v26116_v57, %v26098_v61  ;;  %v30666_v24 = vld [vmem:[#allocation142_spill] sm:$0xff]  ;;  %v30669_v61 = vld [vmem:[#allocation12_spill] sm:$0xff] }
 0x44e   : > { %30657 = vst [vmem:[#allocation242_spill] sm:$0xff] %v26118_v56  ;;  %30660 = vst [vmem:[#allocation132_spill] sm:$0xff] %v26124_v30  ;;  %v26130_v44 = vpop.trf.xlu1  ;;  %v13637_v48 = vrot.slane %v13623_v27, %v22788_v62  ;;  %v14086_v4 = vcombine.low %v30665_v19, %v30664_v1  ;;  %v14102_v58 = vcombine.low %v30667_v54, %v30666_v24  ;;  %v30670_v56 = vld [vmem:[#allocation7_spill] sm:$0xff] }
 0x44f   : > { %30663 = vst [vmem:[#allocation129_spill] sm:$0xff] %v26130_v44  ;;  %v19727_v35 = vcombine.high %v26124_v30, %v26107_v22  ;;  %v13845_v26 = vrot.slane %v13831_v33, %v22779_v49  ;;  %v14087_v28 = vcombine.high %v30665_v19, %v30664_v1  ;;  %v15230_v12 = vrot.slane %v15222_v36, %v22788_v62  ;;  %v30671_v30 = vld [vmem:[#allocation148_spill] sm:$0xff]  ;;  %v30672_v22 = vld [vmem:[#allocation18_spill] sm:$0xff]  ;;  %v30678_v19 = vld [vmem:[#allocation143_spill] sm:$0xff] }
 0x450   : > { %v15509_v40 = vrot.slane %v15495_v25, %v22788_v62  ;;  %v13829_v27 = vrot.slane %v13815_v18, %v22779_v49  ;;  %v13879_v44 = vcombine.high %v30670_v56, %v30669_v61  ;;  %v14103_v8 = vcombine.high %v30667_v54, %v30666_v24 }
 0x451   : > { %v26146_v57 = vpop.trf.xlu0  ;;  %v14374_v33 = vcombine.low %v30672_v22, %v30671_v30  ;;  %v26156_v6 = vrot.slane %v13621_v50, %v22779_v49  ;;  %v26159_v36 = vrot.slane %v13630_v11, %v22779_v49  ;;  %v15237_v25 = vrot.slane %v15223_v0, %v22788_v62  ;;  %v30679_v50 = vld [vmem:[#allocation17_spill] sm:$0xff] }
 0x452   : > { %30668 = vst [vmem:[#allocation27_spill] sm:$0xff] %v26146_v57  ;;  %v26163_v1 = vrot.slane %v15502_v60, %v22779_v49  ;;  %v26165_v18 = vpop.trf.xlu1  ;;  %v26168_v56 = vrot.slane %v13637_v48, %v22779_v49  ;;  %v14094_v54 = vrot.slane %v14086_v4, %v22779_v49  ;;  %v14110_v61 = vrot.slane %v14102_v58, %v22779_v49 }
 0x453   : > { %30673 = vst [vmem:[#allocation138_spill] sm:$0xff] %v26156_v6  ;;  %30674 = vst [vmem:[#allocation142_spill] sm:$0xff] %v26159_v36  ;;  %v14358_v24 = vcombine.low %v30679_v50, %v30678_v19  ;;  %v13894_v57 = vcombine.low %v13829_v27, %v13845_v26  ;;  %v14101_v11 = vrot.slane %v14087_v28, %v22779_v49 }
 0x454   : > { %30675 = vst [vmem:[#allocation141_spill] sm:$0xff] %v26163_v1  ;;  %30676 = vst [vmem:[#allocation12_spill] sm:$0xff] %v26165_v18  ;;  %v26176_v0 = vrot.slane %v15230_v12, %v22779_v49  ;;  %v26179_v60 = vrot.slane %v15509_v40, %v22779_v49  ;;  %v13893_v48 = vrot.slane %v13879_v44, %v22788_v62 }
 0x455   : > { %30677 = vst [vmem:[#allocation7_spill] sm:$0xff] %v26168_v56  ;;  %v26181_v18 = vpop.trf.xlu0  ;;  %v13895_v53 = vcombine.high %v13829_v27, %v13845_v26  ;;  %v14117_v4 = vrot.slane %v14103_v8, %v22779_v49  ;;  %v26186_v58 = vrot.slane %v14374_v33, %v22779_v49  ;;  %v26189_v39 = vrot.slane %v15237_v25, %v22779_v49 }
 0x456   : > { %30680 = vst [vmem:[#allocation148_spill] sm:$0xff] %v26176_v0  ;;  %30681 = vst [vmem:[#allocation18_spill] sm:$0xff] %v26179_v60  ;;  %v26191_v28 = vpop.trf.xlu1  ;;  %v26194_v12 = vrot.slane %v19695_v46, %v22788_v62  ;;  %v26197_v40 = vrot.slane %v19727_v35, %v22788_v62  ;;  %v19831_v44 = vcombine.high %v26176_v0, %v26163_v1 }
 0x457   : > { %30682 = vst [vmem:[#allocation143_spill] sm:$0xff] %v26181_v18  ;;  %30683 = vst [vmem:[#allocation17_spill] sm:$0xff] %v26189_v39  ;;  %v14150_v26 = vcombine.low %v14094_v54, %v14110_v61  ;;  %v14151_v27 = vcombine.high %v14094_v54, %v14110_v61  ;;  %v26202_v8 = vrot.slane %v14358_v24, %v22779_v49 }
 0x458   : > { %30684 = vst [vmem:[#allocation243_spill] sm:$0xff] %v26191_v28  ;;  %30685 = vst [vmem:[#allocation244_spill] sm:$0xff] %v26194_v12  ;;  %v15566_v33 = vcombine.low %v26010_v21, %v26041_v7  ;;  %v15567_v25 = vcombine.high %v26010_v21, %v26041_v7  ;;  %v19863_v46 = vcombine.high %v26189_v39, %v26179_v60 }
 0x459   : > { %30686 = vst [vmem:[#allocation245_spill] sm:$0xff] %v26197_v40  ;;  %v26208_v18 = vpop.trf.xlu0  ;;  %v13902_v61 = vrot.slane %v13894_v57, %v22788_v62  ;;  %v13909_v24 = vrot.slane %v13895_v53, %v22788_v62  ;;  %v14166_v0 = vcombine.low %v14101_v11, %v14117_v4  ;;  %v26219_v1 = vrot.slane %v19831_v44, %v22788_v62 }
 0x45a   : > { %30687 = vst [vmem:[#allocation246_spill] sm:$0xff] %v26208_v18  ;;  %v14422_v21 = vcombine.low %v26202_v8, %v26186_v58  ;;  %v15550_v7 = vcombine.low %v26003_v51, %v26028_v9  ;;  %v15551_v35 = vcombine.high %v26003_v51, %v26028_v9  ;;  %v26227_v39 = vpop.trf.xlu1  ;;  %v26230_v54 = vrot.slane %v19863_v46, %v22788_v62 }
 0x45b   : > { %30688 = vst [vmem:[#allocation247_spill] sm:$0xff] %v26219_v1  ;;  %30689 = vst [vmem:[#allocation248_spill] sm:$0xff] %v26227_v39  ;;  %v26233_v53 = vrot.slane %v13893_v48, %v22779_v49  ;;  %v14167_v57 = vcombine.high %v14101_v11, %v14117_v4  ;;  %v30692_v44 = vcombine.high %v25795_v59, %v25801_v10 }
 0x45c   : > { %30690 = vst [vmem:[#allocation249_spill] sm:$0xff] %v26230_v54  ;;  %v30694_v12 = vcombine.high %v25817_v41, %v25820_v23  ;;  %v14158_v9 = vrot.slane %v14150_v26, %v22788_v62  ;;  %v14165_v46 = vrot.slane %v14151_v27, %v22788_v62  ;;  %v15574_v48 = vrot.slane %v15566_v33, %v22779_v49 }
 0x45d   : > { %30691 = vst [vmem:[#allocation250_spill] sm:$0xff] %v26233_v53  ;;  %v26239_v40 = vrot.slane %v30692_v44, %v22788_v62  ;;  %v15581_v11 = vrot.slane %v15567_v25, %v22779_v49  ;;  %v30696_v4 = vcombine.high %v30640_v5, %v30639_v29  ;;  %v10766_v44 = vpop.trf.xlu0  ;;  %v14174_v59 = vrot.slane %v14166_v0, %v22788_v62 }
 0x45e   : > { %v26245_v51 = vrot.slane %v30694_v12, %v22788_v62  ;;  %v14359_v12 = vcombine.high %v30679_v50, %v30678_v19  ;;  %v14375_v33 = vcombine.high %v30672_v22, %v30671_v30  ;;  %v14430_v25 = vrot.slane %v14422_v21, %v22788_v62  ;;  %v10798_v5 = vpop.trf.xlu1 }
 0x45f   : > { %30693 = vst [vmem:[#allocation251_spill] sm:$0xff] %v26239_v40  ;;  %21008 = vrot.lane.b32.xlu1 %v30696_v4, %s22566_s7  ;;  %v15558_v29 = vrot.slane %v15550_v7, %v22779_v49  ;;  %v15565_v4 = vrot.slane %v15551_v35, %v22779_v49  ;;  %v26268_v0 = vrot.slane %v13902_v61, %v22779_v49 }
 0x460   : > { %30695 = vst [vmem:[#allocation252_spill] sm:$0xff] %v26245_v51  ;;  %v26271_v19 = vrot.slane %v13909_v24, %v22779_v49  ;;  %v18111_v27 = vcombine.high %v26156_v6, %v26233_v53  ;;  %v26278_v30 = vrot.slane %v14167_v57, %v22788_v62  ;;  %v30699_v35 = vcombine.high %v30652_v42, %v30651_v3 }
 0x461   : > { %30697 = vst [vmem:[#allocation253_spill] sm:$0xff] %v26268_v0  ;;  %v15614_v22 = vcombine.low %v15558_v29, %v15574_v48  ;;  %v15615_v21 = vcombine.high %v15558_v29, %v15574_v48  ;;  %v15630_v7 = vcombine.low %v15565_v4, %v15581_v11  ;;  %v10830_v61 = vpop.trf.xlu0  ;;  %v26285_v24 = vrot.slane %v14158_v9, %v22779_v49 }
 0x462   : > { %30698 = vst [vmem:[#allocation254_spill] sm:$0xff] %v26271_v19  ;;  %v26288_v50 = vrot.slane %v14165_v46, %v22779_v49  ;;  %v15822_v26 = vcombine.low %v10766_v44, %v10830_v61  ;;  %v15823_v6 = vcombine.high %v10766_v44, %v10830_v61  ;;  %v26291_v57 = vrot.slane %v14174_v59, %v22779_v49  ;;  %v10862_v3 = vpop.trf.xlu1 }
 0x463   : > { %21010 = vrot.lane.b32.xlu1 %v30699_v35, %s22566_s7  ;;  %30700 = vst [vmem:[#allocation255_spill] sm:$0xff] %v26285_v24  ;;  %v26294_v29 = vrot.slane %v14359_v12, %v22779_v49  ;;  %v26297_v48 = vrot.slane %v14375_v33, %v22779_v49  ;;  %v26300_v35 = vrot.slane %v14430_v25, %v22779_v49 }
 0x464   : > { %30701 = vst [vmem:[#allocation256_spill] sm:$0xff] %v26288_v50  ;;  %30702 = vst [vmem:[#allocation257_spill] sm:$0xff] %v26291_v57  ;;  %v14423_v9 = vcombine.high %v26202_v8, %v26186_v58  ;;  %v15631_v46 = vcombine.high %v15565_v4, %v15581_v11  ;;  %v15838_v42 = vcombine.low %v10798_v5, %v10862_v3 }
 0x465   : > { %30703 = vst [vmem:[#allocation258_spill] sm:$0xff] %v26300_v35  ;;  %v15839_v53 = vcombine.high %v10798_v5, %v10862_v3  ;;  %v15622_v44 = vrot.slane %v15614_v22, %v22788_v62  ;;  %v15629_v59 = vrot.slane %v15615_v21, %v22788_v62  ;;  %v15638_v12 = vrot.slane %v15630_v7, %v22788_v62  ;;  %v26311_v25 = vpop.trf.xlu0 }
 0x466   : > { %v30704_v33 = vcombine.high %v30662_v15, %v30661_v31  ;;  %v30705_v58 = vcombine.high %v25782_v16, %v25785_v43  ;;  %v15830_v5 = vrot.slane %v15822_v26, %v22779_v49  ;;  %v15837_v3 = vrot.slane %v15823_v6, %v22779_v49  ;;  %v26327_v21 = vpop.trf.xlu1  ;;  %v30716_v15 = vld [vmem:[#allocation33_spill] sm:$0xff] }
 0x467   : > { %v15846_v11 = vrot.slane %v15838_v42, %v22779_v49  ;;  %v15853_v4 = vrot.slane %v15839_v53, %v22779_v49  ;;  %v30707_v22 = vcombine.high %v30654_v2, %v30653_v37  ;;  %v26330_v7 = vrot.slane %v18111_v27, %v22788_v62 }
 0x468   : > { %21012 = vrot.lane.b32.xlu1 %v30704_v33, %s22566_s7  ;;  %v26317_v8 = vrot.slane %v30705_v58, %v22788_v62  ;;  %v15645_v37 = vrot.slane %v15631_v46, %v22788_v62  ;;  %v26342_v27 = vrot.slane %v15622_v44, %v22779_v49  ;;  %v30709_v61 = vcombine.high %v30631_v13, %v30630_v52  ;;  %v30713_v52 = vld [vmem:[#allocation14_spill] sm:$0xff] }
 0x469   : > { %21006 = vrot.lane.b32.xlu0 %v30707_v22, %s22566_s7  ;;  %30708 = vst [vmem:[#allocation260_spill] sm:$0xff] %v26330_v7  ;;  %v15886_v53 = vcombine.low %v15830_v5, %v15846_v11  ;;  %v15887_v26 = vcombine.high %v15830_v5, %v15846_v11  ;;  %v15902_v33 = vcombine.low %v15837_v3, %v15853_v4  ;;  %v26348_v6 = vpop.trf.xlu0 }
 0x46a   : > { %30706 = vst [vmem:[#allocation259_spill] sm:$0xff] %v26317_v8  ;;  %v15903_v58 = vcombine.high %v15837_v3, %v15853_v4  ;;  %v30710_v44 = vcombine.high %v30633_v45, %v30632_v63  ;;  %v20046_v42 = vrot.slane %v15638_v12, %v22779_v49  ;;  %v15598_v5 = vcombine.low %v26065_v20, %v26100_v32 }
 0x46b   : > { %v15894_v3 = vrot.slane %v15886_v53, %v22788_v62  ;;  %v15901_v11 = vrot.slane %v15887_v26, %v22788_v62  ;;  %v15910_v4 = vrot.slane %v15902_v33, %v22788_v62  ;;  %v15854_v53 = vcombine.low %v26311_v25, %v26348_v6  ;;  %v10990_v26 = vpop.trf.xlu1 }
 0x46c   : > { %21014 = vrot.lane.b32.xlu1 %v30709_v61, %s22566_s7  ;;  %v15917_v46 = vrot.slane %v15903_v58, %v22788_v62  ;;  %v26361_v61 = vrot.slane %v15629_v59, %v22779_v49  ;;  %v20078_v22 = vrot.slane %v15645_v37, %v22779_v49  ;;  %v15870_v63 = vcombine.low %v26327_v21, %v10990_v26 }
 0x46d   : > { %21016 = vrot.lane.b32.xlu0 %v30710_v44, %s22566_s7  ;;  %v26369_v33 = vrot.slane %v15894_v3, %v22779_v49  ;;  %v26372_v58 = vrot.slane %v15901_v11, %v22779_v49  ;;  %v20062_v44 = vrot.slane %v15910_v4, %v22779_v49  ;;  %v30711_v45 = vcombine.high %v30636_v14, %v30635_v38  ;;  %v26384_v3 = vpop.trf.xlu0  ;;  %v30712_v11 = vld [vmem:[#allocation13_spill] sm:$0xff] }
 0x46e   : > { %v20094_v59 = vrot.slane %v15917_v46, %v22779_v49  ;;  %v18943_v13 = vcombine.high %v30713_v52, %v30712_v11  ;;  %v15582_v4 = vcombine.low %v26059_v47, %v26081_v34  ;;  %v30714_v46 = vcombine.high %v30642_v17, %v30641_v55  ;;  %v30715_v17 = vld [vmem:[#allocation32_spill] sm:$0xff] }
 0x46f   : > { %v19966_v37 = vcombine.low %v26342_v27, %v26369_v33  ;;  %v19998_v12 = vcombine.low %v26361_v61, %v26372_v58  ;;  %v15878_v38 = vrot.slane %v15870_v63, %v22779_v49  ;;  %v26399_v14 = vpop.trf.xlu1  ;;  %v20103_v52 = vcombine.high %v20046_v42, %v20062_v44 }
 0x470   : > { %21018 = vrot.lane.b32.xlu1 %v30711_v45, %s22566_s7  ;;  %v20102_v45 = vcombine.low %v20046_v42, %v20062_v44  ;;  %v20134_v11 = vcombine.low %v20078_v22, %v20094_v59  ;;  %v20135_v2 = vcombine.high %v20078_v22, %v20094_v59  ;;  %v26402_v31 = vrot.slane %v14423_v9, %v22788_v62  ;;  %v30719_v22 = vld [vmem:[#allocation171_spill] sm:$0xff] }
 0x471   : > { %21020 = vrot.lane.b32.xlu0 %v30714_v46, %s22566_s7  ;;  %v15606_v55 = vrot.slane %v15598_v5, %v22779_v49  ;;  %v15862_v46 = vrot.slane %v15854_v53, %v22779_v49  ;;  %v19079_v16 = vcombine.high %v30716_v15, %v30715_v17  ;;  %v15599_v43 = vcombine.high %v26065_v20, %v26100_v32  ;;  %v26412_v41 = vpop.trf.xlu0  ;;  %v30720_v5 = vld [vmem:[#allocation167_spill] sm:$0xff]  ;;  %v30721_v20 = vld [vmem:[#allocation172_spill] sm:$0xff]  ;;  %v30722_v32 = vld [vmem:[#allocation170_spill] sm:$0xff] }
 0x472   : > { %v15871_v63 = vcombine.high %v26327_v21, %v10990_v26  ;;  %v26415_v42 = vrot.slane %v19966_v37, %v22788_v62  ;;  %v26418_v9 = vrot.slane %v19998_v12, %v22788_v62  ;;  %v15590_v44 = vrot.slane %v15582_v4, %v22779_v49  ;;  %v30723_v26 = vld [vmem:[#allocation162_spill] sm:$0xff] }
 0x473   : > { %v15918_v59 = vcombine.low %v15862_v46, %v15878_v38  ;;  %v15919_v17 = vcombine.high %v15862_v46, %v15878_v38  ;;  %v26426_v21 = vpop.trf.xlu1  ;;  %v30724_v37 = vld [vmem:[#allocation22_spill] sm:$0xff]  ;;  %v26431_v12 = vrot.slane %v20102_v45, %v22788_v62  ;;  %v26434_v23 = vrot.slane %v20134_v11, %v22788_v62 }
 0x474   : > { %21022 = vrot.lane.b32.xlu1 %v18943_v13, %s22566_s7  ;;  %30717 = vst [vmem:[#allocation261_spill] sm:$0xff] %v26415_v42  ;;  %30718 = vst [vmem:[#allocation262_spill] sm:$0xff] %v26418_v9  ;;  %v14646_v13 = vcombine.low %v30722_v32, %v30721_v20  ;;  %v19487_v15 = vcombine.high %v30724_v37, %v30723_v26  ;;  %v15646_v53 = vcombine.low %v15590_v44, %v15606_v55  ;;  %v30728_v46 = vld [vmem:[#allocation166_spill] sm:$0xff] }
 0x475   : > { %21024 = vrot.lane.b32.xlu0 %v19079_v16, %s22566_s7  ;;  %30725 = vst [vmem:[#allocation171_spill] sm:$0xff] %v26431_v12  ;;  %30726 = vst [vmem:[#allocation167_spill] sm:$0xff] %v26434_v23  ;;  %v15647_v4 = vcombine.high %v15590_v44, %v15606_v55  ;;  %v15855_v38 = vcombine.high %v26311_v25, %v26348_v6  ;;  %v30727_v16 = vld [vmem:[#allocation165_spill] sm:$0xff]  ;;  %v15583_v54 = vcombine.high %v26059_v47, %v26081_v34  ;;  %v26445_v45 = vpop.trf.xlu0 }
 0x476   : > { %v19623_v10 = vcombine.high %v30728_v46, %v30727_v16  ;;  %v15613_v1 = vrot.slane %v15599_v43, %v22779_v49  ;;  %v15885_v26 = vrot.slane %v15871_v63, %v22779_v49  ;;  %30729 = vst [vmem:[#allocation172_spill] sm:$0xff] %v26445_v45  ;;  %v20031_v55 = vcombine.high %v26415_v42, %v26418_v9  ;;  %v30741_v42 = vld [vmem:[#allocation27_spill] sm:$0xff]  ;;  %v30742_v16 = vld [vmem:[#allocation242_spill] sm:$0xff] }
 0x477   : > { %v15926_v11 = vrot.slane %v15918_v59, %v22788_v62  ;;  %v15933_v25 = vrot.slane %v15919_v17, %v22788_v62  ;;  %v26453_v6 = vrot.slane %v20103_v52, %v22788_v62  ;;  %v26456_v43 = vrot.slane %v20135_v2, %v22788_v62  ;;  %v26458_v47 = vpop.trf.xlu1 }
 0x478   : > { %21026 = vrot.lane.b32.xlu1 %v19487_v15, %s22566_s7  ;;  %30730 = vst [vmem:[#allocation170_spill] sm:$0xff] %v26458_v47  ;;  %v19967_v15 = vcombine.high %v26342_v27, %v26369_v33  ;;  %v19999_v34 = vcombine.high %v26361_v61, %v26372_v58  ;;  %v15654_v52 = vrot.slane %v15646_v53, %v22788_v62 }
 0x479   : > { %21028 = vrot.lane.b32.xlu0 %v19623_v10, %s22566_s7  ;;  %v15661_v17 = vrot.slane %v15647_v4, %v22788_v62  ;;  %v15869_v2 = vrot.slane %v15855_v38, %v22779_v49  ;;  %v20167_v44 = vcombine.high %v26431_v12, %v26434_v23  ;;  %v26474_v27 = vpop.trf.xlu0  ;;  %v15597_v59 = vrot.slane %v15583_v54, %v22779_v49 }
 0x47a   : > { %30731 = vst [vmem:[#allocation263_spill] sm:$0xff] %v26474_v27  ;;  %v26479_v33 = vrot.slane %v19967_v15, %v22788_v62  ;;  %v26482_v58 = vrot.slane %v19999_v34, %v22788_v62  ;;  %v26491_v10 = vrot.slane %v15926_v11, %v22779_v49  ;;  %v26494_v15 = vrot.slane %v15933_v25, %v22779_v49  ;;  %v30737_v11 = vld [vmem:[#allocation129_spill] sm:$0xff] }
 0x47b   : > { %v15934_v4 = vcombine.low %v15869_v2, %v15885_v26  ;;  %v15935_v38 = vcombine.high %v15869_v2, %v15885_v26  ;;  %v26496_v34 = vpop.trf.xlu1  ;;  %v14631_v26 = vcombine.high %v30720_v5, %v30719_v22  ;;  %v14647_v2 = vcombine.high %v30722_v32, %v30721_v20 }
 0x47c   : > { %21030 = vrot.lane.b32.xlu1 %v20031_v55, %s22566_s7  ;;  %30732 = vst [vmem:[#allocation264_spill] sm:$0xff] %v26482_v58  ;;  %v15974_v55 = vcombine.low %v26399_v14, %v26426_v21  ;;  %30733 = vst [vmem:[#allocation265_spill] sm:$0xff] %v26491_v10  ;;  %v15958_v25 = vcombine.low %v26384_v3, %v26412_v41  ;;  %v15662_v61 = vcombine.low %v15597_v59, %v15613_v1 }
 0x47d   : > { %21032 = vrot.lane.b32.xlu0 %v20167_v44, %s22566_s7  ;;  %30734 = vst [vmem:[#allocation266_spill] sm:$0xff] %v26494_v15  ;;  %30735 = vst [vmem:[#allocation267_spill] sm:$0xff] %v26496_v34  ;;  %v30736_v44 = vld [vmem:[#allocation12_spill] sm:$0xff]  ;;  %v15663_v23 = vcombine.high %v15597_v59, %v15613_v1  ;;  %v26511_v12 = vrot.slane %v15654_v52, %v22779_v49  ;;  %v26514_v63 = vrot.slane %v15661_v17, %v22779_v49  ;;  %v26516_v54 = vpop.trf.xlu0 }
 0x47e   : > { %v15702_v53 = vcombine.low %v30737_v11, %v30736_v44  ;;  %v30740_v20 = vcombine.low %v26294_v29, %v26297_v48  ;;  %v26525_v9 = vrot.slane %v14646_v13, %v22779_v49  ;;  %v15686_v1 = vcombine.low %v30742_v16, %v30741_v42 }
 0x47f   : > { %30738 = vst [vmem:[#allocation12_spill] sm:$0xff] %v26511_v12  ;;  %30739 = vst [vmem:[#allocation129_spill] sm:$0xff] %v26514_v63  ;;  %v15982_v52 = vrot.slane %v15974_v55, %v22779_v49  ;;  %v15942_v59 = vrot.slane %v15934_v4, %v22788_v62  ;;  %v15949_v17 = vrot.slane %v15935_v38, %v22788_v62  ;;  %v26532_v46 = vpop.trf.xlu1 }
 0x480   : > { %v26522_v32 = vrot.slane %v30740_v20, %v22788_v62  ;;  %v19983_v37 = vcombine.high %v26511_v12, %v26491_v10  ;;  %v20015_v20 = vcombine.high %v26514_v63, %v26494_v15  ;;  %v30743_v13 = vcombine.high %v26294_v29, %v26297_v48 }
 0x481   : > { %v30744_v4 = vcombine.low %v30720_v5, %v30719_v22  ;;  %v15710_v38 = vrot.slane %v15702_v53, %v22779_v49  ;;  %v15966_v45 = vrot.slane %v15958_v25, %v22779_v49  ;;  %v26553_v12 = vrot.slane %v14631_v26, %v22779_v49 }
 0x482   : > { %v26542_v60 = vrot.slane %v30743_v13, %v22788_v62  ;;  %v26556_v63 = vrot.slane %v14647_v2, %v22779_v49  ;;  %v15670_v29 = vrot.slane %v15662_v61, %v22788_v62  ;;  %v15677_v48 = vrot.slane %v15663_v23, %v22788_v62  ;;  %v26560_v13 = vpop.trf.xlu0 }
 0x483   : > { %v26548_v55 = vrot.slane %v30744_v4, %v22779_v49  ;;  %v15694_v22 = vrot.slane %v15686_v1, %v22779_v49  ;;  %v15975_v5 = vcombine.high %v26399_v14, %v26426_v21  ;;  %v16022_v53 = vcombine.low %v15966_v45, %v15982_v52  ;;  %v26575_v61 = vpop.trf.xlu1 }
 0x484   : > { %v16023_v4 = vcombine.high %v15966_v45, %v15982_v52  ;;  %v26570_v25 = vrot.slane %v15942_v59, %v22779_v49  ;;  %v26573_v23 = vrot.slane %v15949_v17, %v22779_v49  ;;  %v15703_v1 = vcombine.high %v30737_v11, %v30736_v44 }
 0x485   : > { %v14694_v26 = vcombine.low %v26548_v55, %v26525_v9  ;;  %v14695_v2 = vcombine.high %v26548_v55, %v26525_v9  ;;  %v15750_v14 = vcombine.low %v15694_v22, %v15710_v38  ;;  %v15751_v21 = vcombine.high %v15694_v22, %v15710_v38  ;;  %v30747_v9 = vld [vmem:[#allocation190_spill] sm:$0xff]  ;;  %v30748_v55 = vld [vmem:[#allocation184_spill] sm:$0xff] }
 0x486   : > { %30745 = vst [vmem:[#allocation27_spill] sm:$0xff] %v26570_v25  ;;  %30746 = vst [vmem:[#allocation242_spill] sm:$0xff] %v26573_v23  ;;  %v15959_v45 = vcombine.high %v26384_v3, %v26412_v41  ;;  %v14710_v52 = vcombine.low %v26553_v12, %v26556_v63  ;;  %v14918_v59 = vcombine.low %v30748_v55, %v30747_v9  ;;  %v26591_v10 = vpop.trf.xlu0 }
 0x487   : > { %v26586_v15 = vrot.slane %v15670_v29, %v22779_v49  ;;  %v26589_v17 = vrot.slane %v15677_v48, %v22779_v49  ;;  %v15687_v44 = vcombine.high %v30742_v16, %v30741_v42  ;;  %v15989_v11 = vrot.slane %v15975_v5, %v22779_v49  ;;  %v26598_v38 = vpop.trf.xlu1 }
 0x488   : > { %v16030_v41 = vrot.slane %v16022_v53, %v22788_v62  ;;  %v16037_v3 = vrot.slane %v16023_v4, %v22788_v62  ;;  %v26601_v22 = vrot.slane %v19983_v37, %v22788_v62  ;;  %v26604_v29 = vrot.slane %v20015_v20, %v22788_v62 }
 0x489   : > { %30749 = vst [vmem:[#allocation190_spill] sm:$0xff] %v26586_v15  ;;  %30750 = vst [vmem:[#allocation184_spill] sm:$0xff] %v26589_v17  ;;  %v20119_v48 = vcombine.high %v26586_v15, %v26570_v25  ;;  %v20151_v42 = vcombine.high %v26589_v17, %v26573_v23  ;;  %v15717_v16 = vrot.slane %v15703_v1, %v22779_v49  ;;  %v30755_v17 = vld [vmem:[#allocation185_spill] sm:$0xff] }
 0x48a   : > { %30751 = vst [vmem:[#allocation268_spill] sm:$0xff] %v26601_v22  ;;  %30752 = vst [vmem:[#allocation269_spill] sm:$0xff] %v26604_v29  ;;  %v15758_v5 = vrot.slane %v15750_v14, %v22788_v62  ;;  %v15765_v53 = vrot.slane %v15751_v21, %v22788_v62  ;;  %v15973_v4 = vrot.slane %v15959_v45, %v22779_v49  ;;  %v26614_v27 = vpop.trf.xlu0  ;;  %v30756_v14 = vld [vmem:[#allocation181_spill] sm:$0xff] }
 0x48b   : > { %v26619_v20 = vrot.slane %v20119_v48, %v22788_v62  ;;  %v26622_v15 = vrot.slane %v20151_v42, %v22788_v62  ;;  %v14902_v23 = vcombine.low %v30756_v14, %v30755_v17  ;;  %v15701_v21 = vrot.slane %v15687_v44, %v22779_v49  ;;  %v26635_v48 = vpop.trf.xlu1 }
 0x48c   : > { %v16038_v45 = vcombine.low %v15973_v4, %v15989_v11  ;;  %v16039_v25 = vcombine.high %v15973_v4, %v15989_v11  ;;  %v26630_v18 = vrot.slane %v16030_v41, %v22779_v49  ;;  %v26633_v37 = vrot.slane %v16037_v3, %v22779_v49 }
 0x48d   : > { %30753 = vst [vmem:[#allocation270_spill] sm:$0xff] %v26619_v20  ;;  %30754 = vst [vmem:[#allocation271_spill] sm:$0xff] %v26622_v15  ;;  %v14702_v29 = vrot.slane %v14694_v26, %v22788_v62  ;;  %v14711_v44 = vcombine.high %v26553_v12, %v26556_v63  ;;  %v14919_v11 = vcombine.high %v30748_v55, %v30747_v9  ;;  %v30776_v15 = vld [vmem:[#allocation203_spill] sm:$0xff] }
 0x48e   : > { %30757 = vst [vmem:[#allocation185_spill] sm:$0xff] %v26630_v18  ;;  %30758 = vst [vmem:[#allocation181_spill] sm:$0xff] %v26633_v37  ;;  %v14926_v41 = vrot.slane %v14918_v59, %v22779_v49  ;;  %v15766_v3 = vcombine.low %v15701_v21, %v15717_v16  ;;  %v15767_v4 = vcombine.high %v15701_v21, %v15717_v16  ;;  %v26653_v47 = vpop.trf.xlu0  ;;  %v30777_v20 = vld [vmem:[#allocation199_spill] sm:$0xff] }
 0x48f   : > { %v26648_v22 = vrot.slane %v15758_v5, %v22779_v49  ;;  %v26651_v42 = vrot.slane %v15765_v53, %v22779_v49  ;;  %v14709_v26 = vrot.slane %v14695_v2, %v22788_v62  ;;  %v14718_v1 = vrot.slane %v14710_v52, %v22788_v62  ;;  %v26662_v59 = vpop.trf.xlu1 }
 0x490   : > { %v14903_v12 = vcombine.high %v30756_v14, %v30755_v17  ;;  %v14910_v63 = vrot.slane %v14902_v23, %v22779_v49  ;;  %v16046_v9 = vrot.slane %v16038_v45, %v22788_v62  ;;  %v16053_v55 = vrot.slane %v16039_v25, %v22788_v62 }
 0x491   : > { %30759 = vst [vmem:[#allocation272_spill] sm:$0xff] %v26648_v22  ;;  %30760 = vst [vmem:[#allocation273_spill] sm:$0xff] %v26651_v42  ;;  %v20239_v16 = vcombine.high %v26648_v22, %v26630_v18  ;;  %v20271_v5 = vcombine.high %v26651_v42, %v26633_v37  ;;  %v26670_v2 = vrot.slane %v26278_v30, %v22779_v49 }
 0x492   : > { %v26674_v52 = vrot.slane %v26402_v31, %v22779_v49  ;;  %v14725_v23 = vrot.slane %v14711_v44, %v22788_v62  ;;  %v14933_v25 = vrot.slane %v14919_v11, %v22779_v49  ;;  %v26680_v17 = vrot.slane %v26522_v32, %v22779_v49  ;;  %v26684_v45 = vpop.trf.xlu0 }
 0x493   : > { %30761 = vst [vmem:[#allocation274_spill] sm:$0xff] %v26670_v2  ;;  %v14966_v53 = vcombine.low %v14910_v63, %v14926_v41  ;;  %v15774_v14 = vrot.slane %v15766_v3, %v22788_v62  ;;  %v15781_v21 = vrot.slane %v15767_v4, %v22788_v62  ;;  %v26688_v30 = vrot.slane %v26542_v60, %v22779_v49  ;;  %v26706_v60 = vpop.trf.xlu1 }
 0x494   : > { %30762 = vst [vmem:[#allocation275_spill] sm:$0xff] %v26674_v52  ;;  %30763 = vst [vmem:[#allocation276_spill] sm:$0xff] %v26680_v17  ;;  %v26691_v31 = vrot.slane %v14702_v29, %v22779_v49  ;;  %v14917_v44 = vrot.slane %v14903_v12, %v22779_v49  ;;  %v14967_v11 = vcombine.high %v14910_v63, %v14926_v41  ;;  %v30771_v12 = vld [vmem:[#allocation207_spill] sm:$0xff]  ;;  %v30772_v41 = vld [vmem:[#allocation200_spill] sm:$0xff] }
 0x495   : > { %30764 = vst [vmem:[#allocation277_spill] sm:$0xff] %v26688_v30  ;;  %v26695_v32 = vrot.slane %v14709_v26, %v22779_v49  ;;  %v26698_v42 = vrot.slane %v14718_v1, %v22779_v49  ;;  %v26701_v3 = vrot.slane %v16046_v9, %v22779_v49  ;;  %v26704_v4 = vrot.slane %v16053_v55, %v22779_v49 }
 0x496   : > { %30765 = vst [vmem:[#allocation278_spill] sm:$0xff] %v26691_v31  ;;  %v26709_v29 = vrot.slane %v14725_v23, %v22779_v49  ;;  %v14982_v37 = vcombine.low %v14917_v44, %v14933_v25  ;;  %v15190_v63 = vcombine.low %v30772_v41, %v30771_v12  ;;  %v16110_v26 = vcombine.low %v26532_v46, %v26575_v61  ;;  %v26722_v18 = vpop.trf.xlu0 }
 0x497   : > { %30766 = vst [vmem:[#allocation279_spill] sm:$0xff] %v26695_v32  ;;  %30767 = vst [vmem:[#allocation280_spill] sm:$0xff] %v26698_v42  ;;  %v14974_v1 = vrot.slane %v14966_v53, %v22788_v62  ;;  %v14983_v22 = vcombine.high %v14917_v44, %v14933_v25  ;;  %v26717_v9 = vrot.slane %v15774_v14, %v22779_v49  ;;  %v26731_v25 = vpop.trf.xlu1 }
 0x498   : > { %30768 = vst [vmem:[#allocation281_spill] sm:$0xff] %v26701_v3  ;;  %30769 = vst [vmem:[#allocation282_spill] sm:$0xff] %v26704_v4  ;;  %v26720_v55 = vrot.slane %v15781_v21, %v22779_v49  ;;  %v14981_v23 = vrot.slane %v14967_v11, %v22788_v62  ;;  %v15174_v34 = vcombine.low %v30777_v20, %v30776_v15 }
 0x499   : > { %30770 = vst [vmem:[#allocation283_spill] sm:$0xff] %v26709_v29  ;;  %30773 = vst [vmem:[#allocation207_spill] sm:$0xff] %v26717_v9  ;;  %v15191_v28 = vcombine.high %v30772_v41, %v30771_v12  ;;  %v16094_v53 = vcombine.low %v26516_v54, %v26560_v13  ;;  %v26734_v14 = vrot.slane %v20239_v16, %v22788_v62 }
 0x49a   : > { %30774 = vst [vmem:[#allocation200_spill] sm:$0xff] %v26720_v55  ;;  %30775 = vst [vmem:[#allocation284_spill] sm:$0xff] %v26722_v18  ;;  %v26737_v21 = vrot.slane %v20271_v5, %v22788_v62  ;;  %v20375_v44 = vcombine.high %v26717_v9, %v26701_v3  ;;  %v20407_v11 = vcombine.high %v26720_v55, %v26704_v4 }
 0x49b   : > { %30778 = vst [vmem:[#allocation203_spill] sm:$0xff] %v26731_v25  ;;  %30779 = vst [vmem:[#allocation199_spill] sm:$0xff] %v26734_v14  ;;  %v15175_v12 = vcombine.high %v30777_v20, %v30776_v15  ;;  %v15198_v41 = vrot.slane %v15190_v63, %v22779_v49  ;;  %v16111_v18 = vcombine.high %v26532_v46, %v26575_v61  ;;  %v26749_v25 = vpop.trf.xlu0  ;;  %v30791_v14 = vld [vmem:[#allocation225_spill] sm:$0xff] }
 0x49c   : > { %30780 = vst [vmem:[#allocation285_spill] sm:$0xff] %v26737_v21  ;;  %v16118_v16 = vrot.slane %v16110_v26, %v22779_v49  ;;  %30781 = vst [vmem:[#allocation286_spill] sm:$0xff] %v26749_v25  ;;  %v26754_v9 = vrot.slane %v20375_v44, %v22788_v62  ;;  %v26757_v55 = vrot.slane %v20407_v11, %v22788_v62 }
 0x49d   : > { %v15182_v20 = vrot.slane %v15174_v34, %v22779_v49  ;;  %v15205_v46 = vrot.slane %v15191_v28, %v22779_v49  ;;  %v30784_v61 = vcombine.high %v26159_v36, %v26268_v0  ;;  %v30786_v26 = vcombine.high %v26168_v56, %v26271_v19  ;;  %v26778_v34 = vpop.trf.xlu1 }
 0x49e   : > { %30782 = vst [vmem:[#allocation287_spill] sm:$0xff] %v26754_v9  ;;  %30783 = vst [vmem:[#allocation288_spill] sm:$0xff] %v26757_v55  ;;  %v16095_v11 = vcombine.high %v26516_v54, %v26560_v13  ;;  %v16102_v15 = vrot.slane %v16094_v53, %v22779_v49  ;;  %v14990_v5 = vrot.slane %v14982_v37, %v22788_v62  ;;  %v30792_v37 = vld [vmem:[#allocation221_spill] sm:$0xff] }
 0x49f   : > { %v26767_v63 = vrot.slane %v30784_v61, %v22788_v62  ;;  %v26773_v44 = vrot.slane %v30786_v26, %v22788_v62  ;;  %30788 = vst [vmem:[#allocation291_spill] sm:$0xff] %v26778_v34  ;;  %v14997_v36 = vrot.slane %v14983_v22, %v22788_v62  ;;  %v15189_v26 = vrot.slane %v15175_v12, %v22779_v49  ;;  %v11790_v28 = vpop.trf.xlu0 }
 0x4a0   : > { %v15238_v56 = vcombine.low %v15182_v20, %v15198_v41  ;;  %v26788_v19 = vrot.slane %v14974_v1, %v22779_v49  ;;  %v26791_v54 = vrot.slane %v14981_v23, %v22779_v49  ;;  %v16125_v13 = vrot.slane %v16111_v18, %v22779_v49 }
 0x4a1   : > { %30785 = vst [vmem:[#allocation289_spill] sm:$0xff] %v26767_v63  ;;  %30787 = vst [vmem:[#allocation290_spill] sm:$0xff] %v26773_v44  ;;  %v16158_v53 = vcombine.low %v16102_v15, %v16118_v16  ;;  %v15239_v0 = vcombine.high %v15182_v20, %v15198_v41  ;;  %v15254_v21 = vcombine.low %v15189_v26, %v15205_v46  ;;  %v11822_v1 = vpop.trf.xlu1 }
 0x4a2   : > { %30789 = vst [vmem:[#allocation292_spill] sm:$0xff] %v26788_v19  ;;  %30790 = vst [vmem:[#allocation293_spill] sm:$0xff] %v26791_v54  ;;  %v15255_v61 = vcombine.high %v15189_v26, %v15205_v46  ;;  %v15446_v55 = vcombine.low %v30792_v37, %v30791_v14  ;;  %v15447_v22 = vcombine.high %v30792_v37, %v30791_v14  ;;  %v30795_v46 = vld [vmem:[#allocation230_spill] sm:$0xff]  ;;  %v30796_v14 = vld [vmem:[#allocation224_spill] sm:$0xff] }
 0x4a3   : > { %v16109_v12 = vrot.slane %v16095_v11, %v22779_v49  ;;  %v18655_v18 = vcombine.high %v26288_v50, %v26674_v52  ;;  %v26804_v9 = vrot.slane %v14990_v5, %v22779_v49  ;;  %v26807_v41 = vrot.slane %v14997_v36, %v22779_v49  ;;  %v11854_v3 = vpop.trf.xlu0 }
 0x4a4   : > { %v26810_v20 = vrot.slane %v15238_v56, %v22788_v62  ;;  %v15462_v26 = vcombine.low %v30796_v14, %v30795_v46  ;;  %v16159_v11 = vcombine.high %v16102_v15, %v16118_v16  ;;  %v16166_v37 = vrot.slane %v16158_v53, %v22788_v62 }
 0x4a5   : > { %30793 = vst [vmem:[#allocation225_spill] sm:$0xff] %v26804_v9  ;;  %30794 = vst [vmem:[#allocation221_spill] sm:$0xff] %v26807_v41  ;;  %v16174_v4 = vcombine.low %v16109_v12, %v16125_v13  ;;  %v16175_v23 = vcombine.high %v16109_v12, %v16125_v13  ;;  %v26816_v50 = vrot.slane %v15239_v0, %v22788_v62  ;;  %v11886_v13 = vpop.trf.xlu1 }
 0x4a6   : > { %v26819_v5 = vrot.slane %v15254_v21, %v22788_v62  ;;  %v16366_v36 = vcombine.low %v11790_v28, %v11854_v3  ;;  %v16367_v52 = vcombine.high %v11790_v28, %v11854_v3  ;;  %v26822_v56 = vrot.slane %v15255_v61, %v22788_v62 }
 0x4a7   : > { %v26825_v25 = vrot.slane %v15446_v55, %v22779_v49  ;;  %v26828_v16 = vrot.slane %v15447_v22, %v22779_v49  ;;  %v15463_v15 = vcombine.high %v30796_v14, %v30795_v46  ;;  %v26833_v0 = vrot.slane %v15462_v26, %v22779_v49  ;;  %v26847_v46 = vpop.trf.xlu0 }
 0x4a8   : > { %v16382_v21 = vcombine.low %v11822_v1, %v11886_v13  ;;  %v16383_v53 = vcombine.high %v11822_v1, %v11886_v13  ;;  %v30797_v3 = vcombine.high %v26285_v24, %v26300_v35  ;;  %v16173_v55 = vrot.slane %v16159_v11, %v22788_v62 }
 0x4a9   : > { %v16182_v61 = vrot.slane %v16174_v4, %v22788_v62  ;;  %v16189_v22 = vrot.slane %v16175_v23, %v22788_v62  ;;  %v26845_v12 = vrot.slane %v16166_v37, %v22779_v49  ;;  %v16374_v14 = vrot.slane %v16366_v36, %v22779_v49 }
 0x4aa   : > { %v26839_v28 = vrot.slane %v30797_v3, %v22788_v62  ;;  %v16381_v1 = vrot.slane %v16367_v52, %v22779_v49  ;;  %v16390_v26 = vrot.slane %v16382_v21, %v22779_v49  ;;  %v16397_v13 = vrot.slane %v16383_v53, %v22779_v49  ;;  %v11950_v3 = vpop.trf.xlu1 }
 0x4ab   : > { %v26854_v11 = vrot.slane %v18655_v18, %v22788_v62  ;;  %v18759_v4 = vcombine.high %v26291_v57, %v26680_v17  ;;  %v18791_v23 = vcombine.high %v26670_v2, %v26688_v30  ;;  %v26863_v21 = vrot.slane %v16173_v55, %v22779_v49  ;;  %v11982_v53 = vpop.trf.xlu0 }
 0x4ac   : > { %30798 = vst [vmem:[#allocation230_spill] sm:$0xff] %v26839_v28  ;;  %v16430_v36 = vcombine.low %v16374_v14, %v16390_v26  ;;  %v16431_v24 = vcombine.high %v16374_v14, %v16390_v26  ;;  %v16446_v52 = vcombine.low %v16381_v1, %v16397_v13  ;;  %v16447_v35 = vcombine.high %v16381_v1, %v16397_v13 }
 0x4ad   : > { %30799 = vst [vmem:[#allocation224_spill] sm:$0xff] %v26854_v11  ;;  %v26868_v34 = vrot.slane %v18759_v4, %v22788_v62  ;;  %v26871_v57 = vrot.slane %v18791_v23, %v22788_v62  ;;  %v26878_v55 = vrot.slane %v16182_v61, %v22779_v49  ;;  %v26881_v26 = vrot.slane %v16189_v22, %v22779_v49 }
 0x4ae   : > { %v16438_v2 = vrot.slane %v16430_v36, %v22788_v62  ;;  %v16445_v37 = vrot.slane %v16431_v24, %v22788_v62  ;;  %v16454_v14 = vrot.slane %v16446_v52, %v22788_v62  ;;  %v16461_v1 = vrot.slane %v16447_v35, %v22788_v62  ;;  %v12014_v13 = vpop.trf.xlu1 }
 0x4af   : > { %30800 = vst [vmem:[#allocation294_spill] sm:$0xff] %v26868_v34  ;;  %30801 = vst [vmem:[#allocation295_spill] sm:$0xff] %v26871_v57  ;;  %v26900_v22 = vrot.slane %v15463_v15, %v22779_v49  ;;  %v16142_v52 = vcombine.low %v26598_v38, %v26635_v48  ;;  %v16414_v18 = vcombine.low %v11950_v3, %v12014_v13 }
 0x4b0   : > { %v26888_v36 = vrot.slane %v16438_v2, %v22779_v49  ;;  %v26891_v24 = vrot.slane %v16445_v37, %v22779_v49  ;;  %v26894_v35 = vrot.slane %v16454_v14, %v22779_v49  ;;  %v26897_v61 = vrot.slane %v16461_v1, %v22779_v49  ;;  %v12046_v2 = vpop.trf.xlu0 }
 0x4b1   : > { %v16398_v4 = vcombine.low %v26847_v46, %v11982_v53  ;;  %v16126_v23 = vcombine.low %v26591_v10, %v26614_v27  ;;  %v16143_v30 = vcombine.high %v26598_v38, %v26635_v48  ;;  %v16415_v17 = vcombine.high %v11950_v3, %v12014_v13 }
 0x4b2   : > { %v20646_v37 = vcombine.low %v26878_v55, %v26894_v35  ;;  %v20678_v14 = vcombine.low %v26881_v26, %v26897_v61  ;;  %v20510_v1 = vcombine.low %v26845_v12, %v26888_v36  ;;  %v20542_v15 = vcombine.low %v26863_v21, %v26891_v24  ;;  %v12078_v34 = vpop.trf.xlu1 }
 0x4b3   : > { %v16399_v39 = vcombine.high %v26847_v46, %v11982_v53  ;;  %v16127_v48 = vcombine.high %v26591_v10, %v26614_v27  ;;  %v16150_v46 = vrot.slane %v16142_v52, %v22779_v49  ;;  %v16422_v53 = vrot.slane %v16414_v18, %v22779_v49 }
 0x4b4   : > { %v26919_v57 = vrot.slane %v20646_v37, %v22788_v62  ;;  %v26922_v28 = vrot.slane %v20678_v14, %v22788_v62  ;;  %v26925_v11 = vrot.slane %v20510_v1, %v22788_v62  ;;  %v26928_v63 = vrot.slane %v20542_v15, %v22788_v62  ;;  %v12110_v3 = vpop.trf.xlu0 }
 0x4b5   : > { %v16406_v13 = vrot.slane %v16398_v4, %v22779_v49  ;;  %v16134_v10 = vrot.slane %v16126_v23, %v22779_v49  ;;  %v16502_v52 = vcombine.low %v12046_v2, %v12110_v3  ;;  %v16157_v18 = vrot.slane %v16143_v30, %v22779_v49 }
 0x4b6   : > { %30802 = vst [vmem:[#allocation296_spill] sm:$0xff] %v26919_v57  ;;  %30803 = vst [vmem:[#allocation297_spill] sm:$0xff] %v26922_v28  ;;  %v20711_v37 = vcombine.high %v26919_v57, %v26922_v28  ;;  %v20575_v14 = vcombine.high %v26925_v11, %v26928_v63  ;;  %v12142_v27 = vpop.trf.xlu1  ;;  %v16429_v4 = vrot.slane %v16415_v17, %v22779_v49  ;;  %v30827_v57 = vld [vmem:[#allocation41_spill] sm:$0xff] }
 0x4b7   : > { %30804 = vst [vmem:[#allocation298_spill] sm:$0xff] %v26925_v11  ;;  %30805 = vst [vmem:[#allocation299_spill] sm:$0xff] %v26928_v63  ;;  %v16413_v38 = vrot.slane %v16399_v39, %v22779_v49  ;;  %v16518_v44 = vcombine.low %v12078_v34, %v12142_v27  ;;  %v16141_v8 = vrot.slane %v16127_v48, %v22779_v49 }
 0x4b8   : > { %21036 = vrot.lane.b32.xlu0 %v20711_v37, %s22566_s7  ;;  %v16246_v1 = vcombine.low %v26662_v59, %v26706_v60  ;;  %v16519_v7 = vcombine.high %v12078_v34, %v12142_v27  ;;  %v16503_v15 = vcombine.high %v12046_v2, %v12110_v3  ;;  %21034 = vrot.lane.b32.xlu1 %v20575_v14, %s22566_s7  ;;  %v30806_v14 = vld [vmem:[#allocation54_spill] sm:$0xff]  ;;  %v30810_v27 = vld [vmem:[#allocation57_spill] sm:$0xff]  ;;  %s22579_s7 = smov 30  }
 0x4b9   : > { %v16190_v23 = vcombine.low %v16134_v10, %v16150_v46  ;;  %v16247_v30 = vcombine.high %v26662_v59, %v26706_v60  ;;  %v16462_v40 = vcombine.low %v16406_v13, %v16422_v53  ;;  %v16463_v17 = vcombine.high %v16406_v13, %v16422_v53  ;;  %v30807_v59 = vld [vmem:[#allocation55_spill] sm:$0xff] }
 0x4ba   : > { %v16191_v51 = vcombine.high %v16134_v10, %v16150_v46  ;;  %v16230_v39 = vcombine.low %v26653_v47, %v26684_v45  ;;  %v16526_v37 = vrot.slane %v16518_v44, %v22779_v49  ;;  %v16510_v48 = vrot.slane %v16502_v52, %v22779_v49  ;;  %v30809_v10 = vld [vmem:[#allocation56_spill] sm:$0xff] }
 0x4bb   : > { %v16206_v58 = vcombine.low %v16141_v8, %v16157_v18  ;;  %v16231_v34 = vcombine.high %v26653_v47, %v26684_v45  ;;  %v16478_v2 = vcombine.low %v16413_v38, %v16429_v4  ;;  %v16479_v3 = vcombine.high %v16413_v38, %v16429_v4 }
 0x4bc   : > { %v30808_v60 = vcombine.low %v30806_v14, %v30807_v59  ;;  %v16207_v46 = vcombine.high %v16141_v8, %v16157_v18  ;;  %v16254_v53 = vrot.slane %v16246_v1, %v22779_v49  ;;  %v16533_v13 = vrot.slane %v16519_v7, %v22779_v49 }
 0x4bd   : > { %v16517_v44 = vrot.slane %v16503_v15, %v22779_v49  ;;  %v30811_v52 = vcombine.low %v30809_v10, %v30810_v27  ;;  %v16198_v47 = vrot.slane %v16190_v23, %v22788_v62  ;;  %v16261_v45 = vrot.slane %v16247_v30, %v22779_v49  ;;  %v30812_v30 = vld [vmem:[#allocation62_spill] sm:$0xff]  ;;  %v30813_v27 = vld [vmem:[#allocation63_spill] sm:$0xff] }
 0x4be   : > { %21072 = vrot.lane.b32.xlu0 %v30808_v60, %s22567_s8  ;;  %v16470_v38 = vrot.slane %v16462_v40, %v22788_v62  ;;  %v16477_v4 = vrot.slane %v16463_v17, %v22788_v62  ;;  %v16205_v8 = vrot.slane %v16191_v51, %v22788_v62  ;;  %v16238_v1 = vrot.slane %v16230_v39, %v22779_v49 }
 0x4bf   : > { %21070 = vrot.lane.b32.xlu1 %v30811_v52, %s22567_s8  ;;  %v16566_v7 = vcombine.low %v16510_v48, %v16526_v37  ;;  %v16567_v18 = vcombine.high %v16510_v48, %v16526_v37  ;;  %v16214_v15 = vrot.slane %v16206_v58, %v22788_v62  ;;  %v16245_v60 = vrot.slane %v16231_v34, %v22779_v49  ;;  %v30815_v37 = vld [vmem:[#allocation64_spill] sm:$0xff]  ;;  %v30816_v48 = vld [vmem:[#allocation65_spill] sm:$0xff] }
 0x4c0   : > { %v16486_v52 = vrot.slane %v16478_v2, %v22788_v62  ;;  %v16493_v23 = vrot.slane %v16479_v3, %v22788_v62  ;;  %v30814_v40 = vcombine.low %v30812_v30, %v30813_v27  ;;  %v16221_v17 = vrot.slane %v16207_v46, %v22788_v62 }
 0x4c1   : > { %v16294_v51 = vcombine.low %v16238_v1, %v16254_v53  ;;  %v16295_v10 = vcombine.high %v16238_v1, %v16254_v53  ;;  %v16582_v39 = vcombine.low %v16517_v44, %v16533_v13  ;;  %v30817_v58 = vcombine.low %v30815_v37, %v30816_v48 }
 0x4c2   : > { %21076 = vrot.lane.b32.xlu0 %v30814_v40, %s22567_s8  ;;  %v16310_v34 = vcombine.low %v16245_v60, %v16261_v45  ;;  %v26995_v2 = vrot.slane %v16470_v38, %v22779_v49  ;;  %v26998_v3 = vrot.slane %v16477_v4, %v22779_v49  ;;  %v16583_v59 = vcombine.high %v16517_v44, %v16533_v13  ;;  %v30823_v44 = vld [vmem:[#allocation38_spill] sm:$0xff] }
 0x4c3   : > { %21074 = vrot.lane.b32.xlu1 %v30817_v58, %s22567_s8  ;;  %v16574_v40 = vrot.slane %v16566_v7, %v22788_v62  ;;  %v16581_v46 = vrot.slane %v16567_v18, %v22788_v62  ;;  %v27007_v58 = vrot.slane %v16198_v47, %v22779_v49  ;;  %v27010_v38 = vrot.slane %v16205_v8, %v22779_v49  ;;  %v30824_v7 = vld [vmem:[#allocation39_spill] sm:$0xff]  ;;  %v30826_v8 = vld [vmem:[#allocation40_spill] sm:$0xff] }
 0x4c4   : > { %30818 = vst [vmem:[#allocation54_spill] sm:$0xff] %v26995_v2  ;;  %30819 = vst [vmem:[#allocation62_spill] sm:$0xff] %v26998_v3  ;;  %v27013_v4 = vrot.slane %v16486_v52, %v22779_v49  ;;  %v27016_v13 = vrot.slane %v16493_v23, %v22779_v49  ;;  %v30825_v18 = vcombine.low %v30823_v44, %v30824_v7 }
 0x4c5   : > { %30820 = vst [vmem:[#allocation63_spill] sm:$0xff] %v27007_v58  ;;  %30821 = vst [vmem:[#allocation64_spill] sm:$0xff] %v27010_v38  ;;  %v16302_v53 = vrot.slane %v16294_v51, %v22788_v62  ;;  %v16309_v1 = vrot.slane %v16295_v10, %v22788_v62  ;;  %v16311_v47 = vcombine.high %v16245_v60, %v16261_v45 }
 0x4c6   : > { %30822 = vst [vmem:[#allocation65_spill] sm:$0xff] %v27016_v13  ;;  %21080 = vrot.lane.b32.xlu0 %v30825_v18, %s22567_s8  ;;  %v16590_v28 = vrot.slane %v16582_v39, %v22788_v62  ;;  %v30828_v52 = vcombine.low %v30826_v8, %v30827_v57  ;;  %v27030_v23 = vrot.slane %v16214_v15, %v22779_v49  ;;  %v30833_v15 = vld [vmem:[#allocation46_spill] sm:$0xff] }
 0x4c7   : > { %v27033_v63 = vrot.slane %v16221_v17, %v22779_v49  ;;  %v20527_v18 = vcombine.high %v27007_v58, %v26995_v2  ;;  %v20559_v10 = vcombine.high %v27010_v38, %v26998_v3  ;;  %v16318_v45 = vrot.slane %v16310_v34, %v22788_v62  ;;  %v30834_v17 = vld [vmem:[#allocation47_spill] sm:$0xff] }
 0x4c8   : > { %21078 = vrot.lane.b32.xlu1 %v30828_v52, %s22567_s8  ;;  %30829 = vst [vmem:[#allocation38_spill] sm:$0xff] %v27030_v23  ;;  %v16597_v60 = vrot.slane %v16583_v59, %v22788_v62  ;;  %v27042_v51 = vrot.slane %v16574_v40, %v22779_v49  ;;  %v27045_v39 = vrot.slane %v16581_v46, %v22779_v49 }
 0x4c9   : > { %30830 = vst [vmem:[#allocation39_spill] sm:$0xff] %v27033_v63  ;;  %v30835_v52 = vcombine.low %v30833_v15, %v30834_v17  ;;  %v27052_v11 = vrot.slane %v20527_v18, %v22788_v62  ;;  %v27055_v38 = vrot.slane %v20559_v10, %v22788_v62  ;;  %v20663_v59 = vcombine.high %v27030_v23, %v27013_v4  ;;  %v30841_v10 = vld [vmem:[#allocation48_spill] sm:$0xff]  ;;  %v30851_v23 = vld [vmem:[#allocation183_spill] sm:$0xff] }
 0x4ca   : > { %30831 = vst [vmem:[#allocation40_spill] sm:$0xff] %v27042_v51  ;;  %30832 = vst [vmem:[#allocation41_spill] sm:$0xff] %v27045_v39  ;;  %v20695_v34 = vcombine.high %v27033_v63, %v27016_v13  ;;  %v16325_v40 = vrot.slane %v16311_v47, %v22788_v62  ;;  %v27063_v46 = vrot.slane %v16302_v53, %v22779_v49 }
 0x4cb   : > { %21084 = vrot.lane.b32.xlu0 %v30835_v52, %s22567_s8  ;;  %30836 = vst [vmem:[#allocation46_spill] sm:$0xff] %v27052_v11  ;;  %30837 = vst [vmem:[#allocation47_spill] sm:$0xff] %v27055_v38  ;;  %v27066_v3 = vrot.slane %v16309_v1, %v22779_v49  ;;  %v27069_v18 = vrot.slane %v16590_v28, %v22779_v49  ;;  %v30842_v52 = vld [vmem:[#allocation49_spill] sm:$0xff]  ;;  %v27078_v63 = vrot.slane %v20663_v59, %v22788_v62 }
 0x4cc   : > { %30838 = vst [vmem:[#allocation300_spill] sm:$0xff] %v27063_v46  ;;  %v30843_v58 = vcombine.low %v30841_v10, %v30842_v52  ;;  %v27081_v53 = vrot.slane %v20695_v34, %v22788_v62  ;;  %v30846_v28 = vcombine.low %v26825_v25, %v26833_v0  ;;  %v27094_v2 = vrot.slane %v16318_v45, %v22779_v49  ;;  %v30850_v34 = vld [vmem:[#allocation182_spill] sm:$0xff] }
 0x4cd   : > { %30839 = vst [vmem:[#allocation301_spill] sm:$0xff] %v27066_v3  ;;  %30840 = vst [vmem:[#allocation302_spill] sm:$0xff] %v27069_v18  ;;  %v27097_v59 = vrot.slane %v16597_v60, %v22779_v49  ;;  %v30852_v1 = vcombine.low %v30850_v34, %v30851_v23  ;;  %v27112_v45 = vrot.slane %v16325_v40, %v22779_v49  ;;  %v30854_v60 = vld [vmem:[#allocation186_spill] sm:$0xff] }
 0x4ce   : > { %21082 = vrot.lane.b32.xlu1 %v30843_v58, %s22567_s8  ;;  %30844 = vst [vmem:[#allocation48_spill] sm:$0xff] %v27078_v63  ;;  %30845 = vst [vmem:[#allocation49_spill] sm:$0xff] %v27081_v53  ;;  %v15518_v47 = vrot.slane %v30846_v28, %v22788_v62  ;;  %v30847_v58 = vcombine.high %v26825_v25, %v26833_v0  ;;  %v20783_v25 = vcombine.high %v27063_v46, %v27042_v51 }
 0x4cf   : > { %30848 = vst [vmem:[#allocation303_spill] sm:$0xff] %v27094_v2  ;;  %30849 = vst [vmem:[#allocation304_spill] sm:$0xff] %v27097_v59  ;;  %21088 = vrot.lane.b32.xlu0 %v30852_v1, %s22567_s8  ;;  %v20815_v0 = vcombine.high %v27066_v3, %v27045_v39  ;;  %v20647_v1 = vcombine.high %v26878_v55, %v26894_v35  ;;  %v20679_v28 = vcombine.high %v26881_v26, %v26897_v61  ;;  %v30863_v61 = vld [vmem:[#allocation222_spill] sm:$0xff] }
 0x4d0   : > { %v15525_v13 = vrot.slane %v30847_v58, %v22788_v62  ;;  %30853 = vst [vmem:[#allocation182_spill] sm:$0xff] %v27112_v45  ;;  %v30855_v58 = vld [vmem:[#allocation187_spill] sm:$0xff]  ;;  %v20511_v38 = vcombine.high %v26845_v12, %v26888_v36  ;;  %v20543_v3 = vcombine.high %v26863_v21, %v26891_v24  ;;  %v27127_v40 = vrot.slane %v20783_v25, %v22788_v62 }
 0x4d1   : > { %v30856_v11 = vcombine.low %v30854_v60, %v30855_v58  ;;  %v27130_v39 = vrot.slane %v20815_v0, %v22788_v62  ;;  %v30859_v55 = vcombine.low %v26828_v16, %v26900_v22  ;;  %v30860_v12 = vcombine.high %v26828_v16, %v26900_v22  ;;  %v30864_v25 = vld [vmem:[#allocation223_spill] sm:$0xff] }
 0x4d2   : > { %30857 = vst [vmem:[#allocation183_spill] sm:$0xff] %v27127_v40  ;;  %v27143_v21 = vrot.slane %v15518_v47, %v22779_v49  ;;  %v20951_v24 = vcombine.high %v27112_v45, %v27097_v59  ;;  %v27148_v35 = vrot.slane %v15525_v13, %v22779_v49  ;;  %v30865_v0 = vcombine.low %v30863_v61, %v30864_v25  ;;  %v30869_v13 = vld [vmem:[#allocation226_spill] sm:$0xff] }
 0x4d3   : > { %21086 = vrot.lane.b32.xlu1 %v30856_v11, %s22567_s8  ;;  %30858 = vst [vmem:[#allocation186_spill] sm:$0xff] %v27130_v39  ;;  %v20919_v11 = vcombine.high %v27094_v2, %v27069_v18  ;;  %v15534_v26 = vrot.slane %v30859_v55, %v22788_v62  ;;  %v15541_v36 = vrot.slane %v30860_v12, %v22788_v62  ;;  %v30870_v12 = vld [vmem:[#allocation227_spill] sm:$0xff]  ;;  %v30990_v2 = vld [vmem:[#allocation129_spill] sm:$0xff] }
 0x4d4   : > { %30861 = vst [vmem:[#allocation187_spill] sm:$0xff] %v27143_v21  ;;  %30862 = vst [vmem:[#allocation305_spill] sm:$0xff] %v27148_v35  ;;  %21092 = vrot.lane.b32.xlu0 %v30865_v0, %s22567_s8  ;;  %v30867_v22 = vcombine.high %v26691_v31, %v26788_v19  ;;  %v30871_v46 = vcombine.low %v30869_v13, %v30870_v12  ;;  %v27170_v51 = vrot.slane %v20647_v1, %v22788_v62 }
 0x4d5   : > { %v27157_v16 = vrot.slane %v20919_v11, %v22788_v62  ;;  %v27173_v0 = vrot.slane %v20679_v28, %v22788_v62  ;;  %v27176_v11 = vrot.slane %v20951_v24, %v22788_v62  ;;  %v27184_v31 = vrot.slane %v20543_v3, %v22788_v62 }
 0x4d6   : > { %v27163_v47 = vrot.slane %v30867_v22, %v22788_v62  ;;  %v27181_v22 = vrot.slane %v20511_v38, %v22788_v62  ;;  %v19303_v28 = vcombine.high %v26698_v42, %v26804_v9  ;;  %v27195_v24 = vrot.slane %v15534_v26, %v22779_v49  ;;  %v30971_v42 = vld [vmem:[#allocation229_spill] sm:$0xff]  ;;  %v30975_v9 = vld [vmem:[#allocation246_spill] sm:$0xff] }
 0x4d7   : > { %30866 = vst [vmem:[#allocation222_spill] sm:$0xff] %v27157_v16  ;;  %21090 = vrot.lane.b32.xlu1 %v30871_v46, %s22567_s8  ;;  %30872 = vst [vmem:[#allocation226_spill] sm:$0xff] %v27176_v11  ;;  %v30873_v46 = vcombine.high %v26695_v32, %v26791_v54  ;;  %v19335_v3 = vcombine.high %v26709_v29, %v26807_v41  ;;  %v27205_v32 = vrot.slane %v26810_v20, %v22779_v49  ;;  %v30985_v16 = vld [vmem:[#allocation184_spill] sm:$0xff] }
 0x4d8   : > { %30868 = vst [vmem:[#allocation223_spill] sm:$0xff] %v27163_v47  ;;  %30875 = vst [vmem:[#allocation306_spill] sm:$0xff] %v27195_v24  ;;  %v27212_v26 = vrot.slane %v15541_v36, %v22779_v49  ;;  %v30879_v55 = vcombine.low %v26453_v6, %v26456_v43  ;;  %v27222_v54 = vrot.slane %v26819_v5, %v22779_v49 }
 0x4d9   : > { %v27190_v1 = vrot.slane %v30873_v46, %v22788_v62  ;;  %30876 = vst [vmem:[#allocation307_spill] sm:$0xff] %v27205_v32  ;;  %v27209_v46 = vrot.slane %v26816_v50, %v22779_v49  ;;  %v27226_v20 = vrot.slane %v26822_v56, %v22779_v49  ;;  %v30882_v50 = vld [vmem:[#allocation264_spill] sm:$0xff]  ;;  %v27233_v19 = vrot.slane %v19303_v28, %v22788_v62  ;;  %v30909_v56 = vld [vmem:[#allocation57_spill] sm:$0xff] }
 0x4da   : > { %30878 = vst [vmem:[#allocation309_spill] sm:$0xff] %v27212_v26  ;;  %21096 = vrot.lane.b32.xlu0 %v30879_v55, %s22567_s8  ;;  %30880 = vst [vmem:[#allocation310_spill] sm:$0xff] %v27222_v54  ;;  %v30883_v36 = vcombine.low %v26479_v33, %v30882_v50  ;;  %v27236_v55 = vrot.slane %v19335_v3, %v22788_v62  ;;  %v20712_v38 = vcombine.low %v27170_v51, %v27173_v0 }
 0x4db   : > { %30874 = vst [vmem:[#allocation227_spill] sm:$0xff] %v27190_v1  ;;  %30877 = vst [vmem:[#allocation308_spill] sm:$0xff] %v27209_v46  ;;  %v20576_v5 = vcombine.low %v27181_v22, %v27184_v31  ;;  %v19711_v28 = vcombine.high %v27205_v32, %v27143_v21  ;;  %v19743_v3 = vcombine.high %v27209_v46, %v27148_v35  ;;  %v30908_v35 = vld [vmem:[#allocation56_spill] sm:$0xff] }
 0x4dc   : > { %30881 = vst [vmem:[#allocation311_spill] sm:$0xff] %v27226_v20  ;;  %21094 = vrot.lane.b32.xlu1 %v30883_v36, %s22567_s8  ;;  %30884 = vst [vmem:[#allocation264_spill] sm:$0xff] %v27233_v19  ;;  %v19847_v40 = vcombine.high %v27222_v54, %v27195_v24  ;;  %v19879_v41 = vcombine.high %v27226_v20, %v27212_v26  ;;  %v30912_v20 = vcombine.high %v30815_v37, %v30816_v48  ;;  %v30972_v1 = vld [vmem:[#allocation232_spill] sm:$0xff]  ;;  %v30974_v19 = vld [vmem:[#allocation234_spill] sm:$0xff] }
 0x4dd   : > { %30885 = vst [vmem:[#allocation312_spill] sm:$0xff] %v27236_v55  ;;  %v27263_v32 = vrot.slane %v19711_v28, %v22788_v62  ;;  %v27266_v46 = vrot.slane %v19743_v3, %v22788_v62  ;;  %v30917_v37 = vcombine.high %v30850_v34, %v30851_v23  ;;  %v30919_v48 = vcombine.high %v30863_v61, %v30864_v25  ;;  %v30923_v23 = vld [vmem:[#allocation79_spill] sm:$0xff]  ;;  %v30926_v34 = vld [vmem:[#allocation80_spill] sm:$0xff]  ;;  %v30973_v55 = vld [vmem:[#allocation121_spill] sm:$0xff] }
 0x4de   : > { %21100 = vrot.lane.b32.xlu0 %v20712_v38, %s22567_s8  ;;  %v27269_v54 = vrot.slane %v19847_v40, %v22788_v62  ;;  %v27274_v26 = vrot.slane %v19879_v41, %v22788_v62  ;;  %v30906_v41 = vld [vmem:[#allocation55_spill] sm:$0xff]  ;;  %v30911_v40 = vcombine.high %v30812_v30, %v30813_v27  ;;  %v30915_v27 = vcombine.high %v30833_v15, %v30834_v17  ;;  %v30924_v17 = vld [vmem:[#allocation85_spill] sm:$0xff] }
 0x4df   : > { %30894 = vst [vmem:[#allocation313_spill] sm:$0xff] %v27263_v32  ;;  %30895 = vst [vmem:[#allocation314_spill] sm:$0xff] %v27266_v46  ;;  %v30907_v36 = vcombine.high %v30806_v14, %v30906_v41  ;;  %v30913_v14 = vcombine.high %v30823_v44, %v30824_v7  ;;  %v30916_v30 = vcombine.high %v30841_v10, %v30842_v52  ;;  %v30921_v7 = vld [vmem:[#allocation78_spill] sm:$0xff]  ;;  %v30976_v38 = vld [vmem:[#allocation143_spill] sm:$0xff] }
 0x4e0   : > { %21098 = vrot.lane.b32.xlu1 %v20576_v5, %s22567_s8  ;;  %30896 = vst [vmem:[#allocation315_spill] sm:$0xff] %v27269_v54  ;;  %30899 = vst [vmem:[#allocation316_spill] sm:$0xff] %v27274_v26  ;;  %v30910_v5 = vcombine.high %v30908_v35, %v30909_v56  ;;  %v30914_v35 = vcombine.high %v30826_v8, %v30827_v57  ;;  %v30918_v57 = vcombine.high %v30854_v60, %v30855_v58  ;;  %v30922_v8 = vld [vmem:[#allocation84_spill] sm:$0xff]  ;;  %v30925_v52 = vld [vmem:[#allocation82_spill] sm:$0xff]  ;;  %v27344_v58 = vpop.trf.xlu1 }
 0x4e1   : > { %v30920_v44 = vcombine.high %v30869_v13, %v30870_v12  ;;  %v16854_v15 = vcombine.low %v30922_v8, %v30921_v7  ;;  %v16886_v10 = vcombine.low %v30924_v17, %v30923_v23  ;;  %v16718_v60 = vcombine.low %v30926_v34, %v30925_v52  ;;  %v30928_v56 = vld [vmem:[#allocation81_spill] sm:$0xff]  ;;  %v30939_v8 = vld [vmem:[#allocation96_spill] sm:$0xff]  ;;  %v30941_v23 = vld [vmem:[#allocation67_spill] sm:$0xff] }
 0x4e2   : > { %21136 = vrot.lane.b32.xlu0 %v30907_v36, %s22568_s9  ;;  %v30929_v25 = vcombine.high %v26453_v6, %v26456_v43  ;;  %v30930_v13 = vcombine.high %v26479_v33, %v30882_v50  ;;  %v30933_v43 = vld [vmem:[#allocation89_spill] sm:$0xff]  ;;  %v30935_v33 = vld [vmem:[#allocation95_spill] sm:$0xff]  ;;  %v30943_v52 = vld [vmem:[#allocation70_spill] sm:$0xff]  ;;  %v19606_v47 = vcombine.low %v30972_v1, %v30971_v42  ;;  %v19438_v28 = vcombine.low %v30974_v19, %v30973_v55 }
 0x4e3   : > { %v27357_v12 = vrot.slane %v16854_v15, %v22788_v62  ;;  %v27360_v36 = vrot.slane %v16886_v10, %v22788_v62  ;;  %v27367_v6 = vrot.slane %v16718_v60, %v22788_v62  ;;  %v30936_v50 = vld [vmem:[#allocation93_spill] sm:$0xff]  ;;  %v15718_v24 = vcombine.low %v30976_v38, %v30975_v9  ;;  %v30977_v42 = vld [vmem:[#allocation263_spill] sm:$0xff]  ;;  %v30978_v1 = vld [vmem:[#allocation172_spill] sm:$0xff] }
 0x4e4   : > { %21134 = vrot.lane.b32.xlu1 %v30910_v5, %s22568_s9  ;;  %v30931_v5 = vld [vmem:[#allocation66_spill] sm:$0xff]  ;;  %v27383_v15 = vpop.trf.xlu1  ;;  %v30942_v17 = vld [vmem:[#allocation69_spill] sm:$0xff]  ;;  %v15990_v39 = vcombine.low %v30978_v1, %v30977_v42  ;;  %v15991_v19 = vcombine.high %v30978_v1, %v30977_v42  ;;  %v27521_v1 = vrot.slane %v19606_v47, %v22788_v62  ;;  %v27524_v11 = vrot.slane %v19438_v28, %v22788_v62 }
 0x4e5   : > { %v17974_v10 = vcombine.low %v30942_v17, %v30941_v23  ;;  %v16906_v34 = vcombine.low %v27357_v12, %v27360_v36  ;;  %v30957_v23 = vld [vmem:[#allocation191_spill] sm:$0xff]  ;;  %v16907_v46 = vcombine.high %v27357_v12, %v27360_v36  ;;  %v31046_v32 = vld [vmem:[#allocation286_spill] sm:$0xff] }
 0x4e6   : > { %21140 = vrot.lane.b32.xlu0 %v30911_v40, %s22568_s9  ;;  %v30932_v40 = vld [vmem:[#allocation68_spill] sm:$0xff]  ;;  %v15998_v47 = vrot.slane %v15990_v39, %v22779_v49  ;;  %v16005_v45 = vrot.slane %v15991_v19, %v22779_v49 }
 0x4e7   : > { %v17942_v41 = vcombine.low %v30932_v40, %v30931_v5 }
 0x4e8   : > { %21138 = vrot.lane.b32.xlu1 %v30912_v20, %s22568_s9  ;;  %v30927_v20 = vld [vmem:[#allocation83_spill] sm:$0xff] }
 0x4e9   : > { %v16750_v61 = vcombine.low %v30928_v56, %v30927_v20  ;;  %v30945_v56 = vld [vmem:[#allocation71_spill] sm:$0xff] }
 0x4ea   : > { %21144 = vrot.lane.b32.xlu0 %v30913_v14, %s22568_s9  ;;  %v20713_v14 = vcombine.high %v27170_v51, %v27173_v0  ;;  %v30940_v51 = vld [vmem:[#allocation97_spill] sm:$0xff] }
 0x4eb   : > { %v17294_v0 = vcombine.low %v30940_v51, %v30939_v8  ;;  %v30954_v8 = vld [vmem:[#allocation152_spill] sm:$0xff] }
 0x4ec   : > { %21142 = vrot.lane.b32.xlu1 %v30914_v35, %s22568_s9  ;;  %v30934_v35 = vld [vmem:[#allocation92_spill] sm:$0xff] }
 0x4ed   : > { %v27406_v40 = vrot.slane %v17294_v0, %v22788_v62  ;;  %v27420_v0 = vpop.permute.xlu1 %21008 }
 0x4ee   : > { %21148 = vrot.lane.b32.xlu0 %v30915_v27, %s22568_s9  ;;  %v17398_v27 = vcombine.low %v30934_v35, %v30933_v43  ;;  %v30947_v43 = vld [vmem:[#allocation144_spill] sm:$0xff]  ;;  %v30948_v35 = vld [vmem:[#allocation149_spill] sm:$0xff]  ;;  %30955 = vst [vmem:[#allocation55_spill] sm:$0xff] %v27420_v0  ;;  %v30980_v0 = vld [vmem:[#allocation235_spill] sm:$0xff] }
 0x4f0   : > { %21146 = vrot.lane.b32.xlu1 %v30916_v30, %s22568_s9  ;;  %v17430_v30 = vcombine.low %v30936_v50, %v30935_v33  ;;  %v27393_v60 = vrot.slane %v17398_v27, %v22788_v62  ;;  %v18486_v27 = vcombine.low %v30948_v35, %v30947_v43  ;;  %v30949_v33 = vld [vmem:[#allocation145_spill] sm:$0xff]  ;;  %v30950_v50 = vld [vmem:[#allocation150_spill] sm:$0xff] }
 0x4f1   : > { %v30962_v35 = vld [vmem:[#allocation194_spill] sm:$0xff] }
 0x4f2   : > { %21152 = vrot.lane.b32.xlu0 %v30917_v37, %s22568_s9  ;;  %v20577_v37 = vcombine.high %v27181_v22, %v27184_v31  ;;  %v30944_v31 = vld [vmem:[#allocation72_spill] sm:$0xff]  ;;  %v27396_v20 = vrot.slane %v17430_v30, %v22788_v62  ;;  %v18518_v30 = vcombine.low %v30950_v50, %v30949_v33  ;;  %v30963_v33 = vld [vmem:[#allocation117_spill] sm:$0xff] }
 0x4f3   : > { %v17806_v22 = vcombine.low %v30944_v31, %v30943_v52  ;;  %v30958_v52 = vld [vmem:[#allocation189_spill] sm:$0xff]  ;;  %v30959_v31 = vld [vmem:[#allocation192_spill] sm:$0xff]  ;;  %v18926_v50 = vcombine.low %v30963_v33, %v30962_v35  ;;  %v30967_v33 = vld [vmem:[#allocation231_spill] sm:$0xff] }
 0x4f4   : > { %21150 = vrot.lane.b32.xlu1 %v30918_v57, %s22568_s9  ;;  %v27376_v57 = vrot.slane %v16750_v61, %v22788_v62  ;;  %v30946_v61 = vld [vmem:[#allocation73_spill] sm:$0xff] }
 0x4f6   : > { %21156 = vrot.lane.b32.xlu0 %v30919_v48, %s22568_s9  ;;  %v30937_v48 = vld [vmem:[#allocation94_spill] sm:$0xff] }
 0x4f8   : > { %21154 = vrot.lane.b32.xlu1 %v30920_v44, %s22568_s9  ;;  %v30938_v44 = vld [vmem:[#allocation88_spill] sm:$0xff] }
 0x4f9   : > { %v17262_v7 = vcombine.low %v30938_v44, %v30937_v48  ;;  %v30952_v48 = vld [vmem:[#allocation151_spill] sm:$0xff] }
 0x4fa   : > { %21160 = vrot.lane.b32.xlu0 %v30929_v25, %s22568_s9  ;;  %v17838_v25 = vcombine.low %v30946_v61, %v30945_v56  ;;  %v30960_v56 = vld [vmem:[#allocation193_spill] sm:$0xff]  ;;  %v30961_v61 = vld [vmem:[#allocation120_spill] sm:$0xff] }
 0x4fb   : > { %v27403_v5 = vrot.slane %v17262_v7, %v22788_v62  ;;  %v30953_v7 = vld [vmem:[#allocation147_spill] sm:$0xff]  ;;  %v18894_v43 = vcombine.low %v30961_v61, %v30960_v56  ;;  %v30964_v56 = vld [vmem:[#allocation248_spill] sm:$0xff] }
 0x4fc   : > { %21158 = vrot.lane.b32.xlu1 %v30930_v13, %s22568_s9  ;;  %v16770_v13 = vcombine.low %v27367_v6, %v27376_v57  ;;  %v18382_v51 = vcombine.low %v30954_v8, %v30953_v7  ;;  %v27436_v7 = vrot.slane %v17974_v10, %v22788_v62  ;;  %v27442_v8 = vrot.slane %v17838_v25, %v22788_v62 }
 0x4fd   : > { %v17315_v12 = vcombine.high %v27403_v5, %v27406_v40 }
 0x4fe   : > { %21164 = vrot.lane.b32.xlu0 %v20713_v14, %s22568_s9  ;;  %v27409_v14 = vrot.slane %v17942_v41, %v22788_v62  ;;  %v30956_v41 = vld [vmem:[#allocation188_spill] sm:$0xff] }
 0x4ff   : > { %v19030_v17 = vcombine.low %v30957_v23, %v30956_v41  ;;  %v17314_v41 = vcombine.low %v27403_v5, %v27406_v40  ;;  %v27448_v23 = vrot.slane %v18486_v27, %v22788_v62  ;;  %v27467_v27 = vrot.slane %v18894_v43, %v22788_v62 }
 0x500   : > { %21162 = vrot.lane.b32.xlu1 %v20577_v37, %s22568_s9  ;;  %v30951_v37 = vld [vmem:[#allocation146_spill] sm:$0xff] }
 0x501   : > { %v18350_v44 = vcombine.low %v30952_v48, %v30951_v37  ;;  %v27431_v37 = vpop.trf.xlu0  ;;  %v17450_v48 = vcombine.low %v27393_v60, %v27396_v20  ;;  %v27461_v25 = vrot.slane %v19030_v17, %v22788_v62  ;;  %v30966_v17 = vld [vmem:[#allocation228_spill] sm:$0xff] }
 0x502   : > { %21200 = vrot.lane.b32.xlu0 %v16906_v34, %s22569_s11  ;;  %v19062_v34 = vcombine.low %v30959_v31, %v30958_v52  ;;  %v27451_v52 = vrot.slane %v18518_v30, %v22788_v62  ;;  %v27470_v30 = vrot.slane %v18926_v50, %v22788_v62  ;;  %v27484_v50 = vpop.permute.xlu1 %21010 }
 0x503   : > { %v27454_v10 = vrot.slane %v18350_v44, %v22788_v62  ;;  %v30965_v44 = vld [vmem:[#allocation243_spill] sm:$0xff]  ;;  %30970 = vst [vmem:[#allocation56_spill] sm:$0xff] %v27484_v50  ;;  %v30979_v50 = vld [vmem:[#allocation233_spill] sm:$0xff] }
 0x504   : > { %21198 = vrot.lane.b32.xlu1 %v16770_v13, %s22569_s11  ;;  %v27439_v13 = vrot.slane %v17806_v22, %v22788_v62  ;;  %v27457_v22 = vrot.slane %v18382_v51, %v22788_v62  ;;  %v27464_v31 = vrot.slane %v19062_v34, %v22788_v62  ;;  %v15734_v61 = vcombine.low %v30965_v44, %v30964_v56  ;;  %v30968_v34 = vld [vmem:[#allocation267_spill] sm:$0xff] }
 0x505   : > { %v17994_v51 = vcombine.low %v27409_v14, %v27436_v7  ;;  %v19470_v21 = vcombine.low %v30980_v0, %v30979_v50  ;;  %v30983_v0 = vld [vmem:[#allocation190_spill] sm:$0xff] }
 0x506   : > { %21204 = vrot.lane.b32.xlu0 %v17450_v48, %s22569_s11  ;;  %v17858_v35 = vcombine.low %v27439_v13, %v27442_v8  ;;  %v19574_v48 = vcombine.low %v30967_v33, %v30966_v17  ;;  %v15735_v17 = vcombine.high %v30965_v44, %v30964_v56  ;;  %v27494_v33 = vpop.trf.xlu0  ;;  %v19082_v55 = vcombine.low %v27461_v25, %v27464_v31  ;;  %v27537_v28 = vpop.permute.xlu1 %21012 }
 0x507   : > { %v18946_v56 = vcombine.low %v27467_v27, %v27470_v30  ;;  %v15719_v44 = vcombine.high %v30976_v38, %v30975_v9  ;;  %v15726_v9 = vrot.slane %v15718_v24, %v22779_v49  ;;  %30986 = vst [vmem:[#allocation78_spill] sm:$0xff] %v27537_v28  ;;  %v30987_v24 = vld [vmem:[#allocation265_spill] sm:$0xff]  ;;  %v18403_v40 = vcombine.high %v27454_v10, %v27457_v22 }
 0x508   : > { %21202 = vrot.lane.b32.xlu1 %v17314_v41, %s22569_s11  ;;  %v30969_v41 = vld [vmem:[#allocation170_spill] sm:$0xff]  ;;  %v27514_v29 = vrot.slane %v19574_v48, %v22788_v62  ;;  %v15749_v38 = vrot.slane %v15735_v17, %v22779_v49  ;;  %v30982_v48 = vld [vmem:[#allocation27_spill] sm:$0xff]  ;;  %v30988_v17 = vld [vmem:[#allocation12_spill] sm:$0xff] }
 0x509   : > { %v16006_v3 = vcombine.low %v30969_v41, %v30968_v34  ;;  %v16007_v43 = vcombine.high %v30969_v41, %v30968_v34  ;;  %v18538_v34 = vcombine.low %v27448_v23, %v27451_v52  ;;  %v18402_v41 = vcombine.low %v27454_v10, %v27457_v22 }
 0x50a   : > { %21208 = vrot.lane.b32.xlu0 %v17994_v51, %s22569_s11  ;;  %v15742_v51 = vrot.slane %v15734_v61, %v22779_v49  ;;  %v27528_v61 = vpop.permute.xlu0 %21006  ;;  %v20118_v50 = vcombine.low %v30983_v0, %v30982_v48  ;;  %v19982_v59 = vcombine.low %v30988_v17, %v30987_v24  ;;  %v15733_v18 = vrot.slane %v15719_v44, %v22779_v49 }
 0x50b   : > { %v16014_v42 = vrot.slane %v16006_v3, %v22779_v49  ;;  %30981 = vst [vmem:[#allocation57_spill] sm:$0xff] %v27528_v61  ;;  %v30984_v3 = vld [vmem:[#allocation242_spill] sm:$0xff] }
 0x50c   : > { %21206 = vrot.lane.b32.xlu1 %v17858_v35, %s22569_s11  ;;  %v16021_v35 = vrot.slane %v16007_v43, %v22779_v49  ;;  %v20150_v43 = vcombine.low %v30985_v16, %v30984_v3  ;;  %v30989_v61 = vld [vmem:[#allocation266_spill] sm:$0xff]  ;;  %v15782_v48 = vcombine.low %v15726_v9, %v15742_v51  ;;  %v15783_v0 = vcombine.high %v15726_v9, %v15742_v51 }
 0x50d   : > { %v27546_v16 = vrot.slane %v19470_v21, %v22788_v62  ;;  %v16054_v39 = vcombine.low %v15998_v47, %v16014_v42  ;;  %v16055_v3 = vcombine.high %v15998_v47, %v16014_v42  ;;  %v15798_v28 = vcombine.low %v15733_v18, %v15749_v38  ;;  %v30993_v42 = vld [vmem:[#allocation39_spill] sm:$0xff] }
 0x50e   : > { %21212 = vrot.lane.b32.xlu0 %v18538_v34, %s22569_s11  ;;  %v20014_v34 = vcombine.low %v30990_v2, %v30989_v61  ;;  %v16070_v19 = vcombine.low %v16005_v45, %v16021_v35  ;;  %v16071_v53 = vcombine.high %v16005_v45, %v16021_v35  ;;  %v15799_v63 = vcombine.high %v15733_v18, %v15749_v38  ;;  %v30991_v45 = vld [vmem:[#allocation38_spill] sm:$0xff]  ;;  %v30992_v18 = vld [vmem:[#allocation65_spill] sm:$0xff]  ;;  %v27566_v35 = vpop.permute.xlu0 %21016 }
 0x50f   : > { %v27553_v2 = vrot.slane %v20150_v43, %v22788_v62  ;;  %v27557_v44 = vrot.slane %v19982_v59, %v22788_v62  ;;  %v20662_v51 = vcombine.low %v30991_v45, %v27013_v4  ;;  %30994 = vst [vmem:[#allocation84_spill] sm:$0xff] %v27566_v35  ;;  %v19626_v9 = vcombine.low %v27514_v29, %v27521_v1  ;;  %v30995_v38 = vld [vmem:[#allocation54_spill] sm:$0xff]  ;;  %v30996_v59 = vld [vmem:[#allocation63_spill] sm:$0xff]  ;;  %v30998_v43 = vld [vmem:[#allocation64_spill] sm:$0xff]  ;;  %v27580_v45 = vpop.permute.xlu1 %21014 }
 0x510   : > { %21210 = vrot.lane.b32.xlu1 %v18402_v41, %s22569_s11  ;;  %v27550_v41 = vrot.slane %v20118_v50, %v22788_v62  ;;  %v27560_v21 = vrot.slane %v20014_v34, %v22788_v62  ;;  %v20526_v61 = vcombine.low %v30996_v59, %v30995_v38  ;;  %v30997_v50 = vld [vmem:[#allocation62_spill] sm:$0xff]  ;;  %v16062_v24 = vrot.slane %v16054_v39, %v22788_v62 }
 0x511   : > { %v20558_v47 = vcombine.low %v30998_v43, %v30997_v50  ;;  %v16069_v4 = vrot.slane %v16055_v3, %v22788_v62  ;;  %v16078_v17 = vrot.slane %v16070_v19, %v22788_v62  ;;  %v16085_v34 = vrot.slane %v16071_v53, %v22788_v62  ;;  %30999 = vst [vmem:[#allocation79_spill] sm:$0xff] %v27580_v45  ;;  %v31199_v45 = vld [vmem:[#allocation41_spill] sm:$0xff] }
 0x512   : > { %21216 = vrot.lane.b32.xlu0 %v19082_v55, %s22569_s11  ;;  %v20694_v55 = vcombine.low %v30993_v42, %v30992_v18  ;;  %v15790_v18 = vrot.slane %v15782_v48, %v22788_v62  ;;  %v15797_v42 = vrot.slane %v15783_v0, %v22788_v62  ;;  %v15806_v35 = vrot.slane %v15798_v28, %v22788_v62  ;;  %v27620_v59 = vpop.permute.xlu0 %21020 }
 0x513   : > { %v15813_v38 = vrot.slane %v15799_v63, %v22788_v62  ;;  %v20170_v39 = vcombine.low %v27550_v41, %v27553_v2  ;;  %v20034_v53 = vcombine.low %v27557_v44, %v27560_v21  ;;  %v27593_v3 = vrot.slane %v20662_v51, %v22788_v62  ;;  %31000 = vst [vmem:[#allocation85_spill] sm:$0xff] %v27620_v59  ;;  %v31198_v59 = vld [vmem:[#allocation300_spill] sm:$0xff] }
 0x514   : > { %21214 = vrot.lane.b32.xlu1 %v18946_v56, %s22569_s11  ;;  %v19490_v56 = vcombine.low %v27524_v11, %v27546_v16  ;;  %v27596_v48 = vrot.slane %v20694_v55, %v22788_v62  ;;  %v27599_v28 = vrot.slane %v20526_v61, %v22788_v62  ;;  %v27602_v63 = vrot.slane %v20558_v47, %v22788_v62 }
 0x515   : > { %v27612_v51 = vrot.slane %v16069_v4, %v22779_v49  ;;  %v27615_v55 = vrot.slane %v16078_v17, %v22779_v49  ;;  %v27624_v61 = vrot.slane %v15790_v18, %v22779_v49  ;;  %v27627_v50 = vrot.slane %v15797_v42, %v22779_v49 }
 0x516   : > { %21220 = vrot.lane.b32.xlu0 %v19626_v9, %s22569_s11  ;;  %v27609_v9 = vrot.slane %v16062_v24, %v22779_v49  ;;  %v27630_v43 = vrot.slane %v15806_v35, %v22779_v49  ;;  %v27633_v47 = vrot.slane %v15813_v38, %v22779_v49  ;;  %v27635_v24 = vpop.permute.xlu1 %21018  ;;  %v20714_v4 = vcombine.low %v27593_v3, %v27596_v48  ;;  %v27664_v19 = vpop.permute.xlu0 %21024 }
 0x517   : > { %31001 = vst [vmem:[#allocation82_spill] sm:$0xff] %v27635_v24  ;;  %v20578_v17 = vcombine.low %v27599_v28, %v27602_v63  ;;  %v20287_v35 = vcombine.high %v27627_v50, %v27612_v51  ;;  %31006 = vst [vmem:[#allocation68_spill] sm:$0xff] %v27664_v19  ;;  %v19491_v22 = vcombine.high %v27524_v11, %v27546_v16 }
 0x518   : > { %21218 = vrot.lane.b32.xlu1 %v19490_v56, %s22569_s11  ;;  %v27618_v56 = vrot.slane %v16085_v34, %v22779_v49  ;;  %v20255_v34 = vcombine.high %v27624_v61, %v27609_v9  ;;  %v20391_v18 = vcombine.high %v27630_v43, %v27615_v55  ;;  %v20715_v11 = vcombine.high %v27593_v3, %v27596_v48  ;;  %v31025_v3 = vld [vmem:[#allocation90_spill] sm:$0xff]  ;;  %v31026_v48 = vld [vmem:[#allocation91_spill] sm:$0xff] }
 0x519   : > { %v20579_v16 = vcombine.high %v27599_v28, %v27602_v63 }
 0x51a   : > { %21224 = vrot.lane.b32.xlu0 %v20170_v39, %s22569_s11  ;;  %v20423_v42 = vcombine.high %v27633_v47, %v27618_v56  ;;  %v27653_v38 = vrot.slane %v20255_v34, %v22788_v62  ;;  %v27656_v39 = vrot.slane %v20287_v35, %v22788_v62  ;;  %v27682_v36 = vpop.permute.xlu0 %21028 }
 0x51b   : > { %31008 = vst [vmem:[#allocation92_spill] sm:$0xff] %v27682_v36 }
 0x51c   : > { %21222 = vrot.lane.b32.xlu1 %v20034_v53, %s22569_s11  ;;  %31002 = vst [vmem:[#allocation80_spill] sm:$0xff] %v27653_v38  ;;  %31003 = vst [vmem:[#allocation83_spill] sm:$0xff] %v27656_v39  ;;  %v27659_v53 = vrot.slane %v20391_v18, %v22788_v62  ;;  %v27662_v0 = vrot.slane %v20423_v42, %v22788_v62  ;;  %v17451_v18 = vcombine.high %v27393_v60, %v27396_v20  ;;  %v31080_v38 = vld [vmem:[#allocation269_spill] sm:$0xff] }
 0x51d   : > { %v18539_v20 = vcombine.high %v27448_v23, %v27451_v52  ;;  %v19627_v52 = vcombine.high %v27514_v29, %v27521_v1 }
 0x51e   : > { %21228 = vrot.lane.b32.xlu0 %v20714_v4, %s22569_s11  ;;  %31004 = vst [vmem:[#allocation81_spill] sm:$0xff] %v27659_v53  ;;  %31005 = vst [vmem:[#allocation66_spill] sm:$0xff] %v27662_v0  ;;  %v27668_v4 = vpop.permute.xlu1 %21022  ;;  %v27694_v60 = vpop.permute.xlu0 %21032 }
 0x51f   : > { %31007 = vst [vmem:[#allocation89_spill] sm:$0xff] %v27668_v4  ;;  %31010 = vst [vmem:[#allocation93_spill] sm:$0xff] %v27694_v60 }
 0x520   : > { %21226 = vrot.lane.b32.xlu1 %v20578_v17, %s22569_s11  ;;  %v16771_v17 = vcombine.high %v27367_v6, %v27376_v57  ;;  %v17995_v57 = vcombine.high %v27409_v14, %v27436_v7  ;;  %v19083_v7 = vcombine.high %v27461_v25, %v27464_v31  ;;  %v20171_v31 = vcombine.high %v27550_v41, %v27553_v2 }
 0x522   : > { %21264 = vrot.lane.b32.xlu0 %v16907_v46, %s22570_s10  ;;  %v27685_v6 = vpop.permute.xlu1 %21026  ;;  %v17859_v46 = vcombine.high %v27439_v13, %v27442_v8  ;;  %v18947_v8 = vcombine.high %v27467_v27, %v27470_v30  ;;  %v20035_v30 = vcombine.high %v27557_v44, %v27560_v21  ;;  %v31022_v44 = vld [vmem:[#allocation86_spill] sm:$0xff]  ;;  %v31023_v21 = vld [vmem:[#allocation87_spill] sm:$0xff] }
 0x523   : > { %31009 = vst [vmem:[#allocation95_spill] sm:$0xff] %v27685_v6  ;;  %v31024_v42 = vcombine.low %v31022_v44, %v31023_v21 }
 0x524   : > { %21262 = vrot.lane.b32.xlu1 %v16771_v17, %s22570_s10  ;;  %v31027_v17 = vcombine.low %v31025_v3, %v31026_v48 }
 0x526   : > { %21268 = vrot.lane.b32.xlu0 %v17451_v18, %s22570_s10  ;;  %v27698_v5 = vpop.permute.xlu1 %21030  ;;  %v31030_v18 = vld [vmem:[#allocation98_spill] sm:$0xff] }
 0x527   : > { %31011 = vst [vmem:[#allocation94_spill] sm:$0xff] %v27698_v5 }
 0x528   : > { %21266 = vrot.lane.b32.xlu1 %v17315_v12, %s22570_s10  ;;  %v31031_v12 = vld [vmem:[#allocation99_spill] sm:$0xff] }
 0x529   : > { %v31100_v4 = vcombine.high %v31030_v18, %v31031_v12 }
 0x52a   : > { %21272 = vrot.lane.b32.xlu0 %v17995_v57, %s22570_s10  ;;  %v27704_v14 = vpop.permute.xlu0 %21036  ;;  %v27708_v13 = vpop.permute.xlu1 %21034  ;;  %v31032_v57 = vcombine.low %v31030_v18, %v31031_v12 }
 0x52b   : > { %31012 = vst [vmem:[#allocation88_spill] sm:$0xff] %v27704_v14  ;;  %31013 = vst [vmem:[#allocation96_spill] sm:$0xff] %v27708_v13  ;;  %v31085_v13 = vld [vmem:[#allocation49_spill] sm:$0xff] }
 0x52c   : > { %21270 = vrot.lane.b32.xlu1 %v17859_v46, %s22570_s10  ;;  %v31033_v46 = vld [vmem:[#allocation25_spill] sm:$0xff] }
 0x52e   : > { %21276 = vrot.lane.b32.xlu0 %v18539_v20, %s22570_s10  ;;  %v31034_v20 = vld [vmem:[#allocation100_spill] sm:$0xff] }
 0x530   : > { %21274 = vrot.lane.b32.xlu1 %v18403_v40, %s22570_s10  ;;  %v27714_v23 = vpop.permute.xlu0 %21072  ;;  %v31035_v40 = vcombine.low %v31033_v46, %v31034_v20 }
 0x531   : > { %31014 = vst [vmem:[#allocation97_spill] sm:$0xff] %v27714_v23  ;;  %v27718_v10 = vpop.permute.xlu1 %21070 }
 0x532   : > { %21280 = vrot.lane.b32.xlu0 %v19083_v7, %s22570_s10  ;;  %31015 = vst [vmem:[#allocation67_spill] sm:$0xff] %v27718_v10  ;;  %v31062_v10 = vld [vmem:[#allocation197_spill] sm:$0xff] }
 0x534   : > { %21278 = vrot.lane.b32.xlu1 %v18947_v8, %s22570_s10  ;;  %v27724_v25 = vpop.permute.xlu0 %21076  ;;  %v16550_v8 = vcombine.low %v27344_v58, %v27383_v15 }
 0x535   : > { %31016 = vst [vmem:[#allocation69_spill] sm:$0xff] %v27724_v25  ;;  %v27728_v27 = vpop.permute.xlu1 %21074 }
 0x536   : > { %21284 = vrot.lane.b32.xlu0 %v19627_v52, %s22570_s10  ;;  %31017 = vst [vmem:[#allocation70_spill] sm:$0xff] %v27728_v27  ;;  %v16551_v52 = vcombine.high %v27344_v58, %v27383_v15  ;;  %v31043_v58 = vld [vmem:[#allocation76_spill] sm:$0xff]  ;;  %v31044_v15 = vld [vmem:[#allocation77_spill] sm:$0xff] }
 0x537   : > { %v31045_v35 = vcombine.low %v31043_v58, %v31044_v15 }
 0x538   : > { %21282 = vrot.lane.b32.xlu1 %v19491_v22, %s22570_s10  ;;  %v27734_v29 = vpop.permute.xlu0 %21080  ;;  %v16534_v22 = vcombine.low %v27431_v37, %v27494_v33 }
 0x539   : > { %31018 = vst [vmem:[#allocation72_spill] sm:$0xff] %v27734_v29 }
 0x53a   : > { %21288 = vrot.lane.b32.xlu0 %v20171_v31, %s22570_s10  ;;  %v27738_v1 = vpop.permute.xlu1 %21078  ;;  %v16535_v31 = vcombine.high %v27431_v37, %v27494_v33  ;;  %v31047_v37 = vld [vmem:[#allocation284_spill] sm:$0xff] }
 0x53b   : > { %31019 = vst [vmem:[#allocation71_spill] sm:$0xff] %v27738_v1  ;;  %v16262_v33 = vcombine.low %v31047_v37, %v31046_v32  ;;  %v16263_v26 = vcombine.high %v31047_v37, %v31046_v32  ;;  %v31053_v37 = vld [vmem:[#allocation19_spill] sm:$0xff] }
 0x53c   : > { %21286 = vrot.lane.b32.xlu1 %v20035_v30, %s22570_s10 }
 0x53d   : > { %v27744_v41 = vpop.permute.xlu0 %21084 }
 0x53e   : > { %21292 = vrot.lane.b32.xlu0 %v20715_v11, %s22570_s10  ;;  %31020 = vst [vmem:[#allocation73_spill] sm:$0xff] %v27744_v41  ;;  %v31038_v11 = vld [vmem:[#allocation74_spill] sm:$0xff] }
 0x540   : > { %21290 = vrot.lane.b32.xlu1 %v20579_v16, %s22570_s10  ;;  %v27746_v2 = vpop.permute.xlu1 %21082  ;;  %v31039_v16 = vld [vmem:[#allocation75_spill] sm:$0xff] }
 0x541   : > { %31021 = vst [vmem:[#allocation144_spill] sm:$0xff] %v27746_v2  ;;  %v27756_v28 = vpop.permute.xlu0 %21088 }
 0x542   : > { %21328 = vrot.lane.b32.xlu0 %v31024_v42, %s22571_s20  ;;  %31028 = vst [vmem:[#allocation149_spill] sm:$0xff] %v27756_v28  ;;  %v31040_v42 = vcombine.low %v31038_v11, %v31039_v16  ;;  %v31051_v28 = vld [vmem:[#allocation154_spill] sm:$0xff] }
 0x544   : > { %21326 = vrot.lane.b32.xlu1 %v31027_v17, %s22571_s20  ;;  %v31041_v17 = vld [vmem:[#allocation291_spill] sm:$0xff] }
 0x545   : > { %v27758_v63 = vpop.permute.xlu1 %21086 }
 0x546   : > { %31029 = vst [vmem:[#allocation145_spill] sm:$0xff] %v27758_v63  ;;  %21332 = vrot.lane.b32.xlu0 %v31032_v57, %s22571_s20  ;;  %v27768_v7 = vpop.permute.xlu0 %21092  ;;  %v31042_v57 = vld [vmem:[#allocation203_spill] sm:$0xff] }
 0x547   : > { %31036 = vst [vmem:[#allocation150_spill] sm:$0xff] %v27768_v7  ;;  %v16279_v34 = vcombine.high %v31042_v57, %v31041_v17  ;;  %v16542_v7 = vrot.slane %v16534_v22, %v22779_v49 }
 0x548   : > { %21330 = vrot.lane.b32.xlu1 %v31035_v40, %s22571_s20  ;;  %v16278_v40 = vcombine.low %v31042_v57, %v31041_v17  ;;  %v16549_v17 = vrot.slane %v16535_v31, %v22779_v49  ;;  %v16277_v31 = vrot.slane %v16263_v26, %v22779_v49 }
 0x549   : > { %v27778_v30 = vpop.permute.xlu1 %21090  ;;  %v16293_v32 = vrot.slane %v16279_v34, %v22779_v49  ;;  %v31059_v34 = vld [vmem:[#allocation195_spill] sm:$0xff] }
 0x54a   : > { %31037 = vst [vmem:[#allocation146_spill] sm:$0xff] %v27778_v30  ;;  %21336 = vrot.lane.b32.xlu0 %v31040_v42, %s22571_s20  ;;  %v16558_v42 = vrot.slane %v16550_v8, %v22779_v49  ;;  %v16565_v30 = vrot.slane %v16551_v52, %v22779_v49  ;;  %v16286_v41 = vrot.slane %v16278_v40, %v22779_v49  ;;  %v31054_v8 = vld [vmem:[#allocation155_spill] sm:$0xff] }
 0x54b   : > { %v16270_v52 = vrot.slane %v16262_v33, %v22779_v49  ;;  %v31058_v40 = vld [vmem:[#allocation131_spill] sm:$0xff]  ;;  %v31061_v33 = vld [vmem:[#allocation196_spill] sm:$0xff]  ;;  %v16343_v26 = vcombine.high %v16277_v31, %v16293_v32 }
 0x54c   : > { %21334 = vrot.lane.b32.xlu1 %v31045_v35, %s22571_s20  ;;  %v27796_v54 = vpop.permute.xlu0 %21096  ;;  %v31050_v35 = vld [vmem:[#allocation153_spill] sm:$0xff]  ;;  %v16599_v2 = vcombine.high %v16542_v7, %v16558_v42  ;;  %v16614_v29 = vcombine.low %v16549_v17, %v16565_v30  ;;  %v31060_v25 = vcombine.low %v31058_v40, %v31059_v34 }
 0x54d   : > { %31048 = vst [vmem:[#allocation151_spill] sm:$0xff] %v27796_v54  ;;  %v31052_v63 = vcombine.low %v31050_v35, %v31051_v28  ;;  %v31055_v54 = vcombine.low %v31053_v37, %v31054_v8  ;;  %v16326_v27 = vcombine.low %v16270_v52, %v16286_v41  ;;  %v16327_v23 = vcombine.high %v16270_v52, %v16286_v41  ;;  %v31066_v41 = vld [vmem:[#allocation236_spill] sm:$0xff]  ;;  %v31067_v52 = vld [vmem:[#allocation237_spill] sm:$0xff] }
 0x54e   : > { %v27802_v57 = vpop.permute.xlu1 %21094  ;;  %v31108_v12 = vcombine.high %v31050_v35, %v31051_v28  ;;  %v31116_v35 = vcombine.high %v31066_v41, %v31067_v52 }
 0x54f   : > { %31049 = vst [vmem:[#allocation147_spill] sm:$0xff] %v27802_v57  ;;  %21340 = vrot.lane.b32.xlu0 %v31052_v63, %s22571_s20  ;;  %v16598_v57 = vcombine.low %v16542_v7, %v16558_v42  ;;  %v16615_v63 = vcombine.high %v16549_v17, %v16565_v30  ;;  %v16613_v30 = vrot.slane %v16599_v2, %v22788_v62  ;;  %v31070_v2 = vld [vmem:[#allocation239_spill] sm:$0xff] }
 0x550   : > { %21338 = vrot.lane.b32.xlu1 %v31055_v54, %s22571_s20  ;;  %v27815_v22 = vpop.permute.xlu0 %21100  ;;  %v16342_v54 = vcombine.low %v16277_v31, %v16293_v32  ;;  %v16622_v42 = vrot.slane %v16614_v29, %v22788_v62  ;;  %v16341_v32 = vrot.slane %v16327_v23, %v22788_v62  ;;  %v16357_v29 = vrot.slane %v16343_v26, %v22788_v62 }
 0x551   : > { %31056 = vst [vmem:[#allocation152_spill] sm:$0xff] %v27815_v22  ;;  %v31063_v22 = vcombine.low %v31061_v33, %v31062_v10  ;;  %v16606_v7 = vrot.slane %v16598_v57, %v22788_v62  ;;  %v31069_v57 = vld [vmem:[#allocation238_spill] sm:$0xff]  ;;  %v27858_v23 = vrot.slane %v16613_v30, %v22779_v49 }
 0x552   : > { %v27818_v1 = vpop.permute.xlu1 %21098  ;;  %v16350_v31 = vrot.slane %v16342_v54, %v22788_v62  ;;  %v27861_v54 = vrot.slane %v16622_v42, %v22779_v49  ;;  %v31079_v42 = vld [vmem:[#allocation268_spill] sm:$0xff] }
 0x553   : > { %31057 = vst [vmem:[#allocation188_spill] sm:$0xff] %v27818_v1  ;;  %21344 = vrot.lane.b32.xlu0 %v31060_v25, %s22571_s20  ;;  %v16629_v25 = vrot.slane %v16615_v63, %v22788_v62  ;;  %v31068_v1 = vcombine.low %v31066_v41, %v31067_v52  ;;  %31073 = vst [vmem:[#allocation193_spill] sm:$0xff] %v27858_v23  ;;  %v31076_v63 = vld [vmem:[#allocation271_spill] sm:$0xff]  ;;  %v31081_v0 = vcombine.low %v31079_v42, %v31080_v38  ;;  %v31126_v41 = vld [vmem:[#allocation110_spill] sm:$0xff] }
 0x554   : > { %21342 = vrot.lane.b32.xlu1 %v31063_v22, %s22571_s20  ;;  %v27828_v14 = vpop.permute.xlu0 %21136  ;;  %v16334_v22 = vrot.slane %v16326_v27, %v22788_v62  ;;  %v27855_v27 = vrot.slane %v16606_v7, %v22779_v49  ;;  %v27876_v7 = vrot.slane %v16341_v32, %v22779_v49  ;;  %v27879_v30 = vrot.slane %v16350_v31, %v22779_v49  ;;  %v31127_v52 = vld [vmem:[#allocation112_spill] sm:$0xff] }
 0x555   : > { %31064 = vst [vmem:[#allocation191_spill] sm:$0xff] %v27828_v14  ;;  %v31071_v14 = vcombine.low %v31069_v57, %v31070_v2  ;;  %v27866_v26 = vrot.slane %v16629_v25, %v22779_v49  ;;  %v27886_v25 = vrot.slane %v16357_v29, %v22779_v49  ;;  %v31087_v29 = vld [vmem:[#allocation46_spill] sm:$0xff] }
 0x556   : > { %v27833_v17 = vpop.permute.xlu1 %21134  ;;  %31078 = vst [vmem:[#allocation194_spill] sm:$0xff] %v27876_v7  ;;  %v20831_v32 = vcombine.high %v27876_v7, %v27858_v23  ;;  %v20935_v31 = vcombine.high %v27879_v30, %v27861_v54  ;;  %v31200_v7 = vld [vmem:[#allocation301_spill] sm:$0xff] }
 0x557   : > { %31065 = vst [vmem:[#allocation189_spill] sm:$0xff] %v27833_v17  ;;  %21348 = vrot.lane.b32.xlu0 %v31068_v1, %s22571_s20  ;;  %v27873_v1 = vrot.slane %v16334_v22, %v22779_v49  ;;  %v20967_v49 = vcombine.high %v27886_v25, %v27866_v26  ;;  %v20814_v23 = vcombine.low %v31200_v7, %v31199_v45 }
 0x558   : > { %21346 = vrot.lane.b32.xlu1 %v31071_v14, %s22571_s20  ;;  %v27848_v17 = vpop.permute.xlu0 %21140  ;;  %v27912_v5 = vrot.slane %v20831_v32, %v22788_v62  ;;  %v27915_v36 = vrot.slane %v20935_v31, %v22788_v62  ;;  %v31097_v32 = vcombine.high %v31025_v3, %v31026_v48  ;;  %v31104_v3 = vcombine.high %v31038_v11, %v31039_v16 }
 0x559   : > { %31072 = vst [vmem:[#allocation192_spill] sm:$0xff] %v27848_v17  ;;  %v31075_v17 = vld [vmem:[#allocation270_spill] sm:$0xff]  ;;  %v20799_v22 = vcombine.high %v27873_v1, %v27855_v27  ;;  %v31105_v48 = vcombine.high %v31043_v58, %v31044_v15  ;;  %v31112_v16 = vcombine.high %v31058_v40, %v31059_v34  ;;  %v31113_v58 = vcombine.high %v31061_v33, %v31062_v10  ;;  %v31119_v40 = vld [vmem:[#allocation113_spill] sm:$0xff]  ;;  %v31120_v34 = vld [vmem:[#allocation115_spill] sm:$0xff] }
 0x55a   : > { %v27863_v14 = vpop.permute.xlu1 %21138  ;;  %v31077_v39 = vcombine.low %v31075_v17, %v31076_v63  ;;  %31091 = vst [vmem:[#allocation228_spill] sm:$0xff] %v27912_v5  ;;  %31092 = vst [vmem:[#allocation231_spill] sm:$0xff] %v27915_v36  ;;  %v17110_v10 = vcombine.low %v31120_v34, %v31119_v40  ;;  %v31121_v33 = vld [vmem:[#allocation114_spill] sm:$0xff]  ;;  %v31132_v34 = vld [vmem:[#allocation128_spill] sm:$0xff] }
 0x55b   : > { %31074 = vst [vmem:[#allocation120_spill] sm:$0xff] %v27863_v14  ;;  %v31084_v14 = vld [vmem:[#allocation48_spill] sm:$0xff]  ;;  %v27909_v60 = vrot.slane %v20799_v22, %v22788_v62  ;;  %v31131_v40 = vld [vmem:[#allocation126_spill] sm:$0xff]  ;;  %v31244_v5 = vld [vmem:[#allocation169_spill] sm:$0xff] }
 0x55c   : > { %21352 = vrot.lane.b32.xlu0 %v31077_v39, %s22571_s20  ;;  %21350 = vrot.lane.b32.xlu1 %v31081_v0, %s22571_s20  ;;  %v27888_v53 = vpop.permute.xlu0 %21144  ;;  %v31086_v0 = vcombine.low %v31084_v14, %v31085_v13 }
 0x55d   : > { %31082 = vst [vmem:[#allocation117_spill] sm:$0xff] %v27888_v53  ;;  %31090 = vst [vmem:[#allocation243_spill] sm:$0xff] %v27909_v60 }
 0x55e   : > { %v27890_v39 = vpop.permute.xlu1 %21142 }
 0x55f   : > { %31083 = vst [vmem:[#allocation248_spill] sm:$0xff] %v27890_v39  ;;  %v31088_v39 = vld [vmem:[#allocation47_spill] sm:$0xff] }
 0x560   : > { %21356 = vrot.lane.b32.xlu0 %v31086_v0, %s22571_s20  ;;  %v31089_v53 = vcombine.low %v31087_v29, %v31088_v39  ;;  %v27917_v6 = vpop.permute.xlu0 %21148  ;;  %v27920_v0 = vrot.slane %v20967_v49, %v22788_v62 }
 0x561   : > { %31093 = vst [vmem:[#allocation267_spill] sm:$0xff] %v27917_v6  ;;  %v31175_v6 = vld [vmem:[#allocation241_spill] sm:$0xff] }
 0x562   : > { %21354 = vrot.lane.b32.xlu1 %v31089_v53, %s22571_s20  ;;  %31094 = vst [vmem:[#allocation170_spill] sm:$0xff] %v27920_v0  ;;  %v27922_v19 = vpop.permute.xlu1 %21146  ;;  %v31096_v53 = vcombine.high %v31022_v44, %v31023_v21  ;;  %v31101_v44 = vcombine.high %v31033_v46, %v31034_v20  ;;  %v31109_v46 = vcombine.high %v31053_v37, %v31054_v8  ;;  %v31247_v0 = vld [vmem:[#allocation164_spill] sm:$0xff] }
 0x563   : > { %31095 = vst [vmem:[#allocation229_spill] sm:$0xff] %v27922_v19  ;;  %v31117_v37 = vcombine.high %v31069_v57, %v31070_v2  ;;  %v31128_v57 = vcombine.high %v31075_v17, %v31076_v63  ;;  %v31129_v2 = vcombine.high %v31079_v42, %v31080_v38  ;;  %v31136_v42 = vld [vmem:[#allocation124_spill] sm:$0xff] }
 0x564   : > { %21392 = vrot.lane.b32.xlu0 %v31096_v53, %s22572_s27  ;;  %v27936_v31 = vpop.permute.xlu0 %21152  ;;  %v31173_v19 = vld [vmem:[#allocation240_spill] sm:$0xff] }
 0x565   : > { %31098 = vst [vmem:[#allocation232_spill] sm:$0xff] %v27936_v31  ;;  %v31164_v31 = vld [vmem:[#allocation31_spill] sm:$0xff] }
 0x566   : > { %21390 = vrot.lane.b32.xlu1 %v31097_v32, %s22572_s27  ;;  %v27938_v49 = vpop.permute.xlu1 %21150  ;;  %v31122_v32 = vld [vmem:[#allocation116_spill] sm:$0xff] }
 0x567   : > { %31099 = vst [vmem:[#allocation121_spill] sm:$0xff] %v27938_v49 }
 0x568   : > { %21396 = vrot.lane.b32.xlu0 %v31100_v4, %s22572_s27  ;;  %v27948_v21 = vpop.permute.xlu0 %21156 }
 0x569   : > { %31102 = vst [vmem:[#allocation234_spill] sm:$0xff] %v27948_v21  ;;  %v31161_v21 = vld [vmem:[#allocation160_spill] sm:$0xff] }
 0x56a   : > { %21394 = vrot.lane.b32.xlu1 %v31101_v44, %s22572_s27  ;;  %v27950_v53 = vpop.permute.xlu1 %21154  ;;  %v17142_v44 = vcombine.low %v31122_v32, %v31121_v33  ;;  %v17654_v33 = vcombine.low %v31132_v34, %v31131_v40  ;;  %v31133_v32 = vld [vmem:[#allocation135_spill] sm:$0xff]  ;;  %v31141_v40 = vcombine.high %v31087_v29, %v31088_v39  ;;  %v31143_v34 = vld [vmem:[#allocation26_spill] sm:$0xff] }
 0x56b   : > { %31103 = vst [vmem:[#allocation246_spill] sm:$0xff] %v27950_v53  ;;  %v31149_v29 = vld [vmem:[#allocation103_spill] sm:$0xff]  ;;  %v31160_v53 = vld [vmem:[#allocation156_spill] sm:$0xff] }
 0x56c   : > { %21400 = vrot.lane.b32.xlu0 %v31104_v3, %s22572_s27  ;;  %v27960_v4 = vpop.permute.xlu0 %21160 }
 0x56d   : > { %31106 = vst [vmem:[#allocation143_spill] sm:$0xff] %v27960_v4 }
 0x56e   : > { %21398 = vrot.lane.b32.xlu1 %v31105_v48, %s22572_s27  ;;  %v27962_v18 = vpop.permute.xlu1 %21158  ;;  %v31124_v48 = vld [vmem:[#allocation28_spill] sm:$0xff] }
 0x56f   : > { %31107 = vst [vmem:[#allocation263_spill] sm:$0xff] %v27962_v18 }
 0x570   : > { %21404 = vrot.lane.b32.xlu0 %v31108_v12, %s22572_s27  ;;  %v27972_v20 = vpop.permute.xlu0 %21164  ;;  %v31125_v12 = vld [vmem:[#allocation111_spill] sm:$0xff] }
 0x571   : > { %31110 = vst [vmem:[#allocation172_spill] sm:$0xff] %v27972_v20 }
 0x572   : > { %21402 = vrot.lane.b32.xlu1 %v31109_v46, %s22572_s27  ;;  %v27974_v11 = vpop.permute.xlu1 %21162  ;;  %v16974_v46 = vcombine.low %v31125_v12, %v31124_v48  ;;  %v31134_v48 = vld [vmem:[#allocation137_spill] sm:$0xff] }
 0x573   : > { %31111 = vst [vmem:[#allocation233_spill] sm:$0xff] %v27974_v11  ;;  %v17686_v17 = vcombine.low %v31134_v48, %v31133_v32  ;;  %v31144_v32 = vld [vmem:[#allocation101_spill] sm:$0xff]  ;;  %v31145_v48 = vld [vmem:[#allocation104_spill] sm:$0xff]  ;;  %v31196_v11 = vld [vmem:[#allocation182_spill] sm:$0xff] }
 0x574   : > { %21408 = vrot.lane.b32.xlu0 %v31112_v16, %s22572_s27  ;;  %v27984_v28 = vpop.permute.xlu0 %21200  ;;  %v17006_v16 = vcombine.low %v31127_v52, %v31126_v41  ;;  %v28031_v12 = vrot.slane %v16974_v46, %v22788_v62  ;;  %v31138_v52 = vld [vmem:[#allocation125_spill] sm:$0xff]  ;;  %v31142_v46 = vld [vmem:[#allocation23_spill] sm:$0xff]  ;;  %v18094_v22 = vcombine.low %v31145_v48, %v31144_v32 }
 0x575   : > { %31114 = vst [vmem:[#allocation235_spill] sm:$0xff] %v27984_v28  ;;  %v28062_v39 = vrot.slane %v17686_v17, %v22788_v62  ;;  %v31152_v17 = vld [vmem:[#allocation157_spill] sm:$0xff] }
 0x576   : > { %21406 = vrot.lane.b32.xlu1 %v31113_v58, %s22572_s27  ;;  %v27986_v15 = vpop.permute.xlu1 %21198  ;;  %v28034_v38 = vrot.slane %v17006_v16, %v22788_v62  ;;  %v18062_v16 = vcombine.low %v31143_v34, %v31142_v46  ;;  %v31153_v48 = vld [vmem:[#allocation21_spill] sm:$0xff] }
 0x577   : > { %31115 = vst [vmem:[#allocation27_spill] sm:$0xff] %v27986_v15  ;;  %v31190_v15 = vld [vmem:[#allocation181_spill] sm:$0xff] }
 0x578   : > { %21412 = vrot.lane.b32.xlu0 %v31116_v35, %s22572_s27  ;;  %v27996_v8 = vpop.permute.xlu0 %21204  ;;  %v28019_v35 = vrot.slane %v17110_v10, %v22788_v62  ;;  %v31137_v10 = vld [vmem:[#allocation123_spill] sm:$0xff]  ;;  %v17038_v46 = vcombine.low %v28031_v12, %v28034_v38 }
 0x579   : > { %31118 = vst [vmem:[#allocation190_spill] sm:$0xff] %v27996_v8  ;;  %v17518_v41 = vcombine.low %v31137_v10, %v31136_v42  ;;  %v31146_v42 = vld [vmem:[#allocation102_spill] sm:$0xff]  ;;  %v31147_v10 = vld [vmem:[#allocation105_spill] sm:$0xff] }
 0x57a   : > { %21410 = vrot.lane.b32.xlu1 %v31117_v37, %s22572_s27  ;;  %v28002_v3 = vpop.permute.xlu1 %21202  ;;  %v28022_v37 = vrot.slane %v17142_v44, %v22788_v62  ;;  %v31139_v44 = vld [vmem:[#allocation127_spill] sm:$0xff]  ;;  %v18198_v18 = vcombine.low %v31147_v10, %v31146_v42  ;;  %v18742_v42 = vcombine.low %v31153_v48, %v31152_v17  ;;  %v31154_v10 = vld [vmem:[#allocation158_spill] sm:$0xff]  ;;  %v31158_v48 = vld [vmem:[#allocation20_spill] sm:$0xff] }
 0x57b   : > { %31123 = vst [vmem:[#allocation242_spill] sm:$0xff] %v28002_v3  ;;  %v28071_v34 = vrot.slane %v17518_v41, %v22788_v62  ;;  %v31180_v3 = vld [vmem:[#allocation17_spill] sm:$0xff] }
 0x57c   : > { %21416 = vrot.lane.b32.xlu0 %v31128_v57, %s22572_s27  ;;  %v28016_v58 = vpop.permute.xlu0 %21208  ;;  %v17550_v57 = vcombine.low %v31139_v44, %v31138_v52  ;;  %v31150_v44 = vld [vmem:[#allocation106_spill] sm:$0xff] }
 0x57d   : > { %31130 = vst [vmem:[#allocation184_spill] sm:$0xff] %v28016_v58  ;;  %v31179_v58 = vld [vmem:[#allocation18_spill] sm:$0xff] }
 0x57e   : > { %21414 = vrot.lane.b32.xlu1 %v31129_v2, %s22572_s27  ;;  %v28028_v63 = vpop.permute.xlu1 %21206  ;;  %v31140_v2 = vcombine.high %v31084_v14, %v31085_v13  ;;  %v17174_v13 = vcombine.low %v28019_v35, %v28022_v37  ;;  %v28059_v14 = vrot.slane %v17654_v33, %v22788_v62  ;;  %v28074_v32 = vrot.slane %v17550_v57, %v22788_v62 }
 0x57f   : > { %31135 = vst [vmem:[#allocation265_spill] sm:$0xff] %v28028_v63  ;;  %v28079_v33 = vrot.slane %v18062_v16, %v22788_v62  ;;  %v28090_v57 = vrot.slane %v18094_v22, %v22788_v62  ;;  %v28109_v22 = vrot.slane %v18742_v42, %v22788_v62  ;;  %v31178_v63 = vld [vmem:[#allocation148_spill] sm:$0xff]  ;;  %v19862_v8 = vcombine.low %v31180_v3, %v31179_v58  ;;  %v31183_v3 = vld [vmem:[#allocation207_spill] sm:$0xff] }
 0x580   : > { %21420 = vrot.lane.b32.xlu0 %v31140_v2, %s22572_s27  ;;  %v28054_v52 = vpop.permute.xlu0 %21212  ;;  %v18230_v2 = vcombine.low %v31150_v44, %v31149_v29  ;;  %v31155_v29 = vld [vmem:[#allocation161_spill] sm:$0xff]  ;;  %v17718_v41 = vcombine.low %v28059_v14, %v28062_v39  ;;  %v17582_v17 = vcombine.low %v28071_v34, %v28074_v32 }
 0x581   : > { %31148 = vst [vmem:[#allocation12_spill] sm:$0xff] %v28054_v52  ;;  %v18774_v44 = vcombine.low %v31155_v29, %v31154_v10  ;;  %v31159_v10 = vld [vmem:[#allocation159_spill] sm:$0xff] }
 0x582   : > { %21418 = vrot.lane.b32.xlu1 %v31141_v40, %s22572_s27  ;;  %v28066_v40 = vpop.permute.xlu1 %21210  ;;  %v28096_v16 = vrot.slane %v18230_v2, %v22788_v62  ;;  %v18606_v29 = vcombine.low %v31159_v10, %v31158_v48  ;;  %v31162_v2 = vld [vmem:[#allocation8_spill] sm:$0xff] }
 0x583   : > { %31151 = vst [vmem:[#allocation266_spill] sm:$0xff] %v28066_v40  ;;  %v31165_v40 = vld [vmem:[#allocation198_spill] sm:$0xff] }
 0x584   : > { %21456 = vrot.lane.b32.xlu0 %v17174_v13, %s22562_s6  ;;  %v28085_v4 = vpop.permute.xlu0 %21216  ;;  %v28093_v13 = vrot.slane %v18198_v18, %v22788_v62  ;;  %v28112_v18 = vrot.slane %v18774_v44, %v22788_v62  ;;  %v19318_v52 = vcombine.low %v31165_v40, %v31164_v31  ;;  %v28127_v42 = vrot.slane %v18606_v29, %v22788_v62  ;;  %v31170_v31 = vld [vmem:[#allocation15_spill] sm:$0xff] }
 0x585   : > { %31156 = vst [vmem:[#allocation129_spill] sm:$0xff] %v28085_v4  ;;  %v18638_v4 = vcombine.low %v31161_v21, %v31160_v53  ;;  %v18126_v21 = vcombine.low %v28079_v33, %v28090_v57  ;;  %v31171_v40 = vld [vmem:[#allocation11_spill] sm:$0xff] }
 0x586   : > { %21454 = vrot.lane.b32.xlu1 %v17038_v46, %s22562_s6  ;;  %v28098_v46 = vpop.permute.xlu1 %21214  ;;  %v18262_v53 = vcombine.low %v28093_v13, %v28096_v16  ;;  %v28144_v29 = vrot.slane %v19318_v52, %v22788_v62 }
 0x587   : > { %31157 = vst [vmem:[#allocation38_spill] sm:$0xff] %v28098_v46  ;;  %v31163_v46 = vld [vmem:[#allocation29_spill] sm:$0xff]  ;;  %v28130_v44 = vrot.slane %v18638_v4, %v22788_v62 }
 0x588   : > { %21460 = vrot.lane.b32.xlu0 %v17718_v41, %s22562_s6  ;;  %v19286_v49 = vcombine.low %v31163_v46, %v31162_v2  ;;  %v28118_v48 = vpop.permute.xlu0 %21220  ;;  %v31168_v46 = vld [vmem:[#allocation16_spill] sm:$0xff]  ;;  %v19182_v2 = vcombine.low %v31171_v40, %v31170_v31 }
 0x589   : > { %31166 = vst [vmem:[#allocation65_spill] sm:$0xff] %v28118_v48  ;;  %v18806_v48 = vcombine.low %v28109_v22, %v28112_v18  ;;  %v31176_v31 = vld [vmem:[#allocation132_spill] sm:$0xff] }
 0x58a   : > { %21458 = vrot.lane.b32.xlu1 %v17582_v17, %s22562_s6  ;;  %v28124_v41 = vpop.permute.xlu1 %21218  ;;  %v31169_v17 = vld [vmem:[#allocation139_spill] sm:$0xff]  ;;  %v19726_v40 = vcombine.low %v31176_v31, %v31175_v6  ;;  %v31182_v6 = vld [vmem:[#allocation281_spill] sm:$0xff] }
 0x58b   : > { %31167 = vst [vmem:[#allocation39_spill] sm:$0xff] %v28124_v41  ;;  %v19150_v10 = vcombine.low %v31169_v17, %v31168_v46  ;;  %v28141_v41 = vrot.slane %v19286_v49, %v22788_v62  ;;  %v31174_v46 = vld [vmem:[#allocation136_spill] sm:$0xff]  ;;  %v18670_v49 = vcombine.low %v28127_v42, %v28130_v44  ;;  %v20374_v58 = vcombine.low %v31183_v3, %v31182_v6  ;;  %v31188_v3 = vld [vmem:[#allocation185_spill] sm:$0xff] }
 0x58c   : > { %21464 = vrot.lane.b32.xlu0 %v18262_v53, %s22562_s6  ;;  %v28146_v4 = vpop.permute.xlu0 %21224  ;;  %v19694_v17 = vcombine.low %v31174_v46, %v31173_v19  ;;  %v31177_v53 = vld [vmem:[#allocation141_spill] sm:$0xff]  ;;  %v31185_v46 = vld [vmem:[#allocation200_spill] sm:$0xff] }
 0x58d   : > { %31172 = vst [vmem:[#allocation54_spill] sm:$0xff] %v28146_v4  ;;  %v28161_v52 = vrot.slane %v19150_v10, %v22788_v62  ;;  %v28164_v4 = vrot.slane %v19182_v2, %v22788_v62  ;;  %v19350_v19 = vcombine.low %v28141_v41, %v28144_v29  ;;  %v28180_v2 = vrot.slane %v19726_v40, %v22788_v62 }
 0x58e   : > { %21462 = vrot.lane.b32.xlu1 %v18126_v21, %s22562_s6  ;;  %v19830_v21 = vcombine.low %v31178_v63, %v31177_v53  ;;  %v28156_v28 = vpop.permute.xlu1 %21222  ;;  %v31184_v63 = vld [vmem:[#allocation282_spill] sm:$0xff]  ;;  %v28177_v10 = vrot.slane %v19694_v17, %v22788_v62  ;;  %v31191_v17 = vld [vmem:[#allocation273_spill] sm:$0xff]  ;;  %v28199_v40 = vrot.slane %v20374_v58, %v22788_v62 }
 0x58f   : > { %31181 = vst [vmem:[#allocation63_spill] sm:$0xff] %v28156_v28  ;;  %v20406_v31 = vcombine.low %v31185_v46, %v31184_v63  ;;  %v19214_v6 = vcombine.low %v28161_v52, %v28164_v4  ;;  %v31189_v63 = vld [vmem:[#allocation272_spill] sm:$0xff] }
 0x590   : > { %21468 = vrot.lane.b32.xlu0 %v18806_v48, %s22562_s6  ;;  %v28174_v53 = vpop.permute.xlu0 %21228  ;;  %v28183_v48 = vrot.slane %v19830_v21, %v22788_v62  ;;  %v20238_v46 = vcombine.low %v31189_v63, %v31188_v3  ;;  %v31193_v63 = vld [vmem:[#allocation302_spill] sm:$0xff] }
 0x591   : > { %31186 = vst [vmem:[#allocation62_spill] sm:$0xff] %v28174_v53  ;;  %v20270_v53 = vcombine.low %v31191_v17, %v31190_v15  ;;  %v31194_v15 = vld [vmem:[#allocation303_spill] sm:$0xff] }
 0x592   : > { %21466 = vrot.lane.b32.xlu1 %v18670_v49, %s22562_s6  ;;  %v28186_v49 = vrot.slane %v19862_v8, %v22788_v62  ;;  %v28188_v28 = vpop.permute.xlu1 %21226  ;;  %v28202_v8 = vrot.slane %v20406_v31, %v22788_v62  ;;  %v20918_v17 = vcombine.low %v31194_v15, %v31193_v63  ;;  %v28217_v58 = vrot.slane %v20238_v46, %v22788_v62 }
 0x593   : > { %31187 = vst [vmem:[#allocation64_spill] sm:$0xff] %v28188_v28  ;;  %v19758_v28 = vcombine.low %v28177_v10, %v28180_v2  ;;  %v28220_v31 = vrot.slane %v20270_v53, %v22788_v62 }
 0x594   : > { %21472 = vrot.lane.b32.xlu0 %v19350_v19, %s22562_s6  ;;  %v28204_v21 = vpop.permute.xlu0 %21264  ;;  %v19894_v3 = vcombine.low %v28183_v48, %v28186_v49  ;;  %v31195_v19 = vld [vmem:[#allocation304_spill] sm:$0xff]  ;;  %v28233_v46 = vrot.slane %v20918_v17, %v22788_v62 }
 0x595   : > { %31192 = vst [vmem:[#allocation86_spill] sm:$0xff] %v28204_v21  ;;  %v31197_v21 = vld [vmem:[#allocation40_spill] sm:$0xff] }
 0x596   : > { %21470 = vrot.lane.b32.xlu1 %v19214_v6, %s22562_s6  ;;  %v20950_v6 = vcombine.low %v31196_v11, %v31195_v19  ;;  %v28214_v20 = vpop.permute.xlu1 %21262  ;;  %v20782_v24 = vcombine.low %v31198_v59, %v31197_v21  ;;  %v20438_v11 = vcombine.low %v28199_v40, %v28202_v8 }
 0x598   : > { %21476 = vrot.lane.b32.xlu0 %v19894_v3, %s22562_s6  ;;  %v28230_v63 = vpop.permute.xlu0 %21268  ;;  %v20958_v53 = vrot.slane %v20950_v6, %v22788_v62  ;;  %v20790_v21 = vrot.slane %v20782_v24, %v22788_v62  ;;  %v20822_v3 = vrot.slane %v20814_v23, %v22788_v62  ;;  %v17175_v24 = vcombine.high %v28019_v35, %v28022_v37 }
 0x599   : > { %31201 = vst [vmem:[#allocation87_spill] sm:$0xff] %v28230_v63  ;;  %v17583_v35 = vcombine.high %v28071_v34, %v28074_v32  ;;  %v18671_v32 = vcombine.high %v28127_v42, %v28130_v44  ;;  %v19759_v44 = vcombine.high %v28177_v10, %v28180_v2 }
 0x59a   : > { %21474 = vrot.lane.b32.xlu1 %v19758_v28, %s22562_s6  ;;  %v28240_v7 = vpop.permute.xlu1 %21266  ;;  %v20302_v28 = vcombine.low %v28217_v58, %v28220_v31  ;;  %v20982_v17 = vcombine.low %v28233_v46, %v20958_v53  ;;  %v20846_v6 = vcombine.low %v20790_v21, %v20822_v3  ;;  %v20983_v10 = vcombine.high %v28233_v46, %v20958_v53 }
 0x59b   : > { %31202 = vst [vmem:[#allocation90_spill] sm:$0xff] %v28240_v7 }
 0x59c   : > { %21480 = vrot.lane.b32.xlu0 %v20438_v11, %s22562_s6  ;;  %v28248_v15 = vpop.permute.xlu0 %21272  ;;  %v17039_v11 = vcombine.high %v28031_v12, %v28034_v38  ;;  %v18263_v12 = vcombine.high %v28093_v13, %v28096_v16  ;;  %v19215_v16 = vcombine.high %v28161_v52, %v28164_v4  ;;  %v20303_v52 = vcombine.high %v28217_v58, %v28220_v31  ;;  %v31219_v58 = vld [vmem:[#allocation122_spill] sm:$0xff] }
 0x59d   : > { %31203 = vst [vmem:[#allocation91_spill] sm:$0xff] %v28248_v15  ;;  %v31220_v31 = vld [vmem:[#allocation130_spill] sm:$0xff] }
 0x59e   : > { %21478 = vrot.lane.b32.xlu1 %v20302_v28, %s22562_s6  ;;  %v28251_v19 = vpop.permute.xlu1 %21270 }
 0x59f   : > { %31204 = vst [vmem:[#allocation98_spill] sm:$0xff] %v28251_v19 }
 0x5a0   : > { %21484 = vrot.lane.b32.xlu0 %v20982_v17, %s22562_s6  ;;  %v28255_v59 = vpop.permute.xlu0 %21276  ;;  %v17719_v17 = vcombine.high %v28059_v14, %v28062_v39  ;;  %v18807_v39 = vcombine.high %v28109_v22, %v28112_v18  ;;  %v19895_v18 = vcombine.high %v28183_v48, %v28186_v49  ;;  %v20847_v49 = vcombine.high %v20790_v21, %v20822_v3  ;;  %v31227_v21 = vld [vmem:[#allocation140_spill] sm:$0xff]  ;;  %v31228_v3 = vld [vmem:[#allocation30_spill] sm:$0xff] }
 0x5a1   : > { %31205 = vst [vmem:[#allocation99_spill] sm:$0xff] %v28255_v59 }
 0x5a2   : > { %21482 = vrot.lane.b32.xlu1 %v20846_v6, %s22562_s6  ;;  %v28259_v23 = vpop.permute.xlu1 %21274  ;;  %s183_s6 = sand.u32 1, %s22529_s13  }
 0x5a3   : > { %31206 = vst [vmem:[#allocation25_spill] sm:$0xff] %v28259_v23  ;;  %v31264_v23 = vld [vmem:[#allocation288_spill] sm:$0xff]  ;;  %s22347_s8 = sshll.u32 %s183_s6, 7  ;;  %s22222_s11 = scalar_lea.sflag [#allocation3], %s183_s6 }
 0x5a4   : > { %21520 = vrot.lane.b32.xlu0 %v17175_v24, %s22573_s21  ;;  %v28265_v28 = vpop.permute.xlu0 %21280  ;;  %v18127_v24 = vcombine.high %v28079_v33, %v28090_v57  ;;  %v19351_v33 = vcombine.high %v28141_v41, %v28144_v29  ;;  %v20439_v29 = vcombine.high %v28199_v40, %v28202_v8  ;;  %s29494_s9 = scalar_lea.vmem [#allocation2], %s22347_s8 }
 0x5a5   : > { %31207 = vst [vmem:[#allocation100_spill] sm:$0xff] %v28265_v28 }
 0x5a6   : > { %21518 = vrot.lane.b32.xlu1 %v17039_v11, %s22573_s21  ;;  %v28269_v6 = vpop.permute.xlu1 %21278  ;;  %v31221_v11 = vcombine.low %v31219_v58, %v31220_v31 }
 0x5a7   : > { %31208 = vst [vmem:[#allocation74_spill] sm:$0xff] %v28269_v6  ;;  %v31259_v6 = vld [vmem:[#allocation245_spill] sm:$0xff] }
 0x5a8   : > { %21524 = vrot.lane.b32.xlu0 %v17719_v17, %s22573_s21  ;;  %v28275_v37 = vpop.permute.xlu0 %21284  ;;  %v31222_v17 = vld [vmem:[#allocation118_spill] sm:$0xff] }
 0x5a9   : > { %31209 = vst [vmem:[#allocation75_spill] sm:$0xff] %v28275_v37 }
 0x5aa   : > { %21522 = vrot.lane.b32.xlu1 %v17583_v35, %s22573_s21  ;;  %v28279_v38 = vpop.permute.xlu1 %21282  ;;  %v31223_v35 = vld [vmem:[#allocation119_spill] sm:$0xff] }
 0x5ab   : > { %31210 = vst [vmem:[#allocation291_spill] sm:$0xff] %v28279_v38 }
 0x5ac   : > { %21528 = vrot.lane.b32.xlu0 %v18263_v12, %s22573_s21  ;;  %v28285_v14 = vpop.permute.xlu0 %21288  ;;  %v31224_v12 = vcombine.low %v31222_v17, %v31223_v35 }
 0x5ad   : > { %31211 = vst [vmem:[#allocation203_spill] sm:$0xff] %v28285_v14 }
 0x5ae   : > { %21526 = vrot.lane.b32.xlu1 %v18127_v24, %s22573_s21  ;;  %v28289_v34 = vpop.permute.xlu1 %21286  ;;  %v31229_v24 = vcombine.low %v31227_v21, %v31228_v3 }
 0x5af   : > { %31212 = vst [vmem:[#allocation76_spill] sm:$0xff] %v28289_v34 }
 0x5b0   : > { %21532 = vrot.lane.b32.xlu0 %v18807_v39, %s22573_s21  ;;  %v28295_v13 = vpop.permute.xlu0 %21292  ;;  %v31230_v39 = vld [vmem:[#allocation133_spill] sm:$0xff] }
 0x5b2   : > { %21530 = vrot.lane.b32.xlu1 %v18671_v32, %s22573_s21  ;;  %v28299_v57 = vpop.permute.xlu1 %21290  ;;  %v31231_v32 = vld [vmem:[#allocation134_spill] sm:$0xff] }
 0x5b4   : > { %21536 = vrot.lane.b32.xlu0 %v19351_v33, %s22573_s21  ;;  %v28305_v22 = vpop.permute.xlu0 %21328  ;;  %v31232_v33 = vcombine.low %v31230_v39, %v31231_v32 }
 0x5b6   : > { %21534 = vrot.lane.b32.xlu1 %v19215_v16, %s22573_s21  ;;  %v28309_v42 = vpop.permute.xlu1 %21326 }
 0x5b8   : > { %21540 = vrot.lane.b32.xlu0 %v19895_v18, %s22573_s21  ;;  %v28315_v41 = vpop.permute.xlu0 %21332 }
 0x5b9   : > { %31213 = vst [vmem:[#allocation77_spill] sm:$0xff] %v28315_v41 }
 0x5ba   : > { %21538 = vrot.lane.b32.xlu1 %v19759_v44, %s22573_s21  ;;  %v28319_v4 = vpop.permute.xlu1 %21330  ;;  %v31235_v44 = vld [vmem:[#allocation108_spill] sm:$0xff] }
 0x5bb   : > { %31214 = vst [vmem:[#allocation286_spill] sm:$0xff] %v28319_v4  ;;  %v31272_v4 = vld [vmem:[#allocation226_spill] sm:$0xff] }
 0x5bc   : > { %21544 = vrot.lane.b32.xlu0 %v20439_v29, %s22573_s21  ;;  %v28325_v48 = vpop.permute.xlu0 %21336  ;;  %v31236_v29 = vld [vmem:[#allocation109_spill] sm:$0xff] }
 0x5bd   : > { %31215 = vst [vmem:[#allocation284_spill] sm:$0xff] %v28325_v48 }
 0x5be   : > { %21542 = vrot.lane.b32.xlu1 %v20303_v52, %s22573_s21  ;;  %v28328_v2 = vpop.permute.xlu1 %21334  ;;  %v31237_v52 = vcombine.low %v31235_v44, %v31236_v29 }
 0x5bf   : > { %31216 = vst [vmem:[#allocation153_spill] sm:$0xff] %v28328_v2  ;;  %v31267_v2 = vld [vmem:[#allocation285_spill] sm:$0xff] }
 0x5c0   : > { %21548 = vrot.lane.b32.xlu0 %v20983_v10, %s22573_s21  ;;  %v31238_v10 = vld [vmem:[#allocation24_spill] sm:$0xff] }
 0x5c1   : > { %v28332_v40 = vpop.permute.xlu0 %21340 }
 0x5c2   : > { %21546 = vrot.lane.b32.xlu1 %v20847_v49, %s22573_s21  ;;  %31217 = vst [vmem:[#allocation154_spill] sm:$0xff] %v28332_v40  ;;  %v28334_v8 = vpop.permute.xlu1 %21338  ;;  %v31239_v49 = vld [vmem:[#allocation107_spill] sm:$0xff] }
 0x5c3   : > { %31218 = vst [vmem:[#allocation19_spill] sm:$0xff] %v28334_v8 }
 0x5c4   : > { %21584 = vrot.lane.b32.xlu0 %v31221_v11, %s22574_s24  ;;  %v31240_v11 = vcombine.low %v31238_v10, %v31239_v49 }
 0x5c5   : > { %v28342_v46 = vpop.permute.xlu0 %21344 }
 0x5c6   : > { %21582 = vrot.lane.b32.xlu1 %v31224_v12, %s22574_s24  ;;  %31225 = vst [vmem:[#allocation155_spill] sm:$0xff] %v28342_v46  ;;  %v28344_v53 = vpop.permute.xlu1 %21342 }
 0x5c7   : > { %31226 = vst [vmem:[#allocation131_spill] sm:$0xff] %v28344_v53  ;;  %v31256_v53 = vld [vmem:[#allocation249_spill] sm:$0xff] }
 0x5c8   : > { %21588 = vrot.lane.b32.xlu0 %v31229_v24, %s22574_s24  ;;  %v31243_v24 = vld [vmem:[#allocation168_spill] sm:$0xff] }
 0x5c9   : > { %v28352_v16 = vpop.permute.xlu0 %21348  ;;  %v31245_v60 = vcombine.low %v31243_v24, %v31244_v5 }
 0x5ca   : > { %21586 = vrot.lane.b32.xlu1 %v31232_v33, %s22574_s24  ;;  %31233 = vst [vmem:[#allocation195_spill] sm:$0xff] %v28352_v16  ;;  %v28354_v18 = vpop.permute.xlu1 %21346  ;;  %v31246_v33 = vld [vmem:[#allocation163_spill] sm:$0xff] }
 0x5cb   : > { %31234 = vst [vmem:[#allocation196_spill] sm:$0xff] %v28354_v18  ;;  %v31248_v36 = vcombine.low %v31246_v33, %v31247_v0  ;;  %v31250_v18 = vld [vmem:[#allocation205_spill] sm:$0xff] }
 0x5cc   : > { %21592 = vrot.lane.b32.xlu0 %v31237_v52, %s22574_s24  ;;  %v31249_v52 = vld [vmem:[#allocation204_spill] sm:$0xff] }
 0x5cd   : > { %v31251_v16 = vcombine.low %v31249_v52, %v31250_v18 }
 0x5ce   : > { %21590 = vrot.lane.b32.xlu1 %v31240_v11, %s22574_s24  ;;  %v28362_v12 = vpop.permute.xlu0 %21352  ;;  %v28364_v45 = vpop.permute.xlu1 %21350  ;;  %v31252_v11 = vld [vmem:[#allocation201_spill] sm:$0xff] }
 0x5cf   : > { %31241 = vst [vmem:[#allocation197_spill] sm:$0xff] %v28362_v12  ;;  %31242 = vst [vmem:[#allocation236_spill] sm:$0xff] %v28364_v45  ;;  %v31253_v12 = vld [vmem:[#allocation202_spill] sm:$0xff] }
 0x5d0   : > { %21596 = vrot.lane.b32.xlu0 %v31245_v60, %s22574_s24  ;;  %v31254_v38 = vcombine.low %v31252_v11, %v31253_v12  ;;  %v31255_v60 = vld [vmem:[#allocation247_spill] sm:$0xff] }
 0x5d1   : > { %v31257_v46 = vcombine.low %v31255_v60, %v31256_v53 }
 0x5d2   : > { %21594 = vrot.lane.b32.xlu1 %v31248_v36, %s22574_s24  ;;  %v28372_v34 = vpop.permute.xlu0 %21356  ;;  %v31258_v36 = vld [vmem:[#allocation244_spill] sm:$0xff] }
 0x5d3   : > { %v31260_v28 = vcombine.low %v31258_v36, %v31259_v6 }
 0x5d4   : > { %v28374_v14 = vpop.permute.xlu1 %21354  ;;  %21600 = vrot.lane.b32.xlu0 %v31251_v16, %s22574_s24  ;;  %v31263_v16 = vld [vmem:[#allocation287_spill] sm:$0xff] }
 0x5d5   : > { %v31265_v59 = vcombine.low %v31263_v16, %v31264_v23 }
 0x5d6   : > { %21598 = vrot.lane.b32.xlu1 %v31254_v38, %s22574_s24  ;;  %v28382_v45 = vpop.permute.xlu0 %21392  ;;  %v31266_v38 = vld [vmem:[#allocation199_spill] sm:$0xff] }
 0x5d7   : > { %v31268_v48 = vcombine.low %v31266_v38, %v31267_v2 }
 0x5d8   : > { %v28384_v37 = vpop.permute.xlu1 %21390  ;;  %21604 = vrot.lane.b32.xlu0 %v31257_v46, %s22574_s24  ;;  %v31271_v46 = vld [vmem:[#allocation222_spill] sm:$0xff] }
 0x5d9   : > { %v31273_v41 = vcombine.low %v31271_v46, %v31272_v4 }
 0x5da   : > { %21602 = vrot.lane.b32.xlu1 %v31260_v28, %s22574_s24  ;;  %v28392_v8 = vpop.permute.xlu0 %21396  ;;  %v31274_v28 = vld [vmem:[#allocation183_spill] sm:$0xff] }
 0x5db   : > { %31261 = vst [vmem:[#allocation237_spill] sm:$0xff] %v28392_v8  ;;  %v31275_v8 = vld [vmem:[#allocation186_spill] sm:$0xff] }
 0x5dc   : > { %v28394_v40 = vpop.permute.xlu1 %21394  ;;  %21608 = vrot.lane.b32.xlu0 %v31265_v59, %s22574_s24  ;;  %v31276_v7 = vcombine.low %v31274_v28, %v31275_v8  ;;  %v31279_v59 = vcombine.high %v31219_v58, %v31220_v31 }
 0x5dd   : > { %31262 = vst [vmem:[#allocation238_spill] sm:$0xff] %v28394_v40 }
 0x5de   : > { %21606 = vrot.lane.b32.xlu1 %v31268_v48, %s22574_s24  ;;  %v28402_v19 = vpop.permute.xlu0 %21400  ;;  %v31280_v48 = vcombine.high %v31222_v17, %v31223_v35  ;;  %v31287_v17 = vcombine.high %v31235_v44, %v31236_v29  ;;  %v31288_v35 = vcombine.high %v31238_v10, %v31239_v49  ;;  %v31293_v29 = vcombine.high %v31249_v52, %v31250_v18  ;;  %v31301_v52 = vld [vmem:[#allocation175_spill] sm:$0xff] }
 0x5df   : > { %31269 = vst [vmem:[#allocation239_spill] sm:$0xff] %v28402_v19  ;;  %v31294_v10 = vcombine.high %v31252_v11, %v31253_v12  ;;  %v31302_v11 = vld [vmem:[#allocation178_spill] sm:$0xff] }
 0x5e0   : > { %v28404_v15 = vpop.permute.xlu1 %21398  ;;  %21612 = vrot.lane.b32.xlu0 %v31273_v41, %s22574_s24  ;;  %v31357_v19 = vld [vmem:[#allocation306_spill] sm:$0xff] }
 0x5e1   : > { %31270 = vst [vmem:[#allocation270_spill] sm:$0xff] %v28404_v15 }
 0x5e2   : > { %21610 = vrot.lane.b32.xlu1 %v31276_v7, %s22574_s24  ;;  %v28412_v40 = vpop.permute.xlu0 %21404  ;;  %v31283_v7 = vcombine.high %v31227_v21, %v31228_v3 }
 0x5e3   : > { %31277 = vst [vmem:[#allocation271_spill] sm:$0xff] %v28412_v40 }
 0x5e4   : > { %v28414_v63 = vpop.permute.xlu1 %21402  ;;  %21648 = vrot.lane.b32.xlu0 %v31279_v59, %s22575_s28  ;;  %v31303_v59 = vld [vmem:[#allocation176_spill] sm:$0xff] }
 0x5e5   : > { %31278 = vst [vmem:[#allocation268_spill] sm:$0xff] %v28414_v63  ;;  %v31284_v63 = vcombine.high %v31230_v39, %v31231_v32  ;;  %v31292_v39 = vcombine.high %v31246_v33, %v31247_v0  ;;  %v31297_v0 = vcombine.high %v31255_v60, %v31256_v53  ;;  %v31300_v33 = vld [vmem:[#allocation177_spill] sm:$0xff]  ;;  %v31307_v53 = vld [vmem:[#allocation174_spill] sm:$0xff] }
 0x5e6   : > { %21646 = vrot.lane.b32.xlu1 %v31280_v48, %s22575_s28  ;;  %v28424_v41 = vpop.permute.xlu0 %21408  ;;  %v17126_v12 = vcombine.low %v31301_v52, %v31300_v33  ;;  %v17158_v48 = vcombine.low %v31303_v59, %v31302_v11  ;;  %v31308_v60 = vld [vmem:[#allocation9_spill] sm:$0xff]  ;;  %v31313_v33 = vld [vmem:[#allocation212_spill] sm:$0xff]  ;;  %v31314_v11 = vld [vmem:[#allocation218_spill] sm:$0xff] }
 0x5e7   : > { %31281 = vst [vmem:[#allocation269_spill] sm:$0xff] %v28424_v41  ;;  %v31315_v59 = vld [vmem:[#allocation217_spill] sm:$0xff] }
 0x5e8   : > { %v28426_v15 = vpop.permute.xlu1 %21406  ;;  %21652 = vrot.lane.b32.xlu0 %v31283_v7, %s22575_s28 }
 0x5e9   : > { %31282 = vst [vmem:[#allocation48_spill] sm:$0xff] %v28426_v15  ;;  %v31342_v15 = vld [vmem:[#allocation256_spill] sm:$0xff] }
 0x5ea   : > { %21650 = vrot.lane.b32.xlu1 %v31284_v63, %s22575_s28  ;;  %v28436_v58 = vpop.permute.xlu0 %21412  ;;  %v31291_v63 = vcombine.high %v31243_v24, %v31244_v5  ;;  %v31298_v24 = vcombine.high %v31258_v36, %v31259_v6  ;;  %v31309_v6 = vcombine.high %v31263_v16, %v31264_v23  ;;  %v31310_v36 = vcombine.high %v31266_v38, %v31267_v2  ;;  %v31317_v38 = vld [vmem:[#allocation206_spill] sm:$0xff] }
 0x5eb   : > { %31285 = vst [vmem:[#allocation49_spill] sm:$0xff] %v28436_v58  ;;  %v17702_v23 = vcombine.low %v31315_v59, %v31314_v11  ;;  %v31326_v11 = vld [vmem:[#allocation138_spill] sm:$0xff]  ;;  %v31341_v58 = vld [vmem:[#allocation275_spill] sm:$0xff] }
 0x5ec   : > { %v28438_v31 = vpop.permute.xlu1 %21410  ;;  %21656 = vrot.lane.b32.xlu0 %v31287_v17, %s22575_s28  ;;  %v31305_v17 = vld [vmem:[#allocation173_spill] sm:$0xff] }
 0x5ed   : > { %31286 = vst [vmem:[#allocation46_spill] sm:$0xff] %v28438_v31 }
 0x5ee   : > { %21654 = vrot.lane.b32.xlu1 %v31288_v35, %s22575_s28  ;;  %v28448_v21 = vpop.permute.xlu0 %21416  ;;  %v31306_v35 = vld [vmem:[#allocation10_spill] sm:$0xff] }
 0x5ef   : > { %31289 = vst [vmem:[#allocation47_spill] sm:$0xff] %v28448_v21 }
 0x5f0   : > { %v28450_v3 = vpop.permute.xlu1 %21414  ;;  %21660 = vrot.lane.b32.xlu0 %v31291_v63, %s22575_s28  ;;  %v16990_v63 = vcombine.low %v31306_v35, %v31305_v17 }
 0x5f1   : > { %31290 = vst [vmem:[#allocation113_spill] sm:$0xff] %v28450_v3 }
 0x5f2   : > { %21658 = vrot.lane.b32.xlu1 %v31292_v39, %s22575_s28  ;;  %v28460_v32 = vpop.permute.xlu0 %21420  ;;  %v17022_v39 = vcombine.low %v31308_v60, %v31307_v53  ;;  %v28519_v17 = vrot.slane %v16990_v63, %v22788_v62  ;;  %v31319_v53 = vld [vmem:[#allocation213_spill] sm:$0xff]  ;;  %v31323_v63 = vld [vmem:[#allocation210_spill] sm:$0xff] }
 0x5f4   : > { %v28462_v44 = vpop.permute.xlu1 %21418  ;;  %21664 = vrot.lane.b32.xlu0 %v31293_v29, %s22575_s28  ;;  %v28522_v2 = vrot.slane %v17022_v39, %v22788_v62 }
 0x5f6   : > { %21662 = vrot.lane.b32.xlu1 %v31294_v10, %s22575_s28  ;;  %v28472_v5 = vpop.permute.xlu0 %21456  ;;  %v28507_v10 = vrot.slane %v17126_v12, %v22788_v62  ;;  %v31318_v12 = vld [vmem:[#allocation208_spill] sm:$0xff] }
 0x5f7   : > { %31295 = vst [vmem:[#allocation115_spill] sm:$0xff] %v28472_v5  ;;  %v17534_v35 = vcombine.low %v31318_v12, %v31317_v38  ;;  %v31327_v38 = vld [vmem:[#allocation253_spill] sm:$0xff]  ;;  %v31328_v12 = vld [vmem:[#allocation142_spill] sm:$0xff] }
 0x5f8   : > { %v28474_v49 = vpop.permute.xlu1 %21454  ;;  %21668 = vrot.lane.b32.xlu0 %v31297_v0, %s22575_s28  ;;  %v28510_v0 = vrot.slane %v17158_v48, %v22788_v62  ;;  %v31320_v48 = vld [vmem:[#allocation211_spill] sm:$0xff]  ;;  %v18214_v3 = vcombine.low %v31328_v12, %v31327_v38  ;;  %v31335_v38 = vld [vmem:[#allocation257_spill] sm:$0xff] }
 0x5f9   : > { %31296 = vst [vmem:[#allocation114_spill] sm:$0xff] %v28474_v49  ;;  %v17566_v60 = vcombine.low %v31320_v48, %v31319_v53  ;;  %v31329_v53 = vld [vmem:[#allocation254_spill] sm:$0xff]  ;;  %v31330_v48 = vld [vmem:[#allocation7_spill] sm:$0xff] }
 0x5fa   : > { %21666 = vrot.lane.b32.xlu1 %v31298_v24, %s22575_s28  ;;  %v28484_v18 = vpop.permute.xlu0 %21460  ;;  %v31312_v24 = vld [vmem:[#allocation214_spill] sm:$0xff]  ;;  %v18246_v21 = vcombine.low %v31330_v48, %v31329_v53  ;;  %v31336_v53 = vld [vmem:[#allocation277_spill] sm:$0xff]  ;;  %v31360_v49 = vld [vmem:[#allocation311_spill] sm:$0xff] }
 0x5fb   : > { %31299 = vst [vmem:[#allocation116_spill] sm:$0xff] %v28484_v18  ;;  %v17670_v52 = vcombine.low %v31313_v33, %v31312_v24  ;;  %v31324_v24 = vld [vmem:[#allocation209_spill] sm:$0xff]  ;;  %v31325_v33 = vld [vmem:[#allocation250_spill] sm:$0xff] }
 0x5fc   : > { %v28490_v7 = vpop.permute.xlu1 %21458  ;;  %21672 = vrot.lane.b32.xlu0 %v31309_v6, %s22575_s28  ;;  %v31321_v6 = vcombine.high %v31271_v46, %v31272_v4  ;;  %v18078_v39 = vcombine.low %v31324_v24, %v31323_v63  ;;  %v18110_v59 = vcombine.low %v31326_v11, %v31325_v33  ;;  %v17178_v4 = vcombine.low %v28507_v10, %v28510_v0  ;;  %v31334_v11 = vld [vmem:[#allocation276_spill] sm:$0xff]  ;;  %v31359_v18 = vld [vmem:[#allocation309_spill] sm:$0xff] }
 0x5fd   : > { %31304 = vst [vmem:[#allocation28_spill] sm:$0xff] %v28490_v7  ;;  %v28552_v46 = vrot.slane %v17702_v23, %v22788_v62  ;;  %v28562_v63 = vrot.slane %v17566_v60, %v22788_v62  ;;  %v28573_v24 = vrot.slane %v18214_v3, %v22788_v62  ;;  %v18758_v12 = vcombine.low %v31335_v38, %v31334_v11  ;;  %v31358_v7 = vld [vmem:[#allocation310_spill] sm:$0xff] }
 0x5fe   : > { %21670 = vrot.lane.b32.xlu1 %v31310_v36, %s22575_s28  ;;  %v28504_v29 = vpop.permute.xlu0 %21464  ;;  %v31322_v36 = vcombine.high %v31274_v28, %v31275_v8  ;;  %v28549_v8 = vrot.slane %v17670_v52, %v22788_v62  ;;  %v28567_v52 = vrot.slane %v18078_v39, %v22788_v62  ;;  %v28570_v23 = vrot.slane %v18110_v59, %v22788_v62  ;;  %v31337_v39 = vld [vmem:[#allocation274_spill] sm:$0xff] }
 0x5ff   : > { %31311 = vst [vmem:[#allocation111_spill] sm:$0xff] %v28504_v29  ;;  %v18790_v48 = vcombine.low %v31337_v39, %v31336_v53  ;;  %v31339_v59 = vld [vmem:[#allocation258_spill] sm:$0xff]  ;;  %v28603_v39 = vrot.slane %v18758_v12, %v22788_v62  ;;  %v19878_v5 = vcombine.low %v31360_v49, %v31359_v18 }
 0x600   : > { %v28516_v16 = vpop.permute.xlu1 %21462  ;;  %21676 = vrot.lane.b32.xlu0 %v31321_v6, %s22575_s28  ;;  %v17042_v6 = vcombine.low %v28519_v17, %v28522_v2  ;;  %v17722_v60 = vcombine.low %v28549_v8, %v28552_v46  ;;  %v18130_v11 = vcombine.low %v28567_v52, %v28570_v23  ;;  %v31350_v12 = vld [vmem:[#allocation278_spill] sm:$0xff] }
 0x601   : > { %31316 = vst [vmem:[#allocation110_spill] sm:$0xff] %v28516_v16  ;;  %v31351_v16 = vld [vmem:[#allocation293_spill] sm:$0xff] }
 0x602   : > { %21674 = vrot.lane.b32.xlu1 %v31322_v36, %s22575_s28  ;;  %v28544_v31 = vpop.permute.xlu0 %21468  ;;  %v28559_v36 = vrot.slane %v17534_v35, %v22788_v62  ;;  %v28576_v35 = vrot.slane %v18246_v21, %v22788_v62 }
 0x603   : > { %31331 = vst [vmem:[#allocation112_spill] sm:$0xff] %v28544_v31 }
 0x604   : > { %v28554_v28 = vpop.permute.xlu1 %21466  ;;  %21712 = vrot.lane.b32.xlu0 %v17178_v4, %s22576_s29  ;;  %v17586_v3 = vcombine.low %v28559_v36, %v28562_v63  ;;  %v18266_v38 = vcombine.low %v28573_v24, %v28576_v35 }
 0x605   : > { %31332 = vst [vmem:[#allocation126_spill] sm:$0xff] %v28554_v28 }
 0x606   : > { %21710 = vrot.lane.b32.xlu1 %v17042_v6, %s22576_s29  ;;  %v28578_v33 = vpop.permute.xlu0 %21472  ;;  %v31340_v6 = vld [vmem:[#allocation255_spill] sm:$0xff] }
 0x607   : > { %31333 = vst [vmem:[#allocation128_spill] sm:$0xff] %v28578_v33  ;;  %v18622_v21 = vcombine.low %v31340_v6, %v31339_v59  ;;  %v18654_v33 = vcombine.low %v31342_v15, %v31341_v58  ;;  %v28606_v59 = vrot.slane %v18790_v48, %v22788_v62  ;;  %v31344_v6 = vld [vmem:[#allocation225_spill] sm:$0xff]  ;;  %v31345_v15 = vld [vmem:[#allocation280_spill] sm:$0xff]  ;;  %v31352_v48 = vld [vmem:[#allocation279_spill] sm:$0xff] }
 0x608   : > { %v28586_v4 = vpop.permute.xlu1 %21470  ;;  %21716 = vrot.lane.b32.xlu0 %v17722_v60, %s22576_s29  ;;  %v19302_v58 = vcombine.low %v31345_v15, %v31344_v6  ;;  %v31346_v60 = vld [vmem:[#allocation221_spill] sm:$0xff]  ;;  %v19198_v29 = vcombine.low %v31352_v48, %v31351_v16  ;;  %v31353_v6 = vld [vmem:[#allocation187_spill] sm:$0xff]  ;;  %v20390_v48 = vcombine.low %v27630_v43, %v27615_v55 }
 0x609   : > { %31338 = vst [vmem:[#allocation135_spill] sm:$0xff] %v28586_v4  ;;  %v31347_v4 = vld [vmem:[#allocation283_spill] sm:$0xff]  ;;  %v28615_v28 = vrot.slane %v18622_v21, %v22788_v62  ;;  %v28618_v31 = vrot.slane %v18654_v33, %v22788_v62  ;;  %v19846_v33 = vcombine.low %v31358_v7, %v31357_v19  ;;  %v18810_v16 = vcombine.low %v28603_v39, %v28606_v59 }
 0x60a   : > { %21714 = vrot.lane.b32.xlu1 %v17586_v3, %s22576_s29  ;;  %v28600_v53 = vpop.permute.xlu0 %21476  ;;  %v19334_v3 = vcombine.low %v31347_v4, %v31346_v60  ;;  %v31354_v4 = vld [vmem:[#allocation307_spill] sm:$0xff]  ;;  %v31355_v60 = vld [vmem:[#allocation305_spill] sm:$0xff]  ;;  %v28652_v49 = vrot.slane %v19198_v29, %v22788_v62 }
 0x60b   : > { %31343 = vst [vmem:[#allocation137_spill] sm:$0xff] %v28600_v53  ;;  %v31349_v53 = vld [vmem:[#allocation292_spill] sm:$0xff]  ;;  %v19710_v15 = vcombine.low %v31354_v4, %v31353_v6  ;;  %v20422_v6 = vcombine.low %v27633_v47, %v27618_v56  ;;  %v28693_v47 = vrot.slane %v20390_v48, %v22788_v62 }
 0x60c   : > { %v28612_v41 = vpop.permute.xlu1 %21474  ;;  %v19166_v40 = vcombine.low %v31350_v12, %v31349_v53  ;;  %21720 = vrot.lane.b32.xlu0 %v18266_v38, %s22576_s29  ;;  %v28639_v38 = vrot.slane %v19302_v58, %v22788_v62  ;;  %v28663_v58 = vrot.slane %v19846_v33, %v22788_v62 }
 0x60d   : > { %31348 = vst [vmem:[#allocation124_spill] sm:$0xff] %v28612_v41  ;;  %v31356_v41 = vld [vmem:[#allocation308_spill] sm:$0xff]  ;;  %v28657_v18 = vrot.slane %v19710_v15, %v22788_v62 }
 0x60e   : > { %21718 = vrot.lane.b32.xlu1 %v18130_v11, %s22576_s29  ;;  %v19742_v21 = vcombine.low %v31356_v41, %v31355_v60  ;;  %v28634_v53 = vpop.permute.xlu0 %21480  ;;  %v28642_v11 = vrot.slane %v19334_v3, %v22788_v62  ;;  %v18674_v41 = vcombine.low %v28615_v28, %v28618_v31  ;;  %v28649_v19 = vrot.slane %v19166_v40, %v22788_v62 }
 0x60f   : > { %31361 = vst [vmem:[#allocation123_spill] sm:$0xff] %v28634_v53  ;;  %v28666_v3 = vrot.slane %v19878_v5, %v22788_v62  ;;  %v20254_v5 = vcombine.low %v27624_v61, %v27609_v9  ;;  %v20286_v60 = vcombine.low %v27627_v50, %v27612_v51  ;;  %v28696_v9 = vrot.slane %v20422_v6, %v22788_v62  ;;  %v31394_v53 = vld [vmem:[#allocation35_spill] sm:$0xff] }
 0x610   : > { %v28644_v12 = vpop.permute.xlu1 %21478  ;;  %21724 = vrot.lane.b32.xlu0 %v18810_v16, %s22576_s29  ;;  %v28660_v7 = vrot.slane %v19742_v21, %v22788_v62  ;;  %v19354_v29 = vcombine.low %v28639_v38, %v28642_v11  ;;  %v19218_v15 = vcombine.low %v28649_v19, %v28652_v49  ;;  %v20934_v51 = vcombine.low %v27879_v30, %v27861_v54 }
 0x611   : > { %31362 = vst [vmem:[#allocation125_spill] sm:$0xff] %v28644_v12  ;;  %v19898_v56 = vcombine.low %v28663_v58, %v28666_v3  ;;  %31363 = vst [vmem:[#allocation127_spill] sm:$0xff] %v28696_v9  ;;  %v20966_v61 = vcombine.low %v27886_v25, %v27866_v26  ;;  %v28705_v21 = vrot.slane %v20254_v5, %v22788_v62  ;;  %v31390_v12 = vld [vmem:[#allocation53_spill] sm:$0xff] }
 0x612   : > { %21722 = vrot.lane.b32.xlu1 %v18674_v41, %s22576_s29  ;;  %v28668_v40 = vpop.permute.xlu0 %21484  ;;  %v19762_v55 = vcombine.low %v28657_v18, %v28660_v7  ;;  %v28708_v33 = vrot.slane %v20286_v60, %v22788_v62  ;;  %v20798_v16 = vcombine.low %v27873_v1, %v27855_v27  ;;  %v31366_v41 = vld [vmem:[#allocation193_spill] sm:$0xff]  ;;  %v20442_v26 = vcombine.low %v28693_v47, %v28696_v9  ;;  %v31432_v9 = vld [vmem:[#allocation167_spill] sm:$0xff] }
 0x613   : > { %31364 = vst [vmem:[#allocation23_spill] sm:$0xff] %v28705_v21  ;;  %v28721_v30 = vrot.slane %v20934_v51, %v22788_v62  ;;  %v28724_v25 = vrot.slane %v20966_v61, %v22788_v62  ;;  %v17043_v51 = vcombine.high %v28519_v17, %v28522_v2  ;;  %v17179_v61 = vcombine.high %v28507_v10, %v28510_v0  ;;  %v31381_v10 = vld [vmem:[#allocation58_spill] sm:$0xff]  ;;  %v31382_v0 = vld [vmem:[#allocation59_spill] sm:$0xff] }
 0x614   : > { %v28676_v4 = vpop.permute.xlu1 %21482  ;;  %21728 = vrot.lane.b32.xlu0 %v19354_v29, %s22576_s29  ;;  %31365 = vst [vmem:[#allocation26_spill] sm:$0xff] %v28708_v33  ;;  %v31367_v29 = vld [vmem:[#allocation194_spill] sm:$0xff]  ;;  %v20306_v1 = vcombine.low %v28705_v21, %v28708_v33  ;;  %v28731_v27 = vrot.slane %v20798_v16, %v22788_v62  ;;  %v18267_v16 = vcombine.high %v28573_v24, %v28576_v35  ;;  %v31378_v24 = vld [vmem:[#allocation51_spill] sm:$0xff]  ;;  %v31424_v33 = vld [vmem:[#allocation165_spill] sm:$0xff] }
 0x615   : > { %v20830_v48 = vcombine.low %v31367_v29, %v31366_v41  ;;  %31368 = vst [vmem:[#allocation101_spill] sm:$0xff] %v28721_v30  ;;  %31369 = vst [vmem:[#allocation104_spill] sm:$0xff] %v28724_v25  ;;  %v20986_v60 = vcombine.low %v28721_v30, %v28724_v25  ;;  %v17587_v29 = vcombine.high %v28559_v36, %v28562_v63  ;;  %v31377_v63 = vld [vmem:[#allocation50_spill] sm:$0xff]  ;;  %v31380_v36 = vld [vmem:[#allocation56_spill] sm:$0xff] }
 0x616   : > { %21726 = vrot.lane.b32.xlu1 %v19218_v15, %s22576_s29  ;;  %v28690_v43 = vpop.permute.xlu0 %21520  ;;  %31370 = vst [vmem:[#allocation102_spill] sm:$0xff] %v28731_v27  ;;  %v31379_v35 = vcombine.low %v31377_v63, %v31378_v24  ;;  %v31384_v17 = vld [vmem:[#allocation78_spill] sm:$0xff]  ;;  %v31385_v63 = vld [vmem:[#allocation60_spill] sm:$0xff]  ;;  %v31386_v24 = vld [vmem:[#allocation61_spill] sm:$0xff] }
 0x617   : > { %v28734_v15 = vrot.slane %v20830_v48, %v22788_v62  ;;  %v17723_v48 = vcombine.high %v28549_v8, %v28552_v46  ;;  %v31376_v46 = vld [vmem:[#allocation55_spill] sm:$0xff]  ;;  %v31383_v8 = vcombine.low %v31381_v10, %v31382_v0  ;;  %v31389_v62 = vld [vmem:[#allocation52_spill] sm:$0xff]  ;;  %v31407_v25 = vld [vmem:[#allocation45_spill] sm:$0xff] }
 0x618   : > { %v28702_v50 = vpop.permute.xlu1 %21518  ;;  %21732 = vrot.lane.b32.xlu0 %v19898_v56, %s22576_s29  ;;  %v31391_v10 = vcombine.low %v31389_v62, %v31390_v12  ;;  %v31411_v30 = vld [vmem:[#allocation13_spill] sm:$0xff]  ;;  %v31428_v21 = vld [vmem:[#allocation262_spill] sm:$0xff] }
 0x619   : > { %31371 = vst [vmem:[#allocation105_spill] sm:$0xff] %v28734_v15  ;;  %v20850_v56 = vcombine.low %v28731_v27, %v28734_v15  ;;  %v31402_v15 = vld [vmem:[#allocation43_spill] sm:$0xff] }
 0x61a   : > { %21730 = vrot.lane.b32.xlu1 %v19762_v55, %s22576_s29  ;;  %v28716_v54 = vpop.permute.xlu0 %21524 }
 0x61c   : > { %v28726_v6 = vpop.permute.xlu1 %21522  ;;  %21736 = vrot.lane.b32.xlu0 %v20442_v26, %s22576_s29  ;;  %v21953_v26 = vsel %vm21950_vm2, %v31383_v8, %v31380_v36  ;;  %v31392_v36 = vld [vmem:[#allocation79_spill] sm:$0xff]  ;;  %v31393_v8 = vld [vmem:[#allocation34_spill] sm:$0xff] }
 0x61e   : > { %21734 = vrot.lane.b32.xlu1 %v20306_v1, %s22576_s29  ;;  %v28738_v5 = vpop.permute.xlu0 %21528  ;;  %v21952_v1 = vsel %vm21950_vm2, %v31379_v35, %v31376_v46  ;;  %v31387_v46 = vcombine.low %v31385_v63, %v31386_v24  ;;  %v31395_v63 = vcombine.low %v31393_v8, %v31394_v53  ;;  %v31396_v24 = vld [vmem:[#allocation84_spill] sm:$0xff]  ;;  %v31409_v8 = vld [vmem:[#allocation89_spill] sm:$0xff] }
 0x61f   : > { %31372 = vst [vmem:[#allocation103_spill] sm:$0xff] %v28738_v5 }
 0x620   : > { %v28742_v55 = vpop.permute.xlu1 %21526  ;;  %21740 = vrot.lane.b32.xlu0 %v20986_v60, %s22576_s29  ;;  %v21954_v35 = vsel %vm21950_vm2, %v31387_v46, %v31384_v17  ;;  %v21955_v17 = vsel %vm21950_vm2, %v31395_v63, %v31392_v36  ;;  %v31398_v46 = vld [vmem:[#allocation37_spill] sm:$0xff]  ;;  %v31401_v60 = vld [vmem:[#allocation42_spill] sm:$0xff] }
 0x621   : > { %31373 = vst [vmem:[#allocation106_spill] sm:$0xff] %v28742_v55  ;;  %v31403_v27 = vcombine.low %v31401_v60, %v31402_v15  ;;  %v31410_v63 = vld [vmem:[#allocation14_spill] sm:$0xff]  ;;  %v31415_v55 = vld [vmem:[#allocation32_spill] sm:$0xff] }
 0x622   : > { %21738 = vrot.lane.b32.xlu1 %v20850_v56, %s22576_s29  ;;  %v28756_v41 = vpop.permute.xlu0 %21532  ;;  %v31388_v56 = vld [vmem:[#allocation57_spill] sm:$0xff]  ;;  %v31418_v60 = vld [vmem:[#allocation22_spill] sm:$0xff] }
 0x623   : > { %31374 = vst [vmem:[#allocation157_spill] sm:$0xff] %v28756_v41  ;;  %v21951_v0 = vsel %vm21950_vm2, %v31391_v10, %v31388_v56  ;;  %v31400_v41 = vld [vmem:[#allocation82_spill] sm:$0xff]  ;;  %v31405_v56 = vld [vmem:[#allocation85_spill] sm:$0xff]  ;;  %v31406_v10 = vld [vmem:[#allocation44_spill] sm:$0xff] }
 0x624   : > { %v28766_v2 = vpop.permute.xlu1 %21530  ;;  %21776 = vrot.lane.b32.xlu0 %v17179_v61, %s22577_s4  ;;  %v21957_v12 = vsel %vm21950_vm2, %v31403_v27, %v31400_v41  ;;  %v31408_v53 = vcombine.low %v31406_v10, %v31407_v25  ;;  %v31417_v41 = vld [vmem:[#allocation95_spill] sm:$0xff] }
 0x625   : > { %31375 = vst [vmem:[#allocation21_spill] sm:$0xff] %v28766_v2 }
 0x626   : > { %21774 = vrot.lane.b32.xlu1 %v17043_v51, %s22577_s4  ;;  %v31397_v51 = vld [vmem:[#allocation36_spill] sm:$0xff]  ;;  %v28821_v62 = vpop.permute.xlu0 %21536  ;;  %v21958_v36 = vsel %vm21950_vm2, %v31408_v53, %v31405_v56  ;;  %v31423_v53 = vld [vmem:[#allocation166_spill] sm:$0xff] }
 0x627   : > { %v31399_v2 = vcombine.low %v31397_v51, %v31398_v46  ;;  %31404 = vst [vmem:[#allocation158_spill] sm:$0xff] %v28821_v62  ;;  %v31412_v51 = vcombine.low %v31410_v63, %v31411_v30  ;;  %v31414_v46 = vld [vmem:[#allocation33_spill] sm:$0xff]  ;;  %v31419_v62 = vld [vmem:[#allocation162_spill] sm:$0xff]  ;;  %v31422_v56 = vld [vmem:[#allocation92_spill] sm:$0xff]  ;;  %v31425_v30 = vcombine.low %v31423_v53, %v31424_v33 }
 0x628   : > { %v31416_v15 = vcombine.low %v31414_v46, %v31415_v55  ;;  %v31420_v5 = vcombine.low %v31418_v60, %v31419_v62  ;;  %v28843_v10 = vpop.permute.xlu1 %21534  ;;  %v31426_v63 = vld [vmem:[#allocation94_spill] sm:$0xff]  ;;  %v31430_v46 = vld [vmem:[#allocation93_spill] sm:$0xff]  ;;  %21780 = vrot.lane.b32.xlu0 %v17723_v48, %s22577_s4  ;;  %v31436_v33 = vld [vmem:[#allocation299_spill] sm:$0xff] }
 0x629   : > { %v21956_v61 = vsel %vm21950_vm2, %v31399_v2, %v31396_v24  ;;  %v21959_v2 = vsel %vm21950_vm2, %v31412_v51, %v31409_v8  ;;  %v31413_v24 = vld [vmem:[#allocation68_spill] sm:$0xff]  ;;  %31421 = vst [vmem:[#allocation161_spill] sm:$0xff] %v28843_v10  ;;  %v21962_v8 = vsel %vm21950_vm2, %v31425_v30, %v31422_v56  ;;  %v31427_v51 = vld [vmem:[#allocation261_spill] sm:$0xff]  ;;  %v31435_v60 = vld [vmem:[#allocation298_spill] sm:$0xff] }
 0x62a   : > { %v21960_v27 = vsel %vm21950_vm2, %v31416_v15, %v31413_v24  ;;  %v21961_v25 = vsel %vm21950_vm2, %v31420_v5, %v31417_v41  ;;  %v31429_v55 = vcombine.low %v31427_v51, %v31428_v21  ;;  %v31431_v15 = vld [vmem:[#allocation171_spill] sm:$0xff]  ;;  %v31434_v41 = vld [vmem:[#allocation96_spill] sm:$0xff]  ;;  %v31437_v53 = vcombine.low %v31435_v60, %v31436_v33  ;;  %v31440_v21 = vld [vmem:[#allocation297_spill] sm:$0xff]  ;;  %21778 = vrot.lane.b32.xlu1 %v17587_v29, %s22577_s4  ;;  %v28880_v33 = vpop.permute.xlu0 %21540 }
 0x62b   : > { %v31433_v62 = vcombine.low %v31431_v15, %v31432_v9  ;;  %v31438_v30 = vld [vmem:[#allocation88_spill] sm:$0xff]  ;;  %v31442_v9 = vld [vmem:[#allocation67_spill] sm:$0xff]  ;;  %v31443_v48 = vld [vmem:[#allocation97_spill] sm:$0xff] }
 0x62c   : > { %v21963_v24 = vsel %vm21950_vm2, %v31429_v55, %v31426_v63  ;;  %v21965_v56 = vsel %vm21950_vm2, %v31437_v53, %v31434_v41  ;;  %v31439_v10 = vld [vmem:[#allocation296_spill] sm:$0xff]  ;;  %v21967_v55 = vsel %vm224_vm0, %v21951_v0, %v31442_v9  ;;  %v31444_v15 = vld [vmem:[#allocation70_spill] sm:$0xff]  ;;  %v31445_v41 = vld [vmem:[#allocation69_spill] sm:$0xff]  ;;  %21784 = vrot.lane.b32.xlu0 %v18267_v16, %s22577_s4 }
 0x62d   : > { %v21964_v5 = vsel %vm21950_vm2, %v31433_v62, %v31430_v46  ;;  %v31441_v51 = vcombine.low %v31439_v10, %v31440_v21  ;;  %v21968_v46 = vsel %vm224_vm0, %v21952_v1, %v31443_v48  ;;  %v21969_v62 = vsel %vm224_vm0, %v21953_v26, %v31444_v15  ;;  %v31446_v10 = vld [vmem:[#allocation71_spill] sm:$0xff]  ;;  %v31448_v0 = vld [vmem:[#allocation144_spill] sm:$0xff]  ;;  %v31449_v1 = vld [vmem:[#allocation73_spill] sm:$0xff] }
 0x62e   : > { %v21970_v60 = vsel %vm224_vm0, %v21954_v35, %v31445_v41  ;;  %v28884_v53 = vsel %vm224_vm0, %v21955_v17, %v31446_v10  ;;  %v28892_v21 = vsel %vm224_vm0, %v21957_v12, %v31448_v0  ;;  %v28896_v26 = vsel %vm224_vm0, %v21958_v36, %v31449_v1  ;;  %v31450_v35 = vld [vmem:[#allocation145_spill] sm:$0xff]  ;;  %v31453_v12 = vld [vmem:[#allocation152_spill] sm:$0xff]  ;;  %v31454_v36 = vld [vmem:[#allocation146_spill] sm:$0xff] }
 0x62f   : > { %v21966_v63 = vsel %vm21950_vm2, %v31441_v51, %v31438_v30  ;;  %v31447_v30 = vld [vmem:[#allocation72_spill] sm:$0xff]  ;;  %v28898_v51 = vpop.permute.xlu1 %21538  ;;  %v28902_v9 = vsel %vm224_vm0, %v21959_v2, %v31450_v35  ;;  %v31451_v17 = vld [vmem:[#allocation149_spill] sm:$0xff]  ;;  %v28917_v10 = vsel %vm224_vm0, %v21961_v25, %v31454_v36  ;;  %v31459_v16 = vld [vmem:[#allocation147_spill] sm:$0xff] }
 0x630   : > { %v28888_v29 = vsel %vm224_vm0, %v21956_v61, %v31447_v30  ;;  %v28906_v48 = vsel %vm224_vm0, %v21960_v27, %v31451_v17  ;;  %v31452_v61 = vld [vmem:[#allocation150_spill] sm:$0xff]  ;;  %v21982_v41 = vsel %vm224_vm0, %v21966_v63, %v31453_v12  ;;  %v31455_v30 = vld [vmem:[#allocation151_spill] sm:$0xff]  ;;  %v31456_v0 = vld [vmem:[#allocation188_spill] sm:$0xff]  ;;  %v31458_v63 = vcombine.high %v28567_v52, %v28570_v23 }
 0x631   : > { %v28910_v15 = vsel %vm224_vm0, %v21962_v8, %v31452_v61  ;;  %v28921_v2 = vsel %vm224_vm0, %v21964_v5, %v31455_v30  ;;  %v21981_v27 = vsel %vm224_vm0, %v21965_v56, %v31456_v0  ;;  %v31457_v1 = vld [vmem:[#allocation172_spill] sm:$0xff]  ;;  %v28933_v35 = vsel %vm224_vm0, %v21963_v24, %v31459_v16  ;;  %v31460_v25 = vld [vmem:[#allocation233_spill] sm:$0xff]  ;;  %v31461_v5 = vld [vmem:[#allocation62_spill] sm:$0xff]  ;;  %v28939_v56 = vpop.permute.xlu0 %21544 }
 0x632   : > { %v21999_v8 = vsel %vm21983_vm3, %v21982_v41, %v31457_v1  ;;  %21782 = vrot.lane.b32.xlu1 %v31458_v63, %s22577_s4  ;;  %v21998_v17 = vsel %vm21983_vm3, %v21981_v27, %v31460_v25  ;;  %v31462_v12 = vld [vmem:[#allocation189_spill] sm:$0xff]  ;;  %v31463_v36 = vld [vmem:[#allocation191_spill] sm:$0xff]  ;;  %v31464_v23 = vld [vmem:[#allocation64_spill] sm:$0xff]  ;;  %vm22204_vm0 = vcmask 261120  }
 0x633   : > { %v22016_v61 = vsel %vm22000_vm4, %v21999_v8, %v31461_v5  ;;  %v21984_v41 = vsel %vm21983_vm3, %v21967_v55, %v31462_v12  ;;  %v21985_v52 = vsel %vm21983_vm3, %v21968_v46, %v31463_v36  ;;  %v22015_v30 = vsel %vm22000_vm4, %v21998_v17, %v31464_v23  ;;  %v28949_v0 = vpop.permute.xlu1 %21542  ;;  %v31465_v27 = vld [vmem:[#allocation192_spill] sm:$0xff]  ;;  %v31467_v63 = vld [vmem:[#allocation27_spill] sm:$0xff]  ;;  %v31470_v17 = vld [vmem:[#allocation86_spill] sm:$0xff] }
 0x634   : > { %v22033_v24 = vsel %vm22017_vm5, %v22016_v61, %v28295_v13  ;;  %v21987_v1 = vsel %vm21983_vm3, %v21970_v60, %v31465_v27  ;;  %v22032_v8 = vsel %vm22017_vm5, %v22015_v30, %v28299_v57  ;;  %v31466_v46 = vcombine.high %v28603_v39, %v28606_v59  ;;  %v31468_v16 = vld [vmem:[#allocation235_spill] sm:$0xff]  ;;  %v31473_v36 = vld [vmem:[#allocation190_spill] sm:$0xff] }
 0x635   : > { %v22050_v55 = vsel %vm22034_vm6, %v22033_v24, %v28372_v34  ;;  %v22001_v13 = vsel %vm22000_vm4, %v21984_v41, %v31467_v63  ;;  %v22002_v25 = vsel %vm22000_vm4, %v21985_v52, %v31468_v16  ;;  %v22049_v60 = vsel %vm22034_vm6, %v22032_v8, %v28374_v14  ;;  %v21549_v61 = vpop.permute.xlu0 %21548  ;;  %v31474_v23 = vld [vmem:[#allocation115_spill] sm:$0xff]  ;;  %v31478_v27 = vld [vmem:[#allocation114_spill] sm:$0xff]  ;;  %v31480_v63 = vld [vmem:[#allocation77_spill] sm:$0xff] }
 0x636   : > { %21788 = vrot.lane.b32.xlu0 %v31466_v46, %s22577_s4  ;;  %v22067_v57 = vsel %vm22051_vm7, %v22050_v55, %v28460_v32  ;;  %v31469_v34 = vcombine.high %v28615_v28, %v28618_v31  ;;  %v22019_v39 = vsel %vm22017_vm5, %v22002_v25, %v31470_v17  ;;  %v22066_v59 = vsel %vm22051_vm7, %v22049_v60, %v28462_v44  ;;  %v31477_v24 = vld [vmem:[#allocation87_spill] sm:$0xff]  ;;  %v31479_v55 = vld [vmem:[#allocation90_spill] sm:$0xff]  ;;  %v31481_v25 = vld [vmem:[#allocation117_spill] sm:$0xff] }
 0x637   : > { %v22084_v5 = vsel %vm22068_vm8, %v22067_v57, %v28668_v40  ;;  %v22018_v14 = vsel %vm22017_vm5, %v22001_v13, %v28214_v20  ;;  %v22036_v32 = vsel %vm22034_vm6, %v22019_v39, %v28305_v22  ;;  %v22083_v31 = vsel %vm22068_vm8, %v22066_v59, %v28676_v4  ;;  %v21547_v28 = vpop.permute.xlu1 %21546  ;;  %v31472_v22 = vld [vmem:[#allocation120_spill] sm:$0xff]  ;;  %v31482_v57 = vld [vmem:[#allocation286_spill] sm:$0xff] }
 0x638   : > { %21786 = vrot.lane.b32.xlu1 %v31469_v34, %s22577_s4  ;;  %v28986_v12 = vsel %vm22085_vm9, %v22084_v5, %v21549_v61  ;;  %v22035_v44 = vsel %vm22034_vm6, %v22018_v14, %v28309_v42  ;;  %v22053_v40 = vsel %vm22051_vm7, %v22036_v32, %v28382_v45  ;;  %v28993_v41 = vsel %vm22085_vm9, %v22083_v31, %v21547_v28  ;;  %v31483_v34 = vld [vmem:[#allocation237_spill] sm:$0xff]  ;;  %v31485_v59 = vld [vmem:[#allocation248_spill] sm:$0xff]  ;;  %v31487_v14 = vld [vmem:[#allocation238_spill] sm:$0xff] }
 0x639   : > { %v31471_v20 = vcombine.high %v28639_v38, %v28642_v11  ;;  %v21986_v4 = vsel %vm21983_vm3, %v21969_v62, %v31472_v22  ;;  %v22004_v52 = vsel %vm22000_vm4, %v21987_v1, %v31473_v36  ;;  %v22052_v42 = vsel %vm22051_vm7, %v22035_v44, %v28384_v37  ;;  %v31476_v38 = vld [vmem:[#allocation242_spill] sm:$0xff]  ;;  %v21585_v8 = vpop.permute.xlu0 %21584  ;;  %v31486_v61 = vld [vmem:[#allocation184_spill] sm:$0xff] }
 0x63a   : > { %v22070_v45 = vsel %vm22068_vm8, %v22053_v40, %v31474_v23  ;;  %v31475_v30 = vcombine.high %v28649_v19, %v28652_v49  ;;  %v22003_v11 = vsel %vm22000_vm4, %v21986_v4, %v31476_v38  ;;  %v22021_v62 = vsel %vm22017_vm5, %v22004_v52, %v31477_v24  ;;  %v31488_v31 = vld [vmem:[#allocation116_spill] sm:$0xff]  ;;  %v31491_v40 = vld [vmem:[#allocation91_spill] sm:$0xff]  ;;  %v31493_v52 = vld [vmem:[#allocation98_spill] sm:$0xff] }
 0x63b   : > { %21792 = vrot.lane.b32.xlu0 %v31471_v20, %s22577_s4  ;;  %v22069_v1 = vsel %vm22068_vm8, %v22052_v42, %v31478_v27  ;;  %v22087_v37 = vsel %vm22085_vm9, %v22070_v45, %v28690_v43  ;;  %v22020_v46 = vsel %vm22017_vm5, %v22003_v11, %v31479_v55  ;;  %v22038_v19 = vsel %vm22034_vm6, %v22021_v62, %v31480_v63  ;;  %v21583_v13 = vpop.permute.xlu1 %21582  ;;  %v31492_v20 = vld [vmem:[#allocation28_spill] sm:$0xff]  ;;  %v31495_v38 = vld [vmem:[#allocation267_spill] sm:$0xff]  ;;  %v31496_v24 = vld [vmem:[#allocation153_spill] sm:$0xff] }
 0x63c   : > { %21790 = vrot.lane.b32.xlu1 %v31475_v30, %s22577_s4  ;;  %v22086_v49 = vsel %vm22085_vm9, %v22069_v1, %v28702_v50  ;;  %v29026_v16 = vsel %vm22102_vm10, %v22087_v37, %v21585_v8  ;;  %v21989_v60 = vsel %vm21983_vm3, %v28888_v29, %v31481_v25  ;;  %v22037_v43 = vsel %vm22034_vm6, %v22020_v46, %v31482_v57  ;;  %v31494_v23 = vld [vmem:[#allocation284_spill] sm:$0xff]  ;;  %v31497_v62 = vld [vmem:[#allocation239_spill] sm:$0xff]  ;;  %v31500_v8 = vld [vmem:[#allocation229_spill] sm:$0xff] }
 0x63d   : > { %v22055_v17 = vsel %vm22051_vm7, %v22038_v19, %v31483_v34  ;;  %v29036_v39 = vsel %vm22102_vm10, %v22086_v49, %v21583_v13  ;;  %v31484_v50 = vcombine.high %v28663_v58, %v28666_v3  ;;  %v21988_v5 = vsel %vm21983_vm3, %v28884_v53, %v31485_v59  ;;  %v31490_v58 = vld [vmem:[#allocation265_spill] sm:$0xff]  ;;  %v21589_v36 = vpop.permute.xlu0 %21588  ;;  %v31501_v46 = vld [vmem:[#allocation12_spill] sm:$0xff]  ;;  %v31502_v63 = vld [vmem:[#allocation270_spill] sm:$0xff] }
 0x63e   : > { %v22006_v29 = vsel %vm22000_vm4, %v21989_v60, %v31486_v61  ;;  %v22054_v32 = vsel %vm22051_vm7, %v22037_v43, %v31487_v14  ;;  %v22072_v28 = vsel %vm22068_vm8, %v22055_v17, %v31488_v31  ;;  %v31489_v44 = vcombine.high %v28657_v18, %v28660_v7  ;;  %v31503_v49 = vld [vmem:[#allocation111_spill] sm:$0xff]  ;;  %v31505_v60 = vld [vmem:[#allocation26_spill] sm:$0xff] }
 0x63f   : > { %21796 = vrot.lane.b32.xlu0 %v31484_v50, %s22577_s4  ;;  %v22005_v3 = vsel %vm22000_vm4, %v21988_v5, %v31490_v58  ;;  %v22023_v53 = vsel %vm22017_vm5, %v22006_v29, %v31491_v40  ;;  %v22071_v22 = vsel %vm22068_vm8, %v22054_v32, %v31492_v20  ;;  %v22089_v4 = vsel %vm22085_vm9, %v22072_v28, %v28716_v54  ;;  %v21587_v45 = vpop.permute.xlu1 %21586  ;;  %v31504_v25 = vld [vmem:[#allocation23_spill] sm:$0xff]  ;;  %v31509_v17 = vld [vmem:[#allocation110_spill] sm:$0xff]  ;;  %v31511_v29 = vld [vmem:[#allocation25_spill] sm:$0xff] }
 0x640   : > { %21794 = vrot.lane.b32.xlu1 %v31489_v44, %s22577_s4  ;;  %v22022_v42 = vsel %vm22017_vm5, %v22005_v3, %v31493_v52  ;;  %v22040_v18 = vsel %vm22034_vm6, %v22023_v53, %v31494_v23  ;;  %v22088_v7 = vsel %vm22085_vm9, %v22071_v22, %v28726_v6  ;;  %v29070_v30 = vsel %vm22102_vm10, %v22089_v4, %v21589_v36  ;;  %v31498_v6 = vld [vmem:[#allocation127_spill] sm:$0xff]  ;;  %v31512_v32 = vld [vmem:[#allocation154_spill] sm:$0xff]  ;;  %v31514_v40 = vld [vmem:[#allocation232_spill] sm:$0xff] }
 0x641   : > { %v21991_v11 = vsel %vm21983_vm3, %v28896_v26, %v31495_v38  ;;  %v22039_v54 = vsel %vm22034_vm6, %v22022_v42, %v31496_v24  ;;  %v22057_v27 = vsel %vm22051_vm7, %v22040_v18, %v31497_v62  ;;  %v29080_v1 = vsel %vm22102_vm10, %v22088_v7, %v21587_v45  ;;  %v31508_v34 = vld [vmem:[#allocation99_spill] sm:$0xff]  ;;  %v21593_v61 = vpop.permute.xlu0 %21592  ;;  %v31513_v28 = vld [vmem:[#allocation106_spill] sm:$0xff]  ;;  %v31517_v42 = vld [vmem:[#allocation101_spill] sm:$0xff] }
 0x642   : > { %v31499_v37 = vcombine.high %v28693_v47, %v31498_v6  ;;  %v21990_v55 = vsel %vm21983_vm3, %v28892_v21, %v31500_v8  ;;  %v22008_v26 = vsel %vm22000_vm4, %v21991_v11, %v31501_v46  ;;  %v22056_v19 = vsel %vm22051_vm7, %v22039_v54, %v31502_v63  ;;  %v31507_v47 = vld [vmem:[#allocation266_spill] sm:$0xff]  ;;  %v31510_v59 = vld [vmem:[#allocation103_spill] sm:$0xff]  ;;  %v31518_v23 = vld [vmem:[#allocation104_spill] sm:$0xff] }
 0x643   : > { %v22074_v13 = vsel %vm22068_vm8, %v22057_v27, %v31503_v49  ;;  %v31506_v57 = vcombine.high %v31504_v25, %v31505_v60  ;;  %v22007_v43 = vsel %vm22000_vm4, %v21990_v55, %v31507_v47  ;;  %v22025_v21 = vsel %vm22017_vm5, %v22008_v26, %v31508_v34  ;;  %v21591_v58 = vpop.permute.xlu1 %21590  ;;  %v31515_v20 = vld [vmem:[#allocation19_spill] sm:$0xff]  ;;  %v31520_v7 = vld [vmem:[#allocation121_spill] sm:$0xff]  ;;  %v31522_v11 = vld [vmem:[#allocation268_spill] sm:$0xff] }
 0x644   : > { %21800 = vrot.lane.b32.xlu0 %v31499_v37, %s22577_s4  ;;  %v22073_v50 = vsel %vm22068_vm8, %v22056_v19, %v31509_v17  ;;  %v22091_v5 = vsel %vm22085_vm9, %v22074_v13, %v31510_v59  ;;  %v22024_v14 = vsel %vm22017_vm5, %v22007_v43, %v31511_v29  ;;  %v22042_v31 = vsel %vm22034_vm6, %v22025_v21, %v31512_v32  ;;  %v31516_v4 = vld [vmem:[#allocation271_spill] sm:$0xff]  ;;  %v31521_v38 = vld [vmem:[#allocation129_spill] sm:$0xff]  ;;  %v31523_v54 = vld [vmem:[#allocation112_spill] sm:$0xff] }
 0x645   : > { %21798 = vrot.lane.b32.xlu1 %v31506_v57, %s22577_s4  ;;  %v22090_v44 = vsel %vm22085_vm9, %v22073_v50, %v31513_v28  ;;  %v29114_v3 = vsel %vm22102_vm10, %v22091_v5, %v21593_v61  ;;  %v21993_v53 = vsel %vm21983_vm3, %v28906_v48, %v31514_v40  ;;  %v22041_v22 = vsel %vm22034_vm6, %v22024_v14, %v31515_v20  ;;  %v31524_v27 = vld [vmem:[#allocation102_spill] sm:$0xff]  ;;  %v31525_v6 = vld [vmem:[#allocation105_spill] sm:$0xff]  ;;  %v31528_v46 = vld [vmem:[#allocation100_spill] sm:$0xff]  ;;  %v21597_v13 = vpop.permute.xlu0 %21596 }
 0x646   : > { %v22059_v36 = vsel %vm22051_vm7, %v22042_v31, %v31516_v4  ;;  %v29124_v52 = vsel %vm22102_vm10, %v22090_v44, %v21591_v58  ;;  %v31519_v18 = vcombine.high %v31517_v42, %v31518_v23  ;;  %v21992_v45 = vsel %vm21983_vm3, %v28902_v9, %v31520_v7  ;;  %v31527_v8 = vld [vmem:[#allocation38_spill] sm:$0xff]  ;;  %v31530_v19 = vld [vmem:[#allocation157_spill] sm:$0xff]  ;;  %v31532_v57 = vld [vmem:[#allocation155_spill] sm:$0xff] }
 0x647   : > { %v22010_v48 = vsel %vm22000_vm4, %v21993_v53, %v31521_v38  ;;  %v22058_v24 = vsel %vm22051_vm7, %v22041_v22, %v31522_v11  ;;  %v22076_v62 = vsel %vm22068_vm8, %v22059_v36, %v31523_v54  ;;  %v31526_v37 = vcombine.high %v31524_v27, %v31525_v6  ;;  %v31529_v26 = vld [vmem:[#allocation126_spill] sm:$0xff]  ;;  %v31533_v43 = vld [vmem:[#allocation21_spill] sm:$0xff]  ;;  %v21595_v21 = vpop.permute.xlu1 %21594  ;;  %v31535_v5 = vld [vmem:[#allocation131_spill] sm:$0xff] }
 0x648   : > { %21804 = vrot.lane.b32.xlu0 %v31519_v18, %s22577_s4  ;;  %v22009_v55 = vsel %vm22000_vm4, %v21992_v45, %v31527_v8  ;;  %v22027_v9 = vsel %vm22017_vm5, %v22010_v48, %v31528_v46  ;;  %v22075_v63 = vsel %vm22068_vm8, %v22058_v24, %v31529_v26  ;;  %v22093_v49 = vsel %vm22085_vm9, %v22076_v62, %v31530_v19  ;;  %v31531_v25 = vld [vmem:[#allocation74_spill] sm:$0xff]  ;;  %v31536_v29 = vld [vmem:[#allocation269_spill] sm:$0xff]  ;;  %v31537_v31 = vld [vmem:[#allocation215_spill] sm:$0xff] }
 0x649   : > { %21802 = vrot.lane.b32.xlu1 %v31526_v37, %s22577_s4  ;;  %v22026_v60 = vsel %vm22017_vm5, %v22009_v55, %v31531_v25  ;;  %v22044_v47 = vsel %vm22034_vm6, %v22027_v9, %v31532_v57  ;;  %v22092_v34 = vsel %vm22085_vm9, %v22075_v63, %v31533_v43  ;;  %v29158_v17 = vsel %vm22102_vm10, %v22093_v49, %v21597_v13  ;;  %v31534_v50 = vld [vmem:[#allocation234_spill] sm:$0xff]  ;;  %v31538_v28 = vld [vmem:[#allocation216_spill] sm:$0xff]  ;;  %v31544_v42 = vld [vmem:[#allocation179_spill] sm:$0xff]  ;;  %v21601_v62 = vpop.permute.xlu0 %21600 }
 0x64a   : > { %v21995_v59 = vsel %vm21983_vm3, %v28910_v15, %v31534_v50  ;;  %v22043_v61 = vsel %vm22034_vm6, %v22026_v60, %v31535_v5  ;;  %v22061_v14 = vsel %vm22051_vm7, %v22044_v47, %v31536_v29  ;;  %v29168_v32 = vsel %vm22102_vm10, %v22092_v34, %v21595_v21  ;;  %v31540_v58 = vld [vmem:[#allocation246_spill] sm:$0xff]  ;;  %v31541_v15 = vld [vmem:[#allocation65_spill] sm:$0xff]  ;;  %v31542_v20 = vld [vmem:[#allocation48_spill] sm:$0xff] }
 0x64b   : > { %v31539_v44 = vcombine.low %v31537_v31, %v31538_v28  ;;  %v21994_v40 = vsel %vm21983_vm3, %v28917_v10, %v31540_v58  ;;  %v22012_v53 = vsel %vm22000_vm4, %v21995_v59, %v31541_v15  ;;  %v22060_v22 = vsel %vm22051_vm7, %v22043_v61, %v31542_v20  ;;  %v31543_v4 = vld [vmem:[#allocation128_spill] sm:$0xff]  ;;  %v31547_v7 = vld [vmem:[#allocation39_spill] sm:$0xff]  ;;  %v31550_v24 = vld [vmem:[#allocation158_spill] sm:$0xff]  ;;  %v21599_v9 = vpop.permute.xlu1 %21598 }
 0x64c   : > { %v22078_v36 = vsel %vm22068_vm8, %v22061_v14, %v31543_v4  ;;  %v31545_v23 = vld [vmem:[#allocation180_spill] sm:$0xff]  ;;  %v22011_v45 = vsel %vm22000_vm4, %v21994_v40, %v31547_v7  ;;  %v31548_v38 = vld [vmem:[#allocation75_spill] sm:$0xff]  ;;  %v31553_v55 = vld [vmem:[#allocation161_spill] sm:$0xff] }
 0x64d   : > { %21840 = vrot.lane.b32.xlu0 %v31539_v44, %s22578_s5  ;;  %v31546_v18 = vcombine.low %v31544_v42, %v31545_v23  ;;  %v22029_v10 = vsel %vm22017_vm5, %v22012_v53, %v31548_v38  ;;  %v31549_v48 = vld [vmem:[#allocation135_spill] sm:$0xff]  ;;  %v22095_v54 = vsel %vm22085_vm9, %v22078_v36, %v31550_v24  ;;  %v31555_v49 = vld [vmem:[#allocation196_spill] sm:$0xff]  ;;  %v31556_v25 = vld [vmem:[#allocation49_spill] sm:$0xff] }
 0x64e   : > { %v22077_v11 = vsel %vm22068_vm8, %v22060_v22, %v31549_v48  ;;  %v31551_v27 = vld [vmem:[#allocation291_spill] sm:$0xff]  ;;  %v29202_v26 = vsel %vm22102_vm10, %v22095_v54, %v21601_v62  ;;  %v31558_v43 = vld [vmem:[#allocation252_spill] sm:$0xff]  ;;  %v31561_v59 = vld [vmem:[#allocation54_spill] sm:$0xff] }
 0x64f   : > { %21838 = vrot.lane.b32.xlu1 %v31546_v18, %s22578_s5  ;;  %v22028_v6 = vsel %vm22017_vm5, %v22011_v45, %v31551_v27  ;;  %v31552_v37 = vld [vmem:[#allocation195_spill] sm:$0xff]  ;;  %v22094_v46 = vsel %vm22085_vm9, %v22077_v11, %v31553_v55  ;;  %v31562_v5 = vld [vmem:[#allocation46_spill] sm:$0xff]  ;;  %v31563_v29 = vld [vmem:[#allocation137_spill] sm:$0xff]  ;;  %v21605_v18 = vpop.permute.xlu0 %21604  ;;  %v21603_v11 = vpop.permute.xlu1 %21602 }
 0x650   : > { %v22046_v8 = vsel %vm22034_vm6, %v22029_v10, %v31552_v37  ;;  %v31554_v63 = vld [vmem:[#allocation143_spill] sm:$0xff]  ;;  %v22045_v13 = vsel %vm22034_vm6, %v22028_v6, %v31555_v49  ;;  %v29212_v57 = vsel %vm22102_vm10, %v22094_v46, %v21599_v9  ;;  %v31565_v58 = vld [vmem:[#allocation220_spill] sm:$0xff]  ;;  %v31571_v38 = vld [vmem:[#allocation197_spill] sm:$0xff] }
 0x651   : > { %v21997_v19 = vsel %vm21983_vm3, %v28921_v2, %v31554_v63  ;;  %v22063_v60 = vsel %vm22051_vm7, %v22046_v8, %v31556_v25  ;;  %v31557_v47 = vld [vmem:[#allocation251_spill] sm:$0xff]  ;;  %v22062_v61 = vsel %vm22051_vm7, %v22045_v13, %v31562_v5  ;;  %v31569_v22 = vld [vmem:[#allocation124_spill] sm:$0xff]  ;;  %v31574_v37 = vld [vmem:[#allocation289_spill] sm:$0xff] }
 0x652   : > { %v31559_v34 = vcombine.low %v31557_v47, %v31558_v43  ;;  %v31560_v21 = vld [vmem:[#allocation263_spill] sm:$0xff]  ;;  %v22014_v2 = vsel %vm22000_vm4, %v21997_v19, %v31561_v59  ;;  %v22080_v14 = vsel %vm22068_vm8, %v22063_v60, %v31563_v29  ;;  %v22079_v4 = vsel %vm22068_vm8, %v22062_v61, %v31569_v22  ;;  %v31570_v7 = vld [vmem:[#allocation76_spill] sm:$0xff]  ;;  %v31575_v8 = vld [vmem:[#allocation290_spill] sm:$0xff] }
 0x653   : > { %v21996_v50 = vsel %vm21983_vm3, %v28933_v35, %v31560_v21  ;;  %v31564_v44 = vld [vmem:[#allocation219_spill] sm:$0xff]  ;;  %v22097_v36 = vsel %vm22085_vm9, %v22080_v14, %v28880_v33  ;;  %v22096_v48 = vsel %vm22085_vm9, %v22079_v4, %v28898_v51  ;;  %v31572_v54 = vld [vmem:[#allocation236_spill] sm:$0xff]  ;;  %v31576_v55 = vcombine.low %v31574_v37, %v31575_v8  ;;  %v31577_v46 = vld [vmem:[#allocation113_spill] sm:$0xff]  ;;  %v21609_v21 = vpop.permute.xlu0 %21608  ;;  %v21607_v59 = vpop.permute.xlu1 %21606 }
 0x654   : > { %21844 = vrot.lane.b32.xlu0 %v31559_v34, %s22578_s5  ;;  %v31566_v40 = vcombine.low %v31564_v44, %v31565_v58  ;;  %v31567_v15 = vld [vmem:[#allocation63_spill] sm:$0xff]  ;;  %v22114_v24 = vsel %vm22102_vm10, %v22097_v36, %v21605_v18  ;;  %v22113_v33 = vsel %vm22102_vm10, %v22096_v48, %v21603_v11  ;;  %v31580_v49 = vld [vmem:[#allocation260_spill] sm:$0xff]  ;;  %v31582_v25 = vld [vmem:[#allocation125_spill] sm:$0xff] }
 0x655   : > { %v22013_v53 = vsel %vm22000_vm4, %v21996_v50, %v31567_v15  ;;  %v31568_v20 = vld [vmem:[#allocation203_spill] sm:$0xff]  ;;  %v31583_v61 = vld [vmem:[#allocation294_spill] sm:$0xff]  ;;  %v31587_v15 = vld [vmem:[#allocation224_spill] sm:$0xff] }
 0x656   : > { %21842 = vrot.lane.b32.xlu1 %v31566_v40, %s22578_s5  ;;  %v22031_v35 = vsel %vm22017_vm5, %v22014_v2, %v31568_v20  ;;  %v22030_v45 = vsel %vm22017_vm5, %v22013_v53, %v31570_v7  ;;  %v31573_v27 = vld [vmem:[#allocation47_spill] sm:$0xff]  ;;  %v31586_v40 = vld [vmem:[#allocation230_spill] sm:$0xff]  ;;  %v31589_v22 = vld [vmem:[#allocation264_spill] sm:$0xff] }
 0x657   : > { %v22048_v10 = vsel %vm22034_vm6, %v22031_v35, %v31571_v38  ;;  %v22047_v62 = vsel %vm22034_vm6, %v22030_v45, %v31572_v54  ;;  %v31578_v51 = vld [vmem:[#allocation123_spill] sm:$0xff]  ;;  %v31588_v53 = vcombine.low %v31586_v40, %v31587_v15  ;;  %v21611_v20 = vpop.permute.xlu1 %21610  ;;  %v31590_v4 = vld [vmem:[#allocation312_spill] sm:$0xff] }
 0x658   : > { %v22065_v6 = vsel %vm22051_vm7, %v22048_v10, %v31573_v27  ;;  %21848 = vrot.lane.b32.xlu0 %v31576_v55, %s22578_s5  ;;  %v22064_v9 = vsel %vm22051_vm7, %v22047_v62, %v31577_v46  ;;  %v31579_v19 = vld [vmem:[#allocation259_spill] sm:$0xff]  ;;  %v22117_v35 = vsel %vm22102_vm10, %v28993_v41, %v21611_v20  ;;  %v31591_v36 = vcombine.low %v31589_v22, %v31590_v4  ;;  %v31596_v11 = vld [vmem:[#allocation316_spill] sm:$0xff]  ;;  %v31598_v62 = vld [vmem:[#allocation313_spill] sm:$0xff] }
 0x659   : > { %v22082_v63 = vsel %vm22068_vm8, %v22065_v6, %v31578_v51  ;;  %v31581_v13 = vcombine.low %v31579_v19, %v31580_v49  ;;  %v22081_v60 = vsel %vm22068_vm8, %v22064_v9, %v31582_v25  ;;  %v31584_v29 = vld [vmem:[#allocation295_spill] sm:$0xff]  ;;  %v31599_v27 = vld [vmem:[#allocation314_spill] sm:$0xff] }
 0x65a   : > { %v22099_v34 = vsel %vm22085_vm9, %v22082_v63, %v28939_v56  ;;  %v22098_v50 = vsel %vm22085_vm9, %v22081_v60, %v28949_v0  ;;  %v31585_v14 = vcombine.low %v31583_v61, %v31584_v29  ;;  %v21613_v56 = vpop.permute.xlu0 %21612  ;;  %v31592_v18 = vld [vmem:[#allocation223_spill] sm:$0xff]  ;;  %v31600_v6 = vcombine.low %v31598_v62, %v31599_v27  ;;  %v31602_v51 = vld [vmem:[#allocation66_spill] sm:$0xff] }
 0x65b   : > { %21846 = vrot.lane.b32.xlu1 %v31581_v13, %s22578_s5  ;;  %v22116_v2 = vsel %vm22102_vm10, %v22099_v34, %v21609_v21  ;;  %v22115_v5 = vsel %vm22102_vm10, %v22098_v50, %v21607_v59  ;;  %v22118_v0 = vsel %vm22102_vm10, %v28986_v12, %v21613_v56  ;;  %v31593_v7 = vld [vmem:[#allocation227_spill] sm:$0xff]  ;;  %v21647_v10 = vpop.permute.xlu1 %21646  ;;  %v31604_v13 = vld [vmem:[#allocation80_spill] sm:$0xff]  ;;  %v31608_v59 = vld [vmem:[#allocation170_spill] sm:$0xff] }
 0x65c   : > { %21852 = vrot.lane.b32.xlu0 %v31585_v14, %s22578_s5  ;;  %v31594_v45 = vcombine.low %v31592_v18, %v31593_v7  ;;  %v22120_v12 = vsel %vm22119_vm11, %v29036_v39, %v21647_v10  ;;  %v31595_v41 = vld [vmem:[#allocation315_spill] sm:$0xff]  ;;  %v31601_v39 = vld [vmem:[#allocation81_spill] sm:$0xff]  ;;  %v31611_v56 = vld [vmem:[#allocation228_spill] sm:$0xff]  ;;  %v31614_v10 = vcombine.high %v31544_v42, %v31545_v23 }
 0x65d   : > { %v31597_v54 = vcombine.low %v31595_v41, %v31596_v11  ;;  %v31603_v63 = vcombine.low %v31601_v39, %v31602_v51  ;;  %v31605_v25 = vld [vmem:[#allocation83_spill] sm:$0xff] }
 0x65e   : > { %v21649_v38 = vpop.permute.xlu0 %21648  ;;  %v31606_v60 = vcombine.low %v31604_v13, %v31605_v25 }
 0x65f   : > { %21850 = vrot.lane.b32.xlu1 %v31588_v53, %s22578_s5  ;;  %v22121_v48 = vsel %vm22119_vm11, %v29026_v16, %v21649_v38  ;;  %v21651_v46 = vpop.permute.xlu1 %21650  ;;  %v31610_v53 = vld [vmem:[#allocation243_spill] sm:$0xff] }
 0x660   : > { %21856 = vrot.lane.b32.xlu0 %v31591_v36, %s22578_s5  ;;  %v22122_v16 = vsel %vm22119_vm11, %v29080_v1, %v21651_v46  ;;  %v31607_v1 = vld [vmem:[#allocation231_spill] sm:$0xff]  ;;  %v31612_v20 = vcombine.low %v31610_v53, %v31611_v56 }
 0x661   : > { %v31609_v14 = vcombine.low %v31607_v1, %v31608_v59 }
 0x662   : > { %v21653_v55 = vpop.permute.xlu0 %21652 }
 0x663   : > { %21854 = vrot.lane.b32.xlu1 %v31594_v45, %s22578_s5  ;;  %v22123_v9 = vsel %vm22119_vm11, %v29070_v30, %v21653_v55  ;;  %v21655_v21 = vpop.permute.xlu1 %21654 }
 0x664   : > { %21860 = vrot.lane.b32.xlu0 %v31597_v54, %s22578_s5  ;;  %v22124_v30 = vsel %vm22119_vm11, %v29124_v52, %v21655_v21  ;;  %v31613_v52 = vcombine.high %v31537_v31, %v31538_v28  ;;  %v31616_v31 = vcombine.high %v31564_v44, %v31565_v58 }
 0x666   : > { %v21657_v34 = vpop.permute.xlu0 %21656 }
 0x667   : > { %21858 = vrot.lane.b32.xlu1 %v31600_v6, %s22578_s5  ;;  %v22125_v50 = vsel %vm22119_vm11, %v29114_v3, %v21657_v34  ;;  %v21659_v45 = vpop.permute.xlu1 %21658 }
 0x668   : > { %21864 = vrot.lane.b32.xlu0 %v31603_v63, %s22578_s5  ;;  %v22126_v3 = vsel %vm22119_vm11, %v29168_v32, %v21659_v45  ;;  %v31615_v32 = vcombine.high %v31557_v47, %v31558_v43 }
 0x66a   : > { %v21661_v36 = vpop.permute.xlu0 %21660 }
 0x66b   : > { %21862 = vrot.lane.b32.xlu1 %v31606_v60, %s22578_s5  ;;  %v22127_v38 = vsel %vm22119_vm11, %v29158_v17, %v21661_v36  ;;  %v21663_v6 = vpop.permute.xlu1 %21662 }
 0x66c   : > { %21868 = vrot.lane.b32.xlu0 %v31609_v14, %s22578_s5  ;;  %v22128_v17 = vsel %vm22119_vm11, %v29212_v57, %v21663_v6  ;;  %v31618_v57 = vcombine.high %v31579_v19, %v31580_v49 }
 0x66e   : > { %v21665_v54 = vpop.permute.xlu0 %21664 }
 0x66f   : > { %21866 = vrot.lane.b32.xlu1 %v31612_v20, %s22578_s5  ;;  %v22129_v55 = vsel %vm22119_vm11, %v29202_v26, %v21665_v54  ;;  %v21667_v42 = vpop.permute.xlu1 %21666  ;;  %v31617_v26 = vcombine.high %v31574_v37, %v31575_v8 }
 0x670   : > { %21904 = vrot.lane.b32.xlu0 %v31613_v52, %s22579_s7  ;;  %v22130_v46 = vsel %vm22119_vm11, %v22113_v33, %v21667_v42  ;;  %v31620_v33 = vcombine.high %v31586_v40, %v31587_v15 }
 0x672   : > { %v21669_v28 = vpop.permute.xlu0 %21668 }
 0x673   : > { %21902 = vrot.lane.b32.xlu1 %v31614_v10, %s22579_s7  ;;  %v22131_v23 = vsel %vm22119_vm11, %v22114_v24, %v21669_v28  ;;  %v21671_v43 = vpop.permute.xlu1 %21670  ;;  %v31619_v24 = vcombine.high %v31583_v61, %v31584_v29 }
 0x674   : > { %21908 = vrot.lane.b32.xlu0 %v31615_v32, %s22579_s7  ;;  %v22132_v58 = vsel %vm22119_vm11, %v22115_v5, %v21671_v43  ;;  %v31622_v5 = vcombine.high %v31592_v18, %v31593_v7 }
 0x676   : > { %v21673_v47 = vpop.permute.xlu0 %21672 }
 0x677   : > { %21906 = vrot.lane.b32.xlu1 %v31616_v31, %s22579_s7  ;;  %v22133_v44 = vsel %vm22119_vm11, %v22116_v2, %v21673_v47  ;;  %v21675_v8 = vpop.permute.xlu1 %21674  ;;  %v31621_v2 = vcombine.high %v31589_v22, %v31590_v4 }
 0x678   : > { %21912 = vrot.lane.b32.xlu0 %v31617_v26, %s22579_s7  ;;  %v22134_v49 = vsel %vm22119_vm11, %v22117_v35, %v21675_v8  ;;  %v31624_v35 = vcombine.high %v31598_v62, %v31599_v27 }
 0x67a   : > { %v21677_v37 = vpop.permute.xlu0 %21676 }
 0x67b   : > { %21910 = vrot.lane.b32.xlu1 %v31618_v57, %s22579_s7  ;;  %v22135_v19 = vsel %vm22119_vm11, %v22118_v0, %v21677_v37  ;;  %v21711_v29 = vpop.permute.xlu1 %21710  ;;  %v31623_v0 = vcombine.high %v31595_v41, %v31596_v11 }
 0x67c   : > { %21916 = vrot.lane.b32.xlu0 %v31619_v24, %s22579_s7  ;;  %v29386_v15 = vsel %vm22136_vm12, %v22120_v12, %v21711_v29  ;;  %v31626_v12 = vcombine.high %v31604_v13, %v31605_v25 }
 0x67e   : > { %v21713_v61 = vpop.permute.xlu0 %21712 }
 0x67f   : > { %21914 = vrot.lane.b32.xlu1 %v31620_v33, %s22579_s7  ;;  %v29383_v40 = vsel %vm22136_vm12, %v22121_v48, %v21713_v61  ;;  %v21715_v4 = vpop.permute.xlu1 %21714  ;;  %v31625_v48 = vcombine.high %v31601_v39, %v31602_v51 }
 0x680   : > { %21920 = vrot.lane.b32.xlu0 %v31621_v2, %s22579_s7  ;;  %v29400_v7 = vsel %vm22136_vm12, %v22122_v16, %v21715_v4  ;;  %v31628_v16 = vcombine.high %v31610_v53, %v31611_v56 }
 0x682   : > { %v21717_v22 = vpop.permute.xlu0 %21716 }
 0x683   : > { %21918 = vrot.lane.b32.xlu1 %v31622_v5, %s22579_s7  ;;  %v29397_v18 = vsel %vm22136_vm12, %v22123_v9, %v21717_v22  ;;  %v21719_v11 = vpop.permute.xlu1 %21718  ;;  %v31627_v9 = vcombine.high %v31607_v1, %v31608_v59 }
 0x684   : > { %21924 = vrot.lane.b32.xlu0 %v31623_v0, %s22579_s7  ;;  %v29414_v27 = vsel %vm22136_vm12, %v22124_v30, %v21719_v11 }
 0x686   : > { %v21721_v41 = vpop.permute.xlu0 %21720 }
 0x687   : > { %21922 = vrot.lane.b32.xlu1 %v31624_v35, %s22579_s7  ;;  %v29411_v62 = vsel %vm22136_vm12, %v22125_v50, %v21721_v41  ;;  %v21723_v51 = vpop.permute.xlu1 %21722 }
 0x688   : > { %21928 = vrot.lane.b32.xlu0 %v31625_v48, %s22579_s7  ;;  %v29428_v13 = vsel %vm22136_vm12, %v22126_v3, %v21723_v51 }
 0x68a   : > { %v21725_v39 = vpop.permute.xlu0 %21724 }
 0x68b   : > { %21926 = vrot.lane.b32.xlu1 %v31626_v12, %s22579_s7  ;;  %v29425_v63 = vsel %vm22136_vm12, %v22127_v38, %v21725_v39  ;;  %v21727_v60 = vpop.permute.xlu1 %21726 }
 0x68c   : > { %21932 = vrot.lane.b32.xlu0 %v31627_v9, %s22579_s7  ;;  %v29434_v21 = vsel %vm22136_vm12, %v22128_v17, %v21727_v60 }
 0x68e   : > { %v21729_v25 = vpop.permute.xlu0 %21728 }
 0x68f   : > { %21930 = vrot.lane.b32.xlu1 %v31628_v16, %s22579_s7  ;;  %v29431_v34 = vsel %vm22136_vm12, %v22129_v55, %v21729_v25  ;;  %v21731_v30 = vpop.permute.xlu1 %21730 }
 0x690   : > { %v29440_v59 = vsel %vm22136_vm12, %v22130_v46, %v21731_v30 }
 0x692   : > { %v21733_v50 = vpop.permute.xlu0 %21732 }
 0x693   : > { %v29437_v1 = vsel %vm22136_vm12, %v22131_v23, %v21733_v50  ;;  %v21735_v53 = vpop.permute.xlu1 %21734 }
 0x694   : > { %v29446_v20 = vsel %vm22136_vm12, %v22132_v58, %v21735_v53 }
 0x696   : > { %v21737_v14 = vpop.permute.xlu0 %21736 }
 0x697   : > { %v29443_v56 = vsel %vm22136_vm12, %v22133_v44, %v21737_v14  ;;  %v21739_v45 = vpop.permute.xlu1 %21738 }
 0x698   : > { %v29452_v3 = vsel %vm22136_vm12, %v22134_v49, %v21739_v45 }
 0x69a   : > { %v21741_v36 = vpop.permute.xlu0 %21740 }
 0x69b   : > { %v29449_v38 = vsel %vm22136_vm12, %v22135_v19, %v21741_v36  ;;  %v21775_v10 = vpop.permute.xlu1 %21774 }
 0x69c   : > { %v22154_v12 = vsel %vm22153_vm13, %v29386_v15, %v21775_v10 }
 0x69e   : > { %v21777_v52 = vpop.permute.xlu0 %21776 }
 0x69f   : > { %v21779_v6 = vpop.permute.xlu1 %21778  ;;  %v22155_v48 = vsel %vm22153_vm13, %v29383_v40, %v21777_v52 }
 0x6a0   : > { %v22156_v15 = vsel %vm22153_vm13, %v29400_v7, %v21779_v6 }
 0x6a2   : > { %v21781_v54 = vpop.permute.xlu0 %21780 }
 0x6a3   : > { %v22157_v40 = vsel %vm22153_vm13, %v29397_v18, %v21781_v54 }
 0x6a4   : > { %v21783_v17 = vpop.permute.xlu1 %21782 }
 0x6a5   : > { %v22158_v7 = vsel %vm22153_vm13, %v29414_v27, %v21783_v17 }
 0x6a6   : > { %v21785_v55 = vpop.permute.xlu0 %21784 }
 0x6a7   : > { %v22159_v18 = vsel %vm22153_vm13, %v29411_v62, %v21785_v55 }
 0x6aa   : > { %v21789_v32 = vpop.permute.xlu0 %21788  ;;  %v29454_v31 = vpop.permute.xlu1 %21786 }
 0x6ab   : > { %v22161_v62 = vsel %vm22153_vm13, %v29425_v63, %v21789_v32  ;;  %v22160_v27 = vsel %vm22153_vm13, %v29428_v13, %v29454_v31 }
 0x6ae   : > { %v29456_v28 = vpop.permute.xlu0 %21792  ;;  %v29458_v42 = vpop.permute.xlu1 %21790 }
 0x6af   : > { %v22163_v63 = vsel %vm22153_vm13, %v29431_v34, %v29456_v28  ;;  %v22162_v13 = vsel %vm22153_vm13, %v29434_v21, %v29458_v42 }
 0x6b2   : > { %v29460_v23 = vpop.permute.xlu0 %21796  ;;  %v29462_v46 = vpop.permute.xlu1 %21794 }
 0x6b3   : > { %v22165_v34 = vsel %vm22153_vm13, %v29437_v1, %v29460_v23  ;;  %v22164_v21 = vsel %vm22153_vm13, %v29440_v59, %v29462_v46 }
 0x6b6   : > { %v29464_v26 = vpop.permute.xlu0 %21800 }
 0x6b7   : > { %v29466_v57 = vpop.permute.xlu1 %21798  ;;  %v22167_v59 = vsel %vm22153_vm13, %v29443_v56, %v29464_v26 }
 0x6b8   : > { %v22166_v23 = vsel %vm22153_vm13, %v29446_v20, %v29466_v57 }
 0x6ba   : > { %v29468_v47 = vpop.permute.xlu0 %21804 }
 0x6bb   : > { %v29470_v43 = vpop.permute.xlu1 %21802  ;;  %v22169_v20 = vsel %vm22153_vm13, %v29449_v38, %v29468_v47 }
 0x6bc   : > { %v22168_v26 = vsel %vm22153_vm13, %v29452_v3, %v29470_v43 }
 0x6bf   : > { %v21841_v44 = vpop.permute.xlu0 %21840 }
 0x6c0   : > { %v22172_v41 = vsel %vm22170_vm14, %v22155_v48, %v21841_v44 }
 0x6c1   : > { %v21839_v58 = vpop.permute.xlu1 %21838 }
 0x6c2   : > { %v22171_v9 = vsel %vm22170_vm14, %v22154_v12, %v21839_v58 }
 0x6c6   : > { %v21845_v24 = vpop.permute.xlu0 %21844 }
 0x6c7   : > { %v22174_v25 = vsel %vm22170_vm14, %v22157_v40, %v21845_v24 }
 0x6c8   : > { %v21843_v33 = vpop.permute.xlu1 %21842 }
 0x6c9   : > { %v22173_v50 = vsel %vm22170_vm14, %v22156_v15, %v21843_v33 }
 0x6ca   : > { %v21849_v37 = vpop.permute.xlu0 %21848 }
 0x6cb   : > { %v22176_v36 = vsel %vm22170_vm14, %v22159_v18, %v21849_v37 }
 0x6cd   : > { %v21847_v8 = vpop.permute.xlu1 %21846 }
 0x6ce   : > { %v21853_v19 = vpop.permute.xlu0 %21852  ;;  %v22175_v52 = vsel %vm22170_vm14, %v22158_v7, %v21847_v8 }
 0x6cf   : > { %v22178_v55 = vsel %vm22170_vm14, %v22161_v62, %v21853_v19 }
 0x6d1   : > { %v21851_v49 = vpop.permute.xlu1 %21850 }
 0x6d2   : > { %v21857_v2 = vpop.permute.xlu0 %21856  ;;  %v22177_v44 = vsel %vm22170_vm14, %v22160_v27, %v21851_v49 }
 0x6d3   : > { %v22180_v32 = vsel %vm22170_vm14, %v22163_v63, %v21857_v2 }
 0x6d5   : > { %v21855_v5 = vpop.permute.xlu1 %21854 }
 0x6d6   : > { %v29472_v61 = vpop.permute.xlu0 %21860  ;;  %v22179_v37 = vsel %vm22170_vm14, %v22162_v13, %v21855_v5 }
 0x6d7   : > { %v22182_v28 = vsel %vm22170_vm14, %v22165_v34, %v29472_v61 }
 0x6d9   : > { %v29474_v29 = vpop.permute.xlu1 %21858 }
 0x6da   : > { %v29476_v0 = vpop.permute.xlu0 %21864  ;;  %v22181_v2 = vsel %vm22170_vm14, %v22164_v21, %v29474_v29 }
 0x6db   : > { %v22184_v46 = vsel %vm22170_vm14, %v22167_v59, %v29476_v0 }
 0x6dd   : > { %v29478_v35 = vpop.permute.xlu1 %21862 }
 0x6de   : > { %v29480_v22 = vpop.permute.xlu0 %21868  ;;  %v22183_v29 = vsel %vm22170_vm14, %v22166_v23, %v29478_v35 }
 0x6df   : > { %v22186_v57 = vsel %vm22170_vm14, %v22169_v20, %v29480_v22 }
 0x6e1   : > { %v29484_v4 = vpop.permute.xlu1 %21866 }
 0x6e2   : > { %v21905_v11 = vpop.permute.xlu0 %21904  ;;  %v22185_v35 = vsel %vm22170_vm14, %v22168_v26, %v29484_v4 }
 0x6e3   : > { %v22189_v39 = vsel %vm22187_vm15, %v22172_v41, %v21905_v11 }
 0x6e4   : > { %22206 = vst.msk [vmem:[%s29494_s9 + $0x8] sm:$0xff] %vm22204_vm0, %v22189_v39 }
 0x6e5   : > { %v21903_v16 = vpop.permute.xlu1 %21902 }
 0x6e6   : > { %v22188_v51 = vsel %vm22187_vm15, %v22171_v9, %v21903_v16  ;;  %v21909_v60 = vpop.permute.xlu0 %21908 }
 0x6e7   : > { %22205 = vst.msk [vmem:[%s29494_s9] sm:$0xff] %vm22204_vm0, %v22188_v51  ;;  %v22191_v14 = vsel %vm22187_vm15, %v22174_v25, %v21909_v60 }
 0x6e8   : > { %22208 = vst.msk [vmem:[%s29494_s9 + $0x18] sm:$0xff] %vm22204_vm0, %v22191_v14 }
 0x6e9   : > { %v21907_v30 = vpop.permute.xlu1 %21906 }
 0x6ea   : > { %v22190_v53 = vsel %vm22187_vm15, %v22173_v50, %v21907_v30  ;;  %v21913_v45 = vpop.permute.xlu0 %21912 }
 0x6eb   : > { %22207 = vst.msk [vmem:[%s29494_s9 + $0x10] sm:$0xff] %vm22204_vm0, %v22190_v53  ;;  %v22193_v54 = vsel %vm22187_vm15, %v22176_v36, %v21913_v45 }
 0x6ec   : > { %22210 = vst.msk [vmem:[%s29494_s9 + $0x28] sm:$0xff] %vm22204_vm0, %v22193_v54 }
 0x6ed   : > { %v21911_v10 = vpop.permute.xlu1 %21910 }
 0x6ee   : > { %v22192_v6 = vsel %vm22187_vm15, %v22175_v52, %v21911_v10  ;;  %v21917_v17 = vpop.permute.xlu0 %21916 }
 0x6ef   : > { %22209 = vst.msk [vmem:[%s29494_s9 + $0x20] sm:$0xff] %vm22204_vm0, %v22192_v6  ;;  %v22195_v24 = vsel %vm22187_vm15, %v22178_v55, %v21917_v17 }
 0x6f0   : > { %22212 = vst.msk [vmem:[%s29494_s9 + $0x38] sm:$0xff] %vm22204_vm0, %v22195_v24 }
 0x6f1   : > { %v21915_v58 = vpop.permute.xlu1 %21914 }
 0x6f2   : > { %v22194_v33 = vsel %vm22187_vm15, %v22177_v44, %v21915_v58  ;;  %v21921_v31 = vpop.permute.xlu0 %21920 }
 0x6f3   : > { %22211 = vst.msk [vmem:[%s29494_s9 + $0x30] sm:$0xff] %vm22204_vm0, %v22194_v33  ;;  %v22197_v19 = vsel %vm22187_vm15, %v22180_v32, %v21921_v31 }
 0x6f4   : > { %22214 = vst.msk [vmem:[%s29494_s9 + $0x48] sm:$0xff] %vm22204_vm0, %v22197_v19 }
 0x6f5   : > { %v21919_v8 = vpop.permute.xlu1 %21918 }
 0x6f6   : > { %v22196_v49 = vsel %vm22187_vm15, %v22179_v37, %v21919_v8  ;;  %v21925_v42 = vpop.permute.xlu0 %21924 }
 0x6f7   : > { %22213 = vst.msk [vmem:[%s29494_s9 + $0x40] sm:$0xff] %vm22204_vm0, %v22196_v49  ;;  %v22199_v48 = vsel %vm22187_vm15, %v22182_v28, %v21925_v42 }
 0x6f8   : > { %22216 = vst.msk [vmem:[%s29494_s9 + $0x58] sm:$0xff] %vm22204_vm0, %v22199_v48 }
 0x6f9   : > { %v21923_v5 = vpop.permute.xlu1 %21922 }
 0x6fa   : > { %v22198_v1 = vsel %vm22187_vm15, %v22181_v2, %v21923_v5  ;;  %v21929_v61 = vpop.permute.xlu0 %21928 }
 0x6fb   : > { %22215 = vst.msk [vmem:[%s29494_s9 + $0x50] sm:$0xff] %vm22204_vm0, %v22198_v1  ;;  %v22201_v41 = vsel %vm22187_vm15, %v22184_v46, %v21929_v61 }
 0x6fc   : > { %22218 = vst.msk [vmem:[%s29494_s9 + $0x68] sm:$0xff] %vm22204_vm0, %v22201_v41 }
 0x6fd   : > { %v21927_v12 = vpop.permute.xlu1 %21926 }
 0x6fe   : > { %v22200_v56 = vsel %vm22187_vm15, %v22183_v29, %v21927_v12  ;;  %v21933_v0 = vpop.permute.xlu0 %21932 }
 0x6ff   : > { %22217 = vst.msk [vmem:[%s29494_s9 + $0x60] sm:$0xff] %vm22204_vm0, %v22200_v56  ;;  %v22203_v9 = vsel %vm22187_vm15, %v22186_v57, %v21933_v0 }
 0x700   : > { %22220 = vst.msk [vmem:[%s29494_s9 + $0x78] sm:$0xff] %vm22204_vm0, %v22203_v9 }
 0x701   : > { %v21931_v11 = vpop.permute.xlu1 %21930 }
 0x702   : > { %v22202_v16 = vsel %vm22187_vm15, %v22185_v35, %v21931_v11 }
 0x703   : > { %22219 = vst.msk [vmem:[%s29494_s9 + $0x70] sm:$0xff] %vm22204_vm0, %v22202_v16 }
 0x704   : > { %s22356_s10 = sshll.u32 %s22537_s15, 1  ;;  %s22357_s20 = sshll.u32 %s22541_s16, 5 }
 0x705   : > { %s22234_s27 = sadd.s32 %s22357_s20, %s22356_s10  ;;  %s22247_s21 = sshll.u32 %s29494_s9, 4  ;;  %s22248_s21 = int_to_ptr.vmem [resolvable:$true] %s22247_s21 }
 0x706   : > { %s22358_s24 = sshll.u32 %s22234_s27, 7  ;;  %s22580_s5 = smov 256  }
 0x707   : > { %s22236_s4 = scalar_lea.hbm %s29652_s3, %s22358_s24  ;;  %22376 = sst [smem:[#allocation5]] (%p22658_p3), %s22580_s5 }
 0x708   : > { %s22581_s6 = smov 512   ;;  %s22582_s7 = smov 2  }
 0x709   : > { %22377 = sst [smem:[#allocation5 + $0x1]] (%p22658_p3), %s22581_s6  ;;  %s22583_s15 = smov 128  }
 0x70a   : > { %22378 = sst [smem:[#allocation5 + $0x2]] (%p22658_p3), %s22582_s7  ;;  %s22584_s16 = smov 8  }
 0x70b   : > { %22379 = sst [smem:[#allocation5 + $0x3]] (%p22658_p3), %s22583_s15  ;;  %s22585_s8 = smov 131072  }
 0x70c   : > { %22380 = sst [smem:[#allocation5 + $0x4]] (%p22658_p3), %s22583_s15  ;;  %s22586_s9 = smov 0  }
 0x70d   : > { %22381 = sst [smem:[#allocation5 + $0x5]] (%p22658_p3), %s22584_s16 }
 0x70e   : > { %22382 = dma.general (%p22658_p3), %s22248_s21, 2048, %s22236_s4, %s22222_s11, %s22585_s8, [#allocation5], %s22586_s9, 0  }
 0x70f PF: > { %p22388_p0 = scmp.ge.s32.totalorder %s22553_s19, 2  ;;  %s22275_s10 = sand.u32 1, %s22525_s12  }
 0x710   : > { %s22276_s20 = scalar_lea.sflag [#allocation3], %s22275_s10 }
 0x711   : > { %p22385_p1 = pnand %p22388_p0, %p22667_p8 }
 0x713   : > { %p22386_p2 = pneg %p22385_p1 }
 0x715   : > { %22520 = dma.done.wait (%p22386_p2), %s22276_s20, 2048  }
 0x716   : > { %22522 = vsyncadd (%p22386_p2), %s22276_s20, 4294965248  ;;  %s16_s19 = sadd.s32 1, %s22553_s19   ;;  %s31629_s12 = smov %s22529_s13 }
 0x717   : > { %p13_p4 = scmp.ge.s32.totalorder %s16_s19, 6   ;;  %s31630_s13 = smov %s22533_s14 }
 0x718   : > { %s31631_s14 = smov %s22676_s30  ;;  %s31632_s15 = smov %s22545_s17 }
 0x719   : > { %s31633_s16 = smov %s22549_s18  ;;  %s31634_s17 = smov %s31637_s22 }
 0x71a   : > { %s31635_s18 = smov %s31641_s23  ;;  %15 = sbr.rel (!%p13_p4) target bundleno = 5 (0x5), region = 72 }
 0x71f   :  { %22281 = vsyncpa [#allocation3], 1 }
 0x720   :  { %22283 = vsyncpa [#allocation3 + $0x1], 1 }

// kernel: _forward.1
= control target key start
LH: loop header
LB: loop body
LE: loop exit
PB: predicated region body
PF: predicated region fallthrough
CT: control target
= control target key end

     0   :  { %s620_s12 = smov 0   ;;  %s622_s13 = smov 0   ;;  %s743_s0 = inlined_call_operand.vmem [shape: f32[2,4,256], index: 0, kind: input, shape index: {}]   ;;  %s744_s1 = inlined_call_operand.vmem [shape: f32[32,4], index: 1, kind: input, shape index: {}]   ;;  %s745_s2 = inlined_call_operand.vmem [shape: f32[32,1], index: 2, kind: input, shape index: {}]   ;;  %s746_s3 = inlined_call_operand.vmem [shape: f32[2,32,256], index: 3, kind: output, shape index: {}]  }
   0x1   :  { %s624_s14 = smov 0   ;;  %s626_s15 = smov 0  }
   0x2   :  { %s628_s16 = smov 0   ;;  %s630_s17 = smov 0  }
   0x3   :  { %s632_s18 = smov 0  }
   0x4 LB: > { %s22_s19 = sadd.s32 1, %s589_s16  ;;  %s25_s20 = sadd.s32 1, %s593_s17  ;;  %s597_s18 = sphi %s632_s18, %s13_s18   ;;  %s593_s17 = sphi %s630_s17, %s753_s17   ;;  %s589_s16 = sphi %s628_s16, %s752_s16   ;;  %s585_s15 = sphi %s626_s15, %s751_s15   ;;  %s581_s14 = sphi %s624_s14, %s750_s14   ;;  %s577_s13 = sphi %s622_s13, %s749_s13   ;;  %s573_s12 = sphi %s620_s12, %s748_s12  }
   0x5   : > { %p23_p0 = scmp.ge.s32.totalorder %s22_s19, 2  ;;  %s451_s21 = sadd.s32 4294967295, %s597_s18  }
   0x6   : > { %p114_p1 = scmp.ne.s32.totalorder %s577_s13, %s573_s12  ;;  %p115_p2 = scmp.eq.s32.totalorder %s451_s21, 3 }
   0x7   : > { %s755_s19 = smov (%p23_p0, %s22_s19), 0  ;;  %s757_s20 = smov (!%p23_p0, %s25_s20), %s593_s17 }
   0x8   : > { %s100_s22 = ssub.s32 %s589_s16, %s755_s19  ;;  %p27_p3 = scmp.ge.s32.totalorder %s757_s20, 2 }
   0x9   : > { %p455_p4 = scmp.ge.s32.totalorder %s597_s18, 1  ;;  %p666_p5 = por %p115_p2, %p114_p1 }
   0xa   : > { %p156_p6 = scmp.lt.s32.totalorder %s597_s18, 5  ;;  %s759_s20 = smov (%p27_p3, %s757_s20), 0 }
   0xb   : > { %s99_s24 = ssub.s32 %s593_s17, %s759_s20  ;;  %s104_s26 = sadd.s32 1, %s577_s13 }
   0xc   : > { %p157_p7 = pnand %p455_p4, %p156_p6  ;;  %s101_s25 = sor.u32 %s100_s22, %s99_s24 }
   0xd   : > { %p102_p8 = scmp.eq.s32.totalorder %s101_s25, 0  ;;  %p182_p9 = scmp.lt.s32.totalorder (!%p157_p7), %s585_s15, 1 }
   0xe   : > { %160 = sbr.rel (%p157_p7) target bundleno = 235 (0xeb), region = 32  ;;  %p184_p10 = scmp.lt.s32.totalorder (!%p157_p7), %s581_s14, 1 }
   0xf   : > { %s677_s27 = scalar_select %p102_p8, %s577_s13, %s104_s26  }
  0x10   : > { %s179_s9 = sand.u32 (!%p157_p7), 1, %s573_s12  }
  0x13   : > { %v190_v0 = vld [vmem:[%s744_s1] sm:$0xff]  ;;  %vm219_vm0 = vcmask 31744   ;;  %v192_v1 = vld [vmem:[%s744_s1 + $0x10] sm:$0xff]  ;;  %s183_s7 = scalar_select %p182_p9, %s585_s15, 1  ;;  %v599_v3 = vmov 0   ;;  %v198_v5 = vld [vmem:[%s745_s2 + $0x18] sm:$0xff] }
  0x14   : > { %476 = vmatprep.mubr.msk.f32.mxu0 %vm219_vm0, %v190_v0  ;;  %479 = vmatprep.mubr.msk.f32.mxu1 %vm219_vm0, %v192_v1  ;;  %v197_v2 = vld [vmem:[%s745_s2 + $0x10] sm:$0xff]  ;;  %v195_v4 = vld [vmem:[%s745_s2] sm:$0xff]  ;;  %s185_s10 = scalar_select %p184_p10, %s581_s14, 1  ;;  %v196_v6 = vld [vmem:[%s745_s2 + $0x8] sm:$0xff]  ;;  %vm232_vm1 = vcmask 1043456  }
  0x15   : > { %542 = vset.pattern.permute.xlu1 %v599_v3  ;;  %541 = vset.pattern.permute.xlu0 %v599_v3  ;;  %s457_s11 = sshll.u32 %s183_s7, 1  ;;  %v191_v8 = vld [vmem:[%s744_s1 + $0x8] sm:$0xff]  ;;  %v193_v9 = vld [vmem:[%s744_s1 + $0x18] sm:$0xff]  ;;  %s465_s12 = sshll.u32 (%p666_p5), %s585_s15, 3 }
  0x16   : > { %211 = vperm.xlu1 %542, %v197_v2   ;;  %201 = vperm.xlu0 %541, %v195_v4   ;;  %s187_s26 = sadd.s32 %s457_s11, %s185_s10  ;;  %s456_s10 = sshll.u32 %s179_s9, 5 }
  0x17   : > { %s458_s28 = sshll.u32 %s187_s26, 2  ;;  %s181_s11 = scalar_lea.vmem [#allocation2], %s456_s10 }
  0x18   : > { %s189_s4 = scalar_lea.vmem %s743_s0, %s458_s28  ;;  %s333_s21 = sadd.s32 (%p666_p5), %s581_s14, %s465_s12 }
  0x19   : > { %v194_v7 = vld [vmem:[%s189_s4] sm:$0xf]  ;;  %s466_s22 = sshll.u32 (%p666_p5), %s333_s21, 3 }
  0x1a   : > { %216 = vperm.xlu1 %542, %v198_v5   ;;  %206 = vperm.xlu0 %541, %v196_v6   ;;  %s335_s26 = scalar_lea.vmem (%p666_p5), %s746_s3, %s466_s22 }
  0x1b   : > { %474 = vmatprep.subr.msk.mxu0 %vm232_vm1, %v194_v7  ;;  %482 = vmatprep.subr.msk.mxu1 %vm232_vm1, %v194_v7 }
  0x1c   : > { %475 = vmatpush3.msk.msra.mxu0 %vm232_vm1, %v194_v7  ;;  %483 = vmatpush3.msk.msra.mxu1 %vm232_vm1, %v194_v7 }
  0x1d   : > { %477 = vmatmul.mubr.msk.f32.vlgmr.msra.gmra.mxu0 %vm219_vm0, %v191_v8  ;;  %480 = vmatmul.mubr.msk.f32.vlgmr.msra.gmra.mxu1 %vm219_vm0, %v193_v9 }
  0x91   : > { %v212_v10 = vpop.permute.xlu1 %211  ;;  %v202_v11 = vpop.permute.xlu0 %201 }
  0x95   : > { %v217_v12 = vpop.permute.xlu1 %216  ;;  %v207_v13 = vpop.permute.xlu0 %206 }
  0xdd   : > { %v478_v14 = vpop.f32.mrf.mxu0  ;;  %v481_v15 = vpop.f32.mrf.mxu1 }
  0xde   : > { %v308_v16 = vadd.f32 %v478_v14, %v207_v13  ;;  %v318_v17 = vadd.f32 %v481_v15, %v217_v12  ;;  %331 = sbr.rel (!%p666_p5) target bundleno = 235 (0xeb), region = 36 }
  0xdf   : > { %v302_v18 = vpop.f32.mrf.mxu0  ;;  %v312_v19 = vpop.f32.mrf.mxu1 }
  0xe0   : > { %322 = vst [vmem:[%s181_s11 + $0x8] sm:$0xff] %v308_v16  ;;  %324 = vst [vmem:[%s181_s11 + $0x18] sm:$0xff] %v318_v17  ;;  %v303_v20 = vadd.f32 %v302_v18, %v202_v11  ;;  %v313_v21 = vadd.f32 %v312_v19, %v212_v10 }
  0xe2   : > { %321 = vst [vmem:[%s181_s11] sm:$0xff] %v303_v20  ;;  %323 = vst [vmem:[%s181_s11 + $0x10] sm:$0xff] %v313_v21 }
  0xe7   : > { %v372_v23 = vld [vmem:[%s181_s11 + $0x8] sm:$0xff]  ;;  %v376_v25 = vld [vmem:[%s181_s11 + $0x18] sm:$0xff] }
  0xe8   : > { %373 = vst [vmem:[%s335_s26 + $0x10] sm:$0xff] %v372_v23  ;;  %377 = vst [vmem:[%s335_s26 + $0x30] sm:$0xff] %v376_v25 }
  0xe9   : > { %v370_v22 = vld [vmem:[%s181_s11] sm:$0xff]  ;;  %v374_v24 = vld [vmem:[%s181_s11 + $0x10] sm:$0xff] }
  0xea   : > { %371 = vst [vmem:[%s335_s26] sm:$0xff] %v370_v22  ;;  %375 = vst [vmem:[%s335_s26 + $0x20] sm:$0xff] %v374_v24 }
  0xeb PF: > { %s13_s18 = sadd.s32 1, %s597_s18   ;;  %s748_s12 = smov %s577_s13 }
  0xec   : > { %p10_p11 = scmp.ge.s32.totalorder %s13_s18, 6   ;;  %s749_s13 = smov %s677_s27 }
  0xed   : > { %s750_s14 = smov %s589_s16  ;;  %s751_s15 = smov %s593_s17 }
  0xee   : > { %s752_s16 = smov %s755_s19  ;;  %s753_s17 = smov %s759_s20 }
  0xef   :  { %12 = sbr.rel (!%p10_p11) target bundleno = 4 (0x4), region = 100 }

</bundles_post_ra>
